<compile_context>
chip_gen: v7x
topology: tpu7x:2x2x1
jax: 0.10.0
libtpu: 0.0.40
codegen_flags: <defaults>
</compile_context>

<pallas_src>
import functools

import jax
import jax.numpy as jnp
from jax.experimental import pallas as pl
from jax.experimental.pallas import tpu as pltpu

EPSILON = 1e-05      # matches the PyTorch reference
BN_EPS = 1e-05       # nn.BatchNorm2d default eps

MAX_TK = 2304        # K tile (bf16 2304x256 weight tile ~1.2 MB)
TN = 256             # output-channel tile (512-ch convs -> 2 parallel tiles)


def _round_up(x, m):
    return ((x + m - 1) // m) * m


# ---------------------------------------------------------------------------
# Pallas kernels
# ---------------------------------------------------------------------------
def _conv_bn_relu_kernel(x_ref, w_ref, aff_ref, o_ref, acc_ref, *, valid_m):
    """im2col matmul with fused conv-bias + BatchNorm(batch stats) + ReLU.

    Grid = (M_tiles=1, N_tiles, K_tiles).  The whole (padded) M dimension is
    resident in one tile, so per-channel batch statistics are computed in the
    finalize step; zero-padded rows are masked out of the reduction.
    aff_ref rows: 0 = conv bias, 1 = BN gamma, 2 = BN beta.
    """
    k = pl.program_id(2)

    @pl.when(k == 0)
    def _init():
        acc_ref[...] = jnp.zeros_like(acc_ref)

    acc_ref[...] += jnp.dot(x_ref[...], w_ref[...],
                            preferred_element_type=jnp.float32)

    @pl.when(k == pl.num_programs(2) - 1)
    def _fin():
        r = acc_ref[...] + aff_ref[0:1, :]                    # conv bias
        row = jax.lax.broadcasted_iota(jnp.int32, r.shape, 0)
        valid = row < valid_m
        inv_m = 1.0 / float(valid_m)
        mean = jnp.sum(jnp.where(valid, r, 0.0), axis=0, keepdims=True) * inv_m
        d = jnp.where(valid, r - mean, 0.0)
        var = jnp.sum(d * d, axis=0, keepdims=True) * inv_m   # biased variance
        y = (r - mean) * jax.lax.rsqrt(var + BN_EPS)
        y = y * aff_ref[1:2, :] + aff_ref[2:3, :]             # gamma / beta
        o_ref[...] = jnp.maximum(y, 0.0).astype(o_ref.dtype)  # ReLU


def _fusion_kernel(t1_ref, t2_ref, t3_ref, t4_ref, o_ref):
    t1 = t1_ref[...]
    t2 = t2_ref[...]
    t3 = t3_ref[...]
    t4 = t4_ref[...]
    e1 = jnp.exp(jnp.mean(t1, axis=-1, keepdims=True))
    e2 = jnp.exp(jnp.mean(t2, axis=-1, keepdims=True))
    e3 = jnp.exp(jnp.mean(t3, axis=-1, keepdims=True))
    e4 = jnp.exp(jnp.mean(t4, axis=-1, keepdims=True))
    inv = pl.reciprocal(e1 + e2 + e3 + e4 + EPSILON, approx=True)
    o_ref[...] = (e1 * t1 + e2 * t2 + e3 * t3 + e4 * t4) * inv


# ---------------------------------------------------------------------------
# Pallas wrappers
# ---------------------------------------------------------------------------
def conv3x3_bn_relu(x, cp, *, interpret=False):
    """x: (N,H,W,Cin) f32 -> (N,H,W,Cout) f32.  3x3 conv (pad=1) + bias + BN
    (batch statistics) + ReLU, all fused in one Pallas call."""
    N, H, W, C = x.shape
    M = N * H * W

    # im2col: one concatenate of 9 shifted bf16 views (tap order dy, dx, cin
    # matches w.reshape(9*cin, cout)).
    xpad = jnp.pad(x.astype(jnp.bfloat16), ((0, 0), (1, 1), (1, 1), (0, 0)))
    cols = [xpad[:, dy:dy + H, dx:dx + W, :]
            for dy in range(3) for dx in range(3)]
    flat = jnp.concatenate(cols, axis=-1).reshape(M, 9 * C)

    Kp, Np = cp['w'].shape                       # pre-padded at init
    tk = Kp if Kp <= MAX_TK else MAX_TK
    tn = min(TN, Np)
    cout = Np                                    # cout % 128 == 0 (asserted at init)
    Mp = _round_up(M, 8)
    flat = jnp.pad(flat, ((0, Mp - M), (0, Kp - flat.shape[1])))

    grid = (1, Np // tn, Kp // tk)
    out = pl.pallas_call(
        functools.partial(_conv_bn_relu_kernel, valid_m=M),
        out_shape=jax.ShapeDtypeStruct((Mp, Np), jnp.float32),
        grid_spec=pltpu.PrefetchScalarGridSpec(
            num_scalar_prefetch=0,
            grid=grid,
            in_specs=[
                pl.BlockSpec((Mp, tk), lambda i, j, k: (i, k)),   # im2col (bf16)
                pl.BlockSpec((tk, tn), lambda i, j, k: (k, j)),   # weights (bf16)
                pl.BlockSpec((8, tn), lambda i, j, k: (0, j)),    # bias/gamma/beta
            ],
            out_specs=pl.BlockSpec((Mp, tn), lambda i, j, k: (i, j)),
            scratch_shapes=[pltpu.VMEM((Mp, tn), jnp.float32)],
        ),
        compiler_params=pltpu.CompilerParams(
            dimension_semantics=("parallel", "parallel", "arbitrary"),
            vmem_limit_bytes=64 * 1024 * 1024),
        interpret=interpret,
    )(flat, cp['w'], cp['aff'])
    return out[:M, :cout].reshape(N, H, W, cout)


def spatial_fusion(t1, t2, t3, t4):
    """spatial_type='mean': softmax-over-4 of channel means, weighted sum."""
    N, H, W, C = t1.shape
    M = N * H * W
    flats = [t.reshape(M, C).astype(jnp.float32) for t in (t1, t2, t3, t4)]
    out = pl.pallas_call(
        _fusion_kernel,
        out_shape=jax.ShapeDtypeStruct((M, C), jnp.float32),
    )(*flats)
    return out.reshape(N, H, W, C)


# ---------------------------------------------------------------------------
# Tiny JAX glue ops (negligible at these sizes; fused by jit)
# ---------------------------------------------------------------------------
def maxpool(x, k):
    N, H, W, C = x.shape
    return x.reshape(N, H // k, k, W // k, k, C).max(axis=(2, 4))


def upsample_bilinear(x, scale):
    # nn.Upsample(scale_factor=scale, mode='bilinear', align_corners=True)
    N, H, W, C = x.shape
    Ho, Wo = H * scale, W * scale

    def src(Lo, Li):
        if Lo == 1:
            return jnp.zeros((Lo,), jnp.float32)
        return jnp.arange(Lo, dtype=jnp.float32) * ((Li - 1) / (Lo - 1))

    ys, xs = src(Ho, H), src(Wo, W)
    y0 = jnp.clip(jnp.floor(ys).astype(jnp.int32), 0, H - 1)
    y1 = jnp.clip(y0 + 1, 0, H - 1)
    wy = ys - y0.astype(jnp.float32)
    x0 = jnp.clip(jnp.floor(xs).astype(jnp.int32), 0, W - 1)
    x1 = jnp.clip(x0 + 1, 0, W - 1)
    wx = xs - x0.astype(jnp.float32)

    xr = (x[:, y0, :, :] * (1 - wy)[None, :, None, None]
          + x[:, y1, :, :] * wy[None, :, None, None])
    return (xr[:, :, x0, :] * (1 - wx)[None, None, :, None]
            + xr[:, :, x1, :] * wx[None, None, :, None])


def pad_to(x, ref):
    dY = ref.shape[1] - x.shape[1]
    dX = ref.shape[2] - x.shape[2]
    return jnp.pad(x, ((0, 0),
                       (dY // 2, dY - dY // 2),
                       (dX // 2, dX - dX // 2),
                       (0, 0)))


# ---------------------------------------------------------------------------
# Parameter init: weights pre-reshaped / pre-padded / pre-cast to bf16 tiles
# ---------------------------------------------------------------------------
class KeyGen:
    def __init__(self, key):
        self.key = key

    def __call__(self):
        self.key, sub = jax.random.split(self.key)
        return sub


def init_conv_bn(kg, cin, cout):
    assert cout % 128 == 0, "all convs in Up_dense_1_softmax output 512 ch"
    K = 9 * cin
    w = jax.random.normal(kg(), (3, 3, cin, cout), jnp.float32) * (K ** -0.5)
    b = jax.random.normal(kg(), (cout,), jnp.float32) * 0.01
    gamma = jnp.ones((cout,), jnp.float32)
    beta = jnp.zeros((cout,), jnp.float32)

    Kp = _round_up(K, 128)
    if Kp > MAX_TK:
        Kp = _round_up(K, MAX_TK)
    tn = min(TN, _round_up(cout, 128))
    Np = _round_up(cout, tn)

    wp = jnp.pad(w.reshape(K, cout),
                 ((0, Kp - K), (0, Np - cout))).astype(jnp.bfloat16)
    aff = jnp.zeros((8, Np), jnp.float32)
    aff = aff.at[0, :cout].set(b)
    aff = aff.at[1, :cout].set(gamma)
    aff = aff.at[2, :cout].set(beta)
    return dict(w=wp, aff=aff)


def init_double_conv(kg, cin, cout, mid=None):
    mid = mid or cout
    return dict(c1=init_conv_bn(kg, cin, mid), c2=init_conv_bn(kg, mid, cout))


def init_up_dense_params(seed=0, in_channels_0=256, in_channels_1=128,
                         in_channels_2=64, in_channels_3=1024,
                         out_channels=512):
    kg = KeyGen(jax.random.PRNGKey(seed))
    return {
        'mc0': init_double_conv(kg, in_channels_0, 512),
        'mc1': init_double_conv(kg, in_channels_1, 512),
        'mc2': init_double_conv(kg, in_channels_2, 512),
        # bilinear=True branch: DoubleConv(in_channels_3, out, in_channels_3//2)
        'conv': init_double_conv(kg, in_channels_3, out_channels,
                                 in_channels_3 // 2),
    }


# ---------------------------------------------------------------------------
# Forward pass (semantics of Up_dense_1_softmax.forward, bilinear=True)
# ---------------------------------------------------------------------------
def apply_double_conv(x, p):
    x = conv3x3_bn_relu(x, p['c1'])
    x = conv3x3_bn_relu(x, p['c2'])
    return x


def up_dense_1_softmax_forward(params, x1, x2, x3, x4, x5):
    """Inputs/outputs NCHW (PyTorch convention); NHWC internally."""
    to_nhwc = lambda t: jnp.transpose(t, (0, 2, 3, 1)).astype(jnp.float32)
    x1, x2, x3, x4, x5 = map(to_nhwc, (x1, x2, x3, x4, x5))

    x1u = pad_to(upsample_bilinear(x1, 2), x2)              # up_0 + F.pad
    a3 = apply_double_conv(maxpool(x3, 2), params['mc0'])   # maxpool_conv_0
    a4 = apply_double_conv(maxpool(x4, 4), params['mc1'])   # maxpool_conv_1
    a5 = apply_double_conv(maxpool(x5, 8), params['mc2'])   # maxpool_conv_2
    x_add = spatial_fusion(x2, a3, a4, a5)                  # softmax fusion
    x = jnp.concatenate([x_add, x1u], axis=-1)              # torch.cat dim=1
    out = apply_double_conv(x, params['conv'])              # self.conv
    return jnp.transpose(out, (0, 3, 1, 2))


# ---------------------------------------------------------------------------
if __name__ == "__main__":
    params = init_up_dense_params(seed=0)

    key = jax.random.PRNGKey(0)
    k1, k2, k3, k4, k5 = jax.random.split(key, 5)
    # UNet-style feature pyramid, NCHW (matches usage up1(x5, x4, x3, x2, x1))
    x1 = jax.random.normal(k1, (2, 512, 2, 2), jnp.float32)    # deepest, upsampled
    x2 = jax.random.normal(k2, (2, 512, 4, 4), jnp.float32)
    x3 = jax.random.normal(k3, (2, 256, 8, 8), jnp.float32)
    x4 = jax.random.normal(k4, (2, 128, 16, 16), jnp.float32)
    x5 = jax.random.normal(k5, (2, 64, 32, 32), jnp.float32)

    fwd = jax.jit(up_dense_1_softmax_forward)
    out = fwd(params, x1, x2, x3, x4, x5)
    jax.block_until_ready(out)

    assert out.shape == (2, 512, 4, 4), out.shape
    assert bool(jnp.all(jnp.isfinite(out)))
    print("KERNEL_OK")
</pallas_src>

<mosaic_0001>
module attributes {stable_mosaic.version = 11 : i64} {
  func.func @_conv_bn_relu_kernel(%arg0: i32, %arg1: i32, %arg2: i32, %arg3: memref<32x640xbf16, #tpu.memory_space<vmem>>, %arg4: memref<640x256xbf16, #tpu.memory_space<vmem>>, %arg5: memref<8x256xf32, #tpu.memory_space<vmem>>, %arg6: memref<32x256xf32, #tpu.memory_space<vmem>>, %arg7: memref<32x256xf32, #tpu.memory_space<vmem>>) attributes {dimension_semantics = [#tpu.dimension_semantics<parallel>, #tpu.dimension_semantics<parallel>, #tpu.dimension_semantics<arbitrary>], iteration_bounds = array<i64: 1, 2, 1>, scalar_prefetch = 0 : i64, scratch_operands = 1 : i64, tpu.core_type = #tpu.core_type<tc>, window_params = [{transform_indices = @transform_0, window_bounds = array<i64: 32, 640>}, {transform_indices = @transform_1, window_bounds = array<i64: 640, 256>}, {transform_indices = @transform_2, window_bounds = array<i64: 8, 256>}, {transform_indices = @transform_3, window_bounds = array<i64: 32, 256>}]} {
    %c0_i32 = arith.constant 0 : i32
    %0 = arith.cmpi eq, %arg2, %c0_i32 : i32
    %1 = arith.extui %0 : i1 to i32
    %c0_i32_0 = arith.constant 0 : i32
    %2 = arith.cmpi ne, %1, %c0_i32_0 : i32
    scf.if %2 {
      %cst_10 = arith.constant 0.000000e+00 : f32
      %12 = vector.broadcast %cst_10 : f32 to vector<32x256xf32>
      %c0_11 = arith.constant 0 : index
      %c0_12 = arith.constant 0 : index
      %13 = vector.load %arg7[%c0_11, %c0_12] : memref<32x256xf32, #tpu.memory_space<vmem>>, vector<32x256xf32>
      tpu.vector_store %arg7[%c0_11, %c0_12], %12 {strides = array<i32>} : memref<32x256xf32, #tpu.memory_space<vmem>>, vector<32x256xf32>,
    } else {
    }
    %c0 = arith.constant 0 : index
    %c0_1 = arith.constant 0 : index
    %3 = vector.load %arg7[%c0, %c0_1] : memref<32x256xf32, #tpu.memory_space<vmem>>, vector<32x256xf32>
    %c0_2 = arith.constant 0 : index
    %c0_3 = arith.constant 0 : index
    %4 = vector.load %arg3[%c0_2, %c0_3] : memref<32x640xbf16, #tpu.memory_space<vmem>>, vector<32x640xbf16>
    %c0_4 = arith.constant 0 : index
    %c0_5 = arith.constant 0 : index
    %5 = vector.load %arg4[%c0_4, %c0_5] : memref<640x256xbf16, #tpu.memory_space<vmem>>, vector<640x256xbf16>
    %cst = arith.constant dense<0.000000e+00> : vector<32x256xf32>
    %6 = tpu.matmul %4, %5, %cst {dimension_numbers = #tpu.dot_dimension_numbers<[1], [0], [0], [1], [0, 0, 1, 1], [], []>} : vector<32x640xbf16>, vector<640x256xbf16>, vector<32x256xf32> -> vector<32x256xf32>
    %7 = arith.addf %3, %6 : vector<32x256xf32>
    %c0_6 = arith.constant 0 : index
    %c0_7 = arith.constant 0 : index
    %8 = vector.load %arg7[%c0_6, %c0_7] : memref<32x256xf32, #tpu.memory_space<vmem>>, vector<32x256xf32>
    tpu.vector_store %arg7[%c0_6, %c0_7], %7 {strides = array<i32>} : memref<32x256xf32, #tpu.memory_space<vmem>>, vector<32x256xf32>,
    %c0_i32_8 = arith.constant 0 : i32
    %9 = arith.cmpi eq, %arg2, %c0_i32_8 : i32
    %10 = arith.extui %9 : i1 to i32
    %c0_i32_9 = arith.constant 0 : i32
    %11 = arith.cmpi ne, %10, %c0_i32_9 : i32
    scf.if %11 {
      %c0_10 = arith.constant 0 : index
      %c0_11 = arith.constant 0 : index
      %12 = vector.load %arg7[%c0_10, %c0_11] : memref<32x256xf32, #tpu.memory_space<vmem>>, vector<32x256xf32>
      %c0_12 = arith.constant 0 : index
      %c0_13 = arith.constant 0 : index
      %13 = vector.load %arg5[%c0_12, %c0_13] : memref<8x256xf32, #tpu.memory_space<vmem>>, vector<1x256xf32>
      %14 = vector.broadcast %13 : vector<1x256xf32> to vector<32x256xf32>
      %15 = arith.addf %12, %14 : vector<32x256xf32>
      %16 = tpu.iota {dimensions = array<i32: 0>} : vector<32x256xi32>
      %c32_i32 = arith.constant 32 : i32
      %17 = vector.broadcast %c32_i32 : i32 to vector<32x256xi32>
      %18 = arith.cmpi slt, %16, %17 : vector<32x256xi32>
      %cst_14 = arith.constant 0.000000e+00 : f32
      %19 = vector.broadcast %cst_14 : f32 to vector<32x256xf32>
      %20 = arith.select %18, %15, %19 : vector<32x256xi1>, vector<32x256xf32>
      %cst_15 = arith.constant dense<0.000000e+00> : vector<256xf32>
      %21 = vector.multi_reduction <add>, %20, %cst_15 [0] : vector<32x256xf32> to vector<256xf32>
      %22 = vector.shape_cast %21 : vector<256xf32> to vector<1x256xf32>
      %cst_16 = arith.constant 3.125000e-02 : f32
      %23 = vector.broadcast %cst_16 : f32 to vector<1x256xf32>
      %24 = arith.mulf %22, %23 : vector<1x256xf32>
      %25 = vector.broadcast %24 : vector<1x256xf32> to vector<32x256xf32>
      %26 = arith.subf %15, %25 : vector<32x256xf32>
      %cst_17 = arith.constant 0.000000e+00 : f32
      %27 = vector.broadcast %cst_17 : f32 to vector<32x256xf32>
      %28 = arith.select %18, %26, %27 : vector<32x256xi1>, vector<32x256xf32>
      %29 = arith.mulf %28, %28 : vector<32x256xf32>
      %cst_18 = arith.constant dense<0.000000e+00> : vector<256xf32>
      %30 = vector.multi_reduction <add>, %29, %cst_18 [0] : vector<32x256xf32> to vector<256xf32>
      %31 = vector.shape_cast %30 : vector<256xf32> to vector<1x256xf32>
      %cst_19 = arith.constant 3.125000e-02 : f32
      %32 = vector.broadcast %cst_19 : f32 to vector<1x256xf32>
      %33 = arith.mulf %31, %32 : vector<1x256xf32>
      %34 = vector.broadcast %24 : vector<1x256xf32> to vector<32x256xf32>
      %35 = arith.subf %15, %34 : vector<32x256xf32>
      %cst_20 = arith.constant 9.99999974E-6 : f32
      %36 = vector.broadcast %cst_20 : f32 to vector<1x256xf32>
      %37 = arith.addf %33, %36 : vector<1x256xf32>
      %38 = math.rsqrt %37 : vector<1x256xf32>
      %39 = vector.broadcast %38 : vector<1x256xf32> to vector<32x256xf32>
      %40 = arith.mulf %35, %39 : vector<32x256xf32>
      %c1 = arith.constant 1 : index
      %c0_21 = arith.constant 0 : index
      %41 = vector.load %arg5[%c1, %c0_21] : memref<8x256xf32, #tpu.memory_space<vmem>>, vector<1x256xf32>
      %42 = vector.broadcast %41 : vector<1x256xf32> to vector<32x256xf32>
      %43 = arith.mulf %40, %42 : vector<32x256xf32>
      %c2 = arith.constant 2 : index
      %c0_22 = arith.constant 0 : index
      %44 = vector.load %arg5[%c2, %c0_22] : memref<8x256xf32, #tpu.memory_space<vmem>>, vector<1x256xf32>
      %45 = vector.broadcast %44 : vector<1x256xf32> to vector<32x256xf32>
      %46 = arith.addf %43, %45 : vector<32x256xf32>
      %cst_23 = arith.constant 0.000000e+00 : f32
      %47 = vector.broadcast %cst_23 : f32 to vector<32x256xf32>
      %48 = arith.maximumf %46, %47 : vector<32x256xf32>
      %c0_24 = arith.constant 0 : index
      %c0_25 = arith.constant 0 : index
      %49 = vector.load %arg6[%c0_24, %c0_25] : memref<32x256xf32, #tpu.memory_space<vmem>>, vector<32x256xf32>
      tpu.vector_store %arg6[%c0_24, %c0_25], %48 {strides = array<i32>} : memref<32x256xf32, #tpu.memory_space<vmem>>, vector<32x256xf32>,
    } else {
    }
    return
  }
  func.func @transform_0(%arg0: i32, %arg1: i32, %arg2: i32) -> (i32, i32) {
    %c0_i32 = arith.constant 0 : i32
    return %arg0, %arg2 : i32, i32
  }
  func.func @transform_1(%arg0: i32, %arg1: i32, %arg2: i32) -> (i32, i32) {
    %c0_i32 = arith.constant 0 : i32
    return %arg2, %arg1 : i32, i32
  }
  func.func @transform_2(%arg0: i32, %arg1: i32, %arg2: i32) -> (i32, i32) {
    %c0_i32 = arith.constant 0 : i32
    %c0_i32_0 = arith.constant 0 : i32
    return %c0_i32, %arg1 : i32, i32
  }
  func.func @transform_3(%arg0: i32, %arg1: i32, %arg2: i32) -> (i32, i32) {
    %c0_i32 = arith.constant 0 : i32
    return %arg0, %arg1 : i32, i32
  }
}

module attributes {stable_mosaic.version = 11 : i64} {
  func.func @_conv_bn_relu_kernel(%arg0: i32, %arg1: i32, %arg2: i32, %arg3: memref<32x1152xbf16, #tpu.memory_space<vmem>>, %arg4: memref<1152x256xbf16, #tpu.memory_space<vmem>>, %arg5: memref<8x256xf32, #tpu.memory_space<vmem>>, %arg6: memref<32x256xf32, #tpu.memory_space<vmem>>, %arg7: memref<32x256xf32, #tpu.memory_space<vmem>>) attributes {dimension_semantics = [#tpu.dimension_semantics<parallel>, #tpu.dimension_semantics<parallel>, #tpu.dimension_semantics<arbitrary>], iteration_bounds = array<i64: 1, 2, 1>, scalar_prefetch = 0 : i64, scratch_operands = 1 : i64, tpu.core_type = #tpu.core_type<tc>, window_params = [{transform_indices = @transform_0, window_bounds = array<i64: 32, 1152>}, {transform_indices = @transform_1, window_bounds = array<i64: 1152, 256>}, {transform_indices = @transform_2, window_bounds = array<i64: 8, 256>}, {transform_indices = @transform_3, window_bounds = array<i64: 32, 256>}]} {
    %c0_i32 = arith.constant 0 : i32
    %0 = arith.cmpi eq, %arg2, %c0_i32 : i32
    %1 = arith.extui %0 : i1 to i32
    %c0_i32_0 = arith.constant 0 : i32
    %2 = arith.cmpi ne, %1, %c0_i32_0 : i32
    scf.if %2 {
      %cst_10 = arith.constant 0.000000e+00 : f32
      %12 = vector.broadcast %cst_10 : f32 to vector<32x256xf32>
      %c0_11 = arith.constant 0 : index
      %c0_12 = arith.constant 0 : index
      %13 = vector.load %arg7[%c0_11, %c0_12] : memref<32x256xf32, #tpu.memory_space<vmem>>, vector<32x256xf32>
      tpu.vector_store %arg7[%c0_11, %c0_12], %12 {strides = array<i32>} : memref<32x256xf32, #tpu.memory_space<vmem>>, vector<32x256xf32>,
    } else {
    }
    %c0 = arith.constant 0 : index
    %c0_1 = arith.constant 0 : index
    %3 = vector.load %arg7[%c0, %c0_1] : memref<32x256xf32, #tpu.memory_space<vmem>>, vector<32x256xf32>
    %c0_2 = arith.constant 0 : index
    %c0_3 = arith.constant 0 : index
    %4 = vector.load %arg3[%c0_2, %c0_3] : memref<32x1152xbf16, #tpu.memory_space<vmem>>, vector<32x1152xbf16>
    %c0_4 = arith.constant 0 : index
    %c0_5 = arith.constant 0 : index
    %5 = vector.load %arg4[%c0_4, %c0_5] : memref<1152x256xbf16, #tpu.memory_space<vmem>>, vector<1152x256xbf16>
    %cst = arith.constant dense<0.000000e+00> : vector<32x256xf32>
    %6 = tpu.matmul %4, %5, %cst {dimension_numbers = #tpu.dot_dimension_numbers<[1], [0], [0], [1], [0, 0, 1, 1], [], []>} : vector<32x1152xbf16>, vector<1152x256xbf16>, vector<32x256xf32> -> vector<32x256xf32>
    %7 = arith.addf %3, %6 : vector<32x256xf32>
    %c0_6 = arith.constant 0 : index
    %c0_7 = arith.constant 0 : index
    %8 = vector.load %arg7[%c0_6, %c0_7] : memref<32x256xf32, #tpu.memory_space<vmem>>, vector<32x256xf32>
    tpu.vector_store %arg7[%c0_6, %c0_7], %7 {strides = array<i32>} : memref<32x256xf32, #tpu.memory_space<vmem>>, vector<32x256xf32>,
    %c0_i32_8 = arith.constant 0 : i32
    %9 = arith.cmpi eq, %arg2, %c0_i32_8 : i32
    %10 = arith.extui %9 : i1 to i32
    %c0_i32_9 = arith.constant 0 : i32
    %11 = arith.cmpi ne, %10, %c0_i32_9 : i32
    scf.if %11 {
      %c0_10 = arith.constant 0 : index
      %c0_11 = arith.constant 0 : index
      %12 = vector.load %arg7[%c0_10, %c0_11] : memref<32x256xf32, #tpu.memory_space<vmem>>, vector<32x256xf32>
      %c0_12 = arith.constant 0 : index
      %c0_13 = arith.constant 0 : index
      %13 = vector.load %arg5[%c0_12, %c0_13] : memref<8x256xf32, #tpu.memory_space<vmem>>, vector<1x256xf32>
      %14 = vector.broadcast %13 : vector<1x256xf32> to vector<32x256xf32>
      %15 = arith.addf %12, %14 : vector<32x256xf32>
      %16 = tpu.iota {dimensions = array<i32: 0>} : vector<32x256xi32>
      %c32_i32 = arith.constant 32 : i32
      %17 = vector.broadcast %c32_i32 : i32 to vector<32x256xi32>
      %18 = arith.cmpi slt, %16, %17 : vector<32x256xi32>
      %cst_14 = arith.constant 0.000000e+00 : f32
      %19 = vector.broadcast %cst_14 : f32 to vector<32x256xf32>
      %20 = arith.select %18, %15, %19 : vector<32x256xi1>, vector<32x256xf32>
      %cst_15 = arith.constant dense<0.000000e+00> : vector<256xf32>
      %21 = vector.multi_reduction <add>, %20, %cst_15 [0] : vector<32x256xf32> to vector<256xf32>
      %22 = vector.shape_cast %21 : vector<256xf32> to vector<1x256xf32>
      %cst_16 = arith.constant 3.125000e-02 : f32
      %23 = vector.broadcast %cst_16 : f32 to vector<1x256xf32>
      %24 = arith.mulf %22, %23 : vector<1x256xf32>
      %25 = vector.broadcast %24 : vector<1x256xf32> to vector<32x256xf32>
      %26 = arith.subf %15, %25 : vector<32x256xf32>
      %cst_17 = arith.constant 0.000000e+00 : f32
      %27 = vector.broadcast %cst_17 : f32 to vector<32x256xf32>
      %28 = arith.select %18, %26, %27 : vector<32x256xi1>, vector<32x256xf32>
      %29 = arith.mulf %28, %28 : vector<32x256xf32>
      %cst_18 = arith.constant dense<0.000000e+00> : vector<256xf32>
      %30 = vector.multi_reduction <add>, %29, %cst_18 [0] : vector<32x256xf32> to vector<256xf32>
      %31 = vector.shape_cast %30 : vector<256xf32> to vector<1x256xf32>
      %cst_19 = arith.constant 3.125000e-02 : f32
      %32 = vector.broadcast %cst_19 : f32 to vector<1x256xf32>
      %33 = arith.mulf %31, %32 : vector<1x256xf32>
      %34 = vector.broadcast %24 : vector<1x256xf32> to vector<32x256xf32>
      %35 = arith.subf %15, %34 : vector<32x256xf32>
      %cst_20 = arith.constant 9.99999974E-6 : f32
      %36 = vector.broadcast %cst_20 : f32 to vector<1x256xf32>
      %37 = arith.addf %33, %36 : vector<1x256xf32>
      %38 = math.rsqrt %37 : vector<1x256xf32>
      %39 = vector.broadcast %38 : vector<1x256xf32> to vector<32x256xf32>
      %40 = arith.mulf %35, %39 : vector<32x256xf32>
      %c1 = arith.constant 1 : index
      %c0_21 = arith.constant 0 : index
      %41 = vector.load %arg5[%c1, %c0_21] : memref<8x256xf32, #tpu.memory_space<vmem>>, vector<1x256xf32>
      %42 = vector.broadcast %41 : vector<1x256xf32> to vector<32x256xf32>
      %43 = arith.mulf %40, %42 : vector<32x256xf32>
      %c2 = arith.constant 2 : index
      %c0_22 = arith.constant 0 : index
      %44 = vector.load %arg5[%c2, %c0_22] : memref<8x256xf32, #tpu.memory_space<vmem>>, vector<1x256xf32>
      %45 = vector.broadcast %44 : vector<1x256xf32> to vector<32x256xf32>
      %46 = arith.addf %43, %45 : vector<32x256xf32>
      %cst_23 = arith.constant 0.000000e+00 : f32
      %47 = vector.broadcast %cst_23 : f32 to vector<32x256xf32>
      %48 = arith.maximumf %46, %47 : vector<32x256xf32>
      %c0_24 = arith.constant 0 : index
      %c0_25 = arith.constant 0 : index
      %49 = vector.load %arg6[%c0_24, %c0_25] : memref<32x256xf32, #tpu.memory_space<vmem>>, vector<32x256xf32>
      tpu.vector_store %arg6[%c0_24, %c0_25], %48 {strides = array<i32>} : memref<32x256xf32, #tpu.memory_space<vmem>>, vector<32x256xf32>,
    } else {
    }
    return
  }
  func.func @transform_0(%arg0: i32, %arg1: i32, %arg2: i32) -> (i32, i32) {
    %c0_i32 = arith.constant 0 : i32
    return %arg0, %arg2 : i32, i32
  }
  func.func @transform_1(%arg0: i32, %arg1: i32, %arg2: i32) -> (i32, i32) {
    %c0_i32 = arith.constant 0 : i32
    return %arg2, %arg1 : i32, i32
  }
  func.func @transform_2(%arg0: i32, %arg1: i32, %arg2: i32) -> (i32, i32) {
    %c0_i32 = arith.constant 0 : i32
    %c0_i32_0 = arith.constant 0 : i32
    return %c0_i32, %arg1 : i32, i32
  }
  func.func @transform_3(%arg0: i32, %arg1: i32, %arg2: i32) -> (i32, i32) {
    %c0_i32 = arith.constant 0 : i32
    return %arg0, %arg1 : i32, i32
  }
}

module attributes {stable_mosaic.version = 11 : i64} {
  func.func @_conv_bn_relu_kernel(%arg0: i32, %arg1: i32, %arg2: i32, %arg3: memref<32x2304xbf16, #tpu.memory_space<vmem>>, %arg4: memref<2304x256xbf16, #tpu.memory_space<vmem>>, %arg5: memref<8x256xf32, #tpu.memory_space<vmem>>, %arg6: memref<32x256xf32, #tpu.memory_space<vmem>>, %arg7: memref<32x256xf32, #tpu.memory_space<vmem>>) attributes {dimension_semantics = [#tpu.dimension_semantics<parallel>, #tpu.dimension_semantics<parallel>, #tpu.dimension_semantics<arbitrary>], iteration_bounds = array<i64: 1, 2, 1>, scalar_prefetch = 0 : i64, scratch_operands = 1 : i64, tpu.core_type = #tpu.core_type<tc>, window_params = [{transform_indices = @transform_0, window_bounds = array<i64: 32, 2304>}, {transform_indices = @transform_1, window_bounds = array<i64: 2304, 256>}, {transform_indices = @transform_2, window_bounds = array<i64: 8, 256>}, {transform_indices = @transform_3, window_bounds = array<i64: 32, 256>}]} {
    %c0_i32 = arith.constant 0 : i32
    %0 = arith.cmpi eq, %arg2, %c0_i32 : i32
    %1 = arith.extui %0 : i1 to i32
    %c0_i32_0 = arith.constant 0 : i32
    %2 = arith.cmpi ne, %1, %c0_i32_0 : i32
    scf.if %2 {
      %cst_10 = arith.constant 0.000000e+00 : f32
      %12 = vector.broadcast %cst_10 : f32 to vector<32x256xf32>
      %c0_11 = arith.constant 0 : index
      %c0_12 = arith.constant 0 : index
      %13 = vector.load %arg7[%c0_11, %c0_12] : memref<32x256xf32, #tpu.memory_space<vmem>>, vector<32x256xf32>
      tpu.vector_store %arg7[%c0_11, %c0_12], %12 {strides = array<i32>} : memref<32x256xf32, #tpu.memory_space<vmem>>, vector<32x256xf32>,
    } else {
    }
    %c0 = arith.constant 0 : index
    %c0_1 = arith.constant 0 : index
    %3 = vector.load %arg7[%c0, %c0_1] : memref<32x256xf32, #tpu.memory_space<vmem>>, vector<32x256xf32>
    %c0_2 = arith.constant 0 : index
    %c0_3 = arith.constant 0 : index
    %4 = vector.load %arg3[%c0_2, %c0_3] : memref<32x2304xbf16, #tpu.memory_space<vmem>>, vector<32x2304xbf16>
    %c0_4 = arith.constant 0 : index
    %c0_5 = arith.constant 0 : index
    %5 = vector.load %arg4[%c0_4, %c0_5] : memref<2304x256xbf16, #tpu.memory_space<vmem>>, vector<2304x256xbf16>
    %cst = arith.constant dense<0.000000e+00> : vector<32x256xf32>
    %6 = tpu.matmul %4, %5, %cst {dimension_numbers = #tpu.dot_dimension_numbers<[1], [0], [0], [1], [0, 0, 1, 1], [], []>} : vector<32x2304xbf16>, vector<2304x256xbf16>, vector<32x256xf32> -> vector<32x256xf32>
    %7 = arith.addf %3, %6 : vector<32x256xf32>
    %c0_6 = arith.constant 0 : index
    %c0_7 = arith.constant 0 : index
    %8 = vector.load %arg7[%c0_6, %c0_7] : memref<32x256xf32, #tpu.memory_space<vmem>>, vector<32x256xf32>
    tpu.vector_store %arg7[%c0_6, %c0_7], %7 {strides = array<i32>} : memref<32x256xf32, #tpu.memory_space<vmem>>, vector<32x256xf32>,
    %c0_i32_8 = arith.constant 0 : i32
    %9 = arith.cmpi eq, %arg2, %c0_i32_8 : i32
    %10 = arith.extui %9 : i1 to i32
    %c0_i32_9 = arith.constant 0 : i32
    %11 = arith.cmpi ne, %10, %c0_i32_9 : i32
    scf.if %11 {
      %c0_10 = arith.constant 0 : index
      %c0_11 = arith.constant 0 : index
      %12 = vector.load %arg7[%c0_10, %c0_11] : memref<32x256xf32, #tpu.memory_space<vmem>>, vector<32x256xf32>
      %c0_12 = arith.constant 0 : index
      %c0_13 = arith.constant 0 : index
      %13 = vector.load %arg5[%c0_12, %c0_13] : memref<8x256xf32, #tpu.memory_space<vmem>>, vector<1x256xf32>
      %14 = vector.broadcast %13 : vector<1x256xf32> to vector<32x256xf32>
      %15 = arith.addf %12, %14 : vector<32x256xf32>
      %16 = tpu.iota {dimensions = array<i32: 0>} : vector<32x256xi32>
      %c32_i32 = arith.constant 32 : i32
      %17 = vector.broadcast %c32_i32 : i32 to vector<32x256xi32>
      %18 = arith.cmpi slt, %16, %17 : vector<32x256xi32>
      %cst_14 = arith.constant 0.000000e+00 : f32
      %19 = vector.broadcast %cst_14 : f32 to vector<32x256xf32>
      %20 = arith.select %18, %15, %19 : vector<32x256xi1>, vector<32x256xf32>
      %cst_15 = arith.constant dense<0.000000e+00> : vector<256xf32>
      %21 = vector.multi_reduction <add>, %20, %cst_15 [0] : vector<32x256xf32> to vector<256xf32>
      %22 = vector.shape_cast %21 : vector<256xf32> to vector<1x256xf32>
      %cst_16 = arith.constant 3.125000e-02 : f32
      %23 = vector.broadcast %cst_16 : f32 to vector<1x256xf32>
      %24 = arith.mulf %22, %23 : vector<1x256xf32>
      %25 = vector.broadcast %24 : vector<1x256xf32> to vector<32x256xf32>
      %26 = arith.subf %15, %25 : vector<32x256xf32>
      %cst_17 = arith.constant 0.000000e+00 : f32
      %27 = vector.broadcast %cst_17 : f32 to vector<32x256xf32>
      %28 = arith.select %18, %26, %27 : vector<32x256xi1>, vector<32x256xf32>
      %29 = arith.mulf %28, %28 : vector<32x256xf32>
      %cst_18 = arith.constant dense<0.000000e+00> : vector<256xf32>
      %30 = vector.multi_reduction <add>, %29, %cst_18 [0] : vector<32x256xf32> to vector<256xf32>
      %31 = vector.shape_cast %30 : vector<256xf32> to vector<1x256xf32>
      %cst_19 = arith.constant 3.125000e-02 : f32
      %32 = vector.broadcast %cst_19 : f32 to vector<1x256xf32>
      %33 = arith.mulf %31, %32 : vector<1x256xf32>
      %34 = vector.broadcast %24 : vector<1x256xf32> to vector<32x256xf32>
      %35 = arith.subf %15, %34 : vector<32x256xf32>
      %cst_20 = arith.constant 9.99999974E-6 : f32
      %36 = vector.broadcast %cst_20 : f32 to vector<1x256xf32>
      %37 = arith.addf %33, %36 : vector<1x256xf32>
      %38 = math.rsqrt %37 : vector<1x256xf32>
      %39 = vector.broadcast %38 : vector<1x256xf32> to vector<32x256xf32>
      %40 = arith.mulf %35, %39 : vector<32x256xf32>
      %c1 = arith.constant 1 : index
      %c0_21 = arith.constant 0 : index
      %41 = vector.load %arg5[%c1, %c0_21] : memref<8x256xf32, #tpu.memory_space<vmem>>, vector<1x256xf32>
      %42 = vector.broadcast %41 : vector<1x256xf32> to vector<32x256xf32>
      %43 = arith.mulf %40, %42 : vector<32x256xf32>
      %c2 = arith.constant 2 : index
      %c0_22 = arith.constant 0 : index
      %44 = vector.load %arg5[%c2, %c0_22] : memref<8x256xf32, #tpu.memory_space<vmem>>, vector<1x256xf32>
      %45 = vector.broadcast %44 : vector<1x256xf32> to vector<32x256xf32>
      %46 = arith.addf %43, %45 : vector<32x256xf32>
      %cst_23 = arith.constant 0.000000e+00 : f32
      %47 = vector.broadcast %cst_23 : f32 to vector<32x256xf32>
      %48 = arith.maximumf %46, %47 : vector<32x256xf32>
      %c0_24 = arith.constant 0 : index
      %c0_25 = arith.constant 0 : index
      %49 = vector.load %arg6[%c0_24, %c0_25] : memref<32x256xf32, #tpu.memory_space<vmem>>, vector<32x256xf32>
      tpu.vector_store %arg6[%c0_24, %c0_25], %48 {strides = array<i32>} : memref<32x256xf32, #tpu.memory_space<vmem>>, vector<32x256xf32>,
    } else {
    }
    return
  }
  func.func @transform_0(%arg0: i32, %arg1: i32, %arg2: i32) -> (i32, i32) {
    %c0_i32 = arith.constant 0 : i32
    return %arg0, %arg2 : i32, i32
  }
  func.func @transform_1(%arg0: i32, %arg1: i32, %arg2: i32) -> (i32, i32) {
    %c0_i32 = arith.constant 0 : i32
    return %arg2, %arg1 : i32, i32
  }
  func.func @transform_2(%arg0: i32, %arg1: i32, %arg2: i32) -> (i32, i32) {
    %c0_i32 = arith.constant 0 : i32
    %c0_i32_0 = arith.constant 0 : i32
    return %c0_i32, %arg1 : i32, i32
  }
  func.func @transform_3(%arg0: i32, %arg1: i32, %arg2: i32) -> (i32, i32) {
    %c0_i32 = arith.constant 0 : i32
    return %arg0, %arg1 : i32, i32
  }
}

module attributes {stable_mosaic.version = 11 : i64} {
  func.func @_conv_bn_relu_kernel(%arg0: i32, %arg1: i32, %arg2: i32, %arg3: memref<32x2304xbf16, #tpu.memory_space<vmem>>, %arg4: memref<2304x256xbf16, #tpu.memory_space<vmem>>, %arg5: memref<8x256xf32, #tpu.memory_space<vmem>>, %arg6: memref<32x256xf32, #tpu.memory_space<vmem>>, %arg7: memref<32x256xf32, #tpu.memory_space<vmem>>) attributes {dimension_semantics = [#tpu.dimension_semantics<parallel>, #tpu.dimension_semantics<parallel>, #tpu.dimension_semantics<arbitrary>], iteration_bounds = array<i64: 1, 2, 2>, scalar_prefetch = 0 : i64, scratch_operands = 1 : i64, tpu.core_type = #tpu.core_type<tc>, window_params = [{transform_indices = @transform_0, window_bounds = array<i64: 32, 2304>}, {transform_indices = @transform_1, window_bounds = array<i64: 2304, 256>}, {transform_indices = @transform_2, window_bounds = array<i64: 8, 256>}, {transform_indices = @transform_3, window_bounds = array<i64: 32, 256>}]} {
    %c0_i32 = arith.constant 0 : i32
    %0 = arith.cmpi eq, %arg2, %c0_i32 : i32
    %1 = arith.extui %0 : i1 to i32
    %c0_i32_0 = arith.constant 0 : i32
    %2 = arith.cmpi ne, %1, %c0_i32_0 : i32
    scf.if %2 {
      %cst_9 = arith.constant 0.000000e+00 : f32
      %12 = vector.broadcast %cst_9 : f32 to vector<32x256xf32>
      %c0_10 = arith.constant 0 : index
      %c0_11 = arith.constant 0 : index
      %13 = vector.load %arg7[%c0_10, %c0_11] : memref<32x256xf32, #tpu.memory_space<vmem>>, vector<32x256xf32>
      tpu.vector_store %arg7[%c0_10, %c0_11], %12 {strides = array<i32>} : memref<32x256xf32, #tpu.memory_space<vmem>>, vector<32x256xf32>,
    } else {
    }
    %c0 = arith.constant 0 : index
    %c0_1 = arith.constant 0 : index
    %3 = vector.load %arg7[%c0, %c0_1] : memref<32x256xf32, #tpu.memory_space<vmem>>, vector<32x256xf32>
    %c0_2 = arith.constant 0 : index
    %c0_3 = arith.constant 0 : index
    %4 = vector.load %arg3[%c0_2, %c0_3] : memref<32x2304xbf16, #tpu.memory_space<vmem>>, vector<32x2304xbf16>
    %c0_4 = arith.constant 0 : index
    %c0_5 = arith.constant 0 : index
    %5 = vector.load %arg4[%c0_4, %c0_5] : memref<2304x256xbf16, #tpu.memory_space<vmem>>, vector<2304x256xbf16>
    %cst = arith.constant dense<0.000000e+00> : vector<32x256xf32>
    %6 = tpu.matmul %4, %5, %cst {dimension_numbers = #tpu.dot_dimension_numbers<[1], [0], [0], [1], [0, 0, 1, 1], [], []>} : vector<32x2304xbf16>, vector<2304x256xbf16>, vector<32x256xf32> -> vector<32x256xf32>
    %7 = arith.addf %3, %6 : vector<32x256xf32>
    %c0_6 = arith.constant 0 : index
    %c0_7 = arith.constant 0 : index
    %8 = vector.load %arg7[%c0_6, %c0_7] : memref<32x256xf32, #tpu.memory_space<vmem>>, vector<32x256xf32>
    tpu.vector_store %arg7[%c0_6, %c0_7], %7 {strides = array<i32>} : memref<32x256xf32, #tpu.memory_space<vmem>>, vector<32x256xf32>,
    %c1_i32 = arith.constant 1 : i32
    %9 = arith.cmpi eq, %arg2, %c1_i32 : i32
    %10 = arith.extui %9 : i1 to i32
    %c0_i32_8 = arith.constant 0 : i32
    %11 = arith.cmpi ne, %10, %c0_i32_8 : i32
    scf.if %11 {
      %c0_9 = arith.constant 0 : index
      %c0_10 = arith.constant 0 : index
      %12 = vector.load %arg7[%c0_9, %c0_10] : memref<32x256xf32, #tpu.memory_space<vmem>>, vector<32x256xf32>
      %c0_11 = arith.constant 0 : index
      %c0_12 = arith.constant 0 : index
      %13 = vector.load %arg5[%c0_11, %c0_12] : memref<8x256xf32, #tpu.memory_space<vmem>>, vector<1x256xf32>
      %14 = vector.broadcast %13 : vector<1x256xf32> to vector<32x256xf32>
      %15 = arith.addf %12, %14 : vector<32x256xf32>
      %16 = tpu.iota {dimensions = array<i32: 0>} : vector<32x256xi32>
      %c32_i32 = arith.constant 32 : i32
      %17 = vector.broadcast %c32_i32 : i32 to vector<32x256xi32>
      %18 = arith.cmpi slt, %16, %17 : vector<32x256xi32>
      %cst_13 = arith.constant 0.000000e+00 : f32
      %19 = vector.broadcast %cst_13 : f32 to vector<32x256xf32>
      %20 = arith.select %18, %15, %19 : vector<32x256xi1>, vector<32x256xf32>
      %cst_14 = arith.constant dense<0.000000e+00> : vector<256xf32>
      %21 = vector.multi_reduction <add>, %20, %cst_14 [0] : vector<32x256xf32> to vector<256xf32>
      %22 = vector.shape_cast %21 : vector<256xf32> to vector<1x256xf32>
      %cst_15 = arith.constant 3.125000e-02 : f32
      %23 = vector.broadcast %cst_15 : f32 to vector<1x256xf32>
      %24 = arith.mulf %22, %23 : vector<1x256xf32>
      %25 = vector.broadcast %24 : vector<1x256xf32> to vector<32x256xf32>
      %26 = arith.subf %15, %25 : vector<32x256xf32>
      %cst_16 = arith.constant 0.000000e+00 : f32
      %27 = vector.broadcast %cst_16 : f32 to vector<32x256xf32>
      %28 = arith.select %18, %26, %27 : vector<32x256xi1>, vector<32x256xf32>
      %29 = arith.mulf %28, %28 : vector<32x256xf32>
      %cst_17 = arith.constant dense<0.000000e+00> : vector<256xf32>
      %30 = vector.multi_reduction <add>, %29, %cst_17 [0] : vector<32x256xf32> to vector<256xf32>
      %31 = vector.shape_cast %30 : vector<256xf32> to vector<1x256xf32>
      %cst_18 = arith.constant 3.125000e-02 : f32
      %32 = vector.broadcast %cst_18 : f32 to vector<1x256xf32>
      %33 = arith.mulf %31, %32 : vector<1x256xf32>
      %34 = vector.broadcast %24 : vector<1x256xf32> to vector<32x256xf32>
      %35 = arith.subf %15, %34 : vector<32x256xf32>
      %cst_19 = arith.constant 9.99999974E-6 : f32
      %36 = vector.broadcast %cst_19 : f32 to vector<1x256xf32>
      %37 = arith.addf %33, %36 : vector<1x256xf32>
      %38 = math.rsqrt %37 : vector<1x256xf32>
      %39 = vector.broadcast %38 : vector<1x256xf32> to vector<32x256xf32>
      %40 = arith.mulf %35, %39 : vector<32x256xf32>
      %c1 = arith.constant 1 : index
      %c0_20 = arith.constant 0 : index
      %41 = vector.load %arg5[%c1, %c0_20] : memref<8x256xf32, #tpu.memory_space<vmem>>, vector<1x256xf32>
      %42 = vector.broadcast %41 : vector<1x256xf32> to vector<32x256xf32>
      %43 = arith.mulf %40, %42 : vector<32x256xf32>
      %c2 = arith.constant 2 : index
      %c0_21 = arith.constant 0 : index
      %44 = vector.load %arg5[%c2, %c0_21] : memref<8x256xf32, #tpu.memory_space<vmem>>, vector<1x256xf32>
      %45 = vector.broadcast %44 : vector<1x256xf32> to vector<32x256xf32>
      %46 = arith.addf %43, %45 : vector<32x256xf32>
      %cst_22 = arith.constant 0.000000e+00 : f32
      %47 = vector.broadcast %cst_22 : f32 to vector<32x256xf32>
      %48 = arith.maximumf %46, %47 : vector<32x256xf32>
      %c0_23 = arith.constant 0 : index
      %c0_24 = arith.constant 0 : index
      %49 = vector.load %arg6[%c0_23, %c0_24] : memref<32x256xf32, #tpu.memory_space<vmem>>, vector<32x256xf32>
      tpu.vector_store %arg6[%c0_23, %c0_24], %48 {strides = array<i32>} : memref<32x256xf32, #tpu.memory_space<vmem>>, vector<32x256xf32>,
    } else {
    }
    return
  }
  func.func @transform_0(%arg0: i32, %arg1: i32, %arg2: i32) -> (i32, i32) {
    %c0_i32 = arith.constant 0 : i32
    return %arg0, %arg2 : i32, i32
  }
  func.func @transform_1(%arg0: i32, %arg1: i32, %arg2: i32) -> (i32, i32) {
    %c0_i32 = arith.constant 0 : i32
    return %arg2, %arg1 : i32, i32
  }
  func.func @transform_2(%arg0: i32, %arg1: i32, %arg2: i32) -> (i32, i32) {
    %c0_i32 = arith.constant 0 : i32
    %c0_i32_0 = arith.constant 0 : i32
    return %c0_i32, %arg1 : i32, i32
  }
  func.func @transform_3(%arg0: i32, %arg1: i32, %arg2: i32) -> (i32, i32) {
    %c0_i32 = arith.constant 0 : i32
    return %arg0, %arg1 : i32, i32
  }
}

module attributes {stable_mosaic.version = 11 : i64} {
  func.func @_fusion_kernel(%arg0: memref<32x512xf32, #tpu.memory_space<vmem>>, %arg1: memref<32x512xf32, #tpu.memory_space<vmem>>, %arg2: memref<32x512xf32, #tpu.memory_space<vmem>>, %arg3: memref<32x512xf32, #tpu.memory_space<vmem>>, %arg4: memref<32x512xf32, #tpu.memory_space<vmem>>) attributes {dimension_semantics = [], scalar_prefetch = 0 : i64, scratch_operands = 0 : i64, tpu.core_type = #tpu.core_type<tc>} {
    %c0 = arith.constant 0 : index
    %c0_0 = arith.constant 0 : index
    %0 = vector.load %arg0[%c0, %c0_0] : memref<32x512xf32, #tpu.memory_space<vmem>>, vector<32x512xf32>
    %c0_1 = arith.constant 0 : index
    %c0_2 = arith.constant 0 : index
    %1 = vector.load %arg1[%c0_1, %c0_2] : memref<32x512xf32, #tpu.memory_space<vmem>>, vector<32x512xf32>
    %c0_3 = arith.constant 0 : index
    %c0_4 = arith.constant 0 : index
    %2 = vector.load %arg2[%c0_3, %c0_4] : memref<32x512xf32, #tpu.memory_space<vmem>>, vector<32x512xf32>
    %c0_5 = arith.constant 0 : index
    %c0_6 = arith.constant 0 : index
    %3 = vector.load %arg3[%c0_5, %c0_6] : memref<32x512xf32, #tpu.memory_space<vmem>>, vector<32x512xf32>
    %cst = arith.constant dense<0.000000e+00> : vector<32xf32>
    %4 = vector.multi_reduction <add>, %0, %cst [1] : vector<32x512xf32> to vector<32xf32>
    %5 = vector.shape_cast %4 : vector<32xf32> to vector<32x1xf32>
    %cst_7 = arith.constant 5.120000e+02 : f32
    %6 = vector.broadcast %cst_7 : f32 to vector<32x1xf32>
    %7 = arith.divf %5, %6 : vector<32x1xf32>
    %8 = math.exp %7 : vector<32x1xf32>
    %cst_8 = arith.constant dense<0.000000e+00> : vector<32xf32>
    %9 = vector.multi_reduction <add>, %1, %cst_8 [1] : vector<32x512xf32> to vector<32xf32>
    %10 = vector.shape_cast %9 : vector<32xf32> to vector<32x1xf32>
    %cst_9 = arith.constant 5.120000e+02 : f32
    %11 = vector.broadcast %cst_9 : f32 to vector<32x1xf32>
    %12 = arith.divf %10, %11 : vector<32x1xf32>
    %13 = math.exp %12 : vector<32x1xf32>
    %cst_10 = arith.constant dense<0.000000e+00> : vector<32xf32>
    %14 = vector.multi_reduction <add>, %2, %cst_10 [1] : vector<32x512xf32> to vector<32xf32>
    %15 = vector.shape_cast %14 : vector<32xf32> to vector<32x1xf32>
    %cst_11 = arith.constant 5.120000e+02 : f32
    %16 = vector.broadcast %cst_11 : f32 to vector<32x1xf32>
    %17 = arith.divf %15, %16 : vector<32x1xf32>
    %18 = math.exp %17 : vector<32x1xf32>
    %cst_12 = arith.constant dense<0.000000e+00> : vector<32xf32>
    %19 = vector.multi_reduction <add>, %3, %cst_12 [1] : vector<32x512xf32> to vector<32xf32>
    %20 = vector.shape_cast %19 : vector<32xf32> to vector<32x1xf32>
    %cst_13 = arith.constant 5.120000e+02 : f32
    %21 = vector.broadcast %cst_13 : f32 to vector<32x1xf32>
    %22 = arith.divf %20, %21 : vector<32x1xf32>
    %23 = math.exp %22 : vector<32x1xf32>
    %24 = arith.addf %8, %13 : vector<32x1xf32>
    %25 = arith.addf %24, %18 : vector<32x1xf32>
    %26 = arith.addf %25, %23 : vector<32x1xf32>
    %cst_14 = arith.constant 9.99999974E-6 : f32
    %27 = vector.broadcast %cst_14 : f32 to vector<32x1xf32>
    %28 = arith.addf %26, %27 : vector<32x1xf32>
    %29 = tpu.reciprocal %28 {approx = true} : vector<32x1xf32> -> vector<32x1xf32>
    %30 = vector.broadcast %8 : vector<32x1xf32> to vector<32x512xf32>
    %31 = arith.mulf %30, %0 : vector<32x512xf32>
    %32 = vector.broadcast %13 : vector<32x1xf32> to vector<32x512xf32>
    %33 = arith.mulf %32, %1 : vector<32x512xf32>
    %34 = arith.addf %31, %33 : vector<32x512xf32>
    %35 = vector.broadcast %18 : vector<32x1xf32> to vector<32x512xf32>
    %36 = arith.mulf %35, %2 : vector<32x512xf32>
    %37 = arith.addf %34, %36 : vector<32x512xf32>
    %38 = vector.broadcast %23 : vector<32x1xf32> to vector<32x512xf32>
    %39 = arith.mulf %38, %3 : vector<32x512xf32>
    %40 = arith.addf %37, %39 : vector<32x512xf32>
    %41 = vector.broadcast %29 : vector<32x1xf32> to vector<32x512xf32>
    %42 = arith.mulf %40, %41 : vector<32x512xf32>
    %c0_15 = arith.constant 0 : index
    %c0_16 = arith.constant 0 : index
    %43 = vector.load %arg4[%c0_15, %c0_16] : memref<32x512xf32, #tpu.memory_space<vmem>>, vector<32x512xf32>
    tpu.vector_store %arg4[%c0_15, %c0_16], %42 {strides = array<i32>} : memref<32x512xf32, #tpu.memory_space<vmem>>, vector<32x512xf32>,
    return
  }
}

module attributes {stable_mosaic.version = 11 : i64} {
  func.func @_conv_bn_relu_kernel(%arg0: i32, %arg1: i32, %arg2: i32, %arg3: memref<32x2304xbf16, #tpu.memory_space<vmem>>, %arg4: memref<2304x256xbf16, #tpu.memory_space<vmem>>, %arg5: memref<8x256xf32, #tpu.memory_space<vmem>>, %arg6: memref<32x256xf32, #tpu.memory_space<vmem>>, %arg7: memref<32x256xf32, #tpu.memory_space<vmem>>) attributes {dimension_semantics = [#tpu.dimension_semantics<parallel>, #tpu.dimension_semantics<parallel>, #tpu.dimension_semantics<arbitrary>], iteration_bounds = array<i64: 1, 2, 4>, scalar_prefetch = 0 : i64, scratch_operands = 1 : i64, tpu.core_type = #tpu.core_type<tc>, window_params = [{transform_indices = @transform_0, window_bounds = array<i64: 32, 2304>}, {transform_indices = @transform_1, window_bounds = array<i64: 2304, 256>}, {transform_indices = @transform_2, window_bounds = array<i64: 8, 256>}, {transform_indices = @transform_3, window_bounds = array<i64: 32, 256>}]} {
    %c0_i32 = arith.constant 0 : i32
    %0 = arith.cmpi eq, %arg2, %c0_i32 : i32
    %1 = arith.extui %0 : i1 to i32
    %c0_i32_0 = arith.constant 0 : i32
    %2 = arith.cmpi ne, %1, %c0_i32_0 : i32
    scf.if %2 {
      %cst_9 = arith.constant 0.000000e+00 : f32
      %12 = vector.broadcast %cst_9 : f32 to vector<32x256xf32>
      %c0_10 = arith.constant 0 : index
      %c0_11 = arith.constant 0 : index
      %13 = vector.load %arg7[%c0_10, %c0_11] : memref<32x256xf32, #tpu.memory_space<vmem>>, vector<32x256xf32>
      tpu.vector_store %arg7[%c0_10, %c0_11], %12 {strides = array<i32>} : memref<32x256xf32, #tpu.memory_space<vmem>>, vector<32x256xf32>,
    } else {
    }
    %c0 = arith.constant 0 : index
    %c0_1 = arith.constant 0 : index
    %3 = vector.load %arg7[%c0, %c0_1] : memref<32x256xf32, #tpu.memory_space<vmem>>, vector<32x256xf32>
    %c0_2 = arith.constant 0 : index
    %c0_3 = arith.constant 0 : index
    %4 = vector.load %arg3[%c0_2, %c0_3] : memref<32x2304xbf16, #tpu.memory_space<vmem>>, vector<32x2304xbf16>
    %c0_4 = arith.constant 0 : index
    %c0_5 = arith.constant 0 : index
    %5 = vector.load %arg4[%c0_4, %c0_5] : memref<2304x256xbf16, #tpu.memory_space<vmem>>, vector<2304x256xbf16>
    %cst = arith.constant dense<0.000000e+00> : vector<32x256xf32>
    %6 = tpu.matmul %4, %5, %cst {dimension_numbers = #tpu.dot_dimension_numbers<[1], [0], [0], [1], [0, 0, 1, 1], [], []>} : vector<32x2304xbf16>, vector<2304x256xbf16>, vector<32x256xf32> -> vector<32x256xf32>
    %7 = arith.addf %3, %6 : vector<32x256xf32>
    %c0_6 = arith.constant 0 : index
    %c0_7 = arith.constant 0 : index
    %8 = vector.load %arg7[%c0_6, %c0_7] : memref<32x256xf32, #tpu.memory_space<vmem>>, vector<32x256xf32>
    tpu.vector_store %arg7[%c0_6, %c0_7], %7 {strides = array<i32>} : memref<32x256xf32, #tpu.memory_space<vmem>>, vector<32x256xf32>,
    %c3_i32 = arith.constant 3 : i32
    %9 = arith.cmpi eq, %arg2, %c3_i32 : i32
    %10 = arith.extui %9 : i1 to i32
    %c0_i32_8 = arith.constant 0 : i32
    %11 = arith.cmpi ne, %10, %c0_i32_8 : i32
    scf.if %11 {
      %c0_9 = arith.constant 0 : index
      %c0_10 = arith.constant 0 : index
      %12 = vector.load %arg7[%c0_9, %c0_10] : memref<32x256xf32, #tpu.memory_space<vmem>>, vector<32x256xf32>
      %c0_11 = arith.constant 0 : index
      %c0_12 = arith.constant 0 : index
      %13 = vector.load %arg5[%c0_11, %c0_12] : memref<8x256xf32, #tpu.memory_space<vmem>>, vector<1x256xf32>
      %14 = vector.broadcast %13 : vector<1x256xf32> to vector<32x256xf32>
      %15 = arith.addf %12, %14 : vector<32x256xf32>
      %16 = tpu.iota {dimensions = array<i32: 0>} : vector<32x256xi32>
      %c32_i32 = arith.constant 32 : i32
      %17 = vector.broadcast %c32_i32 : i32 to vector<32x256xi32>
      %18 = arith.cmpi slt, %16, %17 : vector<32x256xi32>
      %cst_13 = arith.constant 0.000000e+00 : f32
      %19 = vector.broadcast %cst_13 : f32 to vector<32x256xf32>
      %20 = arith.select %18, %15, %19 : vector<32x256xi1>, vector<32x256xf32>
      %cst_14 = arith.constant dense<0.000000e+00> : vector<256xf32>
      %21 = vector.multi_reduction <add>, %20, %cst_14 [0] : vector<32x256xf32> to vector<256xf32>
      %22 = vector.shape_cast %21 : vector<256xf32> to vector<1x256xf32>
      %cst_15 = arith.constant 3.125000e-02 : f32
      %23 = vector.broadcast %cst_15 : f32 to vector<1x256xf32>
      %24 = arith.mulf %22, %23 : vector<1x256xf32>
      %25 = vector.broadcast %24 : vector<1x256xf32> to vector<32x256xf32>
      %26 = arith.subf %15, %25 : vector<32x256xf32>
      %cst_16 = arith.constant 0.000000e+00 : f32
      %27 = vector.broadcast %cst_16 : f32 to vector<32x256xf32>
      %28 = arith.select %18, %26, %27 : vector<32x256xi1>, vector<32x256xf32>
      %29 = arith.mulf %28, %28 : vector<32x256xf32>
      %cst_17 = arith.constant dense<0.000000e+00> : vector<256xf32>
      %30 = vector.multi_reduction <add>, %29, %cst_17 [0] : vector<32x256xf32> to vector<256xf32>
      %31 = vector.shape_cast %30 : vector<256xf32> to vector<1x256xf32>
      %cst_18 = arith.constant 3.125000e-02 : f32
      %32 = vector.broadcast %cst_18 : f32 to vector<1x256xf32>
      %33 = arith.mulf %31, %32 : vector<1x256xf32>
      %34 = vector.broadcast %24 : vector<1x256xf32> to vector<32x256xf32>
      %35 = arith.subf %15, %34 : vector<32x256xf32>
      %cst_19 = arith.constant 9.99999974E-6 : f32
      %36 = vector.broadcast %cst_19 : f32 to vector<1x256xf32>
      %37 = arith.addf %33, %36 : vector<1x256xf32>
      %38 = math.rsqrt %37 : vector<1x256xf32>
      %39 = vector.broadcast %38 : vector<1x256xf32> to vector<32x256xf32>
      %40 = arith.mulf %35, %39 : vector<32x256xf32>
      %c1 = arith.constant 1 : index
      %c0_20 = arith.constant 0 : index
      %41 = vector.load %arg5[%c1, %c0_20] : memref<8x256xf32, #tpu.memory_space<vmem>>, vector<1x256xf32>
      %42 = vector.broadcast %41 : vector<1x256xf32> to vector<32x256xf32>
      %43 = arith.mulf %40, %42 : vector<32x256xf32>
      %c2 = arith.constant 2 : index
      %c0_21 = arith.constant 0 : index
      %44 = vector.load %arg5[%c2, %c0_21] : memref<8x256xf32, #tpu.memory_space<vmem>>, vector<1x256xf32>
      %45 = vector.broadcast %44 : vector<1x256xf32> to vector<32x256xf32>
      %46 = arith.addf %43, %45 : vector<32x256xf32>
      %cst_22 = arith.constant 0.000000e+00 : f32
      %47 = vector.broadcast %cst_22 : f32 to vector<32x256xf32>
      %48 = arith.maximumf %46, %47 : vector<32x256xf32>
      %c0_23 = arith.constant 0 : index
      %c0_24 = arith.constant 0 : index
      %49 = vector.load %arg6[%c0_23, %c0_24] : memref<32x256xf32, #tpu.memory_space<vmem>>, vector<32x256xf32>
      tpu.vector_store %arg6[%c0_23, %c0_24], %48 {strides = array<i32>} : memref<32x256xf32, #tpu.memory_space<vmem>>, vector<32x256xf32>,
    } else {
    }
    return
  }
  func.func @transform_0(%arg0: i32, %arg1: i32, %arg2: i32) -> (i32, i32) {
    %c0_i32 = arith.constant 0 : i32
    return %arg0, %arg2 : i32, i32
  }
  func.func @transform_1(%arg0: i32, %arg1: i32, %arg2: i32) -> (i32, i32) {
    %c0_i32 = arith.constant 0 : i32
    return %arg2, %arg1 : i32, i32
  }
  func.func @transform_2(%arg0: i32, %arg1: i32, %arg2: i32) -> (i32, i32) {
    %c0_i32 = arith.constant 0 : i32
    %c0_i32_0 = arith.constant 0 : i32
    return %c0_i32, %arg1 : i32, i32
  }
  func.func @transform_3(%arg0: i32, %arg1: i32, %arg2: i32) -> (i32, i32) {
    %c0_i32 = arith.constant 0 : i32
    return %arg0, %arg1 : i32, i32
  }
}

</mosaic_0001>

<bundles_post_ra>
// kernel: up_dense_1_softmax_forward.13
= control target key start
LH: loop header
LB: loop body
LE: loop exit
PB: predicated region body
PF: predicated region fallthrough
CT: control target
= control target key end

     0   :  { %s2289_s0 = inlined_call_operand.hbm [shape: bf16[32,640], index: 0, kind: input, shape index: {}]   ;;  %s2290_s1 = inlined_call_operand.hbm [shape: bf16[640,512], index: 1, kind: input, shape index: {}]   ;;  %s2291_s2 = inlined_call_operand.hbm [shape: f32[8,512], index: 2, kind: input, shape index: {}]   ;;  %s2292_s3 = inlined_call_operand.hbm [shape: f32[32,512], index: 3, kind: output, shape index: {}]  }
   0x1   :  { %2301 = sst [smem:[#allocation14_spill]] %s2290_s1 }
   0x2   :  { %8 = vsyncpa [#allocation4], 0 }
   0x3   :  { %9 = vsyncpa [#allocation7], 0 }
   0x4   :  { %11 = vsyncpa [#allocation7 + $0x1], 0 }
   0x5   :  { %12 = vsyncpa [#allocation5], 0 }
   0x6   :  { %14 = vsyncpa [#allocation5 + $0x1], 0  ;;  %s1933_s12 = smov 0   ;;  %s1935_s13 = smov 0  }
   0x7   :  { %s1937_s14 = smov 0   ;;  %s1939_s15 = smov 0  }
   0x8   :  { %s1941_s16 = smov 0   ;;  %s1943_s17 = smov 0  }
   0x9 LB: > { %s35_s18 = sadd.s32 1, %s1894_s16  ;;  %s76_s19 = sadd.s32 1, %s1886_s14  ;;  %s1898_s17 = sphi %s1943_s17, %s20_s17   ;;  %s1894_s16 = sphi %s1941_s16, %s2325_s16   ;;  %s1890_s15 = sphi %s1939_s15, %s2324_s15   ;;  %s1886_s14 = sphi %s1937_s14, %s2323_s14   ;;  %s1882_s13 = sphi %s1935_s13, %s2322_s13   ;;  %s1878_s12 = sphi %s1933_s12, %s2321_s12  }
   0xa   : > { %p37_p0 = scmp.ge.s32.totalorder %s35_s18, 2  ;;  %p83_p1 = scmp.ne.s32.totalorder %s1886_s14, %s1882_s13 }
   0xb   : > { %p84_p2 = scmp.eq.s32.totalorder %s1898_s17, 0  ;;  %p1525_p5 = scmp.lt.s32.totalorder %s1898_s17, 2 }
   0xc   : > { %s2327_s18 = smov (%p37_p0, %s35_s18), 0  ;;  %s186_s21 = sand.u32 1, %s1898_s17  }
   0xd   : > { %2302 = sst [smem:[#allocation13_spill]] %s2327_s18  ;;  %p85_p4 = por %p84_p2, %p83_p1 }
   0xe   : > { %s72_s20 = ssub.s32 %s1894_s16, %s2327_s18  ;;  %s188_s22 = sand.u32 1, %s1886_s14  }
   0xf   : > { %p74_p6 = scmp.eq.s32.totalorder %s72_s20, 0  ;;  %s1462_s23 = sshll.u32 %s1894_s16, 7 }
  0x10   : > { %s1497_s25 = smul.u32 640, %s188_s22  ;;  %s2303_s1 = sld [smem:[#allocation14_spill]] }
  0x11   : > { %s1981_s24 = scalar_select %p74_p6, %s1886_s14, %s76_s19  }
  0x12   : > { %p1990_p7 = pnand %p1525_p5, %p85_p4  ;;  %s190_s30 = scalar_lea.vmem [#allocation6], %s1497_s25 }
  0x13   : > { %s200_s4 = sshll.u32 %s190_s30, 4  ;;  %s1996_s5 = scalar_lea.sflag [#allocation7], %s186_s21  ;;  %s1994_s4 = int_to_ptr.vmem [resolvable:$true] %s200_s4 }
  0x14   : > { %s2304_s29 = scalar_select %p1990_p7, 1, 0 }
  0x15   : > { %p2295_p9 = pneg %p1990_p7 }
  0x16   : > { %s1988_s28 = scalar_lea.hbm %s2303_s1, %s1462_s23  ;;  %s1729_s9 = scalar_lea.hbm %s2303_s1, 20480 }
  0x17   : > { %s1724_s6 = scalar_lea.hbm %s1988_s28, 10240  ;;  %p1730_p12 = scmp.lt.u32.totalorder %s1988_s28, %s2303_s1 }
  0x18   : > { %p1725_p8 = scmp.ne.s32.totalorder %s1988_s28, %s1724_s6  ;;  %p1731_p13 = scmp.lt.u32.totalorder %s1729_s9, %s1724_s6 }
  0x19   : > { %p1733_p2 = scmp.lt.u32.totalorder %s1724_s6, %s1988_s28 }
  0x1a   : > { %p1727_p10 = pnand %p2295_p9, %p1725_p8  ;;  %p1732_p0 = por %p1731_p13, %p1730_p12 }
  0x1c   : > { %p1728_p11 = pneg %p1727_p10  ;;  %p1734_p4 = por %p1733_p2, %p1732_p0 }
  0x1e   : > { %p1735_p5 = pnand %p1734_p4, %p1728_p11 }
  0x20   : > { %1738 = shalt.err (!%p1735_p5)
}
  0x21   : > { %s1739_s19 = scalar_lea.vmem %s1994_s4, 10240  ;;  %s1900_s20 = smov [#allocation6]  }
  0x22   : > { %p1740_p6 = scmp.ne.s32.totalorder %s1994_s4, %s1739_s19  ;;  %s1744_s21 = sshll.u32 %s1900_s20, 4  ;;  %s1745_s21 = int_to_ptr.vmem [resolvable:$false] %s1744_s21 }
  0x23   : > { %s1746_s23 = scalar_lea.vmem %s1745_s21, 20480  ;;  %p1747_p3 = scmp.lt.s32.totalorder %s1994_s4, %s1745_s21 }
  0x24   : > { %p1742_p8 = pnand %p1740_p6, %p2295_p9  ;;  %p1748_p12 = scmp.lt.s32.totalorder %s1746_s23, %s1739_s19 }
  0x26   : > { %p1743_p10 = pneg %p1742_p8  ;;  %p1749_p13 = por %p1748_p12, %p1747_p3 }
  0x28   : > { %p1750_p0 = pnand %p1749_p13, %p1743_p10 }
  0x2a   : > { %1753 = shalt.err (!%p1750_p0)
}
  0x2b   : > { %s1901_s25 = smov 256   ;;  %s1902_s26 = smov 128  }
  0x2c   : > { %s1903_s27 = smov 8   ;;  %s2025_s30 = sadd.s32 4294967295, %s1898_s17  }
  0x2d   : > { %1516 = dma.hbm_to_vmem [thread:$0]  (!%p1990_p7), %s1988_s28, 10240, %s1994_s4, %s1996_s5, %s1901_s25, %s1902_s26, %s1903_s27  }
  0x2e   : > { %s1352_s6 = sadd.s32 4294967294, %s1898_s17   ;;  %p89_p3 = scmp.ne.s32.totalorder %s1882_s13, %s1878_s12 }
  0x2f   : > { %p2294_p11 = scmp.eq.s32.totalorder %s2025_s30, 0  ;;  %p141_p2 = scmp.eq.s32.totalorder %s2025_s30, 1 }
  0x30   : > { %p147_p4 = scmp.eq.s32.totalorder %s1352_s6, 1  ;;  %p1353_p6 = scmp.ge.s32.totalorder %s1898_s17, 1 }
  0x31   : > { %p2034_p5 = por %p2294_p11, %p89_p3  ;;  %p2042_p8 = por %p141_p2, %p83_p1 }
  0x32   : > { %p2046_p10 = por %p147_p4, %p89_p3  ;;  %p154_p12 = scmp.lt.s32.totalorder %s1898_s17, 3 }
  0x33   : > { %s2305_s7 = scalar_select %p2034_p5, 1, 0 }
  0x34   : > { %s2306_s28 = scalar_select %p2042_p8, 1, 0 }
  0x35   : > { %s2307_s4 = scalar_select %p2046_p10, 1, 0 }
  0x36   : > { %p2051_p13 = pnand %p1353_p6, %p154_p12  ;;  %s1904_s9 = smov [#allocation3]  }
  0x37   : > { %s172_s10 = sshll.u32 %s1904_s9, 4  ;;  %s1358_s11 = sshll.u32 %s188_s22, 4  ;;  %s2055_s10 = int_to_ptr.vmem [resolvable:$true] %s172_s10 }
  0x38   : > { %s2308_s8 = scalar_select %p2051_p13, 1, 0 }
  0x39   : > { %p1509_p0 = pneg %p2051_p13  ;;  %s1463_s19 = sshll.u32 %s1894_s16, 8 }
  0x3a   : > { %s2071_s25 = scalar_lea.hbm %s2291_s2, %s1463_s19  ;;  %s214_s26 = scalar_lea.vmem [#allocation8], %s1358_s11 }
  0x3b   : > { %p2064_p1 = pnand %p1509_p0, %p2294_p11  ;;  %s222_s27 = sshll.u32 %s214_s26, 4  ;;  %s2073_s27 = int_to_ptr.vmem [resolvable:$true] %s222_s27 }
  0x3c   : > { %s1754_s22 = scalar_lea.hbm %s2289_s0, 1280 }
  0x3d   : > { %p1755_p3 = scmp.ne.s32.totalorder %s2289_s0, %s1754_s22  ;;  %p1756_p2 = pneg %p2064_p1 }
  0x3e   : > { %p1761_p12 = scmp.lt.u32.totalorder %s1754_s22, %s2289_s0 }
  0x3f   : > { %p1757_p4 = pnand %p1756_p2, %p1755_p3 }
  0x41   : > { %p1758_p6 = pneg %p1757_p4 }
  0x43   : > { %p1763_p0 = pnand %p1761_p12, %p1758_p6 }
  0x45   : > { %1766 = shalt.err (!%p1763_p0)
}
  0x46   : > { %s1767_s11 = scalar_lea.vmem %s2055_s10, 1280  ;;  %p1775_p8 = scmp.lt.s32.totalorder %s2055_s10, %s2055_s10 }
  0x47   : > { %p1768_p11 = scmp.ne.s32.totalorder %s2055_s10, %s1767_s11  ;;  %p1776_p5 = scmp.lt.s32.totalorder %s1767_s11, %s1767_s11 }
  0x49   : > { %p1770_p9 = pnand %p1768_p11, %p1756_p2  ;;  %p1777_p13 = por %p1776_p5, %p1775_p8 }
  0x4b   : > { %p1771_p10 = pneg %p1770_p9 }
  0x4d   : > { %p1778_p7 = pnand %p1777_p13, %p1771_p10 }
  0x4f   : > { %1781 = shalt.err (!%p1778_p7)
}
  0x50   : > { %s1905_s1 = smov 320   ;;  %s1906_s18 = smov 20  }
  0x51   : > { %1512 = dma.hbm_to_vmem [thread:$0]  (!%p2064_p1), %s2289_s0, 1280, %s2055_s10, [#allocation4], %s1905_s1, %s1905_s1, %s1906_s18  }
  0x52   : > { %s1782_s6 = scalar_lea.hbm %s2071_s25, 256  ;;  %p2310_p11 = scmp.ne.s32.totalorder %s2304_s29, 0 }
  0x53   : > { %p1783_p9 = scmp.ne.s32.totalorder %s2071_s25, %s1782_s6  ;;  %s1787_s21 = scalar_lea.hbm %s2291_s2, 512 }
  0x54   : > { %p2311_p5 = pneg %p2310_p11  ;;  %p1788_p10 = scmp.lt.u32.totalorder %s2071_s25, %s2291_s2 }
  0x55   : > { %p1789_p13 = scmp.lt.u32.totalorder %s1787_s21, %s1782_s6  ;;  %p1791_p2 = scmp.lt.u32.totalorder %s1782_s6, %s2071_s25 }
  0x56   : > { %p1785_p8 = pnand %p1783_p9, %p2311_p5 }
  0x57   : > { %p1790_p3 = por %p1789_p13, %p1788_p10 }
  0x58   : > { %p1786_p7 = pneg %p1785_p8 }
  0x59   : > { %p1792_p4 = por %p1791_p2, %p1790_p3 }
  0x5b   : > { %p1793_p6 = pnand %p1792_p4, %p1786_p7 }
  0x5d   : > { %1796 = shalt.err (!%p1793_p6)
}
  0x5e   : > { %s1797_s10 = scalar_lea.vmem %s2073_s27, 256  ;;  %p2312_p12 = pmov %p2311_p5 }
  0x5f   : > { %p1798_p1 = scmp.ne.s32.totalorder %s2073_s27, %s1797_s10  ;;  %s1907_s20 = smov [#allocation8]  }
  0x60   : > { %s1802_s1 = sshll.u32 %s1907_s20, 4  ;;  %s1803_s1 = int_to_ptr.vmem [resolvable:$false] %s1802_s1 }
  0x61   : > { %p1800_p0 = pnand %p1798_p1, %p2312_p12  ;;  %s1804_s18 = scalar_lea.vmem %s1803_s1, 512 }
  0x62   : > { %p1805_p5 = scmp.lt.s32.totalorder %s2073_s27, %s1803_s1  ;;  %p1806_p8 = scmp.lt.s32.totalorder %s1804_s18, %s1797_s10 }
  0x63   : > { %p1801_p9 = pneg %p1800_p0 }
  0x64   : > { %p1807_p10 = por %p1806_p8, %p1805_p5 }
  0x66   : > { %p1808_p13 = pnand %p1807_p10, %p1801_p9 }
  0x68   : > { %1811 = shalt.err (!%p1808_p13)
}
  0x69   : > { %1519 = dma.hbm_to_vmem [thread:$0]  (!%p2310_p11), %s2071_s25, 256, %s2073_s27, %s1996_s5  }
  0x6a   : > { %p2313_p7 = scmp.ne.s32.totalorder %s2308_s8, 0 }
  0x6b   : > { %p2314_p3 = scmp.eq.s32.totalorder (!%p2313_p7), %s2025_s30, 0 }
  0x6c   : > { %231 = sbr.rel (%p2313_p7) target bundleno = 521 (0x209), region = 32 }
  0x73   : > { %1865 = dma.done.wait (%p2314_p3), [#allocation4], 1280   ;;  %p2315_p2 = pmov %p2314_p3 }
  0x74   : > { %s237_s19 = sand.u32 1, %s2025_s30   ;;  %s2128_s26 = sand.u32 1, %s1882_s13  }
  0x75   : > { %1867 = vsyncadd (%p2315_p2), [#allocation4], 4294966016  ;;  %s1498_s29 = smul.u32 640, %s2128_s26  ;;  %s238_s6 = scalar_lea.sflag [#allocation7], %s237_s19 }
  0x76   : > { %p2316_p11 = scmp.ne.s32.totalorder %s2305_s7, 0 }
  0x77   : > { %s2131_s9 = scalar_lea.vmem [#allocation6], %s1498_s29 }
  0x78   : > { %1869 = dma.done.wait (%p2316_p11), %s238_s6, 10496  }
  0x79   : > { %1871 = vsyncadd (%p2316_p11), %s238_s6, 4294956800  ;;  %v1586_v0 = vld [vmem:[%s2131_s9 + $0x4] ss:$8 sps:$4 sm:$0xff]   ;;  %v1590_v2 = vld [vmem:[%s2131_s9] ss:$8 sps:$4 sm:$0xff]   ;;  %s1363_s5 = sshll.u32 %s2128_s26, 4 }
  0x7a   : > { %v1588_v1 = vld [vmem:[%s2131_s9 + $0x104] ss:$8 sps:$4 sm:$0xff]   ;;  %850 = vmatprep.subr.bf16.mxu1 %v1586_v0  ;;  %v1591_v3 = vld [vmem:[%s2131_s9 + $0x100] ss:$8 sps:$4 sm:$0xff]   ;;  %v1592_v4 = vld [vmem:[%s2131_s9 + $0x14] ss:$8 sps:$4 sm:$0xff]  }
  0x7b   : > { %903 = vmatprep.subr.bf16.mxu0 %v1588_v1  ;;  %851 = vmatpush1.bf16.msra.mxu1 %v1590_v2  ;;  %v1594_v5 = vld [vmem:[%s2131_s9 + $0x114] ss:$8 sps:$4 sm:$0xff]   ;;  %v1596_v6 = vld [vmem:[%s2131_s9 + $0x10] ss:$8 sps:$4 sm:$0xff]   ;;  %v1598_v8 = vld [vmem:[%s2131_s9 + $0x24] ss:$8 sps:$4 sm:$0xff]  }
  0x7c   : > { %904 = vmatpush1.bf16.msra.mxu0 %v1591_v3  ;;  %852 = vmatprep.subr.bf16.mxu1 %v1592_v4  ;;  %v1597_v7 = vld [vmem:[%s2131_s9 + $0x110] ss:$8 sps:$4 sm:$0xff]   ;;  %v1600_v9 = vld [vmem:[%s2131_s9 + $0x124] ss:$8 sps:$4 sm:$0xff]   ;;  %v1602_v10 = vld [vmem:[%s2131_s9 + $0x20] ss:$8 sps:$4 sm:$0xff]  }
  0x7d   : > { %905 = vmatprep.subr.bf16.mxu0 %v1594_v5  ;;  %v1603_v11 = vld [vmem:[%s2131_s9 + $0x120] ss:$8 sps:$4 sm:$0xff]   ;;  %v1604_v12 = vld [vmem:[%s2131_s9 + $0x34] ss:$8 sps:$4 sm:$0xff]   ;;  %v1608_v14 = vld [vmem:[%s2131_s9 + $0x30] ss:$8 sps:$4 sm:$0xff]  }
  0x7e   : > { %v1606_v13 = vld [vmem:[%s2131_s9 + $0x134] ss:$8 sps:$4 sm:$0xff]   ;;  %v1609_v15 = vld [vmem:[%s2131_s9 + $0x130] ss:$8 sps:$4 sm:$0xff]   ;;  %v1610_v16 = vld [vmem:[%s2131_s9 + $0x44] ss:$8 sps:$4 sm:$0xff]  }
  0x7f   : > { %853 = vmatpush1.bf16.msra.mxu1 %v1596_v6  ;;  %v1612_v17 = vld [vmem:[%s2131_s9 + $0x144] ss:$8 sps:$4 sm:$0xff]   ;;  %v1614_v18 = vld [vmem:[%s2131_s9 + $0x40] ss:$8 sps:$4 sm:$0xff]   ;;  %v1616_v20 = vld [vmem:[%s2131_s9 + $0x54] ss:$8 sps:$4 sm:$0xff]  }
  0x80   : > { %906 = vmatpush1.bf16.msra.mxu0 %v1597_v7  ;;  %854 = vmatprep.subr.bf16.mxu1 %v1598_v8  ;;  %v1615_v19 = vld [vmem:[%s2131_s9 + $0x140] ss:$8 sps:$4 sm:$0xff]   ;;  %v1618_v21 = vld [vmem:[%s2131_s9 + $0x154] ss:$8 sps:$4 sm:$0xff]   ;;  %v1620_v22 = vld [vmem:[%s2131_s9 + $0x50] ss:$8 sps:$4 sm:$0xff]  }
  0x81   : > { %907 = vmatprep.subr.bf16.mxu0 %v1600_v9  ;;  %v1621_v23 = vld [vmem:[%s2131_s9 + $0x150] ss:$8 sps:$4 sm:$0xff]   ;;  %v1622_v24 = vld [vmem:[%s2131_s9 + $0x64] ss:$8 sps:$4 sm:$0xff]   ;;  %v1626_v26 = vld [vmem:[%s2131_s9 + $0x60] ss:$8 sps:$4 sm:$0xff]  }
  0x82   : > { %v1624_v25 = vld [vmem:[%s2131_s9 + $0x164] ss:$8 sps:$4 sm:$0xff]   ;;  %v1627_v27 = vld [vmem:[%s2131_s9 + $0x160] ss:$8 sps:$4 sm:$0xff]   ;;  %v1628_v28 = vld [vmem:[%s2131_s9 + $0x74] ss:$8 sps:$4 sm:$0xff]  }
  0x83   : > { %855 = vmatpush1.bf16.msra.mxu1 %v1602_v10  ;;  %v1630_v29 = vld [vmem:[%s2131_s9 + $0x174] ss:$8 sps:$4 sm:$0xff]   ;;  %v1632_v30 = vld [vmem:[%s2131_s9 + $0x70] ss:$8 sps:$4 sm:$0xff]   ;;  %v1634_v32 = vld [vmem:[%s2131_s9 + $0x84] ss:$8 sps:$4 sm:$0xff]  }
  0x84   : > { %908 = vmatpush1.bf16.msra.mxu0 %v1603_v11  ;;  %856 = vmatprep.subr.bf16.mxu1 %v1604_v12  ;;  %v1633_v31 = vld [vmem:[%s2131_s9 + $0x170] ss:$8 sps:$4 sm:$0xff]   ;;  %v1636_v33 = vld [vmem:[%s2131_s9 + $0x184] ss:$8 sps:$4 sm:$0xff]   ;;  %v1638_v34 = vld [vmem:[%s2131_s9 + $0x80] ss:$8 sps:$4 sm:$0xff]  }
  0x85   : > { %909 = vmatprep.subr.bf16.mxu0 %v1606_v13  ;;  %v1639_v35 = vld [vmem:[%s2131_s9 + $0x180] ss:$8 sps:$4 sm:$0xff]   ;;  %v1640_v36 = vld [vmem:[%s2131_s9 + $0x94] ss:$8 sps:$4 sm:$0xff]   ;;  %v1644_v38 = vld [vmem:[%s2131_s9 + $0x90] ss:$8 sps:$4 sm:$0xff]  }
  0x86   : > { %v1642_v37 = vld [vmem:[%s2131_s9 + $0x194] ss:$8 sps:$4 sm:$0xff]   ;;  %v1645_v39 = vld [vmem:[%s2131_s9 + $0x190] ss:$8 sps:$4 sm:$0xff]   ;;  %v1646_v40 = vld [vmem:[%s2131_s9 + $0xa4] ss:$8 sps:$4 sm:$0xff]  }
  0x87   : > { %857 = vmatpush1.bf16.msra.mxu1 %v1608_v14  ;;  %v1648_v41 = vld [vmem:[%s2131_s9 + $0x1a4] ss:$8 sps:$4 sm:$0xff]   ;;  %v1650_v42 = vld [vmem:[%s2131_s9 + $0xa0] ss:$8 sps:$4 sm:$0xff]   ;;  %v1652_v44 = vld [vmem:[%s2131_s9 + $0xb4] ss:$8 sps:$4 sm:$0xff]  }
  0x88   : > { %910 = vmatpush1.bf16.msra.mxu0 %v1609_v15  ;;  %858 = vmatprep.subr.bf16.mxu1 %v1610_v16  ;;  %v1651_v43 = vld [vmem:[%s2131_s9 + $0x1a0] ss:$8 sps:$4 sm:$0xff]   ;;  %v1654_v45 = vld [vmem:[%s2131_s9 + $0x1b4] ss:$8 sps:$4 sm:$0xff]   ;;  %v1656_v46 = vld [vmem:[%s2131_s9 + $0xb0] ss:$8 sps:$4 sm:$0xff]  }
  0x89   : > { %911 = vmatprep.subr.bf16.mxu0 %v1612_v17  ;;  %v1657_v47 = vld [vmem:[%s2131_s9 + $0x1b0] ss:$8 sps:$4 sm:$0xff]   ;;  %v1658_v48 = vld [vmem:[%s2131_s9 + $0xc4] ss:$8 sps:$4 sm:$0xff]   ;;  %v1684_v49 = vld [vmem:[#allocation3 + $0x4] ss:$20 sps:$4 sm:$0xff]  }
  0x8a   : > { %v1660_v50 = vld [vmem:[%s2131_s9 + $0x1c4] ss:$8 sps:$4 sm:$0xff]   ;;  %v1687_v51 = vld [vmem:[#allocation3 + $0xc] ss:$20 sps:$4 sm:$0xff]   ;;  %882 = vmatprep.mubr.bf16.mxu1 %v1684_v49  ;;  %v1662_v52 = vld [vmem:[%s2131_s9 + $0xc0] ss:$8 sps:$4 sm:$0xff]  }
  0x8b   : > { %859 = vmatpush1.bf16.msra.mxu1 %v1614_v18  ;;  %v1663_v53 = vld [vmem:[%s2131_s9 + $0x1c0] ss:$8 sps:$4 sm:$0xff]   ;;  %935 = vmatprep.mubr.bf16.mxu0 %v1687_v51  ;;  %v1664_v54 = vld [vmem:[%s2131_s9 + $0xd4] ss:$8 sps:$4 sm:$0xff]   ;;  %v1668_v56 = vld [vmem:[%s2131_s9 + $0xd0] ss:$8 sps:$4 sm:$0xff]  }
  0x8c   : > { %912 = vmatpush1.bf16.msra.mxu0 %v1615_v19  ;;  %860 = vmatprep.subr.bf16.mxu1 %v1616_v20  ;;  %v1666_v55 = vld [vmem:[%s2131_s9 + $0x1d4] ss:$8 sps:$4 sm:$0xff]   ;;  %v1669_v57 = vld [vmem:[%s2131_s9 + $0x1d0] ss:$8 sps:$4 sm:$0xff]   ;;  %v1670_v58 = vld [vmem:[%s2131_s9 + $0xe4] ss:$8 sps:$4 sm:$0xff]  }
  0x8d   : > { %913 = vmatprep.subr.bf16.mxu0 %v1618_v21  ;;  %v1672_v59 = vld [vmem:[%s2131_s9 + $0x1e4] ss:$8 sps:$4 sm:$0xff]   ;;  %v1674_v60 = vld [vmem:[%s2131_s9 + $0xe0] ss:$8 sps:$4 sm:$0xff]   ;;  %v1676_v62 = vld [vmem:[%s2131_s9 + $0xf4] ss:$8 sps:$4 sm:$0xff]  }
  0x8e   : > { %v1675_v61 = vld [vmem:[%s2131_s9 + $0x1e0] ss:$8 sps:$4 sm:$0xff]   ;;  %v1678_v63 = vld [vmem:[%s2131_s9 + $0x1f4] ss:$8 sps:$4 sm:$0xff]   ;;  %v1680_v0 = vld [vmem:[%s2131_s9 + $0xf0] ss:$8 sps:$4 sm:$0xff]  }
  0x8f   : > { %861 = vmatpush1.bf16.msra.mxu1 %v1620_v22  ;;  %v1681_v1 = vld [vmem:[%s2131_s9 + $0x1f0] ss:$8 sps:$4 sm:$0xff]   ;;  %v1690_v2 = vld [vmem:[%s2131_s9 + $0x204] ss:$8 sps:$4 sm:$0xff]   ;;  %v1688_v5 = vld [vmem:[%s2131_s9 + $0x200] ss:$8 sps:$4 sm:$0xff]  }
  0x90   : > { %914 = vmatpush1.bf16.msra.mxu0 %v1621_v23  ;;  %862 = vmatprep.subr.bf16.mxu1 %v1622_v24  ;;  %v1682_v3 = vld [vmem:[#allocation3] ss:$20 sps:$4 sm:$0xff]   ;;  %v1685_v4 = vld [vmem:[#allocation3 + $0x8] ss:$20 sps:$4 sm:$0xff]   ;;  %v1693_v6 = vld [vmem:[%s2131_s9 + $0x214] ss:$8 sps:$4 sm:$0xff]  }
  0x91   : > { %915 = vmatprep.subr.bf16.mxu0 %v1624_v25  ;;  %v1703_v7 = vld [vmem:[#allocation3 + $0x2c] ss:$20 sps:$4 sm:$0xff]   ;;  %v1705_v8 = vld [vmem:[#allocation3 + $0x34] ss:$20 sps:$4 sm:$0xff]   ;;  %v1711_v12 = vld [vmem:[#allocation3 + $0x30] ss:$20 sps:$4 sm:$0xff]  }
  0x92   : > { %v1691_v9 = vld [vmem:[%s2131_s9 + $0x210] ss:$8 sps:$4 sm:$0xff]   ;;  %v1696_v10 = vld [vmem:[%s2131_s9 + $0x224] ss:$8 sps:$4 sm:$0xff]   ;;  %v1694_v13 = vld [vmem:[%s2131_s9 + $0x220] ss:$8 sps:$4 sm:$0xff]  }
  0x93   : > { %863 = vmatpush1.bf16.msra.mxu1 %v1626_v26  ;;  %v1710_v11 = vld [vmem:[#allocation3 + $0x28] ss:$20 sps:$4 sm:$0xff]   ;;  %v1699_v14 = vld [vmem:[%s2131_s9 + $0x234] ss:$8 sps:$4 sm:$0xff]   ;;  %v1908_v17 = vmov 0   ;;  %s2220_s30 = scalar_lea.vmem [#allocation8], %s1363_s5 }
  0x94   : > { %916 = vmatpush1.bf16.msra.mxu0 %v1627_v27  ;;  %864 = vmatprep.subr.bf16.mxu1 %v1628_v28  ;;  %v1697_v15 = vld [vmem:[%s2131_s9 + $0x230] ss:$8 sps:$4 sm:$0xff]   ;;  %v1702_v16 = vld [vmem:[%s2131_s9 + $0x244] ss:$8 sps:$4 sm:$0xff]   ;;  %v1700_v18 = vld [vmem:[%s2131_s9 + $0x240] ss:$8 sps:$4 sm:$0xff]  }
  0x95   : > { %917 = vmatprep.subr.bf16.mxu0 %v1630_v29  ;;  %v1709_v19 = vld [vmem:[%s2131_s9 + $0x254] ss:$8 sps:$4 sm:$0xff]   ;;  %v1707_v20 = vld [vmem:[%s2131_s9 + $0x250] ss:$8 sps:$4 sm:$0xff]   ;;  %v1714_v21 = vld [vmem:[%s2131_s9 + $0x264] ss:$8 sps:$4 sm:$0xff]  }
  0x96   : > { %v1712_v22 = vld [vmem:[%s2131_s9 + $0x260] ss:$8 sps:$4 sm:$0xff]   ;;  %v1717_v23 = vld [vmem:[%s2131_s9 + $0x274] ss:$8 sps:$4 sm:$0xff]   ;;  %v1715_v24 = vld [vmem:[%s2131_s9 + $0x270] ss:$8 sps:$4 sm:$0xff]  }
  0x97   : > { %865 = vmatpush1.bf16.msra.mxu1 %v1632_v30  ;;  %v1718_v25 = vld [vmem:[#allocation3 + $0x10] ss:$20 sps:$4 sm:$0xff]   ;;  %v1719_v26 = vld [vmem:[#allocation3 + $0x38] ss:$20 sps:$4 sm:$0xff]   ;;  %s1364_s7 = sshll.u32 %s2128_s26, 6  ;;  %s1464_s8 = sshll.u32 %s1890_s15, 8 }
  0x98   : > { %918 = vmatpush1.bf16.msra.mxu0 %v1633_v31  ;;  %866 = vmatprep.subr.bf16.mxu1 %v1634_v32  ;;  %s277_s25 = scalar_lea.vmem [#allocation9], %s1364_s7  ;;  %s2238_s23 = scalar_lea.hbm %s2292_s3, %s1464_s8 }
  0x99   : > { %919 = vmatprep.subr.bf16.mxu0 %v1636_v33  ;;  %s1224_s27 = sshll.u32 %s277_s25, 4  ;;  %s1208_s15 = scalar_lea.sflag [#allocation5], %s2128_s26  ;;  %s2240_s27 = int_to_ptr.vmem [resolvable:$true] %s1224_s27 }
  0x9a   : > { %s1812_s11 = scalar_lea.vmem %s2240_s27, 1024  ;;  %p2317_p6 = scmp.ne.s32.totalorder %s2306_s28, 0 }
  0x9b   : > { %867 = vmatpush1.bf16.msra.mxu1 %v1638_v34  ;;  %p1813_p4 = scmp.ne.s32.totalorder %s2240_s27, %s1812_s11  ;;  %s1909_s10 = smov [#allocation9]  }
  0x9c   : > { %920 = vmatpush1.bf16.msra.mxu0 %v1639_v35  ;;  %868 = vmatprep.subr.bf16.mxu1 %v1640_v36  ;;  %s1816_s20 = sshll.u32 %s1909_s10, 4  ;;  %s1817_s20 = int_to_ptr.vmem [resolvable:$false] %s1816_s20 }
  0x9d   : > { %921 = vmatprep.subr.bf16.mxu0 %v1642_v37  ;;  %p1814_p1 = pnand %p1813_p4, %p2317_p6  ;;  %s1818_s1 = scalar_lea.vmem %s1817_s20, 2048 }
  0x9e   : > { %p1819_p0 = scmp.lt.s32.totalorder %s2240_s27, %s1817_s20  ;;  %p1820_p9 = scmp.lt.s32.totalorder %s1818_s1, %s1812_s11 }
  0x9f   : > { %869 = vmatpush1.bf16.msra.mxu1 %v1644_v38  ;;  %p1815_p12 = pneg %p1814_p1 }
  0xa0   : > { %922 = vmatpush1.bf16.msra.mxu0 %v1645_v39  ;;  %870 = vmatprep.subr.bf16.mxu1 %v1646_v40  ;;  %p1821_p5 = por %p1820_p9, %p1819_p0 }
  0xa1   : > { %923 = vmatprep.subr.bf16.mxu0 %v1648_v41 }
  0xa2   : > { %p1822_p8 = pnand %p1821_p5, %p1815_p12 }
  0xa3   : > { %871 = vmatpush1.bf16.msra.mxu1 %v1650_v42 }
  0xa4   : > { %924 = vmatpush1.bf16.msra.mxu0 %v1651_v43  ;;  %872 = vmatprep.subr.bf16.mxu1 %v1652_v44  ;;  %v1038_v43 = vlaneseq }
  0xa5   : > { %925 = vmatprep.subr.bf16.mxu0 %v1654_v45 }
  0xa6   : > { %v1039_v44 = vshrl.u32 %v1038_v43, 7 }
  0xa7   : > { %873 = vmatpush1.bf16.msra.mxu1 %v1656_v46  ;;  %v1036_v46 = vld [vmem:[%s2220_s30] ss:$8 sm:$0x3] }
  0xa8   : > { %926 = vmatpush1.bf16.msra.mxu0 %v1657_v47  ;;  %874 = vmatprep.subr.bf16.mxu1 %v1658_v48  ;;  %v2218_v45 = vsub.s32 0, %v1039_v44  ;;  %v2223_v47 = vsub.s32 1, %v1039_v44 }
  0xa9   : > { %927 = vmatprep.subr.bf16.mxu0 %v1660_v50 }
  0xaa   : > { %v1041_v51 = vrot.slane %v1036_v46, %v2218_v45 }
  0xab   : > { %875 = vmatpush1.bf16.msra.mxu1 %v1662_v52 }
  0xac   : > { %928 = vmatpush1.bf16.msra.mxu0 %v1663_v53  ;;  %876 = vmatprep.subr.bf16.mxu1 %v1664_v54 }
  0xad   : > { %929 = vmatprep.subr.bf16.mxu0 %v1666_v55 }
  0xaf   : > { %877 = vmatpush1.bf16.msra.mxu1 %v1668_v56  ;;  %v1045_v56 = vrot.slane %v1036_v46, %v2223_v47 }
  0xb0   : > { %930 = vmatpush1.bf16.msra.mxu0 %v1669_v57  ;;  %878 = vmatprep.subr.bf16.mxu1 %v1670_v58 }
  0xb1   : > { %931 = vmatprep.subr.bf16.mxu0 %v1672_v59 }
  0xb3   : > { %879 = vmatpush1.bf16.msra.mxu1 %v1674_v60 }
  0xb4   : > { %932 = vmatpush1.bf16.msra.mxu0 %v1675_v61  ;;  %880 = vmatprep.subr.bf16.mxu1 %v1676_v62 }
  0xb5   : > { %933 = vmatprep.subr.bf16.mxu0 %v1678_v63 }
  0xb7   : > { %881 = vmatpush1.bf16.msra.mxu1 %v1680_v0 }
  0xb8   : > { %934 = vmatpush1.bf16.msra.mxu0 %v1681_v1  ;;  %1465 = vmatprep.subr.bf16.mxu1 %v1690_v2 }
  0xb9   : > { %956 = vmatprep.subr.bf16.mxu0 %v1690_v2 }
  0xba   : > { %883 = vmatmul.mubr.bf16.vlgmr.msra.gmra.mrb[0].mxu1 %v1682_v3 }
  0xbb   : > { %936 = vmatmul.mubr.bf16.vlgmr.msra.gmra.mrb[0].mxu0 %v1685_v4  ;;  %1473 = vmatpush1.bf16.msra.mxu1 %v1688_v5 }
  0xbc   : > { %957 = vmatpush1.bf16.msra.mxu0 %v1688_v5  ;;  %1466 = vmatprep.subr.bf16.mxu1 %v1693_v6 }
  0xbd   : > { %958 = vmatprep.subr.bf16.mxu0 %v1693_v6  ;;  %892 = vmatprep.mubr.bf16.mxu1 %v1703_v7 }
  0xbe   : > { %945 = vmatprep.mubr.bf16.mxu0 %v1705_v8 }
  0xbf   : > { %1474 = vmatpush1.bf16.msra.mxu1 %v1691_v9 }
  0xc0   : > { %959 = vmatpush1.bf16.msra.mxu0 %v1691_v9  ;;  %1467 = vmatprep.subr.bf16.mxu1 %v1696_v10 }
  0xc1   : > { %960 = vmatprep.subr.bf16.mxu0 %v1696_v10 }
  0xc2   : > { %893 = vmatmul.mubr.bf16.gmra.mrb[4].mxu1 %v1710_v11 }
  0xc3   : > { %946 = vmatmul.mubr.bf16.gmra.mrb[4].mxu0 %v1711_v12  ;;  %1475 = vmatpush1.bf16.msra.mxu1 %v1694_v13 }
  0xc4   : > { %961 = vmatpush1.bf16.msra.mxu0 %v1694_v13  ;;  %1468 = vmatprep.subr.bf16.mxu1 %v1699_v14 }
  0xc5   : > { %962 = vmatprep.subr.bf16.mxu0 %v1699_v14  ;;  %988 = vmatprep.mubr.bf16.mxu0 %v1908_v17 }
  0xc6   : > { %998 = vmatprep.mubr.bf16.mxu1 %v1908_v17 }
  0xc7   : > { %1476 = vmatpush1.bf16.msra.mxu1 %v1697_v15 }
  0xc8   : > { %963 = vmatpush1.bf16.msra.mxu0 %v1697_v15  ;;  %1469 = vmatprep.subr.bf16.mxu1 %v1702_v16 }
  0xc9   : > { %964 = vmatprep.subr.bf16.mxu0 %v1702_v16 }
  0xcb   : > { %1477 = vmatpush1.bf16.msra.mxu1 %v1700_v18 }
  0xcc   : > { %965 = vmatpush1.bf16.msra.mxu0 %v1700_v18  ;;  %1470 = vmatprep.subr.bf16.mxu1 %v1709_v19 }
  0xcd   : > { %966 = vmatprep.subr.bf16.mxu0 %v1709_v19 }
  0xcf   : > { %1478 = vmatpush1.bf16.msra.mxu1 %v1707_v20 }
  0xd0   : > { %967 = vmatpush1.bf16.msra.mxu0 %v1707_v20  ;;  %1471 = vmatprep.subr.bf16.mxu1 %v1714_v21 }
  0xd1   : > { %968 = vmatprep.subr.bf16.mxu0 %v1714_v21 }
  0xd3   : > { %1479 = vmatpush1.bf16.msra.mxu1 %v1712_v22 }
  0xd4   : > { %969 = vmatpush1.bf16.msra.mxu0 %v1712_v22  ;;  %1472 = vmatprep.subr.bf16.mxu1 %v1717_v23 }
  0xd5   : > { %970 = vmatprep.subr.bf16.mxu0 %v1717_v23 }
  0xd7   : > { %1480 = vmatpush1.bf16.msra.mxu1 %v1715_v24 }
  0xd8   : > { %971 = vmatpush1.bf16.msra.mxu0 %v1715_v24 }
  0xda   : > { %999 = vmatmul.mubr.bf16.vlgmr.msra.gmra.mrb[8].mxu1 %v1719_v26 }
  0xdb   : > { %989 = vmatmul.mubr.bf16.vlgmr.msra.gmra.mrb[0].mxu0 %v1718_v25 }
 0x18d   : > { %v884_v27 = vpop.f32.mrb[0].mxu1 }
 0x18e   : > { %v886_v28 = vpop.f32.mrb[1].mxu1 }
 0x18f   : > { %v888_v29 = vpop.f32.mrb[2].mxu1 }
 0x190   : > { %v890_v30 = vpop.f32.mrb[3].mxu1 }
 0x195   : > { %v894_v31 = vpop.f32.mrb[4].mxu1 }
 0x196   : > { %v947_v32 = vpop.f32.mrb[4].mxu0  ;;  %v896_v34 = vpop.f32.mrb[5].mxu1 }
 0x197   : > { %v948_v33 = vadd.f32 %v947_v32, %v894_v31  ;;  %v949_v35 = vpop.f32.mrb[5].mxu0  ;;  %v898_v37 = vpop.f32.mrb[6].mxu1 }
 0x198   : > { %v950_v36 = vadd.f32 %v949_v35, %v896_v34  ;;  %v951_v38 = vpop.f32.mrb[6].mxu0  ;;  %v900_v40 = vpop.f32.mrb[7].mxu1 }
 0x199   : > { %v952_v39 = vadd.f32 %v951_v38, %v898_v37  ;;  %v953_v41 = vpop.f32.mrb[7].mxu0 }
 0x19a   : > { %v954_v42 = vadd.f32 %v953_v41, %v900_v40 }
 0x1ad   : > { %v1000_v49 = vpop.f32.mrb[8].mxu1 }
 0x1ae   : > { %v990_v48 = vpop.f32.mrb[0].mxu0  ;;  %v1001_v52 = vadd.f32 %v1000_v49, %v948_v33  ;;  %v1002_v54 = vpop.f32.mrb[9].mxu1 }
 0x1af   : > { %v1481_v50 = vadd.f32 %v990_v48, %v884_v27  ;;  %v992_v53 = vpop.f32.mrb[1].mxu0  ;;  %v1003_v57 = vadd.f32 %v1002_v54, %v950_v36  ;;  %v1004_v59 = vpop.f32.mrb[10].mxu1 }
 0x1b0   : > { %v1482_v55 = vadd.f32 %v992_v53, %v886_v28  ;;  %v994_v58 = vpop.f32.mrb[2].mxu0  ;;  %v1005_v61 = vadd.f32 %v1004_v59, %v952_v39  ;;  %v1006_v63 = vpop.f32.mrb[11].mxu1  ;;  %v1052_v6 = vadd.f32 %v1041_v51, %v1001_v52 }
 0x1b1   : > { %v1483_v60 = vadd.f32 %v994_v58, %v888_v29  ;;  %v996_v62 = vpop.f32.mrb[3].mxu0  ;;  %v1007_v1 = vadd.f32 %v1006_v63, %v954_v42  ;;  %v1048_v2 = vadd.f32 %v1481_v50, %v1041_v51  ;;  %v1053_v8 = vadd.f32 %v1045_v56, %v1003_v57 }
 0x1b2   : > { %v1484_v0 = vadd.f32 %v996_v62, %v890_v30  ;;  %v1049_v4 = vadd.f32 %v1482_v55, %v1045_v56  ;;  %v1054_v10 = vadd.f32 %v1041_v51, %v1005_v61 }
 0x1b3   : > { %v1050_v3 = vadd.f32 %v1483_v60, %v1041_v51  ;;  %v1055_v12 = vadd.f32 %v1045_v56, %v1007_v1 }
 0x1b4   : > { %v1051_v5 = vadd.f32 %v1484_v0, %v1045_v56 }
 0x1b5   : > { %v1073_v7 = vadd.f32 %v1050_v3, %v1048_v2 }
 0x1b6   : > { %v1082_v9 = vadd.f32 %v1051_v5, %v1049_v4 }
 0x1b7   : > { %v1074_v11 = vadd.f32 %v1073_v7, %v1052_v6  ;;  %v1456_v7 = vld [vmem:[%s2220_s30 + $0x2] ss:$8 sm:$0x3] }
 0x1b8   : > { %v1083_v13 = vadd.f32 %v1082_v9, %v1053_v8 }
 0x1b9   : > { %v1075_v14 = vadd.f32 %v1074_v11, %v1054_v10 }
 0x1ba   : > { %v1084_v15 = vadd.f32 %v1083_v13, %v1055_v12 }
 0x1bb   : > { %v1076_v16 = vrot.slane %v1075_v14, 4 }
 0x1bc   : > { %v1085_v17 = vrot.slane %v1084_v15, 4 }
 0x1bd   : > { %v1077_v18 = vadd.f32 %v1076_v16, %v1075_v14 }
 0x1be   : > { %v1086_v19 = vadd.f32 %v1085_v17, %v1084_v15 }
 0x1bf   : > { %v1078_v20 = vrot.slane %v1077_v18, 2 }
 0x1c0   : > { %v1087_v21 = vrot.slane %v1086_v19, 2 }
 0x1c1   : > { %v1079_v22 = vadd.f32 %v1078_v20, %v1077_v18 }
 0x1c2   : > { %v1088_v23 = vadd.f32 %v1087_v21, %v1086_v19 }
 0x1c3   : > { %v1080_v24 = vrot.slane %v1079_v22, 1 }
 0x1c4   : > { %v1089_v25 = vrot.slane %v1088_v23, 1 }
 0x1c5   : > { %v1081_v26 = vadd.f32 %v1080_v24, %v1079_v22 }
 0x1c6   : > { %v1090_v27 = vadd.f32 %v1089_v25, %v1088_v23 }
 0x1c7   : > { %v1091_v28 = vmul.f32 0.03125, %v1081_v26 }
 0x1c8   : > { %v1092_v29 = vmul.f32 0.03125, %v1090_v27 }
 0x1c9   : > { %v1093_v30 = vsub.f32 %v1048_v2, %v1091_v28  ;;  %v1095_v31 = vsub.f32 %v1050_v3, %v1091_v28  ;;  %v1097_v32 = vsub.f32 %v1052_v6, %v1091_v28  ;;  %v1099_v33 = vsub.f32 %v1054_v10, %v1091_v28  ;;  %v1455_v6 = vld [vmem:[%s2220_s30 + $0x1] ss:$8 sm:$0x3] }
 0x1ca   : > { %v1094_v34 = vsub.f32 %v1049_v4, %v1092_v29  ;;  %v1096_v35 = vsub.f32 %v1051_v5, %v1092_v29  ;;  %v1098_v36 = vsub.f32 %v1053_v8, %v1092_v29  ;;  %v1100_v37 = vsub.f32 %v1055_v12, %v1092_v29 }
 0x1cb   : > { %v1109_v38 = vmul.f32 %v1093_v30, %v1093_v30  ;;  %v1111_v39 = vmul.f32 %v1095_v31, %v1095_v31  ;;  %v1113_v42 = vmul.f32 %v1097_v32, %v1097_v32  ;;  %v1115_v48 = vmul.f32 %v1099_v33, %v1099_v33 }
 0x1cc   : > { %v1110_v40 = vmul.f32 %v1094_v34, %v1094_v34  ;;  %v1112_v41 = vmul.f32 %v1096_v35, %v1096_v35  ;;  %v1114_v44 = vmul.f32 %v1098_v36, %v1098_v36  ;;  %v1116_v50 = vmul.f32 %v1100_v37, %v1100_v37 }
 0x1cd   : > { %v1117_v43 = vadd.f32 %v1111_v39, %v1109_v38  ;;  %v1155_v8 = vrot.slane %v1455_v6, %v2218_v45  ;;  %v1176_v10 = vrot.slane %v1456_v7, %v2218_v45  ;;  %v1159_v11 = vrot.slane %v1455_v6, %v2223_v47 }
 0x1ce   : > { %v1126_v46 = vadd.f32 %v1112_v41, %v1110_v40  ;;  %v1180_v12 = vrot.slane %v1456_v7, %v2223_v47 }
 0x1cf   : > { %v1118_v49 = vadd.f32 %v1117_v43, %v1113_v42 }
 0x1d0   : > { %v1127_v51 = vadd.f32 %v1126_v46, %v1114_v44 }
 0x1d1   : > { %v1119_v52 = vadd.f32 %v1118_v49, %v1115_v48 }
 0x1d2   : > { %v1128_v53 = vadd.f32 %v1127_v51, %v1116_v50 }
 0x1d3   : > { %v1120_v54 = vrot.slane %v1119_v52, 4 }
 0x1d4   : > { %v1129_v55 = vrot.slane %v1128_v53, 4 }
 0x1d5   : > { %v1121_v56 = vadd.f32 %v1120_v54, %v1119_v52 }
 0x1d6   : > { %v1130_v57 = vadd.f32 %v1129_v55, %v1128_v53 }
 0x1d7   : > { %v1122_v58 = vrot.slane %v1121_v56, 2 }
 0x1d8   : > { %v1131_v59 = vrot.slane %v1130_v57, 2 }
 0x1d9   : > { %v1123_v60 = vadd.f32 %v1122_v58, %v1121_v56 }
 0x1da   : > { %v1132_v61 = vadd.f32 %v1131_v59, %v1130_v57 }
 0x1db   : > { %v1124_v62 = vrot.slane %v1123_v60, 1 }
 0x1dc   : > { %v1133_v63 = vrot.slane %v1132_v61, 1 }
 0x1dd   : > { %v1125_v0 = vadd.f32 %v1124_v62, %v1123_v60 }
 0x1de   : > { %v1134_v1 = vadd.f32 %v1133_v63, %v1132_v61 }
 0x1df   : > { %v1135_v2 = vmul.f32 0.03125, %v1125_v0 }
 0x1e0   : > { %v1136_v3 = vmul.f32 0.03125, %v1134_v1 }
 0x1e1   : > { %v1137_v4 = vadd.f32 1e-05, %v1135_v2 }
 0x1e2   : > { %v1138_v5 = vadd.f32 1e-05, %v1136_v3 }
 0x1e3   : > { %1720 = vrsqrt.f32 %v1137_v4 }
 0x1e4   : > { %1722 = vrsqrt.f32 %v1138_v5 }
 0x1ed   : > { %v1721_v9 = vpop.eup %1720 }
 0x1ee   : > { %v1723_v13 = vpop.eup %1722  ;;  %v1141_v14 = vmul.f32 %v1721_v9, %v1093_v30  ;;  %v1143_v15 = vmul.f32 %v1721_v9, %v1095_v31  ;;  %v1145_v16 = vmul.f32 %v1721_v9, %v1097_v32  ;;  %v1147_v17 = vmul.f32 %v1721_v9, %v1099_v33 }
 0x1ef   : > { %v1142_v18 = vmul.f32 %v1723_v13, %v1094_v34  ;;  %v1144_v19 = vmul.f32 %v1723_v13, %v1096_v35  ;;  %v1146_v20 = vmul.f32 %v1723_v13, %v1098_v36  ;;  %v1148_v21 = vmul.f32 %v1723_v13, %v1100_v37 }
 0x1f0   : > { %v1162_v22 = vmul.f32 %v1155_v8, %v1141_v14  ;;  %v1164_v23 = vmul.f32 %v1155_v8, %v1143_v15  ;;  %v1166_v24 = vmul.f32 %v1155_v8, %v1145_v16  ;;  %v1168_v25 = vmul.f32 %v1155_v8, %v1147_v17 }
 0x1f1   : > { %v1163_v45 = vmul.f32 %v1159_v11, %v1142_v18  ;;  %v1165_v26 = vmul.f32 %v1159_v11, %v1144_v19  ;;  %v1167_v27 = vmul.f32 %v1159_v11, %v1146_v20  ;;  %v1169_v28 = vmul.f32 %v1159_v11, %v1148_v21 }
 0x1f2   : > { %v1183_v47 = vadd.f32 %v1176_v10, %v1162_v22  ;;  %v1185_v29 = vadd.f32 %v1176_v10, %v1164_v23  ;;  %v1187_v30 = vadd.f32 %v1176_v10, %v1166_v24  ;;  %v1189_v31 = vadd.f32 %v1176_v10, %v1168_v25 }
 0x1f3   : > { %v1184_v32 = vadd.f32 %v1180_v12, %v1163_v45  ;;  %v1186_v33 = vadd.f32 %v1180_v12, %v1165_v26  ;;  %v1188_v34 = vadd.f32 %v1180_v12, %v1167_v27  ;;  %v1190_v35 = vadd.f32 %v1180_v12, %v1169_v28 }
 0x1f4   : > { %v1191_v36 = vmax.f32 %v1183_v47, 0.0  ;;  %v1193_v37 = vmax.f32 %v1185_v29, 0.0  ;;  %v1195_v38 = vmax.f32 %v1187_v30, 0.0  ;;  %v1197_v39 = vmax.f32 %v1189_v31, 0.0 }
 0x1f5   : > { %v1192_v40 = vmax.f32 %v1184_v32, 0.0  ;;  %v1194_v41 = vmax.f32 %v1186_v33, 0.0  ;;  %v1196_v42 = vmax.f32 %v1188_v34, 0.0  ;;  %v1198_v43 = vmax.f32 %v1190_v35, 0.0 }
 0x1f6   : > { %1199 = vst [vmem:[%s277_s25] sm:$0xff] %v1191_v36  ;;  %1201 = vst [vmem:[%s277_s25 + $0x10] sm:$0xff] %v1193_v37 }
 0x1f7   : > { %1203 = vst [vmem:[%s277_s25 + $0x20] sm:$0xff] %v1195_v38  ;;  %1205 = vst [vmem:[%s277_s25 + $0x30] sm:$0xff] %v1197_v39 }
 0x1f8   : > { %1200 = vst [vmem:[%s277_s25 + $0x8] sm:$0xff] %v1192_v40  ;;  %1202 = vst [vmem:[%s277_s25 + $0x18] sm:$0xff] %v1194_v41 }
 0x1f9   : > { %1204 = vst [vmem:[%s277_s25 + $0x28] sm:$0xff] %v1196_v42  ;;  %1206 = vst [vmem:[%s277_s25 + $0x38] sm:$0xff] %v1198_v43 }
 0x1fa   : > { %1825 = shalt.err (!%p1822_p8)
}
 0x1fb   : > { %s1826_s18 = scalar_lea.hbm %s2238_s23, 1024  ;;  %s1830_s6 = scalar_lea.hbm %s2292_s3, 2048 }
 0x1fc   : > { %p1827_p10 = scmp.ne.s32.totalorder %s2238_s23, %s1826_s18  ;;  %p1831_p3 = scmp.lt.u32.totalorder %s2238_s23, %s2292_s3 }
 0x1fd   : > { %p1832_p2 = scmp.lt.u32.totalorder %s1830_s6, %s1826_s18  ;;  %p1834_p4 = scmp.lt.u32.totalorder %s1826_s18, %s2238_s23 }
 0x1fe   : > { %p1828_p13 = pnand %p1827_p10, %p2317_p6 }
 0x1ff   : > { %p1833_p11 = por %p1832_p2, %p1831_p3 }
 0x200   : > { %p1829_p7 = pneg %p1828_p13 }
 0x201   : > { %p1835_p1 = por %p1834_p4, %p1833_p11 }
 0x203   : > { %p1836_p12 = pnand %p1835_p1, %p1829_p7 }
 0x205   : > { %1839 = shalt.err (!%p1836_p12)
}
 0x206   : > { %s1910_s30 = smov 256   ;;  %s1911_s7 = smov 512  }
 0x207   : > { %s1912_s8 = smov 16  }
 0x208   : > { %1507 = dma.vmem_to_hbm [thread:$0]  (%p2317_p6), %s2240_s27, 1024, %s2238_s23, %s1208_s15, %s1910_s30, %s1911_s7, %s1912_s8  }
 0x209 PF: > { %s1239_s25 = sand.u32 1, %s1878_s12   ;;  %p2318_p0 = scmp.ne.s32.totalorder %s2307_s4, 0 }
 0x20a   : > { %p2319_p9 = scmp.ge.s32.totalorder %s1898_s17, 2  ;;  %s1240_s22 = scalar_lea.sflag [#allocation5], %s1239_s25 }
 0x20c   : > { %p1521_p5 = pnand %p2319_p9, %p2318_p0 }
 0x20e   : > { %1873 = dma.done.wait (!%p1521_p5), %s1240_s22, 1024  }
 0x20f   : > { %1875 = vsyncadd (!%p1521_p5), %s1240_s22, 4294966272  ;;  %s20_s17 = sadd.s32 1, %s1898_s17   ;;  %s2320_s28 = sld [smem:[#allocation13_spill]] }
 0x210   : > { %p17_p8 = scmp.ge.s32.totalorder %s20_s17, 4   ;;  %s2321_s12 = smov %s1882_s13 }
 0x211   : > { %s2322_s13 = smov %s1886_s14  ;;  %s2323_s14 = smov %s1981_s24 }
 0x212   : > { %s2324_s15 = smov %s1894_s16  ;;  %19 = sbr.rel (!%p17_p8) target bundleno = 9 (0x9), region = 104 }
 0x215   : > { %s2325_s16 = smov %s2320_s28 }
 0x219   :  { %1245 = vsyncpa [#allocation4], 1 }
 0x21a   :  { %1247 = vsyncpa [#allocation4 + $0x1], 1 }
 0x21b   :  { %1248 = vsyncpa [#allocation7], 1 }
 0x21c   :  { %1250 = vsyncpa [#allocation7 + $0x1], 1 }
 0x21d   :  { %1251 = vsyncpa [#allocation5], 1 }
 0x21e   :  { %1253 = vsyncpa [#allocation5 + $0x1], 1 }

// kernel: up_dense_1_softmax_forward.11
= control target key start
LH: loop header
LB: loop body
LE: loop exit
PB: predicated region body
PF: predicated region fallthrough
CT: control target
= control target key end

     0   :  { %s3087_s0 = inlined_call_operand.hbm [shape: bf16[32,1152], index: 0, kind: input, shape index: {}]   ;;  %s3088_s1 = inlined_call_operand.hbm [shape: bf16[1152,512], index: 1, kind: input, shape index: {}]   ;;  %s3089_s2 = inlined_call_operand.hbm [shape: f32[8,512], index: 2, kind: input, shape index: {}]   ;;  %s3090_s3 = inlined_call_operand.hbm [shape: f32[32,512], index: 3, kind: output, shape index: {}]  }
   0x1   :  { %3099 = sst [smem:[#allocation14_spill]] %s3088_s1 }
   0x2   :  { %8 = vsyncpa [#allocation4], 0 }
   0x3   :  { %9 = vsyncpa [#allocation7], 0 }
   0x4   :  { %11 = vsyncpa [#allocation7 + $0x1], 0 }
   0x5   :  { %12 = vsyncpa [#allocation5], 0 }
   0x6   :  { %14 = vsyncpa [#allocation5 + $0x1], 0  ;;  %s2667_s12 = smov 0   ;;  %s2669_s13 = smov 0  }
   0x7   :  { %s2671_s14 = smov 0   ;;  %s2673_s15 = smov 0  }
   0x8   :  { %s2675_s16 = smov 0   ;;  %s2677_s17 = smov 0  }
   0x9 LB: > { %s35_s18 = sadd.s32 1, %s2628_s16  ;;  %s76_s19 = sadd.s32 1, %s2620_s14  ;;  %s2632_s17 = sphi %s2677_s17, %s20_s17   ;;  %s2628_s16 = sphi %s2675_s16, %s3123_s16   ;;  %s2624_s15 = sphi %s2673_s15, %s3122_s15   ;;  %s2620_s14 = sphi %s2671_s14, %s3121_s14   ;;  %s2616_s13 = sphi %s2669_s13, %s3120_s13   ;;  %s2612_s12 = sphi %s2667_s12, %s3119_s12  }
   0xa   : > { %p37_p0 = scmp.ge.s32.totalorder %s35_s18, 2  ;;  %p83_p1 = scmp.ne.s32.totalorder %s2620_s14, %s2616_s13 }
   0xb   : > { %p84_p2 = scmp.eq.s32.totalorder %s2632_s17, 0  ;;  %p2151_p5 = scmp.lt.s32.totalorder %s2632_s17, 2 }
   0xc   : > { %s3125_s18 = smov (%p37_p0, %s35_s18), 0  ;;  %s186_s21 = sand.u32 1, %s2632_s17  }
   0xd   : > { %3100 = sst [smem:[#allocation13_spill]] %s3125_s18  ;;  %p85_p4 = por %p84_p2, %p83_p1 }
   0xe   : > { %s72_s20 = ssub.s32 %s2628_s16, %s3125_s18  ;;  %s188_s22 = sand.u32 1, %s2620_s14  }
   0xf   : > { %p74_p6 = scmp.eq.s32.totalorder %s72_s20, 0  ;;  %s2072_s23 = sshll.u32 %s2628_s16, 7 }
  0x10   : > { %s2123_s25 = smul.u32 1152, %s188_s22  ;;  %s3101_s1 = sld [smem:[#allocation14_spill]] }
  0x11   : > { %s2715_s24 = scalar_select %p74_p6, %s2620_s14, %s76_s19  }
  0x12   : > { %p2724_p7 = pnand %p2151_p5, %p85_p4  ;;  %s190_s30 = scalar_lea.vmem [#allocation6], %s2123_s25 }
  0x13   : > { %s200_s4 = sshll.u32 %s190_s30, 4  ;;  %s2730_s5 = scalar_lea.sflag [#allocation7], %s186_s21  ;;  %s2728_s4 = int_to_ptr.vmem [resolvable:$true] %s200_s4 }
  0x14   : > { %s3102_s29 = scalar_select %p2724_p7, 1, 0 }
  0x15   : > { %p3093_p9 = pneg %p2724_p7 }
  0x16   : > { %s2722_s28 = scalar_lea.hbm %s3101_s1, %s2072_s23  ;;  %s2463_s9 = scalar_lea.hbm %s3101_s1, 36864 }
  0x17   : > { %s2458_s6 = scalar_lea.hbm %s2722_s28, 18432  ;;  %p2464_p12 = scmp.lt.u32.totalorder %s2722_s28, %s3101_s1 }
  0x18   : > { %p2459_p8 = scmp.ne.s32.totalorder %s2722_s28, %s2458_s6  ;;  %p2465_p13 = scmp.lt.u32.totalorder %s2463_s9, %s2458_s6 }
  0x19   : > { %p2467_p2 = scmp.lt.u32.totalorder %s2458_s6, %s2722_s28 }
  0x1a   : > { %p2461_p10 = pnand %p3093_p9, %p2459_p8  ;;  %p2466_p0 = por %p2465_p13, %p2464_p12 }
  0x1c   : > { %p2462_p11 = pneg %p2461_p10  ;;  %p2468_p4 = por %p2467_p2, %p2466_p0 }
  0x1e   : > { %p2469_p5 = pnand %p2468_p4, %p2462_p11 }
  0x20   : > { %2472 = shalt.err (!%p2469_p5)
}
  0x21   : > { %s2473_s19 = scalar_lea.vmem %s2728_s4, 18432  ;;  %s2634_s20 = smov [#allocation6]  }
  0x22   : > { %p2474_p6 = scmp.ne.s32.totalorder %s2728_s4, %s2473_s19  ;;  %s2478_s21 = sshll.u32 %s2634_s20, 4  ;;  %s2479_s21 = int_to_ptr.vmem [resolvable:$false] %s2478_s21 }
  0x23   : > { %s2480_s23 = scalar_lea.vmem %s2479_s21, 36864  ;;  %p2481_p3 = scmp.lt.s32.totalorder %s2728_s4, %s2479_s21 }
  0x24   : > { %p2476_p8 = pnand %p2474_p6, %p3093_p9  ;;  %p2482_p12 = scmp.lt.s32.totalorder %s2480_s23, %s2473_s19 }
  0x26   : > { %p2477_p10 = pneg %p2476_p8  ;;  %p2483_p13 = por %p2482_p12, %p2481_p3 }
  0x28   : > { %p2484_p0 = pnand %p2483_p13, %p2477_p10 }
  0x2a   : > { %2487 = shalt.err (!%p2484_p0)
}
  0x2b   : > { %s2635_s25 = smov 256   ;;  %s2636_s26 = smov 128  }
  0x2c   : > { %s2637_s27 = smov 8   ;;  %s2759_s30 = sadd.s32 4294967295, %s2632_s17  }
  0x2d   : > { %2142 = dma.hbm_to_vmem [thread:$0]  (!%p2724_p7), %s2722_s28, 18432, %s2728_s4, %s2730_s5, %s2635_s25, %s2636_s26, %s2637_s27  }
  0x2e   : > { %s1890_s6 = sadd.s32 4294967294, %s2632_s17   ;;  %p89_p3 = scmp.ne.s32.totalorder %s2616_s13, %s2612_s12 }
  0x2f   : > { %p3092_p11 = scmp.eq.s32.totalorder %s2759_s30, 0  ;;  %p141_p2 = scmp.eq.s32.totalorder %s2759_s30, 1 }
  0x30   : > { %p147_p4 = scmp.eq.s32.totalorder %s1890_s6, 1  ;;  %p1891_p6 = scmp.ge.s32.totalorder %s2632_s17, 1 }
  0x31   : > { %p2768_p5 = por %p3092_p11, %p89_p3  ;;  %p2776_p8 = por %p141_p2, %p83_p1 }
  0x32   : > { %p2780_p10 = por %p147_p4, %p89_p3  ;;  %p154_p12 = scmp.lt.s32.totalorder %s2632_s17, 3 }
  0x33   : > { %s3103_s7 = scalar_select %p2768_p5, 1, 0 }
  0x34   : > { %s3104_s28 = scalar_select %p2776_p8, 1, 0 }
  0x35   : > { %s3105_s4 = scalar_select %p2780_p10, 1, 0 }
  0x36   : > { %p2785_p13 = pnand %p1891_p6, %p154_p12  ;;  %s2638_s9 = smov [#allocation3]  }
  0x37   : > { %s172_s10 = sshll.u32 %s2638_s9, 4  ;;  %s1896_s11 = sshll.u32 %s188_s22, 4  ;;  %s2789_s10 = int_to_ptr.vmem [resolvable:$true] %s172_s10 }
  0x38   : > { %s3106_s8 = scalar_select %p2785_p13, 1, 0 }
  0x39   : > { %p2135_p0 = pneg %p2785_p13  ;;  %s2073_s19 = sshll.u32 %s2628_s16, 8 }
  0x3a   : > { %s2805_s25 = scalar_lea.hbm %s3089_s2, %s2073_s19  ;;  %s214_s26 = scalar_lea.vmem [#allocation8], %s1896_s11 }
  0x3b   : > { %p2798_p1 = pnand %p2135_p0, %p3092_p11  ;;  %s222_s27 = sshll.u32 %s214_s26, 4  ;;  %s2807_s27 = int_to_ptr.vmem [resolvable:$true] %s222_s27 }
  0x3c   : > { %s2488_s22 = scalar_lea.hbm %s3087_s0, 2304 }
  0x3d   : > { %p2489_p3 = scmp.ne.s32.totalorder %s3087_s0, %s2488_s22  ;;  %p2490_p2 = pneg %p2798_p1 }
  0x3e   : > { %p2495_p12 = scmp.lt.u32.totalorder %s2488_s22, %s3087_s0 }
  0x3f   : > { %p2491_p4 = pnand %p2490_p2, %p2489_p3 }
  0x41   : > { %p2492_p6 = pneg %p2491_p4 }
  0x43   : > { %p2497_p0 = pnand %p2495_p12, %p2492_p6 }
  0x45   : > { %2500 = shalt.err (!%p2497_p0)
}
  0x46   : > { %s2501_s11 = scalar_lea.vmem %s2789_s10, 2304  ;;  %p2509_p8 = scmp.lt.s32.totalorder %s2789_s10, %s2789_s10 }
  0x47   : > { %p2502_p11 = scmp.ne.s32.totalorder %s2789_s10, %s2501_s11  ;;  %p2510_p5 = scmp.lt.s32.totalorder %s2501_s11, %s2501_s11 }
  0x49   : > { %p2504_p9 = pnand %p2502_p11, %p2490_p2  ;;  %p2511_p13 = por %p2510_p5, %p2509_p8 }
  0x4b   : > { %p2505_p10 = pneg %p2504_p9 }
  0x4d   : > { %p2512_p7 = pnand %p2511_p13, %p2505_p10 }
  0x4f   : > { %2515 = shalt.err (!%p2512_p7)
}
  0x50   : > { %s2639_s1 = smov 576   ;;  %s2640_s18 = smov 36  }
  0x51   : > { %2138 = dma.hbm_to_vmem [thread:$0]  (!%p2798_p1), %s3087_s0, 2304, %s2789_s10, [#allocation4], %s2639_s1, %s2639_s1, %s2640_s18  }
  0x52   : > { %s2516_s6 = scalar_lea.hbm %s2805_s25, 256  ;;  %p3108_p11 = scmp.ne.s32.totalorder %s3102_s29, 0 }
  0x53   : > { %p2517_p9 = scmp.ne.s32.totalorder %s2805_s25, %s2516_s6  ;;  %s2521_s21 = scalar_lea.hbm %s3089_s2, 512 }
  0x54   : > { %p3109_p5 = pneg %p3108_p11  ;;  %p2522_p10 = scmp.lt.u32.totalorder %s2805_s25, %s3089_s2 }
  0x55   : > { %p2523_p13 = scmp.lt.u32.totalorder %s2521_s21, %s2516_s6  ;;  %p2525_p2 = scmp.lt.u32.totalorder %s2516_s6, %s2805_s25 }
  0x56   : > { %p2519_p8 = pnand %p2517_p9, %p3109_p5 }
  0x57   : > { %p2524_p3 = por %p2523_p13, %p2522_p10 }
  0x58   : > { %p2520_p7 = pneg %p2519_p8 }
  0x59   : > { %p2526_p4 = por %p2525_p2, %p2524_p3 }
  0x5b   : > { %p2527_p6 = pnand %p2526_p4, %p2520_p7 }
  0x5d   : > { %2530 = shalt.err (!%p2527_p6)
}
  0x5e   : > { %s2531_s10 = scalar_lea.vmem %s2807_s27, 256  ;;  %p3110_p12 = pmov %p3109_p5 }
  0x5f   : > { %p2532_p1 = scmp.ne.s32.totalorder %s2807_s27, %s2531_s10  ;;  %s2641_s20 = smov [#allocation8]  }
  0x60   : > { %s2536_s1 = sshll.u32 %s2641_s20, 4  ;;  %s2537_s1 = int_to_ptr.vmem [resolvable:$false] %s2536_s1 }
  0x61   : > { %p2534_p0 = pnand %p2532_p1, %p3110_p12  ;;  %s2538_s18 = scalar_lea.vmem %s2537_s1, 512 }
  0x62   : > { %p2539_p5 = scmp.lt.s32.totalorder %s2807_s27, %s2537_s1  ;;  %p2540_p8 = scmp.lt.s32.totalorder %s2538_s18, %s2531_s10 }
  0x63   : > { %p2535_p9 = pneg %p2534_p0 }
  0x64   : > { %p2541_p10 = por %p2540_p8, %p2539_p5 }
  0x66   : > { %p2542_p13 = pnand %p2541_p10, %p2535_p9 }
  0x68   : > { %2545 = shalt.err (!%p2542_p13)
}
  0x69   : > { %2145 = dma.hbm_to_vmem [thread:$0]  (!%p3108_p11), %s2805_s25, 256, %s2807_s27, %s2730_s5  }
  0x6a   : > { %p3111_p7 = scmp.ne.s32.totalorder %s3106_s8, 0 }
  0x6b   : > { %p3112_p3 = scmp.eq.s32.totalorder (!%p3111_p7), %s2759_s30, 0 }
  0x6c   : > { %231 = sbr.rel (%p3111_p7) target bundleno = 585 (0x249), region = 32 }
  0x73   : > { %2599 = dma.done.wait (%p3112_p3), [#allocation4], 2304   ;;  %p3113_p2 = pmov %p3112_p3 }
  0x74   : > { %s237_s19 = sand.u32 1, %s2759_s30   ;;  %s2862_s26 = sand.u32 1, %s2616_s13  }
  0x75   : > { %2601 = vsyncadd (%p3113_p2), [#allocation4], 4294964992  ;;  %s2124_s29 = smul.u32 1152, %s2862_s26  ;;  %s238_s6 = scalar_lea.sflag [#allocation7], %s237_s19 }
  0x76   : > { %p3114_p11 = scmp.ne.s32.totalorder %s3103_s7, 0 }
  0x77   : > { %s2865_s9 = scalar_lea.vmem [#allocation6], %s2124_s29 }
  0x78   : > { %2603 = dma.done.wait (%p3114_p11), %s238_s6, 18688  }
  0x79   : > { %2605 = vsyncadd (%p3114_p11), %s238_s6, 4294948608  ;;  %v2212_v0 = vld [vmem:[%s2865_s9 + $0x4] ss:$8 sps:$4 sm:$0xff]   ;;  %v2216_v2 = vld [vmem:[%s2865_s9] ss:$8 sps:$4 sm:$0xff]   ;;  %s1901_s5 = sshll.u32 %s2862_s26, 4 }
  0x7a   : > { %v2214_v1 = vld [vmem:[%s2865_s9 + $0x204] ss:$8 sps:$4 sm:$0xff]   ;;  %1282 = vmatprep.subr.bf16.mxu1 %v2212_v0  ;;  %v2217_v3 = vld [vmem:[%s2865_s9 + $0x200] ss:$8 sps:$4 sm:$0xff]   ;;  %v2218_v4 = vld [vmem:[%s2865_s9 + $0x14] ss:$8 sps:$4 sm:$0xff]  }
  0x7b   : > { %1388 = vmatprep.subr.bf16.mxu0 %v2214_v1  ;;  %1283 = vmatpush1.bf16.msra.mxu1 %v2216_v2  ;;  %v2220_v5 = vld [vmem:[%s2865_s9 + $0x214] ss:$8 sps:$4 sm:$0xff]   ;;  %v2222_v6 = vld [vmem:[%s2865_s9 + $0x10] ss:$8 sps:$4 sm:$0xff]   ;;  %v2224_v8 = vld [vmem:[%s2865_s9 + $0x24] ss:$8 sps:$4 sm:$0xff]  }
  0x7c   : > { %1389 = vmatpush1.bf16.msra.mxu0 %v2217_v3  ;;  %1284 = vmatprep.subr.bf16.mxu1 %v2218_v4  ;;  %v2223_v7 = vld [vmem:[%s2865_s9 + $0x210] ss:$8 sps:$4 sm:$0xff]   ;;  %v2226_v9 = vld [vmem:[%s2865_s9 + $0x224] ss:$8 sps:$4 sm:$0xff]   ;;  %v2228_v10 = vld [vmem:[%s2865_s9 + $0x20] ss:$8 sps:$4 sm:$0xff]  }
  0x7d   : > { %1390 = vmatprep.subr.bf16.mxu0 %v2220_v5  ;;  %v2229_v11 = vld [vmem:[%s2865_s9 + $0x220] ss:$8 sps:$4 sm:$0xff]   ;;  %v2230_v12 = vld [vmem:[%s2865_s9 + $0x34] ss:$8 sps:$4 sm:$0xff]   ;;  %v2234_v14 = vld [vmem:[%s2865_s9 + $0x30] ss:$8 sps:$4 sm:$0xff]  }
  0x7e   : > { %v2232_v13 = vld [vmem:[%s2865_s9 + $0x234] ss:$8 sps:$4 sm:$0xff]   ;;  %v2235_v15 = vld [vmem:[%s2865_s9 + $0x230] ss:$8 sps:$4 sm:$0xff]   ;;  %v2236_v16 = vld [vmem:[%s2865_s9 + $0x44] ss:$8 sps:$4 sm:$0xff]  }
  0x7f   : > { %1285 = vmatpush1.bf16.msra.mxu1 %v2222_v6  ;;  %v2238_v17 = vld [vmem:[%s2865_s9 + $0x244] ss:$8 sps:$4 sm:$0xff]   ;;  %v2240_v18 = vld [vmem:[%s2865_s9 + $0x40] ss:$8 sps:$4 sm:$0xff]   ;;  %v2242_v20 = vld [vmem:[%s2865_s9 + $0x54] ss:$8 sps:$4 sm:$0xff]  }
  0x80   : > { %1391 = vmatpush1.bf16.msra.mxu0 %v2223_v7  ;;  %1286 = vmatprep.subr.bf16.mxu1 %v2224_v8  ;;  %v2241_v19 = vld [vmem:[%s2865_s9 + $0x240] ss:$8 sps:$4 sm:$0xff]   ;;  %v2244_v21 = vld [vmem:[%s2865_s9 + $0x254] ss:$8 sps:$4 sm:$0xff]   ;;  %v2246_v22 = vld [vmem:[%s2865_s9 + $0x50] ss:$8 sps:$4 sm:$0xff]  }
  0x81   : > { %1392 = vmatprep.subr.bf16.mxu0 %v2226_v9  ;;  %v2247_v23 = vld [vmem:[%s2865_s9 + $0x250] ss:$8 sps:$4 sm:$0xff]   ;;  %v2248_v24 = vld [vmem:[%s2865_s9 + $0x64] ss:$8 sps:$4 sm:$0xff]   ;;  %v2252_v26 = vld [vmem:[%s2865_s9 + $0x60] ss:$8 sps:$4 sm:$0xff]  }
  0x82   : > { %v2250_v25 = vld [vmem:[%s2865_s9 + $0x264] ss:$8 sps:$4 sm:$0xff]   ;;  %v2253_v27 = vld [vmem:[%s2865_s9 + $0x260] ss:$8 sps:$4 sm:$0xff]   ;;  %v2254_v28 = vld [vmem:[%s2865_s9 + $0x74] ss:$8 sps:$4 sm:$0xff]  }
  0x83   : > { %1287 = vmatpush1.bf16.msra.mxu1 %v2228_v10  ;;  %v2256_v29 = vld [vmem:[%s2865_s9 + $0x274] ss:$8 sps:$4 sm:$0xff]   ;;  %v2258_v30 = vld [vmem:[%s2865_s9 + $0x70] ss:$8 sps:$4 sm:$0xff]   ;;  %v2260_v32 = vld [vmem:[%s2865_s9 + $0x84] ss:$8 sps:$4 sm:$0xff]  }
  0x84   : > { %1393 = vmatpush1.bf16.msra.mxu0 %v2229_v11  ;;  %1288 = vmatprep.subr.bf16.mxu1 %v2230_v12  ;;  %v2259_v31 = vld [vmem:[%s2865_s9 + $0x270] ss:$8 sps:$4 sm:$0xff]   ;;  %v2262_v33 = vld [vmem:[%s2865_s9 + $0x284] ss:$8 sps:$4 sm:$0xff]   ;;  %v2264_v34 = vld [vmem:[%s2865_s9 + $0x80] ss:$8 sps:$4 sm:$0xff]  }
  0x85   : > { %1394 = vmatprep.subr.bf16.mxu0 %v2232_v13  ;;  %v2265_v35 = vld [vmem:[%s2865_s9 + $0x280] ss:$8 sps:$4 sm:$0xff]   ;;  %v2266_v36 = vld [vmem:[%s2865_s9 + $0x94] ss:$8 sps:$4 sm:$0xff]   ;;  %v2270_v38 = vld [vmem:[%s2865_s9 + $0x90] ss:$8 sps:$4 sm:$0xff]  }
  0x86   : > { %v2268_v37 = vld [vmem:[%s2865_s9 + $0x294] ss:$8 sps:$4 sm:$0xff]   ;;  %v2271_v39 = vld [vmem:[%s2865_s9 + $0x290] ss:$8 sps:$4 sm:$0xff]   ;;  %v2272_v40 = vld [vmem:[%s2865_s9 + $0xa4] ss:$8 sps:$4 sm:$0xff]  }
  0x87   : > { %1289 = vmatpush1.bf16.msra.mxu1 %v2234_v14  ;;  %v2274_v41 = vld [vmem:[%s2865_s9 + $0x2a4] ss:$8 sps:$4 sm:$0xff]   ;;  %v2276_v42 = vld [vmem:[%s2865_s9 + $0xa0] ss:$8 sps:$4 sm:$0xff]   ;;  %v2278_v44 = vld [vmem:[%s2865_s9 + $0xb4] ss:$8 sps:$4 sm:$0xff]  }
  0x88   : > { %1395 = vmatpush1.bf16.msra.mxu0 %v2235_v15  ;;  %1290 = vmatprep.subr.bf16.mxu1 %v2236_v16  ;;  %v2277_v43 = vld [vmem:[%s2865_s9 + $0x2a0] ss:$8 sps:$4 sm:$0xff]   ;;  %v2280_v45 = vld [vmem:[%s2865_s9 + $0x2b4] ss:$8 sps:$4 sm:$0xff]   ;;  %v2282_v46 = vld [vmem:[%s2865_s9 + $0xb0] ss:$8 sps:$4 sm:$0xff]  }
  0x89   : > { %1396 = vmatprep.subr.bf16.mxu0 %v2238_v17  ;;  %v2283_v47 = vld [vmem:[%s2865_s9 + $0x2b0] ss:$8 sps:$4 sm:$0xff]   ;;  %v2284_v49 = vld [vmem:[%s2865_s9 + $0xc4] ss:$8 sps:$4 sm:$0xff]   ;;  %v2288_v52 = vld [vmem:[%s2865_s9 + $0xc0] ss:$8 sps:$4 sm:$0xff]  }
  0x8a   : > { %v2310_v48 = vld [vmem:[#allocation3 + $0x4] ss:$36 sps:$4 sm:$0xff]   ;;  %v2286_v50 = vld [vmem:[%s2865_s9 + $0x2c4] ss:$8 sps:$4 sm:$0xff]   ;;  %v2289_v53 = vld [vmem:[%s2865_s9 + $0x2c0] ss:$8 sps:$4 sm:$0xff]  }
  0x8b   : > { %1291 = vmatpush1.bf16.msra.mxu1 %v2240_v18  ;;  %1314 = vmatprep.mubr.bf16.mxu1 %v2310_v48  ;;  %v2316_v51 = vld [vmem:[#allocation3 + $0x14] ss:$36 sps:$4 sm:$0xff]   ;;  %v2290_v54 = vld [vmem:[%s2865_s9 + $0xd4] ss:$8 sps:$4 sm:$0xff]   ;;  %v2294_v56 = vld [vmem:[%s2865_s9 + $0xd0] ss:$8 sps:$4 sm:$0xff]  }
  0x8c   : > { %1397 = vmatpush1.bf16.msra.mxu0 %v2241_v19  ;;  %1292 = vmatprep.subr.bf16.mxu1 %v2242_v20  ;;  %v2292_v55 = vld [vmem:[%s2865_s9 + $0x2d4] ss:$8 sps:$4 sm:$0xff]   ;;  %v2295_v57 = vld [vmem:[%s2865_s9 + $0x2d0] ss:$8 sps:$4 sm:$0xff]   ;;  %v2296_v58 = vld [vmem:[%s2865_s9 + $0xe4] ss:$8 sps:$4 sm:$0xff]  }
  0x8d   : > { %1398 = vmatprep.subr.bf16.mxu0 %v2244_v21  ;;  %1420 = vmatprep.mubr.bf16.mxu0 %v2316_v51  ;;  %v2298_v59 = vld [vmem:[%s2865_s9 + $0x2e4] ss:$8 sps:$4 sm:$0xff]   ;;  %v2300_v60 = vld [vmem:[%s2865_s9 + $0xe0] ss:$8 sps:$4 sm:$0xff]   ;;  %v2302_v62 = vld [vmem:[%s2865_s9 + $0xf4] ss:$8 sps:$4 sm:$0xff]  }
  0x8e   : > { %v2301_v61 = vld [vmem:[%s2865_s9 + $0x2e0] ss:$8 sps:$4 sm:$0xff]   ;;  %v2304_v63 = vld [vmem:[%s2865_s9 + $0x2f4] ss:$8 sps:$4 sm:$0xff]   ;;  %v2306_v0 = vld [vmem:[%s2865_s9 + $0xf0] ss:$8 sps:$4 sm:$0xff]  }
  0x8f   : > { %1293 = vmatpush1.bf16.msra.mxu1 %v2246_v22  ;;  %v2307_v1 = vld [vmem:[%s2865_s9 + $0x2f0] ss:$8 sps:$4 sm:$0xff]   ;;  %v2313_v2 = vld [vmem:[%s2865_s9 + $0x104] ss:$8 sps:$4 sm:$0xff]   ;;  %v2311_v5 = vld [vmem:[%s2865_s9 + $0x100] ss:$8 sps:$4 sm:$0xff]  }
  0x90   : > { %1399 = vmatpush1.bf16.msra.mxu0 %v2247_v23  ;;  %1294 = vmatprep.subr.bf16.mxu1 %v2248_v24  ;;  %v2319_v3 = vld [vmem:[%s2865_s9 + $0x304] ss:$8 sps:$4 sm:$0xff]   ;;  %v2308_v4 = vld [vmem:[#allocation3] ss:$36 sps:$4 sm:$0xff]   ;;  %v2317_v7 = vld [vmem:[%s2865_s9 + $0x300] ss:$8 sps:$4 sm:$0xff]  }
  0x91   : > { %1400 = vmatprep.subr.bf16.mxu0 %v2250_v25  ;;  %v2314_v6 = vld [vmem:[#allocation3 + $0x10] ss:$36 sps:$4 sm:$0xff]   ;;  %v2322_v8 = vld [vmem:[%s2865_s9 + $0x114] ss:$8 sps:$4 sm:$0xff]   ;;  %v2320_v10 = vld [vmem:[%s2865_s9 + $0x110] ss:$8 sps:$4 sm:$0xff]  }
  0x92   : > { %v2325_v9 = vld [vmem:[%s2865_s9 + $0x314] ss:$8 sps:$4 sm:$0xff]   ;;  %v2323_v11 = vld [vmem:[%s2865_s9 + $0x310] ss:$8 sps:$4 sm:$0xff]   ;;  %v2328_v12 = vld [vmem:[%s2865_s9 + $0x124] ss:$8 sps:$4 sm:$0xff]  }
  0x93   : > { %1295 = vmatpush1.bf16.msra.mxu1 %v2252_v26  ;;  %v2331_v13 = vld [vmem:[%s2865_s9 + $0x324] ss:$8 sps:$4 sm:$0xff]   ;;  %v2326_v14 = vld [vmem:[%s2865_s9 + $0x120] ss:$8 sps:$4 sm:$0xff]   ;;  %v2334_v16 = vld [vmem:[%s2865_s9 + $0x134] ss:$8 sps:$4 sm:$0xff]  }
  0x94   : > { %1401 = vmatpush1.bf16.msra.mxu0 %v2253_v27  ;;  %1296 = vmatprep.subr.bf16.mxu1 %v2254_v28  ;;  %v2329_v15 = vld [vmem:[%s2865_s9 + $0x320] ss:$8 sps:$4 sm:$0xff]   ;;  %v2337_v17 = vld [vmem:[%s2865_s9 + $0x334] ss:$8 sps:$4 sm:$0xff]   ;;  %v2332_v18 = vld [vmem:[%s2865_s9 + $0x130] ss:$8 sps:$4 sm:$0xff]  }
  0x95   : > { %1402 = vmatprep.subr.bf16.mxu0 %v2256_v29  ;;  %v2335_v19 = vld [vmem:[%s2865_s9 + $0x330] ss:$8 sps:$4 sm:$0xff]   ;;  %v2340_v20 = vld [vmem:[%s2865_s9 + $0x144] ss:$8 sps:$4 sm:$0xff]   ;;  %v2338_v22 = vld [vmem:[%s2865_s9 + $0x140] ss:$8 sps:$4 sm:$0xff]  }
  0x96   : > { %v2343_v21 = vld [vmem:[%s2865_s9 + $0x344] ss:$8 sps:$4 sm:$0xff]   ;;  %v2341_v23 = vld [vmem:[%s2865_s9 + $0x340] ss:$8 sps:$4 sm:$0xff]   ;;  %v2346_v24 = vld [vmem:[%s2865_s9 + $0x154] ss:$8 sps:$4 sm:$0xff]  }
  0x97   : > { %1297 = vmatpush1.bf16.msra.mxu1 %v2258_v30  ;;  %v2349_v25 = vld [vmem:[%s2865_s9 + $0x354] ss:$8 sps:$4 sm:$0xff]   ;;  %v2344_v26 = vld [vmem:[%s2865_s9 + $0x150] ss:$8 sps:$4 sm:$0xff]   ;;  %v2352_v28 = vld [vmem:[%s2865_s9 + $0x164] ss:$8 sps:$4 sm:$0xff]  }
  0x98   : > { %1403 = vmatpush1.bf16.msra.mxu0 %v2259_v31  ;;  %1298 = vmatprep.subr.bf16.mxu1 %v2260_v32  ;;  %v2347_v27 = vld [vmem:[%s2865_s9 + $0x350] ss:$8 sps:$4 sm:$0xff]   ;;  %v2398_v29 = vld [vmem:[#allocation3 + $0x4c] ss:$36 sps:$4 sm:$0xff]   ;;  %v2355_v32 = vld [vmem:[%s2865_s9 + $0x364] ss:$8 sps:$4 sm:$0xff]  }
  0x99   : > { %1404 = vmatprep.subr.bf16.mxu0 %v2262_v33  ;;  %v2400_v30 = vld [vmem:[#allocation3 + $0x5c] ss:$36 sps:$4 sm:$0xff]   ;;  %v2402_v31 = vld [vmem:[#allocation3 + $0x48] ss:$36 sps:$4 sm:$0xff]   ;;  %s3018_s30 = scalar_lea.vmem [#allocation8], %s1901_s5  ;;  %s1902_s7 = sshll.u32 %s2862_s26, 6 }
  0x9a   : > { %v2406_v33 = vld [vmem:[#allocation3 + $0x58] ss:$36 sps:$4 sm:$0xff]   ;;  %v2368_v48 = vld [vmem:[%s2865_s9 + $0x190] ss:$8 sps:$4 sm:$0xff]   ;;  %s2074_s8 = sshll.u32 %s2624_s15, 8  ;;  %s277_s25 = scalar_lea.vmem [#allocation9], %s1902_s7 }
  0x9b   : > { %1299 = vmatpush1.bf16.msra.mxu1 %v2264_v34  ;;  %v2350_v34 = vld [vmem:[%s2865_s9 + $0x160] ss:$8 sps:$4 sm:$0xff]   ;;  %v2379_v51 = vld [vmem:[%s2865_s9 + $0x3a4] ss:$8 sps:$4 sm:$0xff]   ;;  %s1762_s27 = sshll.u32 %s277_s25, 4  ;;  %s3036_s23 = scalar_lea.hbm %s3090_s3, %s2074_s8  ;;  %s3038_s27 = int_to_ptr.vmem [resolvable:$true] %s1762_s27 }
  0x9c   : > { %1405 = vmatpush1.bf16.msra.mxu0 %v2265_v35  ;;  %1300 = vmatprep.subr.bf16.mxu1 %v2266_v36  ;;  %v2353_v35 = vld [vmem:[%s2865_s9 + $0x360] ss:$8 sps:$4 sm:$0xff]   ;;  %v2358_v36 = vld [vmem:[%s2865_s9 + $0x174] ss:$8 sps:$4 sm:$0xff]   ;;  %s1746_s15 = scalar_lea.sflag [#allocation5], %s2862_s26  ;;  %s2546_s11 = scalar_lea.vmem %s3038_s27, 1024 }
  0x9d   : > { %1406 = vmatprep.subr.bf16.mxu0 %v2268_v37  ;;  %v2361_v37 = vld [vmem:[%s2865_s9 + $0x374] ss:$8 sps:$4 sm:$0xff]   ;;  %p2547_p4 = scmp.ne.s32.totalorder %s3038_s27, %s2546_s11  ;;  %p3115_p6 = scmp.ne.s32.totalorder %s3104_s28, 0 }
  0x9e   : > { %s2643_s10 = smov [#allocation9]  }
  0x9f   : > { %1301 = vmatpush1.bf16.msra.mxu1 %v2270_v38  ;;  %v2356_v38 = vld [vmem:[%s2865_s9 + $0x170] ss:$8 sps:$4 sm:$0xff]   ;;  %p2548_p1 = pnand %p2547_p4, %p3115_p6  ;;  %s2550_s20 = sshll.u32 %s2643_s10, 4  ;;  %s2551_s20 = int_to_ptr.vmem [resolvable:$false] %s2550_s20 }
  0xa0   : > { %1407 = vmatpush1.bf16.msra.mxu0 %v2271_v39  ;;  %1302 = vmatprep.subr.bf16.mxu1 %v2272_v40  ;;  %v2359_v39 = vld [vmem:[%s2865_s9 + $0x370] ss:$8 sps:$4 sm:$0xff]   ;;  %v2364_v40 = vld [vmem:[%s2865_s9 + $0x184] ss:$8 sps:$4 sm:$0xff]   ;;  %s2552_s1 = scalar_lea.vmem %s2551_s20, 2048  ;;  %p2553_p0 = scmp.lt.s32.totalorder %s3038_s27, %s2551_s20 }
  0xa1   : > { %1408 = vmatprep.subr.bf16.mxu0 %v2274_v41  ;;  %v2418_v41 = vld [vmem:[#allocation3 + $0xc] ss:$36 sps:$4 sm:$0xff]   ;;  %p2549_p12 = pneg %p2548_p1  ;;  %p2554_p9 = scmp.lt.s32.totalorder %s2552_s1, %s2546_s11 }
  0xa3   : > { %1303 = vmatpush1.bf16.msra.mxu1 %v2276_v42  ;;  %v2367_v42 = vld [vmem:[%s2865_s9 + $0x384] ss:$8 sps:$4 sm:$0xff]   ;;  %p2555_p5 = por %p2554_p9, %p2553_p0 }
  0xa4   : > { %1409 = vmatpush1.bf16.msra.mxu0 %v2277_v43  ;;  %1304 = vmatprep.subr.bf16.mxu1 %v2278_v44  ;;  %v2421_v43 = vld [vmem:[#allocation3 + $0x1c] ss:$36 sps:$4 sm:$0xff]   ;;  %v2362_v44 = vld [vmem:[%s2865_s9 + $0x180] ss:$8 sps:$4 sm:$0xff]  }
  0xa5   : > { %1410 = vmatprep.subr.bf16.mxu0 %v2280_v45  ;;  %v2365_v45 = vld [vmem:[%s2865_s9 + $0x380] ss:$8 sps:$4 sm:$0xff]   ;;  %p2556_p8 = pnand %p2555_p5, %p2549_p12 }
  0xa7   : > { %1305 = vmatpush1.bf16.msra.mxu1 %v2282_v46  ;;  %v2370_v46 = vld [vmem:[%s2865_s9 + $0x194] ss:$8 sps:$4 sm:$0xff]  }
  0xa8   : > { %1411 = vmatpush1.bf16.msra.mxu0 %v2283_v47  ;;  %1306 = vmatprep.subr.bf16.mxu1 %v2284_v49  ;;  %v2373_v47 = vld [vmem:[%s2865_s9 + $0x394] ss:$8 sps:$4 sm:$0xff]   ;;  %v2371_v49 = vld [vmem:[%s2865_s9 + $0x390] ss:$8 sps:$4 sm:$0xff]  }
  0xa9   : > { %1412 = vmatprep.subr.bf16.mxu0 %v2286_v50  ;;  %v2376_v50 = vld [vmem:[%s2865_s9 + $0x1a4] ss:$8 sps:$4 sm:$0xff]  }
  0xab   : > { %1307 = vmatpush1.bf16.msra.mxu1 %v2288_v52  ;;  %v2374_v52 = vld [vmem:[%s2865_s9 + $0x1a0] ss:$8 sps:$4 sm:$0xff]  }
  0xac   : > { %1413 = vmatpush1.bf16.msra.mxu0 %v2289_v53  ;;  %1308 = vmatprep.subr.bf16.mxu1 %v2290_v54  ;;  %v2377_v53 = vld [vmem:[%s2865_s9 + $0x3a0] ss:$8 sps:$4 sm:$0xff]   ;;  %v2382_v54 = vld [vmem:[%s2865_s9 + $0x1b4] ss:$8 sps:$4 sm:$0xff]  }
  0xad   : > { %1414 = vmatprep.subr.bf16.mxu0 %v2292_v55  ;;  %v2385_v55 = vld [vmem:[%s2865_s9 + $0x3b4] ss:$8 sps:$4 sm:$0xff]  }
  0xaf   : > { %1309 = vmatpush1.bf16.msra.mxu1 %v2294_v56  ;;  %v2380_v56 = vld [vmem:[%s2865_s9 + $0x1b0] ss:$8 sps:$4 sm:$0xff]  }
  0xb0   : > { %1415 = vmatpush1.bf16.msra.mxu0 %v2295_v57  ;;  %1310 = vmatprep.subr.bf16.mxu1 %v2296_v58  ;;  %v2383_v57 = vld [vmem:[%s2865_s9 + $0x3b0] ss:$8 sps:$4 sm:$0xff]   ;;  %v2388_v58 = vld [vmem:[%s2865_s9 + $0x1c4] ss:$8 sps:$4 sm:$0xff]  }
  0xb1   : > { %1416 = vmatprep.subr.bf16.mxu0 %v2298_v59  ;;  %v2391_v59 = vld [vmem:[%s2865_s9 + $0x3c4] ss:$8 sps:$4 sm:$0xff]  }
  0xb3   : > { %1311 = vmatpush1.bf16.msra.mxu1 %v2300_v60  ;;  %v2386_v60 = vld [vmem:[%s2865_s9 + $0x1c0] ss:$8 sps:$4 sm:$0xff]  }
  0xb4   : > { %1417 = vmatpush1.bf16.msra.mxu0 %v2301_v61  ;;  %1312 = vmatprep.subr.bf16.mxu1 %v2302_v62  ;;  %v2389_v61 = vld [vmem:[%s2865_s9 + $0x3c0] ss:$8 sps:$4 sm:$0xff]   ;;  %v2394_v62 = vld [vmem:[%s2865_s9 + $0x1d4] ss:$8 sps:$4 sm:$0xff]  }
  0xb5   : > { %1418 = vmatprep.subr.bf16.mxu0 %v2304_v63  ;;  %v2397_v63 = vld [vmem:[%s2865_s9 + $0x3d4] ss:$8 sps:$4 sm:$0xff]  }
  0xb7   : > { %1313 = vmatpush1.bf16.msra.mxu1 %v2306_v0  ;;  %v2392_v0 = vld [vmem:[%s2865_s9 + $0x1d0] ss:$8 sps:$4 sm:$0xff]  }
  0xb8   : > { %1419 = vmatpush1.bf16.msra.mxu0 %v2307_v1  ;;  %1335 = vmatprep.subr.bf16.mxu1 %v2313_v2  ;;  %v2395_v1 = vld [vmem:[%s2865_s9 + $0x3d0] ss:$8 sps:$4 sm:$0xff]   ;;  %v2405_v2 = vld [vmem:[%s2865_s9 + $0x1e4] ss:$8 sps:$4 sm:$0xff]  }
  0xb9   : > { %1441 = vmatprep.subr.bf16.mxu0 %v2319_v3  ;;  %v2409_v3 = vld [vmem:[%s2865_s9 + $0x3e4] ss:$8 sps:$4 sm:$0xff]  }
  0xba   : > { %1315 = vmatmul.mubr.bf16.vlgmr.msra.gmra.mrb[0].mxu1 %v2308_v4  ;;  %v2403_v4 = vld [vmem:[%s2865_s9 + $0x1e0] ss:$8 sps:$4 sm:$0xff]  }
  0xbb   : > { %1421 = vmatmul.mubr.bf16.vlgmr.msra.gmra.mrb[0].mxu0 %v2314_v6  ;;  %1336 = vmatpush1.bf16.msra.mxu1 %v2311_v5  ;;  %v2407_v5 = vld [vmem:[%s2865_s9 + $0x3e0] ss:$8 sps:$4 sm:$0xff]   ;;  %v2412_v6 = vld [vmem:[%s2865_s9 + $0x1f4] ss:$8 sps:$4 sm:$0xff]  }
  0xbc   : > { %1442 = vmatpush1.bf16.msra.mxu0 %v2317_v7  ;;  %1337 = vmatprep.subr.bf16.mxu1 %v2322_v8  ;;  %v2415_v7 = vld [vmem:[%s2865_s9 + $0x3f4] ss:$8 sps:$4 sm:$0xff]   ;;  %v2410_v8 = vld [vmem:[%s2865_s9 + $0x1f0] ss:$8 sps:$4 sm:$0xff]  }
  0xbd   : > { %1443 = vmatprep.subr.bf16.mxu0 %v2325_v9  ;;  %1324 = vmatprep.mubr.bf16.mxu1 %v2398_v29  ;;  %v2413_v9 = vld [vmem:[%s2865_s9 + $0x3f0] ss:$8 sps:$4 sm:$0xff]   ;;  %v2448_v29 = vld [vmem:[%s2865_s9 + $0x464] ss:$8 sps:$4 sm:$0xff]  }
  0xbe   : > { %1430 = vmatprep.mubr.bf16.mxu0 %v2400_v30  ;;  %v2446_v30 = vld [vmem:[%s2865_s9 + $0x460] ss:$8 sps:$4 sm:$0xff]  }
  0xbf   : > { %1338 = vmatpush1.bf16.msra.mxu1 %v2320_v10  ;;  %v2424_v10 = vld [vmem:[%s2865_s9 + $0x404] ss:$8 sps:$4 sm:$0xff]  }
  0xc0   : > { %1444 = vmatpush1.bf16.msra.mxu0 %v2323_v11  ;;  %1339 = vmatprep.subr.bf16.mxu1 %v2328_v12  ;;  %v2416_v11 = vld [vmem:[#allocation3 + $0x8] ss:$36 sps:$4 sm:$0xff]   ;;  %v2419_v12 = vld [vmem:[#allocation3 + $0x18] ss:$36 sps:$4 sm:$0xff]  }
  0xc1   : > { %1445 = vmatprep.subr.bf16.mxu0 %v2331_v13  ;;  %v2422_v13 = vld [vmem:[%s2865_s9 + $0x400] ss:$8 sps:$4 sm:$0xff]  }
  0xc2   : > { %1325 = vmatmul.mubr.bf16.gmra.mrb[4].mxu1 %v2402_v31  ;;  %v2451_v31 = vld [vmem:[%s2865_s9 + $0x474] ss:$8 sps:$4 sm:$0xff]  }
  0xc3   : > { %1340 = vmatpush1.bf16.msra.mxu1 %v2326_v14  ;;  %1431 = vmatmul.mubr.bf16.gmra.mrb[4].mxu0 %v2406_v33  ;;  %v2427_v14 = vld [vmem:[%s2865_s9 + $0x414] ss:$8 sps:$4 sm:$0xff]  }
  0xc4   : > { %1446 = vmatpush1.bf16.msra.mxu0 %v2329_v15  ;;  %1341 = vmatprep.subr.bf16.mxu1 %v2334_v16  ;;  %v2428_v15 = vld [vmem:[#allocation3 + $0x54] ss:$36 sps:$4 sm:$0xff]   ;;  %v2430_v16 = vld [vmem:[#allocation3 + $0x64] ss:$36 sps:$4 sm:$0xff]  }
  0xc5   : > { %1447 = vmatprep.subr.bf16.mxu0 %v2337_v17  ;;  %1367 = vmatprep.mubr.bf16.mxu1 %v2418_v41  ;;  %v2425_v17 = vld [vmem:[%s2865_s9 + $0x410] ss:$8 sps:$4 sm:$0xff]  }
  0xc6   : > { %1473 = vmatprep.mubr.bf16.mxu0 %v2421_v43  ;;  %v2452_v33 = vld [vmem:[#allocation3 + $0x20] ss:$36 sps:$4 sm:$0xff]  }
  0xc7   : > { %1342 = vmatpush1.bf16.msra.mxu1 %v2332_v18  ;;  %v2436_v18 = vld [vmem:[%s2865_s9 + $0x424] ss:$8 sps:$4 sm:$0xff]  }
  0xc8   : > { %1448 = vmatpush1.bf16.msra.mxu0 %v2335_v19  ;;  %1343 = vmatprep.subr.bf16.mxu1 %v2340_v20  ;;  %v2432_v19 = vld [vmem:[#allocation3 + $0x50] ss:$36 sps:$4 sm:$0xff]   ;;  %v2433_v20 = vld [vmem:[#allocation3 + $0x60] ss:$36 sps:$4 sm:$0xff]  }
  0xc9   : > { %1449 = vmatprep.subr.bf16.mxu0 %v2343_v21  ;;  %v2434_v21 = vld [vmem:[%s2865_s9 + $0x420] ss:$8 sps:$4 sm:$0xff]  }
  0xcb   : > { %1344 = vmatpush1.bf16.msra.mxu1 %v2338_v22  ;;  %v2439_v22 = vld [vmem:[%s2865_s9 + $0x434] ss:$8 sps:$4 sm:$0xff]  }
  0xcc   : > { %1450 = vmatpush1.bf16.msra.mxu0 %v2341_v23  ;;  %1345 = vmatprep.subr.bf16.mxu1 %v2346_v24  ;;  %v2437_v23 = vld [vmem:[%s2865_s9 + $0x430] ss:$8 sps:$4 sm:$0xff]   ;;  %v2442_v24 = vld [vmem:[%s2865_s9 + $0x444] ss:$8 sps:$4 sm:$0xff]  }
  0xcd   : > { %1451 = vmatprep.subr.bf16.mxu0 %v2349_v25  ;;  %v2642_v25 = vmov 0  }
  0xcf   : > { %1346 = vmatpush1.bf16.msra.mxu1 %v2344_v26  ;;  %v2440_v26 = vld [vmem:[%s2865_s9 + $0x440] ss:$8 sps:$4 sm:$0xff]  }
  0xd0   : > { %1452 = vmatpush1.bf16.msra.mxu0 %v2347_v27  ;;  %1347 = vmatprep.subr.bf16.mxu1 %v2352_v28  ;;  %v2445_v27 = vld [vmem:[%s2865_s9 + $0x454] ss:$8 sps:$4 sm:$0xff]   ;;  %v2443_v28 = vld [vmem:[%s2865_s9 + $0x450] ss:$8 sps:$4 sm:$0xff]  }
  0xd1   : > { %1453 = vmatprep.subr.bf16.mxu0 %v2355_v32  ;;  %v2449_v32 = vld [vmem:[%s2865_s9 + $0x470] ss:$8 sps:$4 sm:$0xff]  }
  0xd3   : > { %1348 = vmatpush1.bf16.msra.mxu1 %v2350_v34  ;;  %v2453_v34 = vld [vmem:[#allocation3 + $0x68] ss:$36 sps:$4 sm:$0xff]  }
  0xd4   : > { %1454 = vmatpush1.bf16.msra.mxu0 %v2353_v35  ;;  %1349 = vmatprep.subr.bf16.mxu1 %v2358_v36 }
  0xd5   : > { %1455 = vmatprep.subr.bf16.mxu0 %v2361_v37 }
  0xd7   : > { %1350 = vmatpush1.bf16.msra.mxu1 %v2356_v38 }
  0xd8   : > { %1456 = vmatpush1.bf16.msra.mxu0 %v2359_v39  ;;  %1351 = vmatprep.subr.bf16.mxu1 %v2364_v40 }
  0xd9   : > { %1457 = vmatprep.subr.bf16.mxu0 %v2367_v42 }
  0xdb   : > { %1352 = vmatpush1.bf16.msra.mxu1 %v2362_v44 }
  0xdc   : > { %1458 = vmatpush1.bf16.msra.mxu0 %v2365_v45  ;;  %1353 = vmatprep.subr.bf16.mxu1 %v2370_v46 }
  0xdd   : > { %1459 = vmatprep.subr.bf16.mxu0 %v2373_v47 }
  0xdf   : > { %1354 = vmatpush1.bf16.msra.mxu1 %v2368_v48 }
  0xe0   : > { %1460 = vmatpush1.bf16.msra.mxu0 %v2371_v49  ;;  %1355 = vmatprep.subr.bf16.mxu1 %v2376_v50 }
  0xe1   : > { %1461 = vmatprep.subr.bf16.mxu0 %v2379_v51  ;;  %v1576_v51 = vlaneseq }
  0xe3   : > { %1356 = vmatpush1.bf16.msra.mxu1 %v2374_v52  ;;  %v1577_v52 = vshrl.u32 %v1576_v51, 7 }
  0xe4   : > { %1462 = vmatpush1.bf16.msra.mxu0 %v2377_v53  ;;  %1357 = vmatprep.subr.bf16.mxu1 %v2382_v54  ;;  %v1574_v54 = vld [vmem:[%s3018_s30] ss:$8 sm:$0x3] }
  0xe5   : > { %1463 = vmatprep.subr.bf16.mxu0 %v2385_v55  ;;  %v3016_v53 = vsub.s32 0, %v1577_v52  ;;  %v3021_v55 = vsub.s32 1, %v1577_v52 }
  0xe7   : > { %1358 = vmatpush1.bf16.msra.mxu1 %v2380_v56 }
  0xe8   : > { %1464 = vmatpush1.bf16.msra.mxu0 %v2383_v57  ;;  %1359 = vmatprep.subr.bf16.mxu1 %v2388_v58 }
  0xe9   : > { %1465 = vmatprep.subr.bf16.mxu0 %v2391_v59  ;;  %v1579_v59 = vrot.slane %v1574_v54, %v3016_v53 }
  0xeb   : > { %1360 = vmatpush1.bf16.msra.mxu1 %v2386_v60 }
  0xec   : > { %1466 = vmatpush1.bf16.msra.mxu0 %v2389_v61  ;;  %1361 = vmatprep.subr.bf16.mxu1 %v2394_v62 }
  0xed   : > { %1467 = vmatprep.subr.bf16.mxu0 %v2397_v63 }
  0xef   : > { %1362 = vmatpush1.bf16.msra.mxu1 %v2392_v0  ;;  %v1583_v0 = vrot.slane %v1574_v54, %v3021_v55 }
  0xf0   : > { %1468 = vmatpush1.bf16.msra.mxu0 %v2395_v1  ;;  %1363 = vmatprep.subr.bf16.mxu1 %v2405_v2 }
  0xf1   : > { %1469 = vmatprep.subr.bf16.mxu0 %v2409_v3 }
  0xf3   : > { %1364 = vmatpush1.bf16.msra.mxu1 %v2403_v4 }
  0xf4   : > { %1470 = vmatpush1.bf16.msra.mxu0 %v2407_v5  ;;  %1365 = vmatprep.subr.bf16.mxu1 %v2412_v6 }
  0xf5   : > { %1471 = vmatprep.subr.bf16.mxu0 %v2415_v7 }
  0xf7   : > { %1366 = vmatpush1.bf16.msra.mxu1 %v2410_v8 }
  0xf8   : > { %1472 = vmatpush1.bf16.msra.mxu0 %v2413_v9  ;;  %2075 = vmatprep.subr.bf16.mxu1 %v2424_v10 }
  0xf9   : > { %1494 = vmatprep.subr.bf16.mxu0 %v2424_v10 }
  0xfa   : > { %1368 = vmatmul.mubr.bf16.vlgmr.msra.gmra.mrb[0].mxu1 %v2416_v11 }
  0xfb   : > { %1474 = vmatmul.mubr.bf16.vlgmr.msra.gmra.mrb[0].mxu0 %v2419_v12  ;;  %2083 = vmatpush1.bf16.msra.mxu1 %v2422_v13 }
  0xfc   : > { %1495 = vmatpush1.bf16.msra.mxu0 %v2422_v13  ;;  %2076 = vmatprep.subr.bf16.mxu1 %v2427_v14 }
  0xfd   : > { %1496 = vmatprep.subr.bf16.mxu0 %v2427_v14  ;;  %1377 = vmatprep.mubr.bf16.mxu1 %v2428_v15 }
  0xfe   : > { %1483 = vmatprep.mubr.bf16.mxu0 %v2430_v16 }
  0xff   : > { %2084 = vmatpush1.bf16.msra.mxu1 %v2425_v17 }
 0x100   : > { %1497 = vmatpush1.bf16.msra.mxu0 %v2425_v17  ;;  %2077 = vmatprep.subr.bf16.mxu1 %v2436_v18 }
 0x101   : > { %1498 = vmatprep.subr.bf16.mxu0 %v2436_v18 }
 0x102   : > { %1378 = vmatmul.mubr.bf16.gmra.mrb[4].mxu1 %v2432_v19 }
 0x103   : > { %1484 = vmatmul.mubr.bf16.gmra.mrb[4].mxu0 %v2433_v20  ;;  %2085 = vmatpush1.bf16.msra.mxu1 %v2434_v21 }
 0x104   : > { %1499 = vmatpush1.bf16.msra.mxu0 %v2434_v21  ;;  %2078 = vmatprep.subr.bf16.mxu1 %v2439_v22 }
 0x105   : > { %1500 = vmatprep.subr.bf16.mxu0 %v2439_v22  ;;  %1526 = vmatprep.mubr.bf16.mxu0 %v2642_v25 }
 0x106   : > { %1536 = vmatprep.mubr.bf16.mxu1 %v2642_v25 }
 0x107   : > { %2086 = vmatpush1.bf16.msra.mxu1 %v2437_v23 }
 0x108   : > { %1501 = vmatpush1.bf16.msra.mxu0 %v2437_v23  ;;  %2079 = vmatprep.subr.bf16.mxu1 %v2442_v24 }
 0x109   : > { %1502 = vmatprep.subr.bf16.mxu0 %v2442_v24 }
 0x10b   : > { %2087 = vmatpush1.bf16.msra.mxu1 %v2440_v26 }
 0x10c   : > { %1503 = vmatpush1.bf16.msra.mxu0 %v2440_v26  ;;  %2080 = vmatprep.subr.bf16.mxu1 %v2445_v27 }
 0x10d   : > { %1504 = vmatprep.subr.bf16.mxu0 %v2445_v27 }
 0x10f   : > { %2088 = vmatpush1.bf16.msra.mxu1 %v2443_v28 }
 0x110   : > { %1505 = vmatpush1.bf16.msra.mxu0 %v2443_v28  ;;  %2081 = vmatprep.subr.bf16.mxu1 %v2448_v29 }
 0x111   : > { %1506 = vmatprep.subr.bf16.mxu0 %v2448_v29 }
 0x113   : > { %2089 = vmatpush1.bf16.msra.mxu1 %v2446_v30 }
 0x114   : > { %1507 = vmatpush1.bf16.msra.mxu0 %v2446_v30  ;;  %2082 = vmatprep.subr.bf16.mxu1 %v2451_v31 }
 0x115   : > { %1508 = vmatprep.subr.bf16.mxu0 %v2451_v31 }
 0x117   : > { %2090 = vmatpush1.bf16.msra.mxu1 %v2449_v32 }
 0x118   : > { %1509 = vmatpush1.bf16.msra.mxu0 %v2449_v32 }
 0x11a   : > { %1537 = vmatmul.mubr.bf16.vlgmr.msra.gmra.mrb[8].mxu1 %v2453_v34 }
 0x11b   : > { %1527 = vmatmul.mubr.bf16.vlgmr.msra.gmra.mrb[0].mxu0 %v2452_v33 }
 0x1cd   : > { %v1369_v35 = vpop.f32.mrb[0].mxu1 }
 0x1ce   : > { %v1371_v36 = vpop.f32.mrb[1].mxu1 }
 0x1cf   : > { %v1373_v37 = vpop.f32.mrb[2].mxu1 }
 0x1d0   : > { %v1375_v38 = vpop.f32.mrb[3].mxu1 }
 0x1d5   : > { %v1379_v39 = vpop.f32.mrb[4].mxu1 }
 0x1d6   : > { %v1485_v40 = vpop.f32.mrb[4].mxu0  ;;  %v1381_v42 = vpop.f32.mrb[5].mxu1 }
 0x1d7   : > { %v2095_v41 = vadd.f32 %v1485_v40, %v1379_v39  ;;  %v1487_v43 = vpop.f32.mrb[5].mxu0  ;;  %v1383_v45 = vpop.f32.mrb[6].mxu1 }
 0x1d8   : > { %v2097_v44 = vadd.f32 %v1487_v43, %v1381_v42  ;;  %v1489_v46 = vpop.f32.mrb[6].mxu0  ;;  %v1385_v48 = vpop.f32.mrb[7].mxu1 }
 0x1d9   : > { %v2099_v47 = vadd.f32 %v1489_v46, %v1383_v45  ;;  %v1491_v49 = vpop.f32.mrb[7].mxu0 }
 0x1da   : > { %v2101_v50 = vadd.f32 %v1491_v49, %v1385_v48 }
 0x1ed   : > { %v1538_v57 = vpop.f32.mrb[8].mxu1 }
 0x1ee   : > { %v1528_v56 = vpop.f32.mrb[0].mxu0  ;;  %v2096_v60 = vadd.f32 %v2095_v41, %v1538_v57  ;;  %v1540_v62 = vpop.f32.mrb[9].mxu1 }
 0x1ef   : > { %v2091_v58 = vadd.f32 %v1528_v56, %v1369_v35  ;;  %v1530_v61 = vpop.f32.mrb[1].mxu0  ;;  %v2098_v1 = vadd.f32 %v2097_v44, %v1540_v62  ;;  %v1542_v3 = vpop.f32.mrb[10].mxu1 }
 0x1f0   : > { %v2092_v63 = vadd.f32 %v1530_v61, %v1371_v36  ;;  %v1532_v2 = vpop.f32.mrb[2].mxu0  ;;  %v2100_v5 = vadd.f32 %v2099_v47, %v1542_v3  ;;  %v1544_v7 = vpop.f32.mrb[11].mxu1  ;;  %v1590_v14 = vadd.f32 %v2096_v60, %v1579_v59 }
 0x1f1   : > { %v2093_v4 = vadd.f32 %v1532_v2, %v1373_v37  ;;  %v1534_v6 = vpop.f32.mrb[3].mxu0  ;;  %v2102_v9 = vadd.f32 %v2101_v50, %v1544_v7  ;;  %v1586_v10 = vadd.f32 %v2091_v58, %v1579_v59  ;;  %v1591_v16 = vadd.f32 %v2098_v1, %v1583_v0 }
 0x1f2   : > { %v2094_v8 = vadd.f32 %v1534_v6, %v1375_v38  ;;  %v1587_v12 = vadd.f32 %v2092_v63, %v1583_v0  ;;  %v1592_v18 = vadd.f32 %v2100_v5, %v1579_v59 }
 0x1f3   : > { %v1588_v11 = vadd.f32 %v2093_v4, %v1579_v59  ;;  %v1593_v20 = vadd.f32 %v2102_v9, %v1583_v0 }
 0x1f4   : > { %v1589_v13 = vadd.f32 %v2094_v8, %v1583_v0 }
 0x1f5   : > { %v1611_v15 = vadd.f32 %v1588_v11, %v1586_v10 }
 0x1f6   : > { %v1620_v17 = vadd.f32 %v1589_v13, %v1587_v12 }
 0x1f7   : > { %v1612_v19 = vadd.f32 %v1611_v15, %v1590_v14  ;;  %v2066_v15 = vld [vmem:[%s3018_s30 + $0x2] ss:$8 sm:$0x3] }
 0x1f8   : > { %v1621_v21 = vadd.f32 %v1620_v17, %v1591_v16 }
 0x1f9   : > { %v1613_v22 = vadd.f32 %v1612_v19, %v1592_v18 }
 0x1fa   : > { %v1622_v23 = vadd.f32 %v1621_v21, %v1593_v20 }
 0x1fb   : > { %v1614_v24 = vrot.slane %v1613_v22, 4 }
 0x1fc   : > { %v1623_v25 = vrot.slane %v1622_v23, 4 }
 0x1fd   : > { %v1615_v26 = vadd.f32 %v1614_v24, %v1613_v22 }
 0x1fe   : > { %v1624_v27 = vadd.f32 %v1623_v25, %v1622_v23 }
 0x1ff   : > { %v1616_v28 = vrot.slane %v1615_v26, 2 }
 0x200   : > { %v1625_v29 = vrot.slane %v1624_v27, 2 }
 0x201   : > { %v1617_v30 = vadd.f32 %v1616_v28, %v1615_v26 }
 0x202   : > { %v1626_v31 = vadd.f32 %v1625_v29, %v1624_v27 }
 0x203   : > { %v1618_v32 = vrot.slane %v1617_v30, 1 }
 0x204   : > { %v1627_v33 = vrot.slane %v1626_v31, 1 }
 0x205   : > { %v1619_v34 = vadd.f32 %v1618_v32, %v1617_v30 }
 0x206   : > { %v1628_v35 = vadd.f32 %v1627_v33, %v1626_v31 }
 0x207   : > { %v1629_v36 = vmul.f32 0.03125, %v1619_v34 }
 0x208   : > { %v1630_v37 = vmul.f32 0.03125, %v1628_v35 }
 0x209   : > { %v1631_v38 = vsub.f32 %v1586_v10, %v1629_v36  ;;  %v1633_v39 = vsub.f32 %v1588_v11, %v1629_v36  ;;  %v1635_v40 = vsub.f32 %v1590_v14, %v1629_v36  ;;  %v1637_v41 = vsub.f32 %v1592_v18, %v1629_v36  ;;  %v2065_v14 = vld [vmem:[%s3018_s30 + $0x1] ss:$8 sm:$0x3] }
 0x20a   : > { %v1632_v42 = vsub.f32 %v1587_v12, %v1630_v37  ;;  %v1634_v43 = vsub.f32 %v1589_v13, %v1630_v37  ;;  %v1636_v44 = vsub.f32 %v1591_v16, %v1630_v37  ;;  %v1638_v45 = vsub.f32 %v1593_v20, %v1630_v37 }
 0x20b   : > { %v1647_v46 = vmul.f32 %v1631_v38, %v1631_v38  ;;  %v1649_v47 = vmul.f32 %v1633_v39, %v1633_v39  ;;  %v1651_v50 = vmul.f32 %v1635_v40, %v1635_v40  ;;  %v1653_v56 = vmul.f32 %v1637_v41, %v1637_v41 }
 0x20c   : > { %v1648_v48 = vmul.f32 %v1632_v42, %v1632_v42  ;;  %v1650_v49 = vmul.f32 %v1634_v43, %v1634_v43  ;;  %v1652_v52 = vmul.f32 %v1636_v44, %v1636_v44  ;;  %v1654_v58 = vmul.f32 %v1638_v45, %v1638_v45 }
 0x20d   : > { %v1655_v51 = vadd.f32 %v1649_v47, %v1647_v46  ;;  %v1693_v16 = vrot.slane %v2065_v14, %v3016_v53  ;;  %v1714_v18 = vrot.slane %v2066_v15, %v3016_v53  ;;  %v1697_v19 = vrot.slane %v2065_v14, %v3021_v55 }
 0x20e   : > { %v1664_v54 = vadd.f32 %v1650_v49, %v1648_v48  ;;  %v1718_v20 = vrot.slane %v2066_v15, %v3021_v55 }
 0x20f   : > { %v1656_v57 = vadd.f32 %v1655_v51, %v1651_v50 }
 0x210   : > { %v1665_v59 = vadd.f32 %v1664_v54, %v1652_v52 }
 0x211   : > { %v1657_v60 = vadd.f32 %v1656_v57, %v1653_v56 }
 0x212   : > { %v1666_v61 = vadd.f32 %v1665_v59, %v1654_v58 }
 0x213   : > { %v1658_v62 = vrot.slane %v1657_v60, 4 }
 0x214   : > { %v1667_v63 = vrot.slane %v1666_v61, 4 }
 0x215   : > { %v1659_v0 = vadd.f32 %v1658_v62, %v1657_v60 }
 0x216   : > { %v1668_v1 = vadd.f32 %v1667_v63, %v1666_v61 }
 0x217   : > { %v1660_v2 = vrot.slane %v1659_v0, 2 }
 0x218   : > { %v1669_v3 = vrot.slane %v1668_v1, 2 }
 0x219   : > { %v1661_v4 = vadd.f32 %v1660_v2, %v1659_v0 }
 0x21a   : > { %v1670_v5 = vadd.f32 %v1669_v3, %v1668_v1 }
 0x21b   : > { %v1662_v6 = vrot.slane %v1661_v4, 1 }
 0x21c   : > { %v1671_v7 = vrot.slane %v1670_v5, 1 }
 0x21d   : > { %v1663_v8 = vadd.f32 %v1662_v6, %v1661_v4 }
 0x21e   : > { %v1672_v9 = vadd.f32 %v1671_v7, %v1670_v5 }
 0x21f   : > { %v1673_v10 = vmul.f32 0.03125, %v1663_v8 }
 0x220   : > { %v1674_v11 = vmul.f32 0.03125, %v1672_v9 }
 0x221   : > { %v1675_v12 = vadd.f32 1e-05, %v1673_v10 }
 0x222   : > { %v1676_v13 = vadd.f32 1e-05, %v1674_v11 }
 0x223   : > { %2454 = vrsqrt.f32 %v1675_v12 }
 0x224   : > { %2456 = vrsqrt.f32 %v1676_v13 }
 0x22d   : > { %v2455_v17 = vpop.eup %2454 }
 0x22e   : > { %v2457_v21 = vpop.eup %2456  ;;  %v1679_v22 = vmul.f32 %v2455_v17, %v1631_v38  ;;  %v1681_v23 = vmul.f32 %v2455_v17, %v1633_v39  ;;  %v1683_v24 = vmul.f32 %v2455_v17, %v1635_v40  ;;  %v1685_v25 = vmul.f32 %v2455_v17, %v1637_v41 }
 0x22f   : > { %v1680_v26 = vmul.f32 %v2457_v21, %v1632_v42  ;;  %v1682_v27 = vmul.f32 %v2457_v21, %v1634_v43  ;;  %v1684_v28 = vmul.f32 %v2457_v21, %v1636_v44  ;;  %v1686_v29 = vmul.f32 %v2457_v21, %v1638_v45 }
 0x230   : > { %v1700_v30 = vmul.f32 %v1693_v16, %v1679_v22  ;;  %v1702_v31 = vmul.f32 %v1693_v16, %v1681_v23  ;;  %v1704_v32 = vmul.f32 %v1693_v16, %v1683_v24  ;;  %v1706_v33 = vmul.f32 %v1693_v16, %v1685_v25 }
 0x231   : > { %v1701_v53 = vmul.f32 %v1697_v19, %v1680_v26  ;;  %v1703_v34 = vmul.f32 %v1697_v19, %v1682_v27  ;;  %v1705_v35 = vmul.f32 %v1697_v19, %v1684_v28  ;;  %v1707_v36 = vmul.f32 %v1697_v19, %v1686_v29 }
 0x232   : > { %v1721_v55 = vadd.f32 %v1714_v18, %v1700_v30  ;;  %v1723_v37 = vadd.f32 %v1714_v18, %v1702_v31  ;;  %v1725_v38 = vadd.f32 %v1714_v18, %v1704_v32  ;;  %v1727_v39 = vadd.f32 %v1714_v18, %v1706_v33 }
 0x233   : > { %v1722_v40 = vadd.f32 %v1718_v20, %v1701_v53  ;;  %v1724_v41 = vadd.f32 %v1718_v20, %v1703_v34  ;;  %v1726_v42 = vadd.f32 %v1718_v20, %v1705_v35  ;;  %v1728_v43 = vadd.f32 %v1718_v20, %v1707_v36 }
 0x234   : > { %v1729_v44 = vmax.f32 %v1721_v55, 0.0  ;;  %v1731_v45 = vmax.f32 %v1723_v37, 0.0  ;;  %v1733_v46 = vmax.f32 %v1725_v38, 0.0  ;;  %v1735_v47 = vmax.f32 %v1727_v39, 0.0 }
 0x235   : > { %v1730_v48 = vmax.f32 %v1722_v40, 0.0  ;;  %v1732_v49 = vmax.f32 %v1724_v41, 0.0  ;;  %v1734_v50 = vmax.f32 %v1726_v42, 0.0  ;;  %v1736_v51 = vmax.f32 %v1728_v43, 0.0 }
 0x236   : > { %1737 = vst [vmem:[%s277_s25] sm:$0xff] %v1729_v44  ;;  %1739 = vst [vmem:[%s277_s25 + $0x10] sm:$0xff] %v1731_v45 }
 0x237   : > { %1741 = vst [vmem:[%s277_s25 + $0x20] sm:$0xff] %v1733_v46  ;;  %1743 = vst [vmem:[%s277_s25 + $0x30] sm:$0xff] %v1735_v47 }
 0x238   : > { %1738 = vst [vmem:[%s277_s25 + $0x8] sm:$0xff] %v1730_v48  ;;  %1740 = vst [vmem:[%s277_s25 + $0x18] sm:$0xff] %v1732_v49 }
 0x239   : > { %1742 = vst [vmem:[%s277_s25 + $0x28] sm:$0xff] %v1734_v50  ;;  %1744 = vst [vmem:[%s277_s25 + $0x38] sm:$0xff] %v1736_v51 }
 0x23a   : > { %2559 = shalt.err (!%p2556_p8)
}
 0x23b   : > { %s2560_s18 = scalar_lea.hbm %s3036_s23, 1024  ;;  %s2564_s6 = scalar_lea.hbm %s3090_s3, 2048 }
 0x23c   : > { %p2561_p10 = scmp.ne.s32.totalorder %s3036_s23, %s2560_s18  ;;  %p2565_p3 = scmp.lt.u32.totalorder %s3036_s23, %s3090_s3 }
 0x23d   : > { %p2566_p2 = scmp.lt.u32.totalorder %s2564_s6, %s2560_s18  ;;  %p2568_p4 = scmp.lt.u32.totalorder %s2560_s18, %s3036_s23 }
 0x23e   : > { %p2562_p13 = pnand %p2561_p10, %p3115_p6 }
 0x23f   : > { %p2567_p11 = por %p2566_p2, %p2565_p3 }
 0x240   : > { %p2563_p7 = pneg %p2562_p13 }
 0x241   : > { %p2569_p1 = por %p2568_p4, %p2567_p11 }
 0x243   : > { %p2570_p12 = pnand %p2569_p1, %p2563_p7 }
 0x245   : > { %2573 = shalt.err (!%p2570_p12)
}
 0x246   : > { %s2644_s30 = smov 256   ;;  %s2645_s7 = smov 512  }
 0x247   : > { %s2646_s8 = smov 16  }
 0x248   : > { %2133 = dma.vmem_to_hbm [thread:$0]  (%p3115_p6), %s3038_s27, 1024, %s3036_s23, %s1746_s15, %s2644_s30, %s2645_s7, %s2646_s8  }
 0x249 PF: > { %s1777_s25 = sand.u32 1, %s2612_s12   ;;  %p3116_p0 = scmp.ne.s32.totalorder %s3105_s4, 0 }
 0x24a   : > { %p3117_p9 = scmp.ge.s32.totalorder %s2632_s17, 2  ;;  %s1778_s22 = scalar_lea.sflag [#allocation5], %s1777_s25 }
 0x24c   : > { %p2147_p5 = pnand %p3117_p9, %p3116_p0 }
 0x24e   : > { %2607 = dma.done.wait (!%p2147_p5), %s1778_s22, 1024  }
 0x24f   : > { %2609 = vsyncadd (!%p2147_p5), %s1778_s22, 4294966272  ;;  %s20_s17 = sadd.s32 1, %s2632_s17   ;;  %s3118_s28 = sld [smem:[#allocation13_spill]] }
 0x250   : > { %p17_p8 = scmp.ge.s32.totalorder %s20_s17, 4   ;;  %s3119_s12 = smov %s2616_s13 }
 0x251   : > { %s3120_s13 = smov %s2620_s14  ;;  %s3121_s14 = smov %s2715_s24 }
 0x252   : > { %s3122_s15 = smov %s2628_s16  ;;  %19 = sbr.rel (!%p17_p8) target bundleno = 9 (0x9), region = 104 }
 0x255   : > { %s3123_s16 = smov %s3118_s28 }
 0x259   :  { %1783 = vsyncpa [#allocation4], 1 }
 0x25a   :  { %1785 = vsyncpa [#allocation4 + $0x1], 1 }
 0x25b   :  { %1786 = vsyncpa [#allocation7], 1 }
 0x25c   :  { %1788 = vsyncpa [#allocation7 + $0x1], 1 }
 0x25d   :  { %1789 = vsyncpa [#allocation5], 1 }
 0x25e   :  { %1791 = vsyncpa [#allocation5 + $0x1], 1 }

// kernel: up_dense_1_softmax_forward.9
= control target key start
LH: loop header
LB: loop body
LE: loop exit
PB: predicated region body
PF: predicated region fallthrough
CT: control target
= control target key end

     0   :  { %s4862_s0 = inlined_call_operand.hbm [shape: bf16[32,2304], index: 0, kind: input, shape index: {}]   ;;  %s4863_s1 = inlined_call_operand.hbm [shape: bf16[2304,512], index: 1, kind: input, shape index: {}]   ;;  %s4864_s2 = inlined_call_operand.hbm [shape: f32[8,512], index: 2, kind: input, shape index: {}]   ;;  %s4865_s3 = inlined_call_operand.hbm [shape: f32[32,512], index: 3, kind: output, shape index: {}]  }
   0x1   :  { %4874 = sst [smem:[#allocation14_spill]] %s4863_s1 }
   0x2   :  { %8 = vsyncpa [#allocation4], 0 }
   0x3   :  { %9 = vsyncpa [#allocation7], 0 }
   0x4   :  { %11 = vsyncpa [#allocation7 + $0x1], 0 }
   0x5   :  { %12 = vsyncpa [#allocation5], 0 }
   0x6   :  { %14 = vsyncpa [#allocation5 + $0x1], 0  ;;  %s4298_s12 = smov 0   ;;  %s4300_s13 = smov 0  }
   0x7   :  { %s4302_s14 = smov 0   ;;  %s4304_s15 = smov 0  }
   0x8   :  { %s4306_s16 = smov 0   ;;  %s4308_s17 = smov 0  }
   0x9 LB: > { %s35_s18 = sadd.s32 1, %s4260_s16  ;;  %s76_s19 = sadd.s32 1, %s4252_s14  ;;  %s4264_s17 = sphi %s4308_s17, %s20_s17   ;;  %s4260_s16 = sphi %s4306_s16, %s4898_s16   ;;  %s4256_s15 = sphi %s4304_s15, %s4897_s15   ;;  %s4252_s14 = sphi %s4302_s14, %s4896_s14   ;;  %s4248_s13 = sphi %s4300_s13, %s4895_s13   ;;  %s4244_s12 = sphi %s4298_s12, %s4894_s12  }
   0xa   : > { %p37_p0 = scmp.ge.s32.totalorder %s35_s18, 2  ;;  %p83_p1 = scmp.ne.s32.totalorder %s4252_s14, %s4248_s13 }
   0xb   : > { %p84_p2 = scmp.eq.s32.totalorder %s4264_s17, 0  ;;  %p3540_p5 = scmp.lt.s32.totalorder %s4264_s17, 2 }
   0xc   : > { %s4900_s18 = smov (%p37_p0, %s35_s18), 0  ;;  %s186_s21 = sand.u32 1, %s4264_s17  }
   0xd   : > { %4875 = sst [smem:[#allocation13_spill]] %s4900_s18  ;;  %p85_p4 = por %p84_p2, %p83_p1 }
   0xe   : > { %s72_s20 = ssub.s32 %s4260_s16, %s4900_s18  ;;  %s188_s22 = sand.u32 1, %s4252_s14  }
   0xf   : > { %p74_p6 = scmp.eq.s32.totalorder %s72_s20, 0  ;;  %s3413_s23 = sshll.u32 %s4260_s16, 7 }
  0x10   : > { %s3512_s25 = smul.u32 2304, %s188_s22  ;;  %s4876_s1 = sld [smem:[#allocation14_spill]] }
  0x11   : > { %s4346_s24 = scalar_select %p74_p6, %s4252_s14, %s76_s19  }
  0x12   : > { %p4355_p7 = pnand %p3540_p5, %p85_p4  ;;  %s190_s30 = scalar_lea.vmem [#allocation6], %s3512_s25 }
  0x13   : > { %s200_s4 = sshll.u32 %s190_s30, 4  ;;  %s4361_s5 = scalar_lea.sflag [#allocation7], %s186_s21  ;;  %s4359_s4 = int_to_ptr.vmem [resolvable:$true] %s200_s4 }
  0x14   : > { %s4877_s29 = scalar_select %p4355_p7, 1, 0 }
  0x15   : > { %p4868_p9 = pneg %p4355_p7 }
  0x16   : > { %s4353_s28 = scalar_lea.hbm %s4876_s1, %s3413_s23  ;;  %s4095_s9 = scalar_lea.hbm %s4876_s1, 73728 }
  0x17   : > { %s4090_s6 = scalar_lea.hbm %s4353_s28, 36864  ;;  %p4096_p12 = scmp.lt.u32.totalorder %s4353_s28, %s4876_s1 }
  0x18   : > { %p4091_p8 = scmp.ne.s32.totalorder %s4353_s28, %s4090_s6  ;;  %p4097_p13 = scmp.lt.u32.totalorder %s4095_s9, %s4090_s6 }
  0x19   : > { %p4099_p2 = scmp.lt.u32.totalorder %s4090_s6, %s4353_s28 }
  0x1a   : > { %p4093_p10 = pnand %p4868_p9, %p4091_p8  ;;  %p4098_p0 = por %p4097_p13, %p4096_p12 }
  0x1c   : > { %p4094_p11 = pneg %p4093_p10  ;;  %p4100_p4 = por %p4099_p2, %p4098_p0 }
  0x1e   : > { %p4101_p5 = pnand %p4100_p4, %p4094_p11 }
  0x20   : > { %4104 = shalt.err (!%p4101_p5)
}
  0x21   : > { %s4105_s19 = scalar_lea.vmem %s4359_s4, 36864  ;;  %s4266_s20 = smov [#allocation6]  }
  0x22   : > { %p4106_p6 = scmp.ne.s32.totalorder %s4359_s4, %s4105_s19  ;;  %s4110_s21 = sshll.u32 %s4266_s20, 4  ;;  %s4111_s21 = int_to_ptr.vmem [resolvable:$false] %s4110_s21 }
  0x23   : > { %s4112_s23 = scalar_lea.vmem %s4111_s21, 73728  ;;  %p4113_p3 = scmp.lt.s32.totalorder %s4359_s4, %s4111_s21 }
  0x24   : > { %p4108_p8 = pnand %p4106_p6, %p4868_p9  ;;  %p4114_p12 = scmp.lt.s32.totalorder %s4112_s23, %s4105_s19 }
  0x26   : > { %p4109_p10 = pneg %p4108_p8  ;;  %p4115_p13 = por %p4114_p12, %p4113_p3 }
  0x28   : > { %p4116_p0 = pnand %p4115_p13, %p4109_p10 }
  0x2a   : > { %4119 = shalt.err (!%p4116_p0)
}
  0x2b   : > { %s4267_s25 = smov 256   ;;  %s4268_s26 = smov 128  }
  0x2c   : > { %s4269_s27 = smov 8   ;;  %s4390_s30 = sadd.s32 4294967295, %s4264_s17  }
  0x2d   : > { %3531 = dma.hbm_to_vmem [thread:$0]  (!%p4355_p7), %s4353_s28, 36864, %s4359_s4, %s4361_s5, %s4267_s25, %s4268_s26, %s4269_s27  }
  0x2e   : > { %s3069_s6 = sadd.s32 4294967294, %s4264_s17   ;;  %p89_p3 = scmp.ne.s32.totalorder %s4248_s13, %s4244_s12 }
  0x2f   : > { %p4867_p11 = scmp.eq.s32.totalorder %s4390_s30, 0  ;;  %p141_p2 = scmp.eq.s32.totalorder %s4390_s30, 1 }
  0x30   : > { %p147_p4 = scmp.eq.s32.totalorder %s3069_s6, 1  ;;  %p3070_p6 = scmp.ge.s32.totalorder %s4264_s17, 1 }
  0x31   : > { %p4399_p5 = por %p4867_p11, %p89_p3  ;;  %p4407_p8 = por %p141_p2, %p83_p1 }
  0x32   : > { %p4411_p10 = por %p147_p4, %p89_p3  ;;  %p154_p12 = scmp.lt.s32.totalorder %s4264_s17, 3 }
  0x33   : > { %s4878_s7 = scalar_select %p4399_p5, 1, 0 }
  0x34   : > { %s4879_s28 = scalar_select %p4407_p8, 1, 0 }
  0x35   : > { %s4880_s4 = scalar_select %p4411_p10, 1, 0 }
  0x36   : > { %p4416_p13 = pnand %p3070_p6, %p154_p12  ;;  %s4270_s9 = smov [#allocation3]  }
  0x37   : > { %s172_s10 = sshll.u32 %s4270_s9, 4  ;;  %s3075_s11 = sshll.u32 %s188_s22, 4  ;;  %s4420_s10 = int_to_ptr.vmem [resolvable:$true] %s172_s10 }
  0x38   : > { %s4881_s8 = scalar_select %p4416_p13, 1, 0 }
  0x39   : > { %p3524_p0 = pneg %p4416_p13  ;;  %s3414_s19 = sshll.u32 %s4260_s16, 8 }
  0x3a   : > { %s4436_s25 = scalar_lea.hbm %s4864_s2, %s3414_s19  ;;  %s214_s26 = scalar_lea.vmem [#allocation8], %s3075_s11 }
  0x3b   : > { %p4429_p1 = pnand %p3524_p0, %p4867_p11  ;;  %s222_s27 = sshll.u32 %s214_s26, 4  ;;  %s4438_s27 = int_to_ptr.vmem [resolvable:$true] %s222_s27 }
  0x3c   : > { %s4120_s22 = scalar_lea.hbm %s4862_s0, 4608 }
  0x3d   : > { %p4121_p3 = scmp.ne.s32.totalorder %s4862_s0, %s4120_s22  ;;  %p4122_p2 = pneg %p4429_p1 }
  0x3e   : > { %p4127_p12 = scmp.lt.u32.totalorder %s4120_s22, %s4862_s0 }
  0x3f   : > { %p4123_p4 = pnand %p4122_p2, %p4121_p3 }
  0x41   : > { %p4124_p6 = pneg %p4123_p4 }
  0x43   : > { %p4129_p0 = pnand %p4127_p12, %p4124_p6 }
  0x45   : > { %4132 = shalt.err (!%p4129_p0)
}
  0x46   : > { %s4133_s11 = scalar_lea.vmem %s4420_s10, 4608  ;;  %p4141_p8 = scmp.lt.s32.totalorder %s4420_s10, %s4420_s10 }
  0x47   : > { %p4134_p11 = scmp.ne.s32.totalorder %s4420_s10, %s4133_s11  ;;  %p4142_p5 = scmp.lt.s32.totalorder %s4133_s11, %s4133_s11 }
  0x49   : > { %p4136_p9 = pnand %p4134_p11, %p4122_p2  ;;  %p4143_p13 = por %p4142_p5, %p4141_p8 }
  0x4b   : > { %p4137_p10 = pneg %p4136_p9 }
  0x4d   : > { %p4144_p7 = pnand %p4143_p13, %p4137_p10 }
  0x4f   : > { %4147 = shalt.err (!%p4144_p7)
}
  0x50   : > { %s4271_s1 = smov 1152   ;;  %s4272_s18 = smov 72  }
  0x51   : > { %3527 = dma.hbm_to_vmem [thread:$0]  (!%p4429_p1), %s4862_s0, 4608, %s4420_s10, [#allocation4], %s4271_s1, %s4271_s1, %s4272_s18  }
  0x52   : > { %s4148_s6 = scalar_lea.hbm %s4436_s25, 256  ;;  %p4883_p11 = scmp.ne.s32.totalorder %s4877_s29, 0 }
  0x53   : > { %p4149_p9 = scmp.ne.s32.totalorder %s4436_s25, %s4148_s6  ;;  %s4153_s21 = scalar_lea.hbm %s4864_s2, 512 }
  0x54   : > { %p4884_p5 = pneg %p4883_p11  ;;  %p4154_p10 = scmp.lt.u32.totalorder %s4436_s25, %s4864_s2 }
  0x55   : > { %p4155_p13 = scmp.lt.u32.totalorder %s4153_s21, %s4148_s6  ;;  %p4157_p2 = scmp.lt.u32.totalorder %s4148_s6, %s4436_s25 }
  0x56   : > { %p4151_p8 = pnand %p4149_p9, %p4884_p5 }
  0x57   : > { %p4156_p3 = por %p4155_p13, %p4154_p10 }
  0x58   : > { %p4152_p7 = pneg %p4151_p8 }
  0x59   : > { %p4158_p4 = por %p4157_p2, %p4156_p3 }
  0x5b   : > { %p4159_p6 = pnand %p4158_p4, %p4152_p7 }
  0x5d   : > { %4162 = shalt.err (!%p4159_p6)
}
  0x5e   : > { %s4163_s10 = scalar_lea.vmem %s4438_s27, 256  ;;  %p4885_p12 = pmov %p4884_p5 }
  0x5f   : > { %p4164_p1 = scmp.ne.s32.totalorder %s4438_s27, %s4163_s10  ;;  %s4273_s20 = smov [#allocation8]  }
  0x60   : > { %s4168_s1 = sshll.u32 %s4273_s20, 4  ;;  %s4169_s1 = int_to_ptr.vmem [resolvable:$false] %s4168_s1 }
  0x61   : > { %p4166_p0 = pnand %p4164_p1, %p4885_p12  ;;  %s4170_s18 = scalar_lea.vmem %s4169_s1, 512 }
  0x62   : > { %p4171_p5 = scmp.lt.s32.totalorder %s4438_s27, %s4169_s1  ;;  %p4172_p8 = scmp.lt.s32.totalorder %s4170_s18, %s4163_s10 }
  0x63   : > { %p4167_p9 = pneg %p4166_p0 }
  0x64   : > { %p4173_p10 = por %p4172_p8, %p4171_p5 }
  0x66   : > { %p4174_p13 = pnand %p4173_p10, %p4167_p9 }
  0x68   : > { %4177 = shalt.err (!%p4174_p13)
}
  0x69   : > { %3534 = dma.hbm_to_vmem [thread:$0]  (!%p4883_p11), %s4436_s25, 256, %s4438_s27, %s4361_s5  }
  0x6a   : > { %p4886_p7 = scmp.ne.s32.totalorder %s4881_s8, 0 }
  0x6b   : > { %p4887_p3 = scmp.eq.s32.totalorder (!%p4886_p7), %s4390_s30, 0 }
  0x6c   : > { %231 = sbr.rel (%p4886_p7) target bundleno = 745 (0x2e9), region = 32 }
  0x73   : > { %4231 = dma.done.wait (%p4887_p3), [#allocation4], 4608   ;;  %p4888_p2 = pmov %p4887_p3 }
  0x74   : > { %s237_s19 = sand.u32 1, %s4390_s30   ;;  %s4493_s26 = sand.u32 1, %s4248_s13  }
  0x75   : > { %4233 = vsyncadd (%p4888_p2), [#allocation4], 4294962688  ;;  %s3513_s29 = smul.u32 2304, %s4493_s26  ;;  %s238_s6 = scalar_lea.sflag [#allocation7], %s237_s19 }
  0x76   : > { %p4889_p11 = scmp.ne.s32.totalorder %s4878_s7, 0 }
  0x77   : > { %s4496_s9 = scalar_lea.vmem [#allocation6], %s3513_s29 }
  0x78   : > { %4235 = dma.done.wait (%p4889_p11), %s238_s6, 37120  }
  0x79   : > { %4237 = vsyncadd (%p4889_p11), %s238_s6, 4294930176  ;;  %v3600_v0 = vld [vmem:[%s4496_s9 + $0x4] ss:$8 sps:$4 sm:$0xff]   ;;  %v3604_v2 = vld [vmem:[%s4496_s9] ss:$8 sps:$4 sm:$0xff]   ;;  %s3080_s5 = sshll.u32 %s4493_s26, 4 }
  0x7a   : > { %v3602_v1 = vld [vmem:[%s4496_s9 + $0x404] ss:$8 sps:$4 sm:$0xff]   ;;  %2249 = vmatprep.subr.bf16.mxu1 %v3600_v0  ;;  %v3605_v3 = vld [vmem:[%s4496_s9 + $0x400] ss:$8 sps:$4 sm:$0xff]   ;;  %v3606_v4 = vld [vmem:[%s4496_s9 + $0x14] ss:$8 sps:$4 sm:$0xff]  }
  0x7b   : > { %2461 = vmatprep.subr.bf16.mxu0 %v3602_v1  ;;  %2250 = vmatpush1.bf16.msra.mxu1 %v3604_v2  ;;  %v3608_v5 = vld [vmem:[%s4496_s9 + $0x414] ss:$8 sps:$4 sm:$0xff]   ;;  %v3610_v6 = vld [vmem:[%s4496_s9 + $0x10] ss:$8 sps:$4 sm:$0xff]   ;;  %v3612_v8 = vld [vmem:[%s4496_s9 + $0x24] ss:$8 sps:$4 sm:$0xff]  }
  0x7c   : > { %2462 = vmatpush1.bf16.msra.mxu0 %v3605_v3  ;;  %2251 = vmatprep.subr.bf16.mxu1 %v3606_v4  ;;  %v3611_v7 = vld [vmem:[%s4496_s9 + $0x410] ss:$8 sps:$4 sm:$0xff]   ;;  %v3614_v9 = vld [vmem:[%s4496_s9 + $0x424] ss:$8 sps:$4 sm:$0xff]   ;;  %v3616_v10 = vld [vmem:[%s4496_s9 + $0x20] ss:$8 sps:$4 sm:$0xff]  }
  0x7d   : > { %2463 = vmatprep.subr.bf16.mxu0 %v3608_v5  ;;  %v3617_v11 = vld [vmem:[%s4496_s9 + $0x420] ss:$8 sps:$4 sm:$0xff]   ;;  %v3618_v12 = vld [vmem:[%s4496_s9 + $0x34] ss:$8 sps:$4 sm:$0xff]   ;;  %v3622_v14 = vld [vmem:[%s4496_s9 + $0x30] ss:$8 sps:$4 sm:$0xff]  }
  0x7e   : > { %v3620_v13 = vld [vmem:[%s4496_s9 + $0x434] ss:$8 sps:$4 sm:$0xff]   ;;  %v3623_v15 = vld [vmem:[%s4496_s9 + $0x430] ss:$8 sps:$4 sm:$0xff]   ;;  %v3624_v16 = vld [vmem:[%s4496_s9 + $0x44] ss:$8 sps:$4 sm:$0xff]  }
  0x7f   : > { %2252 = vmatpush1.bf16.msra.mxu1 %v3610_v6  ;;  %v3626_v17 = vld [vmem:[%s4496_s9 + $0x444] ss:$8 sps:$4 sm:$0xff]   ;;  %v3628_v18 = vld [vmem:[%s4496_s9 + $0x40] ss:$8 sps:$4 sm:$0xff]   ;;  %v3630_v20 = vld [vmem:[%s4496_s9 + $0x54] ss:$8 sps:$4 sm:$0xff]  }
  0x80   : > { %2464 = vmatpush1.bf16.msra.mxu0 %v3611_v7  ;;  %2253 = vmatprep.subr.bf16.mxu1 %v3612_v8  ;;  %v3629_v19 = vld [vmem:[%s4496_s9 + $0x440] ss:$8 sps:$4 sm:$0xff]   ;;  %v3632_v21 = vld [vmem:[%s4496_s9 + $0x454] ss:$8 sps:$4 sm:$0xff]   ;;  %v3634_v22 = vld [vmem:[%s4496_s9 + $0x50] ss:$8 sps:$4 sm:$0xff]  }
  0x81   : > { %2465 = vmatprep.subr.bf16.mxu0 %v3614_v9  ;;  %v3635_v23 = vld [vmem:[%s4496_s9 + $0x450] ss:$8 sps:$4 sm:$0xff]   ;;  %v3636_v24 = vld [vmem:[%s4496_s9 + $0x64] ss:$8 sps:$4 sm:$0xff]   ;;  %v3640_v26 = vld [vmem:[%s4496_s9 + $0x60] ss:$8 sps:$4 sm:$0xff]  }
  0x82   : > { %v3638_v25 = vld [vmem:[%s4496_s9 + $0x464] ss:$8 sps:$4 sm:$0xff]   ;;  %v3641_v27 = vld [vmem:[%s4496_s9 + $0x460] ss:$8 sps:$4 sm:$0xff]   ;;  %v3642_v28 = vld [vmem:[%s4496_s9 + $0x74] ss:$8 sps:$4 sm:$0xff]  }
  0x83   : > { %2254 = vmatpush1.bf16.msra.mxu1 %v3616_v10  ;;  %v3644_v29 = vld [vmem:[%s4496_s9 + $0x474] ss:$8 sps:$4 sm:$0xff]   ;;  %v3646_v30 = vld [vmem:[%s4496_s9 + $0x70] ss:$8 sps:$4 sm:$0xff]   ;;  %v3648_v32 = vld [vmem:[%s4496_s9 + $0x84] ss:$8 sps:$4 sm:$0xff]  }
  0x84   : > { %2466 = vmatpush1.bf16.msra.mxu0 %v3617_v11  ;;  %2255 = vmatprep.subr.bf16.mxu1 %v3618_v12  ;;  %v3647_v31 = vld [vmem:[%s4496_s9 + $0x470] ss:$8 sps:$4 sm:$0xff]   ;;  %v3650_v33 = vld [vmem:[%s4496_s9 + $0x484] ss:$8 sps:$4 sm:$0xff]   ;;  %v3652_v34 = vld [vmem:[%s4496_s9 + $0x80] ss:$8 sps:$4 sm:$0xff]  }
  0x85   : > { %2467 = vmatprep.subr.bf16.mxu0 %v3620_v13  ;;  %v3653_v35 = vld [vmem:[%s4496_s9 + $0x480] ss:$8 sps:$4 sm:$0xff]   ;;  %v3654_v36 = vld [vmem:[%s4496_s9 + $0x94] ss:$8 sps:$4 sm:$0xff]   ;;  %v3658_v38 = vld [vmem:[%s4496_s9 + $0x90] ss:$8 sps:$4 sm:$0xff]  }
  0x86   : > { %v3656_v37 = vld [vmem:[%s4496_s9 + $0x494] ss:$8 sps:$4 sm:$0xff]   ;;  %v3659_v39 = vld [vmem:[%s4496_s9 + $0x490] ss:$8 sps:$4 sm:$0xff]   ;;  %v3660_v40 = vld [vmem:[%s4496_s9 + $0xa4] ss:$8 sps:$4 sm:$0xff]  }
  0x87   : > { %2256 = vmatpush1.bf16.msra.mxu1 %v3622_v14  ;;  %v3662_v41 = vld [vmem:[%s4496_s9 + $0x4a4] ss:$8 sps:$4 sm:$0xff]   ;;  %v3664_v42 = vld [vmem:[%s4496_s9 + $0xa0] ss:$8 sps:$4 sm:$0xff]   ;;  %v3666_v44 = vld [vmem:[%s4496_s9 + $0xb4] ss:$8 sps:$4 sm:$0xff]  }
  0x88   : > { %2468 = vmatpush1.bf16.msra.mxu0 %v3623_v15  ;;  %2257 = vmatprep.subr.bf16.mxu1 %v3624_v16  ;;  %v3665_v43 = vld [vmem:[%s4496_s9 + $0x4a0] ss:$8 sps:$4 sm:$0xff]   ;;  %v3668_v45 = vld [vmem:[%s4496_s9 + $0x4b4] ss:$8 sps:$4 sm:$0xff]   ;;  %v3670_v46 = vld [vmem:[%s4496_s9 + $0xb0] ss:$8 sps:$4 sm:$0xff]  }
  0x89   : > { %2469 = vmatprep.subr.bf16.mxu0 %v3626_v17  ;;  %v3671_v47 = vld [vmem:[%s4496_s9 + $0x4b0] ss:$8 sps:$4 sm:$0xff]   ;;  %v3698_v48 = vld [vmem:[#allocation3 + $0x4] ss:$72 sps:$4 sm:$0xff]   ;;  %v3676_v52 = vld [vmem:[%s4496_s9 + $0xc0] ss:$8 sps:$4 sm:$0xff]  }
  0x8a   : > { %v3672_v49 = vld [vmem:[%s4496_s9 + $0xc4] ss:$8 sps:$4 sm:$0xff]   ;;  %2281 = vmatprep.mubr.bf16.mxu1 %v3698_v48  ;;  %v3677_v53 = vld [vmem:[%s4496_s9 + $0x4c0] ss:$8 sps:$4 sm:$0xff]   ;;  %v3678_v54 = vld [vmem:[%s4496_s9 + $0xd4] ss:$8 sps:$4 sm:$0xff]  }
  0x8b   : > { %2258 = vmatpush1.bf16.msra.mxu1 %v3628_v18  ;;  %v3674_v50 = vld [vmem:[%s4496_s9 + $0x4c4] ss:$8 sps:$4 sm:$0xff]   ;;  %v3680_v55 = vld [vmem:[%s4496_s9 + $0x4d4] ss:$8 sps:$4 sm:$0xff]   ;;  %v3682_v56 = vld [vmem:[%s4496_s9 + $0xd0] ss:$8 sps:$4 sm:$0xff]  }
  0x8c   : > { %2470 = vmatpush1.bf16.msra.mxu0 %v3629_v19  ;;  %2259 = vmatprep.subr.bf16.mxu1 %v3630_v20  ;;  %v3704_v51 = vld [vmem:[#allocation3 + $0x24] ss:$72 sps:$4 sm:$0xff]   ;;  %v3683_v57 = vld [vmem:[%s4496_s9 + $0x4d0] ss:$8 sps:$4 sm:$0xff]   ;;  %v3688_v60 = vld [vmem:[%s4496_s9 + $0xe0] ss:$8 sps:$4 sm:$0xff]  }
  0x8d   : > { %2471 = vmatprep.subr.bf16.mxu0 %v3632_v21  ;;  %2493 = vmatprep.mubr.bf16.mxu0 %v3704_v51  ;;  %v3684_v58 = vld [vmem:[%s4496_s9 + $0xe4] ss:$8 sps:$4 sm:$0xff]   ;;  %v3689_v61 = vld [vmem:[%s4496_s9 + $0x4e0] ss:$8 sps:$4 sm:$0xff]   ;;  %v3690_v62 = vld [vmem:[%s4496_s9 + $0xf4] ss:$8 sps:$4 sm:$0xff]  }
  0x8e   : > { %v3686_v59 = vld [vmem:[%s4496_s9 + $0x4e4] ss:$8 sps:$4 sm:$0xff]   ;;  %v3692_v63 = vld [vmem:[%s4496_s9 + $0x4f4] ss:$8 sps:$4 sm:$0xff]   ;;  %v3694_v0 = vld [vmem:[%s4496_s9 + $0xf0] ss:$8 sps:$4 sm:$0xff]  }
  0x8f   : > { %2260 = vmatpush1.bf16.msra.mxu1 %v3634_v22  ;;  %v3695_v1 = vld [vmem:[%s4496_s9 + $0x4f0] ss:$8 sps:$4 sm:$0xff]   ;;  %v3701_v2 = vld [vmem:[%s4496_s9 + $0x104] ss:$8 sps:$4 sm:$0xff]   ;;  %v3696_v4 = vld [vmem:[#allocation3] ss:$72 sps:$4 sm:$0xff]  }
  0x90   : > { %2472 = vmatpush1.bf16.msra.mxu0 %v3635_v23  ;;  %2261 = vmatprep.subr.bf16.mxu1 %v3636_v24  ;;  %v3707_v3 = vld [vmem:[%s4496_s9 + $0x504] ss:$8 sps:$4 sm:$0xff]   ;;  %v3699_v5 = vld [vmem:[%s4496_s9 + $0x100] ss:$8 sps:$4 sm:$0xff]   ;;  %v3710_v8 = vld [vmem:[%s4496_s9 + $0x114] ss:$8 sps:$4 sm:$0xff]  }
  0x91   : > { %2473 = vmatprep.subr.bf16.mxu0 %v3638_v25  ;;  %v3702_v6 = vld [vmem:[#allocation3 + $0x20] ss:$72 sps:$4 sm:$0xff]   ;;  %v3713_v9 = vld [vmem:[%s4496_s9 + $0x514] ss:$8 sps:$4 sm:$0xff]   ;;  %v3708_v10 = vld [vmem:[%s4496_s9 + $0x110] ss:$8 sps:$4 sm:$0xff]  }
  0x92   : > { %v3705_v7 = vld [vmem:[%s4496_s9 + $0x500] ss:$8 sps:$4 sm:$0xff]   ;;  %v3711_v11 = vld [vmem:[%s4496_s9 + $0x510] ss:$8 sps:$4 sm:$0xff]   ;;  %v3716_v12 = vld [vmem:[%s4496_s9 + $0x124] ss:$8 sps:$4 sm:$0xff]  }
  0x93   : > { %2262 = vmatpush1.bf16.msra.mxu1 %v3640_v26  ;;  %v3719_v13 = vld [vmem:[%s4496_s9 + $0x524] ss:$8 sps:$4 sm:$0xff]   ;;  %v3714_v14 = vld [vmem:[%s4496_s9 + $0x120] ss:$8 sps:$4 sm:$0xff]   ;;  %v3722_v16 = vld [vmem:[%s4496_s9 + $0x134] ss:$8 sps:$4 sm:$0xff]  }
  0x94   : > { %2474 = vmatpush1.bf16.msra.mxu0 %v3641_v27  ;;  %2263 = vmatprep.subr.bf16.mxu1 %v3642_v28  ;;  %v3717_v15 = vld [vmem:[%s4496_s9 + $0x520] ss:$8 sps:$4 sm:$0xff]   ;;  %v3725_v17 = vld [vmem:[%s4496_s9 + $0x534] ss:$8 sps:$4 sm:$0xff]   ;;  %v3720_v18 = vld [vmem:[%s4496_s9 + $0x130] ss:$8 sps:$4 sm:$0xff]  }
  0x95   : > { %2475 = vmatprep.subr.bf16.mxu0 %v3644_v29  ;;  %v3723_v19 = vld [vmem:[%s4496_s9 + $0x530] ss:$8 sps:$4 sm:$0xff]   ;;  %v3728_v20 = vld [vmem:[%s4496_s9 + $0x144] ss:$8 sps:$4 sm:$0xff]   ;;  %v3726_v22 = vld [vmem:[%s4496_s9 + $0x140] ss:$8 sps:$4 sm:$0xff]  }
  0x96   : > { %v3731_v21 = vld [vmem:[%s4496_s9 + $0x544] ss:$8 sps:$4 sm:$0xff]   ;;  %v3729_v23 = vld [vmem:[%s4496_s9 + $0x540] ss:$8 sps:$4 sm:$0xff]   ;;  %v3734_v24 = vld [vmem:[%s4496_s9 + $0x154] ss:$8 sps:$4 sm:$0xff]  }
  0x97   : > { %2264 = vmatpush1.bf16.msra.mxu1 %v3646_v30  ;;  %v3737_v25 = vld [vmem:[%s4496_s9 + $0x554] ss:$8 sps:$4 sm:$0xff]   ;;  %v3732_v26 = vld [vmem:[%s4496_s9 + $0x150] ss:$8 sps:$4 sm:$0xff]   ;;  %v3740_v29 = vld [vmem:[%s4496_s9 + $0x164] ss:$8 sps:$4 sm:$0xff]  }
  0x98   : > { %2476 = vmatpush1.bf16.msra.mxu0 %v3647_v31  ;;  %2265 = vmatprep.subr.bf16.mxu1 %v3648_v32  ;;  %v3735_v27 = vld [vmem:[%s4496_s9 + $0x550] ss:$8 sps:$4 sm:$0xff]   ;;  %v3786_v28 = vld [vmem:[#allocation3 + $0x94] ss:$72 sps:$4 sm:$0xff]   ;;  %v3743_v30 = vld [vmem:[%s4496_s9 + $0x564] ss:$8 sps:$4 sm:$0xff]  }
  0x99   : > { %2477 = vmatprep.subr.bf16.mxu0 %v3650_v33  ;;  %v3791_v31 = vld [vmem:[#allocation3 + $0xb4] ss:$72 sps:$4 sm:$0xff]   ;;  %v3738_v32 = vld [vmem:[%s4496_s9 + $0x160] ss:$8 sps:$4 sm:$0xff]   ;;  %v3756_v48 = vld [vmem:[%s4496_s9 + $0x190] ss:$8 sps:$4 sm:$0xff]  }
  0x9a   : > { %v3741_v33 = vld [vmem:[%s4496_s9 + $0x560] ss:$8 sps:$4 sm:$0xff]   ;;  %v3767_v51 = vld [vmem:[%s4496_s9 + $0x5a4] ss:$8 sps:$4 sm:$0xff]   ;;  %s4793_s30 = scalar_lea.vmem [#allocation8], %s3080_s5  ;;  %s3081_s7 = sshll.u32 %s4493_s26, 6 }
  0x9b   : > { %2266 = vmatpush1.bf16.msra.mxu1 %v3652_v34  ;;  %v3796_v34 = vld [vmem:[#allocation3 + $0x90] ss:$72 sps:$4 sm:$0xff]   ;;  %s3415_s8 = sshll.u32 %s4256_s15, 8  ;;  %s277_s25 = scalar_lea.vmem [#allocation9], %s3081_s7 }
  0x9c   : > { %2478 = vmatpush1.bf16.msra.mxu0 %v3653_v35  ;;  %2267 = vmatprep.subr.bf16.mxu1 %v3654_v36  ;;  %v3797_v35 = vld [vmem:[#allocation3 + $0xb0] ss:$72 sps:$4 sm:$0xff]   ;;  %v3746_v36 = vld [vmem:[%s4496_s9 + $0x174] ss:$8 sps:$4 sm:$0xff]   ;;  %s2941_s27 = sshll.u32 %s277_s25, 4  ;;  %s4811_s23 = scalar_lea.hbm %s4865_s3, %s3415_s8  ;;  %s4813_s27 = int_to_ptr.vmem [resolvable:$true] %s2941_s27 }
  0x9d   : > { %2479 = vmatprep.subr.bf16.mxu0 %v3656_v37  ;;  %v3749_v37 = vld [vmem:[%s4496_s9 + $0x574] ss:$8 sps:$4 sm:$0xff]   ;;  %s2925_s15 = scalar_lea.sflag [#allocation5], %s4493_s26  ;;  %s4178_s11 = scalar_lea.vmem %s4813_s27, 1024 }
  0x9e   : > { %p4179_p4 = scmp.ne.s32.totalorder %s4813_s27, %s4178_s11  ;;  %p4890_p6 = scmp.ne.s32.totalorder %s4879_s28, 0 }
  0x9f   : > { %2268 = vmatpush1.bf16.msra.mxu1 %v3658_v38  ;;  %v3744_v38 = vld [vmem:[%s4496_s9 + $0x170] ss:$8 sps:$4 sm:$0xff]   ;;  %s4274_s10 = smov [#allocation9]  }
  0xa0   : > { %2480 = vmatpush1.bf16.msra.mxu0 %v3659_v39  ;;  %2269 = vmatprep.subr.bf16.mxu1 %v3660_v40  ;;  %v3747_v39 = vld [vmem:[%s4496_s9 + $0x570] ss:$8 sps:$4 sm:$0xff]   ;;  %v3806_v40 = vld [vmem:[#allocation3 + $0xc] ss:$72 sps:$4 sm:$0xff]   ;;  %p4180_p1 = pnand %p4179_p4, %p4890_p6  ;;  %s4182_s20 = sshll.u32 %s4274_s10, 4  ;;  %s4183_s20 = int_to_ptr.vmem [resolvable:$false] %s4182_s20 }
  0xa1   : > { %2481 = vmatprep.subr.bf16.mxu0 %v3662_v41  ;;  %v3752_v41 = vld [vmem:[%s4496_s9 + $0x184] ss:$8 sps:$4 sm:$0xff]   ;;  %s4184_s1 = scalar_lea.vmem %s4183_s20, 2048  ;;  %p4185_p0 = scmp.lt.s32.totalorder %s4813_s27, %s4183_s20 }
  0xa2   : > { %p4181_p12 = pneg %p4180_p1  ;;  %p4186_p9 = scmp.lt.s32.totalorder %s4184_s1, %s4178_s11 }
  0xa3   : > { %2270 = vmatpush1.bf16.msra.mxu1 %v3664_v42  ;;  %v3755_v42 = vld [vmem:[%s4496_s9 + $0x584] ss:$8 sps:$4 sm:$0xff]  }
  0xa4   : > { %2482 = vmatpush1.bf16.msra.mxu0 %v3665_v43  ;;  %2271 = vmatprep.subr.bf16.mxu1 %v3666_v44  ;;  %v3812_v43 = vld [vmem:[#allocation3 + $0x2c] ss:$72 sps:$4 sm:$0xff]   ;;  %v3750_v44 = vld [vmem:[%s4496_s9 + $0x180] ss:$8 sps:$4 sm:$0xff]   ;;  %p4187_p5 = por %p4186_p9, %p4185_p0 }
  0xa5   : > { %2483 = vmatprep.subr.bf16.mxu0 %v3668_v45  ;;  %v3753_v45 = vld [vmem:[%s4496_s9 + $0x580] ss:$8 sps:$4 sm:$0xff]  }
  0xa6   : > { %p4188_p8 = pnand %p4187_p5, %p4181_p12 }
  0xa7   : > { %2272 = vmatpush1.bf16.msra.mxu1 %v3670_v46  ;;  %v3758_v46 = vld [vmem:[%s4496_s9 + $0x194] ss:$8 sps:$4 sm:$0xff]  }
  0xa8   : > { %2484 = vmatpush1.bf16.msra.mxu0 %v3671_v47  ;;  %2273 = vmatprep.subr.bf16.mxu1 %v3672_v49  ;;  %v3761_v47 = vld [vmem:[%s4496_s9 + $0x594] ss:$8 sps:$4 sm:$0xff]   ;;  %v3759_v49 = vld [vmem:[%s4496_s9 + $0x590] ss:$8 sps:$4 sm:$0xff]  }
  0xa9   : > { %2485 = vmatprep.subr.bf16.mxu0 %v3674_v50  ;;  %v3764_v50 = vld [vmem:[%s4496_s9 + $0x1a4] ss:$8 sps:$4 sm:$0xff]  }
  0xab   : > { %2274 = vmatpush1.bf16.msra.mxu1 %v3676_v52  ;;  %v3762_v52 = vld [vmem:[%s4496_s9 + $0x1a0] ss:$8 sps:$4 sm:$0xff]  }
  0xac   : > { %2486 = vmatpush1.bf16.msra.mxu0 %v3677_v53  ;;  %2275 = vmatprep.subr.bf16.mxu1 %v3678_v54  ;;  %v3765_v53 = vld [vmem:[%s4496_s9 + $0x5a0] ss:$8 sps:$4 sm:$0xff]   ;;  %v3770_v54 = vld [vmem:[%s4496_s9 + $0x1b4] ss:$8 sps:$4 sm:$0xff]  }
  0xad   : > { %2487 = vmatprep.subr.bf16.mxu0 %v3680_v55  ;;  %v3773_v55 = vld [vmem:[%s4496_s9 + $0x5b4] ss:$8 sps:$4 sm:$0xff]  }
  0xaf   : > { %2276 = vmatpush1.bf16.msra.mxu1 %v3682_v56  ;;  %v3768_v56 = vld [vmem:[%s4496_s9 + $0x1b0] ss:$8 sps:$4 sm:$0xff]  }
  0xb0   : > { %2488 = vmatpush1.bf16.msra.mxu0 %v3683_v57  ;;  %2277 = vmatprep.subr.bf16.mxu1 %v3684_v58  ;;  %v3771_v57 = vld [vmem:[%s4496_s9 + $0x5b0] ss:$8 sps:$4 sm:$0xff]   ;;  %v3776_v58 = vld [vmem:[%s4496_s9 + $0x1c4] ss:$8 sps:$4 sm:$0xff]  }
  0xb1   : > { %2489 = vmatprep.subr.bf16.mxu0 %v3686_v59  ;;  %v3779_v59 = vld [vmem:[%s4496_s9 + $0x5c4] ss:$8 sps:$4 sm:$0xff]  }
  0xb3   : > { %2278 = vmatpush1.bf16.msra.mxu1 %v3688_v60  ;;  %v3774_v60 = vld [vmem:[%s4496_s9 + $0x1c0] ss:$8 sps:$4 sm:$0xff]  }
  0xb4   : > { %2490 = vmatpush1.bf16.msra.mxu0 %v3689_v61  ;;  %2279 = vmatprep.subr.bf16.mxu1 %v3690_v62  ;;  %v3777_v61 = vld [vmem:[%s4496_s9 + $0x5c0] ss:$8 sps:$4 sm:$0xff]   ;;  %v3782_v62 = vld [vmem:[%s4496_s9 + $0x1d4] ss:$8 sps:$4 sm:$0xff]  }
  0xb5   : > { %2491 = vmatprep.subr.bf16.mxu0 %v3692_v63  ;;  %v3785_v63 = vld [vmem:[%s4496_s9 + $0x5d4] ss:$8 sps:$4 sm:$0xff]  }
  0xb7   : > { %2280 = vmatpush1.bf16.msra.mxu1 %v3694_v0  ;;  %v3780_v0 = vld [vmem:[%s4496_s9 + $0x1d0] ss:$8 sps:$4 sm:$0xff]  }
  0xb8   : > { %2492 = vmatpush1.bf16.msra.mxu0 %v3695_v1  ;;  %2302 = vmatprep.subr.bf16.mxu1 %v3701_v2  ;;  %v3783_v1 = vld [vmem:[%s4496_s9 + $0x5d0] ss:$8 sps:$4 sm:$0xff]   ;;  %v3790_v2 = vld [vmem:[%s4496_s9 + $0x1e4] ss:$8 sps:$4 sm:$0xff]  }
  0xb9   : > { %2514 = vmatprep.subr.bf16.mxu0 %v3707_v3  ;;  %v3795_v3 = vld [vmem:[%s4496_s9 + $0x5e4] ss:$8 sps:$4 sm:$0xff]  }
  0xba   : > { %2282 = vmatmul.mubr.bf16.vlgmr.msra.gmra.mrb[0].mxu1 %v3696_v4  ;;  %v3788_v4 = vld [vmem:[%s4496_s9 + $0x1e0] ss:$8 sps:$4 sm:$0xff]  }
  0xbb   : > { %2494 = vmatmul.mubr.bf16.vlgmr.msra.gmra.mrb[0].mxu0 %v3702_v6  ;;  %2303 = vmatpush1.bf16.msra.mxu1 %v3699_v5  ;;  %v3793_v5 = vld [vmem:[%s4496_s9 + $0x5e0] ss:$8 sps:$4 sm:$0xff]   ;;  %v3800_v6 = vld [vmem:[%s4496_s9 + $0x1f4] ss:$8 sps:$4 sm:$0xff]  }
  0xbc   : > { %2515 = vmatpush1.bf16.msra.mxu0 %v3705_v7  ;;  %2304 = vmatprep.subr.bf16.mxu1 %v3710_v8  ;;  %v3803_v7 = vld [vmem:[%s4496_s9 + $0x5f4] ss:$8 sps:$4 sm:$0xff]   ;;  %v3798_v8 = vld [vmem:[%s4496_s9 + $0x1f0] ss:$8 sps:$4 sm:$0xff]  }
  0xbd   : > { %2516 = vmatprep.subr.bf16.mxu0 %v3713_v9  ;;  %2291 = vmatprep.mubr.bf16.mxu1 %v3786_v28  ;;  %v3801_v9 = vld [vmem:[%s4496_s9 + $0x5f0] ss:$8 sps:$4 sm:$0xff]   ;;  %v3830_v28 = vld [vmem:[%s4496_s9 + $0x234] ss:$8 sps:$4 sm:$0xff]  }
  0xbe   : > { %2503 = vmatprep.mubr.bf16.mxu0 %v3791_v31  ;;  %v3831_v31 = vld [vmem:[%s4496_s9 + $0x630] ss:$8 sps:$4 sm:$0xff]  }
  0xbf   : > { %2305 = vmatpush1.bf16.msra.mxu1 %v3708_v10  ;;  %v3809_v10 = vld [vmem:[%s4496_s9 + $0x204] ss:$8 sps:$4 sm:$0xff]  }
  0xc0   : > { %2517 = vmatpush1.bf16.msra.mxu0 %v3711_v11  ;;  %2306 = vmatprep.subr.bf16.mxu1 %v3716_v12  ;;  %v3815_v11 = vld [vmem:[%s4496_s9 + $0x604] ss:$8 sps:$4 sm:$0xff]   ;;  %v3804_v12 = vld [vmem:[#allocation3 + $0x8] ss:$72 sps:$4 sm:$0xff]  }
  0xc1   : > { %2518 = vmatprep.subr.bf16.mxu0 %v3719_v13  ;;  %v3807_v13 = vld [vmem:[%s4496_s9 + $0x200] ss:$8 sps:$4 sm:$0xff]  }
  0xc2   : > { %2292 = vmatmul.mubr.bf16.gmra.mrb[4].mxu1 %v3796_v34  ;;  %v3839_v34 = vld [vmem:[%s4496_s9 + $0x644] ss:$8 sps:$4 sm:$0xff]  }
  0xc3   : > { %2307 = vmatpush1.bf16.msra.mxu1 %v3714_v14  ;;  %2504 = vmatmul.mubr.bf16.gmra.mrb[4].mxu0 %v3797_v35  ;;  %v3810_v14 = vld [vmem:[#allocation3 + $0x28] ss:$72 sps:$4 sm:$0xff]   ;;  %v3920_v35 = vld [vmem:[#allocation3 + $0x34] ss:$72 sps:$4 sm:$0xff]  }
  0xc4   : > { %2519 = vmatpush1.bf16.msra.mxu0 %v3717_v15  ;;  %2308 = vmatprep.subr.bf16.mxu1 %v3722_v16  ;;  %v3813_v15 = vld [vmem:[%s4496_s9 + $0x600] ss:$8 sps:$4 sm:$0xff]   ;;  %v3818_v16 = vld [vmem:[%s4496_s9 + $0x214] ss:$8 sps:$4 sm:$0xff]  }
  0xc5   : > { %2520 = vmatprep.subr.bf16.mxu0 %v3725_v17  ;;  %2334 = vmatprep.mubr.bf16.mxu1 %v3806_v40  ;;  %v3821_v17 = vld [vmem:[%s4496_s9 + $0x614] ss:$8 sps:$4 sm:$0xff]   ;;  %v3840_v40 = vld [vmem:[%s4496_s9 + $0x250] ss:$8 sps:$4 sm:$0xff]  }
  0xc6   : > { %2546 = vmatprep.mubr.bf16.mxu0 %v3812_v43  ;;  %v3851_v43 = vld [vmem:[%s4496_s9 + $0x664] ss:$8 sps:$4 sm:$0xff]  }
  0xc7   : > { %2309 = vmatpush1.bf16.msra.mxu1 %v3720_v18  ;;  %v3816_v18 = vld [vmem:[%s4496_s9 + $0x210] ss:$8 sps:$4 sm:$0xff]  }
  0xc8   : > { %2521 = vmatpush1.bf16.msra.mxu0 %v3723_v19  ;;  %2310 = vmatprep.subr.bf16.mxu1 %v3728_v20  ;;  %v3819_v19 = vld [vmem:[%s4496_s9 + $0x610] ss:$8 sps:$4 sm:$0xff]   ;;  %v3894_v20 = vld [vmem:[#allocation3 + $0x9c] ss:$72 sps:$4 sm:$0xff]  }
  0xc9   : > { %2522 = vmatprep.subr.bf16.mxu0 %v3731_v21  ;;  %v3824_v21 = vld [vmem:[%s4496_s9 + $0x224] ss:$8 sps:$4 sm:$0xff]  }
  0xcb   : > { %2311 = vmatpush1.bf16.msra.mxu1 %v3726_v22  ;;  %v3827_v22 = vld [vmem:[%s4496_s9 + $0x624] ss:$8 sps:$4 sm:$0xff]  }
  0xcc   : > { %2523 = vmatpush1.bf16.msra.mxu0 %v3729_v23  ;;  %2312 = vmatprep.subr.bf16.mxu1 %v3734_v24  ;;  %v3899_v23 = vld [vmem:[#allocation3 + $0xbc] ss:$72 sps:$4 sm:$0xff]   ;;  %v3822_v24 = vld [vmem:[%s4496_s9 + $0x220] ss:$8 sps:$4 sm:$0xff]  }
  0xcd   : > { %2524 = vmatprep.subr.bf16.mxu0 %v3737_v25  ;;  %v3825_v25 = vld [vmem:[%s4496_s9 + $0x620] ss:$8 sps:$4 sm:$0xff]  }
  0xcf   : > { %2313 = vmatpush1.bf16.msra.mxu1 %v3732_v26  ;;  %v3904_v26 = vld [vmem:[#allocation3 + $0x98] ss:$72 sps:$4 sm:$0xff]  }
  0xd0   : > { %2525 = vmatpush1.bf16.msra.mxu0 %v3735_v27  ;;  %2314 = vmatprep.subr.bf16.mxu1 %v3740_v29  ;;  %v3905_v27 = vld [vmem:[#allocation3 + $0xb8] ss:$72 sps:$4 sm:$0xff]   ;;  %v3833_v29 = vld [vmem:[%s4496_s9 + $0x634] ss:$8 sps:$4 sm:$0xff]  }
  0xd1   : > { %2526 = vmatprep.subr.bf16.mxu0 %v3743_v30  ;;  %v3828_v30 = vld [vmem:[%s4496_s9 + $0x230] ss:$8 sps:$4 sm:$0xff]  }
  0xd3   : > { %2315 = vmatpush1.bf16.msra.mxu1 %v3738_v32  ;;  %v3914_v32 = vld [vmem:[#allocation3 + $0x14] ss:$72 sps:$4 sm:$0xff]  }
  0xd4   : > { %2527 = vmatpush1.bf16.msra.mxu0 %v3741_v33  ;;  %2316 = vmatprep.subr.bf16.mxu1 %v3746_v36  ;;  %v3836_v33 = vld [vmem:[%s4496_s9 + $0x244] ss:$8 sps:$4 sm:$0xff]   ;;  %v3834_v36 = vld [vmem:[%s4496_s9 + $0x240] ss:$8 sps:$4 sm:$0xff]  }
  0xd5   : > { %2528 = vmatprep.subr.bf16.mxu0 %v3749_v37  ;;  %v3837_v37 = vld [vmem:[%s4496_s9 + $0x640] ss:$8 sps:$4 sm:$0xff]  }
  0xd7   : > { %2317 = vmatpush1.bf16.msra.mxu1 %v3744_v38  ;;  %v3842_v38 = vld [vmem:[%s4496_s9 + $0x254] ss:$8 sps:$4 sm:$0xff]  }
  0xd8   : > { %2529 = vmatpush1.bf16.msra.mxu0 %v3747_v39  ;;  %2318 = vmatprep.subr.bf16.mxu1 %v3752_v41  ;;  %v3845_v39 = vld [vmem:[%s4496_s9 + $0x654] ss:$8 sps:$4 sm:$0xff]   ;;  %v3843_v41 = vld [vmem:[%s4496_s9 + $0x650] ss:$8 sps:$4 sm:$0xff]  }
  0xd9   : > { %2530 = vmatprep.subr.bf16.mxu0 %v3755_v42  ;;  %v3848_v42 = vld [vmem:[%s4496_s9 + $0x264] ss:$8 sps:$4 sm:$0xff]  }
  0xdb   : > { %2319 = vmatpush1.bf16.msra.mxu1 %v3750_v44  ;;  %v3846_v44 = vld [vmem:[%s4496_s9 + $0x260] ss:$8 sps:$4 sm:$0xff]  }
  0xdc   : > { %2531 = vmatpush1.bf16.msra.mxu0 %v3753_v45  ;;  %2320 = vmatprep.subr.bf16.mxu1 %v3758_v46  ;;  %v3849_v45 = vld [vmem:[%s4496_s9 + $0x660] ss:$8 sps:$4 sm:$0xff]   ;;  %v3854_v46 = vld [vmem:[%s4496_s9 + $0x274] ss:$8 sps:$4 sm:$0xff]  }
  0xdd   : > { %2532 = vmatprep.subr.bf16.mxu0 %v3761_v47  ;;  %v3857_v47 = vld [vmem:[%s4496_s9 + $0x674] ss:$8 sps:$4 sm:$0xff]  }
  0xdf   : > { %2321 = vmatpush1.bf16.msra.mxu1 %v3756_v48  ;;  %v3852_v48 = vld [vmem:[%s4496_s9 + $0x270] ss:$8 sps:$4 sm:$0xff]  }
  0xe0   : > { %2533 = vmatpush1.bf16.msra.mxu0 %v3759_v49  ;;  %2322 = vmatprep.subr.bf16.mxu1 %v3764_v50  ;;  %v3855_v49 = vld [vmem:[%s4496_s9 + $0x670] ss:$8 sps:$4 sm:$0xff]   ;;  %v3860_v50 = vld [vmem:[%s4496_s9 + $0x284] ss:$8 sps:$4 sm:$0xff]  }
  0xe1   : > { %2534 = vmatprep.subr.bf16.mxu0 %v3767_v51  ;;  %v3863_v51 = vld [vmem:[%s4496_s9 + $0x684] ss:$8 sps:$4 sm:$0xff]  }
  0xe3   : > { %2323 = vmatpush1.bf16.msra.mxu1 %v3762_v52  ;;  %v3858_v52 = vld [vmem:[%s4496_s9 + $0x280] ss:$8 sps:$4 sm:$0xff]  }
  0xe4   : > { %2535 = vmatpush1.bf16.msra.mxu0 %v3765_v53  ;;  %2324 = vmatprep.subr.bf16.mxu1 %v3770_v54  ;;  %v3861_v53 = vld [vmem:[%s4496_s9 + $0x680] ss:$8 sps:$4 sm:$0xff]   ;;  %v3866_v54 = vld [vmem:[%s4496_s9 + $0x294] ss:$8 sps:$4 sm:$0xff]  }
  0xe5   : > { %2536 = vmatprep.subr.bf16.mxu0 %v3773_v55  ;;  %v3869_v55 = vld [vmem:[%s4496_s9 + $0x694] ss:$8 sps:$4 sm:$0xff]  }
  0xe7   : > { %2325 = vmatpush1.bf16.msra.mxu1 %v3768_v56  ;;  %v3864_v56 = vld [vmem:[%s4496_s9 + $0x290] ss:$8 sps:$4 sm:$0xff]  }
  0xe8   : > { %2537 = vmatpush1.bf16.msra.mxu0 %v3771_v57  ;;  %2326 = vmatprep.subr.bf16.mxu1 %v3776_v58  ;;  %v3867_v57 = vld [vmem:[%s4496_s9 + $0x690] ss:$8 sps:$4 sm:$0xff]   ;;  %v3872_v58 = vld [vmem:[%s4496_s9 + $0x2a4] ss:$8 sps:$4 sm:$0xff]  }
  0xe9   : > { %2538 = vmatprep.subr.bf16.mxu0 %v3779_v59  ;;  %v3875_v59 = vld [vmem:[%s4496_s9 + $0x6a4] ss:$8 sps:$4 sm:$0xff]  }
  0xeb   : > { %2327 = vmatpush1.bf16.msra.mxu1 %v3774_v60  ;;  %v3870_v60 = vld [vmem:[%s4496_s9 + $0x2a0] ss:$8 sps:$4 sm:$0xff]  }
  0xec   : > { %2539 = vmatpush1.bf16.msra.mxu0 %v3777_v61  ;;  %2328 = vmatprep.subr.bf16.mxu1 %v3782_v62  ;;  %v3873_v61 = vld [vmem:[%s4496_s9 + $0x6a0] ss:$8 sps:$4 sm:$0xff]   ;;  %v3878_v62 = vld [vmem:[%s4496_s9 + $0x2b4] ss:$8 sps:$4 sm:$0xff]  }
  0xed   : > { %2540 = vmatprep.subr.bf16.mxu0 %v3785_v63  ;;  %v3881_v63 = vld [vmem:[%s4496_s9 + $0x6b4] ss:$8 sps:$4 sm:$0xff]  }
  0xef   : > { %2329 = vmatpush1.bf16.msra.mxu1 %v3780_v0  ;;  %v3876_v0 = vld [vmem:[%s4496_s9 + $0x2b0] ss:$8 sps:$4 sm:$0xff]  }
  0xf0   : > { %2541 = vmatpush1.bf16.msra.mxu0 %v3783_v1  ;;  %2330 = vmatprep.subr.bf16.mxu1 %v3790_v2  ;;  %v3879_v1 = vld [vmem:[%s4496_s9 + $0x6b0] ss:$8 sps:$4 sm:$0xff]   ;;  %v3884_v2 = vld [vmem:[%s4496_s9 + $0x2c4] ss:$8 sps:$4 sm:$0xff]  }
  0xf1   : > { %2542 = vmatprep.subr.bf16.mxu0 %v3795_v3  ;;  %v3887_v3 = vld [vmem:[%s4496_s9 + $0x6c4] ss:$8 sps:$4 sm:$0xff]  }
  0xf3   : > { %2331 = vmatpush1.bf16.msra.mxu1 %v3788_v4  ;;  %v3882_v4 = vld [vmem:[%s4496_s9 + $0x2c0] ss:$8 sps:$4 sm:$0xff]  }
  0xf4   : > { %2543 = vmatpush1.bf16.msra.mxu0 %v3793_v5  ;;  %2332 = vmatprep.subr.bf16.mxu1 %v3800_v6  ;;  %v3885_v5 = vld [vmem:[%s4496_s9 + $0x6c0] ss:$8 sps:$4 sm:$0xff]   ;;  %v3890_v6 = vld [vmem:[%s4496_s9 + $0x2d4] ss:$8 sps:$4 sm:$0xff]  }
  0xf5   : > { %2544 = vmatprep.subr.bf16.mxu0 %v3803_v7  ;;  %v3893_v7 = vld [vmem:[%s4496_s9 + $0x6d4] ss:$8 sps:$4 sm:$0xff]  }
  0xf7   : > { %2333 = vmatpush1.bf16.msra.mxu1 %v3798_v8  ;;  %v3888_v8 = vld [vmem:[%s4496_s9 + $0x2d0] ss:$8 sps:$4 sm:$0xff]  }
  0xf8   : > { %2545 = vmatpush1.bf16.msra.mxu0 %v3801_v9  ;;  %2355 = vmatprep.subr.bf16.mxu1 %v3809_v10  ;;  %v3891_v9 = vld [vmem:[%s4496_s9 + $0x6d0] ss:$8 sps:$4 sm:$0xff]   ;;  %v3898_v10 = vld [vmem:[%s4496_s9 + $0x2e4] ss:$8 sps:$4 sm:$0xff]  }
  0xf9   : > { %2567 = vmatprep.subr.bf16.mxu0 %v3815_v11  ;;  %v3903_v11 = vld [vmem:[%s4496_s9 + $0x6e4] ss:$8 sps:$4 sm:$0xff]  }
  0xfa   : > { %2335 = vmatmul.mubr.bf16.vlgmr.msra.gmra.mrb[0].mxu1 %v3804_v12  ;;  %v3896_v12 = vld [vmem:[%s4496_s9 + $0x2e0] ss:$8 sps:$4 sm:$0xff]  }
  0xfb   : > { %2547 = vmatmul.mubr.bf16.vlgmr.msra.gmra.mrb[0].mxu0 %v3810_v14  ;;  %2356 = vmatpush1.bf16.msra.mxu1 %v3807_v13  ;;  %v3901_v13 = vld [vmem:[%s4496_s9 + $0x6e0] ss:$8 sps:$4 sm:$0xff]   ;;  %v3908_v14 = vld [vmem:[%s4496_s9 + $0x2f4] ss:$8 sps:$4 sm:$0xff]  }
  0xfc   : > { %2568 = vmatpush1.bf16.msra.mxu0 %v3813_v15  ;;  %2357 = vmatprep.subr.bf16.mxu1 %v3818_v16  ;;  %v3911_v15 = vld [vmem:[%s4496_s9 + $0x6f4] ss:$8 sps:$4 sm:$0xff]   ;;  %v3906_v16 = vld [vmem:[%s4496_s9 + $0x2f0] ss:$8 sps:$4 sm:$0xff]  }
  0xfd   : > { %2569 = vmatprep.subr.bf16.mxu0 %v3821_v17  ;;  %2344 = vmatprep.mubr.bf16.mxu1 %v3894_v20  ;;  %v3909_v17 = vld [vmem:[%s4496_s9 + $0x6f0] ss:$8 sps:$4 sm:$0xff]  }
  0xfe   : > { %2556 = vmatprep.mubr.bf16.mxu0 %v3899_v23  ;;  %v3912_v20 = vld [vmem:[#allocation3 + $0x10] ss:$72 sps:$4 sm:$0xff]   ;;  %v3921_v23 = vld [vmem:[%s4496_s9 + $0x700] ss:$8 sps:$4 sm:$0xff]  }
  0xff   : > { %2358 = vmatpush1.bf16.msra.mxu1 %v3816_v18  ;;  %v3917_v18 = vld [vmem:[%s4496_s9 + $0x304] ss:$8 sps:$4 sm:$0xff]  }
 0x100   : > { %2570 = vmatpush1.bf16.msra.mxu0 %v3819_v19  ;;  %2359 = vmatprep.subr.bf16.mxu1 %v3824_v21  ;;  %v3923_v19 = vld [vmem:[%s4496_s9 + $0x704] ss:$8 sps:$4 sm:$0xff]   ;;  %v3915_v21 = vld [vmem:[%s4496_s9 + $0x300] ss:$8 sps:$4 sm:$0xff]  }
 0x101   : > { %2571 = vmatprep.subr.bf16.mxu0 %v3827_v22  ;;  %v3918_v22 = vld [vmem:[#allocation3 + $0x30] ss:$72 sps:$4 sm:$0xff]  }
 0x102   : > { %2345 = vmatmul.mubr.bf16.gmra.mrb[4].mxu1 %v3904_v26  ;;  %v4002_v26 = vld [vmem:[#allocation3 + $0xa4] ss:$72 sps:$4 sm:$0xff]  }
 0x103   : > { %2557 = vmatmul.mubr.bf16.gmra.mrb[4].mxu0 %v3905_v27  ;;  %2360 = vmatpush1.bf16.msra.mxu1 %v3822_v24  ;;  %v3926_v24 = vld [vmem:[%s4496_s9 + $0x314] ss:$8 sps:$4 sm:$0xff]   ;;  %v4004_v27 = vld [vmem:[#allocation3 + $0xc4] ss:$72 sps:$4 sm:$0xff]  }
 0x104   : > { %2572 = vmatpush1.bf16.msra.mxu0 %v3825_v25  ;;  %2361 = vmatprep.subr.bf16.mxu1 %v3830_v28  ;;  %v3929_v25 = vld [vmem:[%s4496_s9 + $0x714] ss:$8 sps:$4 sm:$0xff]   ;;  %v3924_v28 = vld [vmem:[%s4496_s9 + $0x310] ss:$8 sps:$4 sm:$0xff]  }
 0x105   : > { %2573 = vmatprep.subr.bf16.mxu0 %v3833_v29  ;;  %2387 = vmatprep.mubr.bf16.mxu1 %v3914_v32  ;;  %v3927_v29 = vld [vmem:[%s4496_s9 + $0x710] ss:$8 sps:$4 sm:$0xff]   ;;  %v3930_v32 = vld [vmem:[%s4496_s9 + $0x320] ss:$8 sps:$4 sm:$0xff]  }
 0x106   : > { %2599 = vmatprep.mubr.bf16.mxu0 %v3920_v35  ;;  %v4010_v35 = vld [vmem:[#allocation3 + $0xc0] ss:$72 sps:$4 sm:$0xff]  }
 0x107   : > { %2362 = vmatpush1.bf16.msra.mxu1 %v3828_v30  ;;  %v3932_v30 = vld [vmem:[%s4496_s9 + $0x324] ss:$8 sps:$4 sm:$0xff]  }
 0x108   : > { %2574 = vmatpush1.bf16.msra.mxu0 %v3831_v31  ;;  %2363 = vmatprep.subr.bf16.mxu1 %v3836_v33  ;;  %v3935_v31 = vld [vmem:[%s4496_s9 + $0x724] ss:$8 sps:$4 sm:$0xff]   ;;  %v3933_v33 = vld [vmem:[%s4496_s9 + $0x720] ss:$8 sps:$4 sm:$0xff]  }
 0x109   : > { %2575 = vmatprep.subr.bf16.mxu0 %v3839_v34  ;;  %v4006_v34 = vld [vmem:[#allocation3 + $0xa0] ss:$72 sps:$4 sm:$0xff]  }
 0x10b   : > { %2364 = vmatpush1.bf16.msra.mxu1 %v3834_v36  ;;  %v3938_v36 = vld [vmem:[%s4496_s9 + $0x334] ss:$8 sps:$4 sm:$0xff]  }
 0x10c   : > { %2576 = vmatpush1.bf16.msra.mxu0 %v3837_v37  ;;  %2365 = vmatprep.subr.bf16.mxu1 %v3842_v38  ;;  %v3941_v37 = vld [vmem:[%s4496_s9 + $0x734] ss:$8 sps:$4 sm:$0xff]  }
 0x10d   : > { %2577 = vmatprep.subr.bf16.mxu0 %v3845_v39  ;;  %v4022_v38 = vld [vmem:[#allocation3 + $0x1c] ss:$72 sps:$4 sm:$0xff]  }
 0x10e   : > { %v4025_v39 = vld [vmem:[#allocation3 + $0x3c] ss:$72 sps:$4 sm:$0xff]  }
 0x10f   : > { %2366 = vmatpush1.bf16.msra.mxu1 %v3840_v40  ;;  %v3936_v40 = vld [vmem:[%s4496_s9 + $0x330] ss:$8 sps:$4 sm:$0xff]  }
 0x110   : > { %2578 = vmatpush1.bf16.msra.mxu0 %v3843_v41  ;;  %2367 = vmatprep.subr.bf16.mxu1 %v3848_v42  ;;  %v3939_v41 = vld [vmem:[%s4496_s9 + $0x730] ss:$8 sps:$4 sm:$0xff]   ;;  %v3944_v42 = vld [vmem:[%s4496_s9 + $0x344] ss:$8 sps:$4 sm:$0xff]  }
 0x111   : > { %2579 = vmatprep.subr.bf16.mxu0 %v3851_v43  ;;  %v3947_v43 = vld [vmem:[%s4496_s9 + $0x744] ss:$8 sps:$4 sm:$0xff]  }
 0x113   : > { %2368 = vmatpush1.bf16.msra.mxu1 %v3846_v44  ;;  %v3942_v44 = vld [vmem:[%s4496_s9 + $0x340] ss:$8 sps:$4 sm:$0xff]  }
 0x114   : > { %2580 = vmatpush1.bf16.msra.mxu0 %v3849_v45  ;;  %2369 = vmatprep.subr.bf16.mxu1 %v3854_v46  ;;  %v3945_v45 = vld [vmem:[%s4496_s9 + $0x740] ss:$8 sps:$4 sm:$0xff]   ;;  %v3950_v46 = vld [vmem:[%s4496_s9 + $0x354] ss:$8 sps:$4 sm:$0xff]  }
 0x115   : > { %2581 = vmatprep.subr.bf16.mxu0 %v3857_v47  ;;  %v3953_v47 = vld [vmem:[%s4496_s9 + $0x754] ss:$8 sps:$4 sm:$0xff]  }
 0x117   : > { %2370 = vmatpush1.bf16.msra.mxu1 %v3852_v48  ;;  %v3948_v48 = vld [vmem:[%s4496_s9 + $0x350] ss:$8 sps:$4 sm:$0xff]  }
 0x118   : > { %2582 = vmatpush1.bf16.msra.mxu0 %v3855_v49  ;;  %2371 = vmatprep.subr.bf16.mxu1 %v3860_v50  ;;  %v3951_v49 = vld [vmem:[%s4496_s9 + $0x750] ss:$8 sps:$4 sm:$0xff]   ;;  %v3956_v50 = vld [vmem:[%s4496_s9 + $0x364] ss:$8 sps:$4 sm:$0xff]  }
 0x119   : > { %2583 = vmatprep.subr.bf16.mxu0 %v3863_v51  ;;  %v3959_v51 = vld [vmem:[%s4496_s9 + $0x764] ss:$8 sps:$4 sm:$0xff]  }
 0x11b   : > { %2372 = vmatpush1.bf16.msra.mxu1 %v3858_v52  ;;  %v3954_v52 = vld [vmem:[%s4496_s9 + $0x360] ss:$8 sps:$4 sm:$0xff]  }
 0x11c   : > { %2584 = vmatpush1.bf16.msra.mxu0 %v3861_v53  ;;  %2373 = vmatprep.subr.bf16.mxu1 %v3866_v54  ;;  %v3957_v53 = vld [vmem:[%s4496_s9 + $0x760] ss:$8 sps:$4 sm:$0xff]   ;;  %v3962_v54 = vld [vmem:[%s4496_s9 + $0x374] ss:$8 sps:$4 sm:$0xff]  }
 0x11d   : > { %2585 = vmatprep.subr.bf16.mxu0 %v3869_v55  ;;  %v3965_v55 = vld [vmem:[%s4496_s9 + $0x774] ss:$8 sps:$4 sm:$0xff]  }
 0x11f   : > { %2374 = vmatpush1.bf16.msra.mxu1 %v3864_v56  ;;  %v3960_v56 = vld [vmem:[%s4496_s9 + $0x370] ss:$8 sps:$4 sm:$0xff]  }
 0x120   : > { %2586 = vmatpush1.bf16.msra.mxu0 %v3867_v57  ;;  %2375 = vmatprep.subr.bf16.mxu1 %v3872_v58  ;;  %v3963_v57 = vld [vmem:[%s4496_s9 + $0x770] ss:$8 sps:$4 sm:$0xff]   ;;  %v3968_v58 = vld [vmem:[%s4496_s9 + $0x384] ss:$8 sps:$4 sm:$0xff]  }
 0x121   : > { %2587 = vmatprep.subr.bf16.mxu0 %v3875_v59  ;;  %v3971_v59 = vld [vmem:[%s4496_s9 + $0x784] ss:$8 sps:$4 sm:$0xff]  }
 0x123   : > { %2376 = vmatpush1.bf16.msra.mxu1 %v3870_v60  ;;  %v3966_v60 = vld [vmem:[%s4496_s9 + $0x380] ss:$8 sps:$4 sm:$0xff]  }
 0x124   : > { %2588 = vmatpush1.bf16.msra.mxu0 %v3873_v61  ;;  %2377 = vmatprep.subr.bf16.mxu1 %v3878_v62  ;;  %v3969_v61 = vld [vmem:[%s4496_s9 + $0x780] ss:$8 sps:$4 sm:$0xff]   ;;  %v3974_v62 = vld [vmem:[%s4496_s9 + $0x394] ss:$8 sps:$4 sm:$0xff]  }
 0x125   : > { %2589 = vmatprep.subr.bf16.mxu0 %v3881_v63  ;;  %v3977_v63 = vld [vmem:[%s4496_s9 + $0x794] ss:$8 sps:$4 sm:$0xff]  }
 0x127   : > { %2378 = vmatpush1.bf16.msra.mxu1 %v3876_v0  ;;  %v3972_v0 = vld [vmem:[%s4496_s9 + $0x390] ss:$8 sps:$4 sm:$0xff]  }
 0x128   : > { %2590 = vmatpush1.bf16.msra.mxu0 %v3879_v1  ;;  %2379 = vmatprep.subr.bf16.mxu1 %v3884_v2  ;;  %v3975_v1 = vld [vmem:[%s4496_s9 + $0x790] ss:$8 sps:$4 sm:$0xff]   ;;  %v3980_v2 = vld [vmem:[%s4496_s9 + $0x3a4] ss:$8 sps:$4 sm:$0xff]  }
 0x129   : > { %2591 = vmatprep.subr.bf16.mxu0 %v3887_v3  ;;  %v3983_v3 = vld [vmem:[%s4496_s9 + $0x7a4] ss:$8 sps:$4 sm:$0xff]  }
 0x12b   : > { %2380 = vmatpush1.bf16.msra.mxu1 %v3882_v4  ;;  %v3978_v4 = vld [vmem:[%s4496_s9 + $0x3a0] ss:$8 sps:$4 sm:$0xff]  }
 0x12c   : > { %2592 = vmatpush1.bf16.msra.mxu0 %v3885_v5  ;;  %2381 = vmatprep.subr.bf16.mxu1 %v3890_v6  ;;  %v3981_v5 = vld [vmem:[%s4496_s9 + $0x7a0] ss:$8 sps:$4 sm:$0xff]   ;;  %v3986_v6 = vld [vmem:[%s4496_s9 + $0x3b4] ss:$8 sps:$4 sm:$0xff]  }
 0x12d   : > { %2593 = vmatprep.subr.bf16.mxu0 %v3893_v7  ;;  %v3989_v7 = vld [vmem:[%s4496_s9 + $0x7b4] ss:$8 sps:$4 sm:$0xff]  }
 0x12f   : > { %2382 = vmatpush1.bf16.msra.mxu1 %v3888_v8  ;;  %v3984_v8 = vld [vmem:[%s4496_s9 + $0x3b0] ss:$8 sps:$4 sm:$0xff]  }
 0x130   : > { %2594 = vmatpush1.bf16.msra.mxu0 %v3891_v9  ;;  %2383 = vmatprep.subr.bf16.mxu1 %v3898_v10  ;;  %v3987_v9 = vld [vmem:[%s4496_s9 + $0x7b0] ss:$8 sps:$4 sm:$0xff]   ;;  %v3992_v10 = vld [vmem:[%s4496_s9 + $0x3c4] ss:$8 sps:$4 sm:$0xff]  }
 0x131   : > { %2595 = vmatprep.subr.bf16.mxu0 %v3903_v11  ;;  %v3995_v11 = vld [vmem:[%s4496_s9 + $0x7c4] ss:$8 sps:$4 sm:$0xff]  }
 0x133   : > { %2384 = vmatpush1.bf16.msra.mxu1 %v3896_v12  ;;  %v3990_v12 = vld [vmem:[%s4496_s9 + $0x3c0] ss:$8 sps:$4 sm:$0xff]  }
 0x134   : > { %2596 = vmatpush1.bf16.msra.mxu0 %v3901_v13  ;;  %2385 = vmatprep.subr.bf16.mxu1 %v3908_v14  ;;  %v3993_v13 = vld [vmem:[%s4496_s9 + $0x7c0] ss:$8 sps:$4 sm:$0xff]   ;;  %v3998_v14 = vld [vmem:[%s4496_s9 + $0x3d4] ss:$8 sps:$4 sm:$0xff]  }
 0x135   : > { %2597 = vmatprep.subr.bf16.mxu0 %v3911_v15  ;;  %v4001_v15 = vld [vmem:[%s4496_s9 + $0x7d4] ss:$8 sps:$4 sm:$0xff]  }
 0x137   : > { %2386 = vmatpush1.bf16.msra.mxu1 %v3906_v16  ;;  %v3996_v16 = vld [vmem:[%s4496_s9 + $0x3d0] ss:$8 sps:$4 sm:$0xff]  }
 0x138   : > { %2598 = vmatpush1.bf16.msra.mxu0 %v3909_v17  ;;  %2408 = vmatprep.subr.bf16.mxu1 %v3917_v18  ;;  %v3999_v17 = vld [vmem:[%s4496_s9 + $0x7d0] ss:$8 sps:$4 sm:$0xff]   ;;  %v4009_v18 = vld [vmem:[%s4496_s9 + $0x3e4] ss:$8 sps:$4 sm:$0xff]  }
 0x139   : > { %2620 = vmatprep.subr.bf16.mxu0 %v3923_v19  ;;  %v4013_v19 = vld [vmem:[%s4496_s9 + $0x7e4] ss:$8 sps:$4 sm:$0xff]  }
 0x13a   : > { %2388 = vmatmul.mubr.bf16.vlgmr.msra.gmra.mrb[0].mxu1 %v3912_v20  ;;  %v4007_v20 = vld [vmem:[%s4496_s9 + $0x3e0] ss:$8 sps:$4 sm:$0xff]  }
 0x13b   : > { %2600 = vmatmul.mubr.bf16.vlgmr.msra.gmra.mrb[0].mxu0 %v3918_v22  ;;  %2409 = vmatpush1.bf16.msra.mxu1 %v3915_v21  ;;  %v4011_v21 = vld [vmem:[%s4496_s9 + $0x7e0] ss:$8 sps:$4 sm:$0xff]   ;;  %v4016_v22 = vld [vmem:[%s4496_s9 + $0x3f4] ss:$8 sps:$4 sm:$0xff]  }
 0x13c   : > { %2621 = vmatpush1.bf16.msra.mxu0 %v3921_v23  ;;  %2410 = vmatprep.subr.bf16.mxu1 %v3926_v24  ;;  %v4019_v23 = vld [vmem:[%s4496_s9 + $0x7f4] ss:$8 sps:$4 sm:$0xff]   ;;  %v4014_v24 = vld [vmem:[%s4496_s9 + $0x3f0] ss:$8 sps:$4 sm:$0xff]  }
 0x13d   : > { %2622 = vmatprep.subr.bf16.mxu0 %v3929_v25  ;;  %2397 = vmatprep.mubr.bf16.mxu1 %v4002_v26  ;;  %v4017_v25 = vld [vmem:[%s4496_s9 + $0x7f0] ss:$8 sps:$4 sm:$0xff]   ;;  %v4028_v26 = vld [vmem:[%s4496_s9 + $0x804] ss:$8 sps:$4 sm:$0xff]  }
 0x13e   : > { %2609 = vmatprep.mubr.bf16.mxu0 %v4004_v27  ;;  %v4020_v27 = vld [vmem:[#allocation3 + $0x18] ss:$72 sps:$4 sm:$0xff]  }
 0x13f   : > { %2411 = vmatpush1.bf16.msra.mxu1 %v3924_v28  ;;  %v4023_v28 = vld [vmem:[#allocation3 + $0x38] ss:$72 sps:$4 sm:$0xff]  }
 0x140   : > { %2623 = vmatpush1.bf16.msra.mxu0 %v3927_v29  ;;  %2412 = vmatprep.subr.bf16.mxu1 %v3932_v30  ;;  %v4026_v29 = vld [vmem:[%s4496_s9 + $0x800] ss:$8 sps:$4 sm:$0xff]   ;;  %v4031_v30 = vld [vmem:[%s4496_s9 + $0x814] ss:$8 sps:$4 sm:$0xff]  }
 0x141   : > { %2624 = vmatprep.subr.bf16.mxu0 %v3935_v31  ;;  %v4032_v31 = vld [vmem:[#allocation3 + $0xac] ss:$72 sps:$4 sm:$0xff]  }
 0x142   : > { %2398 = vmatmul.mubr.bf16.gmra.mrb[4].mxu1 %v4006_v34  ;;  %v4040_v34 = vld [vmem:[%s4496_s9 + $0x824] ss:$8 sps:$4 sm:$0xff]  }
 0x143   : > { %2610 = vmatmul.mubr.bf16.gmra.mrb[4].mxu0 %v4010_v35  ;;  %2413 = vmatpush1.bf16.msra.mxu1 %v3930_v32  ;;  %v4034_v32 = vld [vmem:[#allocation3 + $0xcc] ss:$72 sps:$4 sm:$0xff]   ;;  %v4036_v35 = vld [vmem:[#allocation3 + $0xa8] ss:$72 sps:$4 sm:$0xff]  }
 0x144   : > { %2625 = vmatpush1.bf16.msra.mxu0 %v3933_v33  ;;  %2414 = vmatprep.subr.bf16.mxu1 %v3938_v36  ;;  %v4029_v33 = vld [vmem:[%s4496_s9 + $0x810] ss:$8 sps:$4 sm:$0xff]  }
 0x145   : > { %2626 = vmatprep.subr.bf16.mxu0 %v3941_v37  ;;  %2440 = vmatprep.mubr.bf16.mxu1 %v4022_v38  ;;  %v4037_v36 = vld [vmem:[#allocation3 + $0xc8] ss:$72 sps:$4 sm:$0xff]   ;;  %v4043_v38 = vld [vmem:[%s4496_s9 + $0x834] ss:$8 sps:$4 sm:$0xff]  }
 0x146   : > { %2652 = vmatprep.mubr.bf16.mxu0 %v4025_v39  ;;  %v4038_v37 = vld [vmem:[%s4496_s9 + $0x820] ss:$8 sps:$4 sm:$0xff]   ;;  %v4082_v39 = vld [vmem:[#allocation3 + $0x44] ss:$72 sps:$4 sm:$0xff]  }
 0x147   : > { %2415 = vmatpush1.bf16.msra.mxu1 %v3936_v40  ;;  %v4085_v40 = vld [vmem:[#allocation3 + $0xd4] ss:$72 sps:$4 sm:$0xff]  }
 0x148   : > { %2627 = vmatpush1.bf16.msra.mxu0 %v3939_v41  ;;  %2416 = vmatprep.subr.bf16.mxu1 %v3944_v42  ;;  %v4041_v41 = vld [vmem:[%s4496_s9 + $0x830] ss:$8 sps:$4 sm:$0xff]   ;;  %v4046_v42 = vld [vmem:[%s4496_s9 + $0x844] ss:$8 sps:$4 sm:$0xff]  }
 0x149   : > { %2628 = vmatprep.subr.bf16.mxu0 %v3947_v43  ;;  %v4044_v43 = vld [vmem:[%s4496_s9 + $0x840] ss:$8 sps:$4 sm:$0xff]  }
 0x14b   : > { %2417 = vmatpush1.bf16.msra.mxu1 %v3942_v44  ;;  %v4049_v44 = vld [vmem:[%s4496_s9 + $0x854] ss:$8 sps:$4 sm:$0xff]  }
 0x14c   : > { %2629 = vmatpush1.bf16.msra.mxu0 %v3945_v45  ;;  %2418 = vmatprep.subr.bf16.mxu1 %v3950_v46  ;;  %v4047_v45 = vld [vmem:[%s4496_s9 + $0x850] ss:$8 sps:$4 sm:$0xff]   ;;  %v4052_v46 = vld [vmem:[%s4496_s9 + $0x864] ss:$8 sps:$4 sm:$0xff]  }
 0x14d   : > { %2630 = vmatprep.subr.bf16.mxu0 %v3953_v47  ;;  %v4050_v47 = vld [vmem:[%s4496_s9 + $0x860] ss:$8 sps:$4 sm:$0xff]  }
 0x14f   : > { %2419 = vmatpush1.bf16.msra.mxu1 %v3948_v48  ;;  %v4055_v48 = vld [vmem:[%s4496_s9 + $0x874] ss:$8 sps:$4 sm:$0xff]  }
 0x150   : > { %2631 = vmatpush1.bf16.msra.mxu0 %v3951_v49  ;;  %2420 = vmatprep.subr.bf16.mxu1 %v3956_v50  ;;  %v4053_v49 = vld [vmem:[%s4496_s9 + $0x870] ss:$8 sps:$4 sm:$0xff]   ;;  %v4058_v50 = vld [vmem:[%s4496_s9 + $0x884] ss:$8 sps:$4 sm:$0xff]  }
 0x151   : > { %2632 = vmatprep.subr.bf16.mxu0 %v3959_v51  ;;  %v4056_v51 = vld [vmem:[%s4496_s9 + $0x880] ss:$8 sps:$4 sm:$0xff]  }
 0x153   : > { %2421 = vmatpush1.bf16.msra.mxu1 %v3954_v52  ;;  %v4061_v52 = vld [vmem:[%s4496_s9 + $0x894] ss:$8 sps:$4 sm:$0xff]  }
 0x154   : > { %2633 = vmatpush1.bf16.msra.mxu0 %v3957_v53  ;;  %2422 = vmatprep.subr.bf16.mxu1 %v3962_v54  ;;  %v4059_v53 = vld [vmem:[%s4496_s9 + $0x890] ss:$8 sps:$4 sm:$0xff]   ;;  %v4064_v54 = vld [vmem:[%s4496_s9 + $0x8a4] ss:$8 sps:$4 sm:$0xff]  }
 0x155   : > { %2634 = vmatprep.subr.bf16.mxu0 %v3965_v55  ;;  %v4062_v55 = vld [vmem:[%s4496_s9 + $0x8a0] ss:$8 sps:$4 sm:$0xff]  }
 0x157   : > { %2423 = vmatpush1.bf16.msra.mxu1 %v3960_v56  ;;  %v4067_v56 = vld [vmem:[%s4496_s9 + $0x8b4] ss:$8 sps:$4 sm:$0xff]  }
 0x158   : > { %2635 = vmatpush1.bf16.msra.mxu0 %v3963_v57  ;;  %2424 = vmatprep.subr.bf16.mxu1 %v3968_v58  ;;  %v4065_v57 = vld [vmem:[%s4496_s9 + $0x8b0] ss:$8 sps:$4 sm:$0xff]   ;;  %v4070_v58 = vld [vmem:[%s4496_s9 + $0x8c4] ss:$8 sps:$4 sm:$0xff]  }
 0x159   : > { %2636 = vmatprep.subr.bf16.mxu0 %v3971_v59  ;;  %v4068_v59 = vld [vmem:[%s4496_s9 + $0x8c0] ss:$8 sps:$4 sm:$0xff]  }
 0x15b   : > { %2425 = vmatpush1.bf16.msra.mxu1 %v3966_v60  ;;  %v4073_v60 = vld [vmem:[%s4496_s9 + $0x8d4] ss:$8 sps:$4 sm:$0xff]  }
 0x15c   : > { %2637 = vmatpush1.bf16.msra.mxu0 %v3969_v61  ;;  %2426 = vmatprep.subr.bf16.mxu1 %v3974_v62  ;;  %v4071_v61 = vld [vmem:[%s4496_s9 + $0x8d0] ss:$8 sps:$4 sm:$0xff]   ;;  %v4076_v62 = vld [vmem:[%s4496_s9 + $0x8e4] ss:$8 sps:$4 sm:$0xff]  }
 0x15d   : > { %2638 = vmatprep.subr.bf16.mxu0 %v3977_v63  ;;  %v4074_v63 = vld [vmem:[%s4496_s9 + $0x8e0] ss:$8 sps:$4 sm:$0xff]  }
 0x15f   : > { %2427 = vmatpush1.bf16.msra.mxu1 %v3972_v0  ;;  %v4079_v0 = vld [vmem:[%s4496_s9 + $0x8f4] ss:$8 sps:$4 sm:$0xff]  }
 0x160   : > { %2639 = vmatpush1.bf16.msra.mxu0 %v3975_v1  ;;  %2428 = vmatprep.subr.bf16.mxu1 %v3980_v2  ;;  %v4077_v1 = vld [vmem:[%s4496_s9 + $0x8f0] ss:$8 sps:$4 sm:$0xff]   ;;  %v4080_v2 = vld [vmem:[#allocation3 + $0x40] ss:$72 sps:$4 sm:$0xff]  }
 0x161   : > { %2640 = vmatprep.subr.bf16.mxu0 %v3983_v3  ;;  %v4083_v3 = vld [vmem:[#allocation3 + $0xd0] ss:$72 sps:$4 sm:$0xff]  }
 0x163   : > { %2429 = vmatpush1.bf16.msra.mxu1 %v3978_v4 }
 0x164   : > { %2641 = vmatpush1.bf16.msra.mxu0 %v3981_v5  ;;  %2430 = vmatprep.subr.bf16.mxu1 %v3986_v6 }
 0x165   : > { %2642 = vmatprep.subr.bf16.mxu0 %v3989_v7 }
 0x167   : > { %2431 = vmatpush1.bf16.msra.mxu1 %v3984_v8 }
 0x168   : > { %2643 = vmatpush1.bf16.msra.mxu0 %v3987_v9  ;;  %2432 = vmatprep.subr.bf16.mxu1 %v3992_v10 }
 0x169   : > { %2644 = vmatprep.subr.bf16.mxu0 %v3995_v11 }
 0x16b   : > { %2433 = vmatpush1.bf16.msra.mxu1 %v3990_v12 }
 0x16c   : > { %2645 = vmatpush1.bf16.msra.mxu0 %v3993_v13  ;;  %2434 = vmatprep.subr.bf16.mxu1 %v3998_v14 }
 0x16d   : > { %2646 = vmatprep.subr.bf16.mxu0 %v4001_v15 }
 0x16f   : > { %2435 = vmatpush1.bf16.msra.mxu1 %v3996_v16 }
 0x170   : > { %2647 = vmatpush1.bf16.msra.mxu0 %v3999_v17  ;;  %2436 = vmatprep.subr.bf16.mxu1 %v4009_v18 }
 0x171   : > { %2648 = vmatprep.subr.bf16.mxu0 %v4013_v19 }
 0x173   : > { %2437 = vmatpush1.bf16.msra.mxu1 %v4007_v20  ;;  %v2755_v20 = vlaneseq }
 0x174   : > { %2649 = vmatpush1.bf16.msra.mxu0 %v4011_v21  ;;  %2438 = vmatprep.subr.bf16.mxu1 %v4016_v22 }
 0x175   : > { %2650 = vmatprep.subr.bf16.mxu0 %v4019_v23  ;;  %v2756_v21 = vshrl.u32 %v2755_v20, 7  ;;  %v2753_v23 = vld [vmem:[%s4793_s30] ss:$8 sm:$0x3] }
 0x177   : > { %2439 = vmatpush1.bf16.msra.mxu1 %v4014_v24  ;;  %v4791_v22 = vsub.s32 0, %v2756_v21  ;;  %v4796_v24 = vsub.s32 1, %v2756_v21 }
 0x178   : > { %2651 = vmatpush1.bf16.msra.mxu0 %v4017_v25  ;;  %3416 = vmatprep.subr.bf16.mxu1 %v4028_v26 }
 0x179   : > { %2673 = vmatprep.subr.bf16.mxu0 %v4028_v26 }
 0x17a   : > { %2441 = vmatmul.mubr.bf16.vlgmr.msra.gmra.mrb[0].mxu1 %v4020_v27 }
 0x17b   : > { %2653 = vmatmul.mubr.bf16.vlgmr.msra.gmra.mrb[0].mxu0 %v4023_v28  ;;  %3432 = vmatpush1.bf16.msra.mxu1 %v4026_v29  ;;  %v2758_v28 = vrot.slane %v2753_v23, %v4791_v22 }
 0x17c   : > { %2674 = vmatpush1.bf16.msra.mxu0 %v4026_v29  ;;  %3417 = vmatprep.subr.bf16.mxu1 %v4031_v30 }
 0x17d   : > { %2675 = vmatprep.subr.bf16.mxu0 %v4031_v30  ;;  %2450 = vmatprep.mubr.bf16.mxu1 %v4032_v31 }
 0x17e   : > { %2662 = vmatprep.mubr.bf16.mxu0 %v4034_v32 }
 0x17f   : > { %3433 = vmatpush1.bf16.msra.mxu1 %v4029_v33 }
 0x180   : > { %2676 = vmatpush1.bf16.msra.mxu0 %v4029_v33  ;;  %3418 = vmatprep.subr.bf16.mxu1 %v4040_v34  ;;  %v2762_v33 = vrot.slane %v2753_v23, %v4796_v24 }
 0x181   : > { %2677 = vmatprep.subr.bf16.mxu0 %v4040_v34 }
 0x182   : > { %2451 = vmatmul.mubr.bf16.gmra.mrb[4].mxu1 %v4036_v35 }
 0x183   : > { %2663 = vmatmul.mubr.bf16.gmra.mrb[4].mxu0 %v4037_v36  ;;  %3434 = vmatpush1.bf16.msra.mxu1 %v4038_v37 }
 0x184   : > { %2678 = vmatpush1.bf16.msra.mxu0 %v4038_v37  ;;  %3419 = vmatprep.subr.bf16.mxu1 %v4043_v38 }
 0x185   : > { %2679 = vmatprep.subr.bf16.mxu0 %v4043_v38  ;;  %2705 = vmatprep.mubr.bf16.mxu0 %v4082_v39 }
 0x186   : > { %2715 = vmatprep.mubr.bf16.mxu1 %v4085_v40 }
 0x187   : > { %3435 = vmatpush1.bf16.msra.mxu1 %v4041_v41 }
 0x188   : > { %2680 = vmatpush1.bf16.msra.mxu0 %v4041_v41  ;;  %3420 = vmatprep.subr.bf16.mxu1 %v4046_v42 }
 0x189   : > { %2681 = vmatprep.subr.bf16.mxu0 %v4046_v42 }
 0x18b   : > { %3436 = vmatpush1.bf16.msra.mxu1 %v4044_v43 }
 0x18c   : > { %2682 = vmatpush1.bf16.msra.mxu0 %v4044_v43  ;;  %3421 = vmatprep.subr.bf16.mxu1 %v4049_v44 }
 0x18d   : > { %2683 = vmatprep.subr.bf16.mxu0 %v4049_v44 }
 0x18f   : > { %3437 = vmatpush1.bf16.msra.mxu1 %v4047_v45 }
 0x190   : > { %2684 = vmatpush1.bf16.msra.mxu0 %v4047_v45  ;;  %3422 = vmatprep.subr.bf16.mxu1 %v4052_v46 }
 0x191   : > { %2685 = vmatprep.subr.bf16.mxu0 %v4052_v46 }
 0x193   : > { %3438 = vmatpush1.bf16.msra.mxu1 %v4050_v47 }
 0x194   : > { %2686 = vmatpush1.bf16.msra.mxu0 %v4050_v47  ;;  %3423 = vmatprep.subr.bf16.mxu1 %v4055_v48 }
 0x195   : > { %2687 = vmatprep.subr.bf16.mxu0 %v4055_v48 }
 0x197   : > { %3439 = vmatpush1.bf16.msra.mxu1 %v4053_v49 }
 0x198   : > { %2688 = vmatpush1.bf16.msra.mxu0 %v4053_v49  ;;  %3424 = vmatprep.subr.bf16.mxu1 %v4058_v50 }
 0x199   : > { %2689 = vmatprep.subr.bf16.mxu0 %v4058_v50 }
 0x19b   : > { %3440 = vmatpush1.bf16.msra.mxu1 %v4056_v51 }
 0x19c   : > { %2690 = vmatpush1.bf16.msra.mxu0 %v4056_v51  ;;  %3425 = vmatprep.subr.bf16.mxu1 %v4061_v52 }
 0x19d   : > { %2691 = vmatprep.subr.bf16.mxu0 %v4061_v52 }
 0x19f   : > { %3441 = vmatpush1.bf16.msra.mxu1 %v4059_v53 }
 0x1a0   : > { %2692 = vmatpush1.bf16.msra.mxu0 %v4059_v53  ;;  %3426 = vmatprep.subr.bf16.mxu1 %v4064_v54 }
 0x1a1   : > { %2693 = vmatprep.subr.bf16.mxu0 %v4064_v54 }
 0x1a3   : > { %3442 = vmatpush1.bf16.msra.mxu1 %v4062_v55 }
 0x1a4   : > { %2694 = vmatpush1.bf16.msra.mxu0 %v4062_v55  ;;  %3427 = vmatprep.subr.bf16.mxu1 %v4067_v56 }
 0x1a5   : > { %2695 = vmatprep.subr.bf16.mxu0 %v4067_v56 }
 0x1a7   : > { %3443 = vmatpush1.bf16.msra.mxu1 %v4065_v57 }
 0x1a8   : > { %2696 = vmatpush1.bf16.msra.mxu0 %v4065_v57  ;;  %3428 = vmatprep.subr.bf16.mxu1 %v4070_v58 }
 0x1a9   : > { %2697 = vmatprep.subr.bf16.mxu0 %v4070_v58 }
 0x1ab   : > { %3444 = vmatpush1.bf16.msra.mxu1 %v4068_v59 }
 0x1ac   : > { %2698 = vmatpush1.bf16.msra.mxu0 %v4068_v59  ;;  %3429 = vmatprep.subr.bf16.mxu1 %v4073_v60 }
 0x1ad   : > { %2699 = vmatprep.subr.bf16.mxu0 %v4073_v60 }
 0x1af   : > { %3445 = vmatpush1.bf16.msra.mxu1 %v4071_v61 }
 0x1b0   : > { %2700 = vmatpush1.bf16.msra.mxu0 %v4071_v61  ;;  %3430 = vmatprep.subr.bf16.mxu1 %v4076_v62 }
 0x1b1   : > { %2701 = vmatprep.subr.bf16.mxu0 %v4076_v62 }
 0x1b3   : > { %3446 = vmatpush1.bf16.msra.mxu1 %v4074_v63 }
 0x1b4   : > { %2702 = vmatpush1.bf16.msra.mxu0 %v4074_v63  ;;  %3431 = vmatprep.subr.bf16.mxu1 %v4079_v0 }
 0x1b5   : > { %2703 = vmatprep.subr.bf16.mxu0 %v4079_v0 }
 0x1b7   : > { %3447 = vmatpush1.bf16.msra.mxu1 %v4077_v1 }
 0x1b8   : > { %2704 = vmatpush1.bf16.msra.mxu0 %v4077_v1 }
 0x1ba   : > { %2716 = vmatmul.mubr.bf16.vlgmr.msra.gmra.mrb[8].mxu1 %v4083_v3 }
 0x1bb   : > { %2706 = vmatmul.mubr.bf16.vlgmr.msra.gmra.mrb[0].mxu0 %v4080_v2 }
 0x24d   : > { %v2442_v4 = vpop.f32.mrb[0].mxu1 }
 0x24e   : > { %v2444_v5 = vpop.f32.mrb[1].mxu1 }
 0x24f   : > { %v2446_v6 = vpop.f32.mrb[2].mxu1 }
 0x250   : > { %v2448_v7 = vpop.f32.mrb[3].mxu1 }
 0x255   : > { %v2452_v8 = vpop.f32.mrb[4].mxu1 }
 0x256   : > { %v2664_v9 = vpop.f32.mrb[4].mxu0  ;;  %v2454_v11 = vpop.f32.mrb[5].mxu1 }
 0x257   : > { %v3452_v10 = vadd.f32 %v2664_v9, %v2452_v8  ;;  %v2666_v12 = vpop.f32.mrb[5].mxu0  ;;  %v2456_v14 = vpop.f32.mrb[6].mxu1 }
 0x258   : > { %v3454_v13 = vadd.f32 %v2666_v12, %v2454_v11  ;;  %v2668_v15 = vpop.f32.mrb[6].mxu0  ;;  %v2458_v17 = vpop.f32.mrb[7].mxu1 }
 0x259   : > { %v3456_v16 = vadd.f32 %v2668_v15, %v2456_v14  ;;  %v2670_v18 = vpop.f32.mrb[7].mxu0 }
 0x25a   : > { %v3458_v19 = vadd.f32 %v2670_v18, %v2458_v17 }
 0x28d   : > { %v2717_v26 = vpop.f32.mrb[8].mxu1 }
 0x28e   : > { %v2707_v25 = vpop.f32.mrb[0].mxu0  ;;  %v3453_v29 = vadd.f32 %v3452_v10, %v2717_v26  ;;  %v2719_v31 = vpop.f32.mrb[9].mxu1 }
 0x28f   : > { %v3448_v27 = vadd.f32 %v2707_v25, %v2442_v4  ;;  %v2709_v30 = vpop.f32.mrb[1].mxu0  ;;  %v3455_v34 = vadd.f32 %v3454_v13, %v2719_v31  ;;  %v2721_v36 = vpop.f32.mrb[10].mxu1 }
 0x290   : > { %v3449_v32 = vadd.f32 %v2709_v30, %v2444_v5  ;;  %v2711_v35 = vpop.f32.mrb[2].mxu0  ;;  %v3457_v38 = vadd.f32 %v3456_v16, %v2721_v36  ;;  %v2723_v40 = vpop.f32.mrb[11].mxu1  ;;  %v2769_v47 = vadd.f32 %v3453_v29, %v2758_v28 }
 0x291   : > { %v3450_v37 = vadd.f32 %v2711_v35, %v2446_v6  ;;  %v2713_v39 = vpop.f32.mrb[3].mxu0  ;;  %v3459_v42 = vadd.f32 %v3458_v19, %v2723_v40  ;;  %v2765_v43 = vadd.f32 %v3448_v27, %v2758_v28  ;;  %v2770_v49 = vadd.f32 %v3455_v34, %v2762_v33 }
 0x292   : > { %v3451_v41 = vadd.f32 %v2713_v39, %v2448_v7  ;;  %v2766_v45 = vadd.f32 %v3449_v32, %v2762_v33  ;;  %v2771_v51 = vadd.f32 %v3457_v38, %v2758_v28 }
 0x293   : > { %v2767_v44 = vadd.f32 %v3450_v37, %v2758_v28  ;;  %v2772_v53 = vadd.f32 %v3459_v42, %v2762_v33 }
 0x294   : > { %v2768_v46 = vadd.f32 %v3451_v41, %v2762_v33 }
 0x295   : > { %v2790_v48 = vadd.f32 %v2767_v44, %v2765_v43 }
 0x296   : > { %v2799_v50 = vadd.f32 %v2768_v46, %v2766_v45 }
 0x297   : > { %v2791_v52 = vadd.f32 %v2790_v48, %v2769_v47  ;;  %v3407_v48 = vld [vmem:[%s4793_s30 + $0x2] ss:$8 sm:$0x3] }
 0x298   : > { %v2800_v54 = vadd.f32 %v2799_v50, %v2770_v49 }
 0x299   : > { %v2792_v55 = vadd.f32 %v2791_v52, %v2771_v51 }
 0x29a   : > { %v2801_v56 = vadd.f32 %v2800_v54, %v2772_v53 }
 0x29b   : > { %v2793_v57 = vrot.slane %v2792_v55, 4 }
 0x29c   : > { %v2802_v58 = vrot.slane %v2801_v56, 4 }
 0x29d   : > { %v2794_v59 = vadd.f32 %v2793_v57, %v2792_v55 }
 0x29e   : > { %v2803_v60 = vadd.f32 %v2802_v58, %v2801_v56 }
 0x29f   : > { %v2795_v61 = vrot.slane %v2794_v59, 2 }
 0x2a0   : > { %v2804_v62 = vrot.slane %v2803_v60, 2 }
 0x2a1   : > { %v2796_v63 = vadd.f32 %v2795_v61, %v2794_v59 }
 0x2a2   : > { %v2805_v0 = vadd.f32 %v2804_v62, %v2803_v60 }
 0x2a3   : > { %v2797_v1 = vrot.slane %v2796_v63, 1 }
 0x2a4   : > { %v2806_v2 = vrot.slane %v2805_v0, 1 }
 0x2a5   : > { %v2798_v3 = vadd.f32 %v2797_v1, %v2796_v63 }
 0x2a6   : > { %v2807_v4 = vadd.f32 %v2806_v2, %v2805_v0 }
 0x2a7   : > { %v2808_v5 = vmul.f32 0.03125, %v2798_v3 }
 0x2a8   : > { %v2809_v6 = vmul.f32 0.03125, %v2807_v4 }
 0x2a9   : > { %v2810_v7 = vsub.f32 %v2765_v43, %v2808_v5  ;;  %v2812_v8 = vsub.f32 %v2767_v44, %v2808_v5  ;;  %v2814_v9 = vsub.f32 %v2769_v47, %v2808_v5  ;;  %v2816_v10 = vsub.f32 %v2771_v51, %v2808_v5  ;;  %v3406_v47 = vld [vmem:[%s4793_s30 + $0x1] ss:$8 sm:$0x3] }
 0x2aa   : > { %v2811_v11 = vsub.f32 %v2766_v45, %v2809_v6  ;;  %v2813_v12 = vsub.f32 %v2768_v46, %v2809_v6  ;;  %v2815_v13 = vsub.f32 %v2770_v49, %v2809_v6  ;;  %v2817_v14 = vsub.f32 %v2772_v53, %v2809_v6 }
 0x2ab   : > { %v2826_v15 = vmul.f32 %v2810_v7, %v2810_v7  ;;  %v2828_v16 = vmul.f32 %v2812_v8, %v2812_v8  ;;  %v2830_v19 = vmul.f32 %v2814_v9, %v2814_v9  ;;  %v2832_v25 = vmul.f32 %v2816_v10, %v2816_v10 }
 0x2ac   : > { %v2827_v17 = vmul.f32 %v2811_v11, %v2811_v11  ;;  %v2829_v18 = vmul.f32 %v2813_v12, %v2813_v12  ;;  %v2831_v21 = vmul.f32 %v2815_v13, %v2815_v13  ;;  %v2833_v27 = vmul.f32 %v2817_v14, %v2817_v14 }
 0x2ad   : > { %v2834_v20 = vadd.f32 %v2828_v16, %v2826_v15  ;;  %v2872_v49 = vrot.slane %v3406_v47, %v4791_v22  ;;  %v2893_v51 = vrot.slane %v3407_v48, %v4791_v22  ;;  %v2876_v52 = vrot.slane %v3406_v47, %v4796_v24 }
 0x2ae   : > { %v2843_v23 = vadd.f32 %v2829_v18, %v2827_v17  ;;  %v2897_v53 = vrot.slane %v3407_v48, %v4796_v24 }
 0x2af   : > { %v2835_v26 = vadd.f32 %v2834_v20, %v2830_v19 }
 0x2b0   : > { %v2844_v28 = vadd.f32 %v2843_v23, %v2831_v21 }
 0x2b1   : > { %v2836_v29 = vadd.f32 %v2835_v26, %v2832_v25 }
 0x2b2   : > { %v2845_v30 = vadd.f32 %v2844_v28, %v2833_v27 }
 0x2b3   : > { %v2837_v31 = vrot.slane %v2836_v29, 4 }
 0x2b4   : > { %v2846_v32 = vrot.slane %v2845_v30, 4 }
 0x2b5   : > { %v2838_v33 = vadd.f32 %v2837_v31, %v2836_v29 }
 0x2b6   : > { %v2847_v34 = vadd.f32 %v2846_v32, %v2845_v30 }
 0x2b7   : > { %v2839_v35 = vrot.slane %v2838_v33, 2 }
 0x2b8   : > { %v2848_v36 = vrot.slane %v2847_v34, 2 }
 0x2b9   : > { %v2840_v37 = vadd.f32 %v2839_v35, %v2838_v33 }
 0x2ba   : > { %v2849_v38 = vadd.f32 %v2848_v36, %v2847_v34 }
 0x2bb   : > { %v2841_v39 = vrot.slane %v2840_v37, 1 }
 0x2bc   : > { %v2850_v40 = vrot.slane %v2849_v38, 1 }
 0x2bd   : > { %v2842_v41 = vadd.f32 %v2841_v39, %v2840_v37 }
 0x2be   : > { %v2851_v42 = vadd.f32 %v2850_v40, %v2849_v38 }
 0x2bf   : > { %v2852_v43 = vmul.f32 0.03125, %v2842_v41 }
 0x2c0   : > { %v2853_v44 = vmul.f32 0.03125, %v2851_v42 }
 0x2c1   : > { %v2854_v45 = vadd.f32 1e-05, %v2852_v43 }
 0x2c2   : > { %v2855_v46 = vadd.f32 1e-05, %v2853_v44 }
 0x2c3   : > { %4086 = vrsqrt.f32 %v2854_v45 }
 0x2c4   : > { %4088 = vrsqrt.f32 %v2855_v46 }
 0x2cd   : > { %v4087_v50 = vpop.eup %4086 }
 0x2ce   : > { %v4089_v54 = vpop.eup %4088  ;;  %v2858_v55 = vmul.f32 %v4087_v50, %v2810_v7  ;;  %v2860_v56 = vmul.f32 %v4087_v50, %v2812_v8  ;;  %v2862_v57 = vmul.f32 %v4087_v50, %v2814_v9  ;;  %v2864_v58 = vmul.f32 %v4087_v50, %v2816_v10 }
 0x2cf   : > { %v2859_v59 = vmul.f32 %v4089_v54, %v2811_v11  ;;  %v2861_v60 = vmul.f32 %v4089_v54, %v2813_v12  ;;  %v2863_v61 = vmul.f32 %v4089_v54, %v2815_v13  ;;  %v2865_v62 = vmul.f32 %v4089_v54, %v2817_v14 }
 0x2d0   : > { %v2879_v63 = vmul.f32 %v2872_v49, %v2858_v55  ;;  %v2881_v0 = vmul.f32 %v2872_v49, %v2860_v56  ;;  %v2883_v1 = vmul.f32 %v2872_v49, %v2862_v57  ;;  %v2885_v2 = vmul.f32 %v2872_v49, %v2864_v58 }
 0x2d1   : > { %v2880_v22 = vmul.f32 %v2876_v52, %v2859_v59  ;;  %v2882_v3 = vmul.f32 %v2876_v52, %v2861_v60  ;;  %v2884_v4 = vmul.f32 %v2876_v52, %v2863_v61  ;;  %v2886_v5 = vmul.f32 %v2876_v52, %v2865_v62 }
 0x2d2   : > { %v2900_v24 = vadd.f32 %v2893_v51, %v2879_v63  ;;  %v2902_v6 = vadd.f32 %v2893_v51, %v2881_v0  ;;  %v2904_v7 = vadd.f32 %v2893_v51, %v2883_v1  ;;  %v2906_v8 = vadd.f32 %v2893_v51, %v2885_v2 }
 0x2d3   : > { %v2901_v9 = vadd.f32 %v2897_v53, %v2880_v22  ;;  %v2903_v10 = vadd.f32 %v2897_v53, %v2882_v3  ;;  %v2905_v11 = vadd.f32 %v2897_v53, %v2884_v4  ;;  %v2907_v12 = vadd.f32 %v2897_v53, %v2886_v5 }
 0x2d4   : > { %v2908_v13 = vmax.f32 %v2900_v24, 0.0  ;;  %v2910_v14 = vmax.f32 %v2902_v6, 0.0  ;;  %v2912_v15 = vmax.f32 %v2904_v7, 0.0  ;;  %v2914_v16 = vmax.f32 %v2906_v8, 0.0 }
 0x2d5   : > { %v2909_v17 = vmax.f32 %v2901_v9, 0.0  ;;  %v2911_v18 = vmax.f32 %v2903_v10, 0.0  ;;  %v2913_v19 = vmax.f32 %v2905_v11, 0.0  ;;  %v2915_v20 = vmax.f32 %v2907_v12, 0.0 }
 0x2d6   : > { %2916 = vst [vmem:[%s277_s25] sm:$0xff] %v2908_v13  ;;  %2918 = vst [vmem:[%s277_s25 + $0x10] sm:$0xff] %v2910_v14 }
 0x2d7   : > { %2920 = vst [vmem:[%s277_s25 + $0x20] sm:$0xff] %v2912_v15  ;;  %2922 = vst [vmem:[%s277_s25 + $0x30] sm:$0xff] %v2914_v16 }
 0x2d8   : > { %2917 = vst [vmem:[%s277_s25 + $0x8] sm:$0xff] %v2909_v17  ;;  %2919 = vst [vmem:[%s277_s25 + $0x18] sm:$0xff] %v2911_v18 }
 0x2d9   : > { %2921 = vst [vmem:[%s277_s25 + $0x28] sm:$0xff] %v2913_v19  ;;  %2923 = vst [vmem:[%s277_s25 + $0x38] sm:$0xff] %v2915_v20 }
 0x2da   : > { %4191 = shalt.err (!%p4188_p8)
}
 0x2db   : > { %s4192_s18 = scalar_lea.hbm %s4811_s23, 1024  ;;  %s4196_s6 = scalar_lea.hbm %s4865_s3, 2048 }
 0x2dc   : > { %p4193_p10 = scmp.ne.s32.totalorder %s4811_s23, %s4192_s18  ;;  %p4197_p3 = scmp.lt.u32.totalorder %s4811_s23, %s4865_s3 }
 0x2dd   : > { %p4198_p2 = scmp.lt.u32.totalorder %s4196_s6, %s4192_s18  ;;  %p4200_p4 = scmp.lt.u32.totalorder %s4192_s18, %s4811_s23 }
 0x2de   : > { %p4194_p13 = pnand %p4193_p10, %p4890_p6 }
 0x2df   : > { %p4199_p11 = por %p4198_p2, %p4197_p3 }
 0x2e0   : > { %p4195_p7 = pneg %p4194_p13 }
 0x2e1   : > { %p4201_p1 = por %p4200_p4, %p4199_p11 }
 0x2e3   : > { %p4202_p12 = pnand %p4201_p1, %p4195_p7 }
 0x2e5   : > { %4205 = shalt.err (!%p4202_p12)
}
 0x2e6   : > { %s4275_s30 = smov 256   ;;  %s4276_s7 = smov 512  }
 0x2e7   : > { %s4277_s8 = smov 16  }
 0x2e8   : > { %3522 = dma.vmem_to_hbm [thread:$0]  (%p4890_p6), %s4813_s27, 1024, %s4811_s23, %s2925_s15, %s4275_s30, %s4276_s7, %s4277_s8  }
 0x2e9 PF: > { %s2956_s25 = sand.u32 1, %s4244_s12   ;;  %p4891_p0 = scmp.ne.s32.totalorder %s4880_s4, 0 }
 0x2ea   : > { %p4892_p9 = scmp.ge.s32.totalorder %s4264_s17, 2  ;;  %s2957_s22 = scalar_lea.sflag [#allocation5], %s2956_s25 }
 0x2ec   : > { %p3536_p5 = pnand %p4892_p9, %p4891_p0 }
 0x2ee   : > { %4239 = dma.done.wait (!%p3536_p5), %s2957_s22, 1024  }
 0x2ef   : > { %4241 = vsyncadd (!%p3536_p5), %s2957_s22, 4294966272  ;;  %s20_s17 = sadd.s32 1, %s4264_s17   ;;  %s4893_s28 = sld [smem:[#allocation13_spill]] }
 0x2f0   : > { %p17_p8 = scmp.ge.s32.totalorder %s20_s17, 4   ;;  %s4894_s12 = smov %s4248_s13 }
 0x2f1   : > { %s4895_s13 = smov %s4252_s14  ;;  %s4896_s14 = smov %s4346_s24 }
 0x2f2   : > { %s4897_s15 = smov %s4260_s16  ;;  %19 = sbr.rel (!%p17_p8) target bundleno = 9 (0x9), region = 104 }
 0x2f5   : > { %s4898_s16 = smov %s4893_s28 }
 0x2f9   :  { %2962 = vsyncpa [#allocation4], 1 }
 0x2fa   :  { %2964 = vsyncpa [#allocation4 + $0x1], 1 }
 0x2fb   :  { %2965 = vsyncpa [#allocation7], 1 }
 0x2fc   :  { %2967 = vsyncpa [#allocation7 + $0x1], 1 }
 0x2fd   :  { %2968 = vsyncpa [#allocation5], 1 }
 0x2fe   :  { %2970 = vsyncpa [#allocation5 + $0x1], 1 }

// kernel: up_dense_1_softmax_forward.10
= control target key start
LH: loop header
LB: loop body
LE: loop exit
PB: predicated region body
PF: predicated region fallthrough
CT: control target
= control target key end

     0   :  { %s5228_s0 = inlined_call_operand.hbm [shape: bf16[32,4608], index: 0, kind: input, shape index: {}]   ;;  %s5229_s1 = inlined_call_operand.hbm [shape: bf16[4608,512], index: 1, kind: input, shape index: {}]   ;;  %s5230_s2 = inlined_call_operand.hbm [shape: f32[8,512], index: 2, kind: input, shape index: {}]   ;;  %s5231_s3 = inlined_call_operand.hbm [shape: f32[32,512], index: 3, kind: output, shape index: {}]  }
   0x1   :  { %5244 = sst [smem:[#allocation21_spill]] %s5228_s0 }
   0x2   :  { %5245 = sst [smem:[#allocation22_spill]] %s5229_s1 }
   0x3   :  { %5246 = sst [smem:[#allocation23_spill]] %s5230_s2 }
   0x4   :  { %5247 = sst [smem:[#allocation24_spill]] %s5231_s3 }
   0x5   :  { %8 = vsyncpa [#allocation4], 0 }
   0x6   :  { %10 = vsyncpa [#allocation4 + $0x1], 0 }
   0x7   :  { %11 = vsyncpa [#allocation7], 0 }
   0x8   :  { %13 = vsyncpa [#allocation7 + $0x1], 0 }
   0x9   :  { %14 = vsyncpa [#allocation5], 0 }
   0xa   :  { %16 = vsyncpa [#allocation5 + $0x1], 0  ;;  %s4465_s12 = smov 0   ;;  %s4467_s13 = smov 0  }
   0xb   :  { %s4469_s14 = smov 0   ;;  %s4471_s15 = smov 0  }
   0xc   :  { %s4473_s16 = smov 0   ;;  %s4475_s17 = smov 0  }
   0xd   :  { %s4477_s18 = smov 0   ;;  %s4479_s19 = smov 0  }
   0xe   :  { %s4481_s20 = smov 0   ;;  %s4483_s21 = smov 0  }
   0xf   :  { %s4485_s22 = smov 0   ;;  %s4487_s23 = smov 0  }
  0x10   :  { %s4489_s24 = smov 0   ;;  %s4491_s25 = smov 0  }
  0x11 LB: > { %5248 = sst [smem:[#allocation14_spill]] %s4377_s12  ;;  %s34_s26 = sadd.s32 1, %s4421_s23  ;;  %s4429_s25 = sphi %s4491_s25, %s22_s25   ;;  %s4425_s24 = sphi %s4489_s24, %s5292_s24   ;;  %s4421_s23 = sphi %s4487_s23, %s5303_s23   ;;  %s4417_s22 = sphi %s4485_s22, %s5290_s22   ;;  %s4413_s21 = sphi %s4483_s21, %s5302_s21   ;;  %s4409_s20 = sphi %s4481_s20, %s5301_s20   ;;  %s4405_s19 = sphi %s4479_s19, %s5300_s19   ;;  %s4401_s18 = sphi %s4477_s18, %s5299_s18   ;;  %s4397_s17 = sphi %s4475_s17, %s5298_s17   ;;  %s4393_s16 = sphi %s4473_s16, %s5297_s16   ;;  %s4389_s15 = sphi %s4471_s15, %s5296_s15   ;;  %s4385_s14 = sphi %s4469_s14, %s5295_s14   ;;  %s4381_s13 = sphi %s4467_s13, %s5294_s13   ;;  %s4377_s12 = sphi %s4465_s12, %s5293_s12  }
  0x12   : > { %5249 = sst [smem:[#allocation15_spill]] %s4389_s15  ;;  %s37_s27 = sadd.s32 1, %s4425_s24 }
  0x13   : > { %5250 = sst [smem:[#allocation16_spill]] %s4413_s21  ;;  %p35_p0 = scmp.ge.s32.totalorder %s34_s26, 2 }
  0x14   : > { %5251 = sst [smem:[#allocation17_spill]] %s4417_s22  ;;  %p5237_p1 = scmp.eq.s32.totalorder %s4429_s25, 0 }
  0x15   : > { %5252 = sst [smem:[#allocation18_spill]] %s4425_s24  ;;  %s78_s28 = sadd.s32 1, %s4397_s17 }
  0x16   : > { %p85_p2 = scmp.ne.s32.totalorder %s4397_s17, %s4393_s16  ;;  %s5305_s26 = smov (%p35_p0, %s34_s26), 0 }
  0x17   : > { %5253 = sst [smem:[#allocation19_spill]] %s5305_s26  ;;  %s5307_s27 = smov (!%p35_p0, %s37_s27), %s4425_s24 }
  0x18   : > { %s4546_s29 = ssub.s32 %s4421_s23, %s5305_s26  ;;  %p4550_p3 = por %p85_p2, %p5237_p1 }
  0x19   : > { %p39_p4 = scmp.ge.s32.totalorder %s5307_s27, 2  ;;  %p5236_p7 = scmp.lt.s32.totalorder %s4429_s25, 4 }
  0x1a   : > { %s3445_s4 = smul.u32 1152, %s4421_s23  ;;  %s193_s6 = sand.u32 1, %s4429_s25  }
  0x1b   : > { %s5309_s27 = smov (%p39_p4, %s5307_s27), 0  ;;  %s195_s8 = sand.u32 1, %s4397_s17  }
  0x1c   : > { %5255 = sst [smem:[#allocation20_spill]] %s5309_s27  ;;  %s4563_s5 = ssub.s32 %s4425_s24, %s5309_s27 }
  0x1d   : > { %s75_s7 = sor.u32 %s4563_s5, %s4546_s29  ;;  %s3546_s9 = smul.u32 2304, %s195_s8 }
  0x1e   : > { %p76_p8 = scmp.eq.s32.totalorder %s75_s7, 0  ;;  %s3103_s10 = sshll.u32 %s4425_s24, 1 }
  0x1f   : > { %s204_s26 = sadd.s32 %s3445_s4, %s3103_s10  ;;  %s197_s22 = scalar_lea.vmem [#allocation6], %s3546_s9 }
  0x20   : > { %s4571_s11 = scalar_select %p76_p8, %s4397_s17, %s78_s28  }
  0x21   : > { %s3105_s3 = sshll.u32 %s204_s26, 6  ;;  %s207_s21 = sshll.u32 %s197_s22, 4  ;;  %s4580_s21 = int_to_ptr.vmem [resolvable:$true] %s207_s21 }
  0x22   : > { %s5256_s1 = sld [smem:[#allocation22_spill]]  ;;  %p4586_p9 = pnand %p5236_p7, %p4550_p3 }
  0x23   : > { %p3109_p10 = scmp.ge.s32.totalorder %s4429_s25, 1  ;;  %s4591_s22 = scalar_lea.sflag [#allocation7], %s193_s6 }
  0x24   : > { %p4187_p12 = pneg %p4586_p9 }
  0x28   : > { %s4578_s15 = scalar_lea.hbm %s5256_s1, %s3105_s3  ;;  %s4190_s26 = scalar_lea.hbm %s5256_s1, 147456 }
  0x29   : > { %s4185_s2 = scalar_lea.hbm %s4578_s15, 36864  ;;  %p4191_p2 = scmp.lt.u32.totalorder %s4578_s15, %s5256_s1 }
  0x2a   : > { %p4186_p11 = scmp.ne.s32.totalorder %s4578_s15, %s4185_s2  ;;  %p4192_p3 = scmp.lt.u32.totalorder %s4190_s26, %s4185_s2 }
  0x2b   : > { %p4194_p8 = scmp.lt.u32.totalorder %s4185_s2, %s4578_s15 }
  0x2c   : > { %p4188_p13 = pnand %p4187_p12, %p4186_p11  ;;  %p4193_p4 = por %p4192_p3, %p4191_p2 }
  0x2e   : > { %p4189_p0 = pneg %p4188_p13  ;;  %p4195_p6 = por %p4194_p8, %p4193_p4 }
  0x30   : > { %p4196_p7 = pnand %p4195_p6, %p4189_p0 }
  0x32   : > { %4199 = shalt.err (!%p4196_p7)
}
  0x33   : > { %s4200_s6 = scalar_lea.vmem %s4580_s21, 36864  ;;  %s4431_s8 = smov [#allocation6]  }
  0x34   : > { %p4201_p11 = scmp.ne.s32.totalorder %s4580_s21, %s4200_s6  ;;  %s4205_s9 = sshll.u32 %s4431_s8, 4  ;;  %s4206_s9 = int_to_ptr.vmem [resolvable:$false] %s4205_s9 }
  0x35   : > { %s4207_s10 = scalar_lea.vmem %s4206_s9, 73728  ;;  %p4208_p5 = scmp.lt.s32.totalorder %s4580_s21, %s4206_s9 }
  0x36   : > { %p4203_p13 = pnand %p4201_p11, %p4187_p12  ;;  %p4209_p2 = scmp.lt.s32.totalorder %s4207_s10, %s4200_s6 }
  0x38   : > { %p4204_p1 = pneg %p4203_p13  ;;  %p4210_p3 = por %p4209_p2, %p4208_p5 }
  0x3a   : > { %p4211_p4 = pnand %p4210_p3, %p4204_p1 }
  0x3c   : > { %4214 = shalt.err (!%p4211_p4)
}
  0x3d   : > { %s4432_s2 = smov 256   ;;  %s4433_s3 = smov 128  }
  0x3e   : > { %s4434_s12 = smov 8   ;;  %p234_p1 = scmp.lt.s32.totalorder %s4429_s25, 5 }
  0x3f   : > { %3563 = dma.hbm_to_vmem [thread:$0]  (!%p4586_p9), %s4578_s15, 36864, %s4580_s21, %s4591_s22, %s4432_s2, %s4433_s3, %s4434_s12  }
  0x40   : > { %p4622_p5 = pnand %p3109_p10, %p234_p1  ;;  %s50_s30 = sadd.s32 1, %s4409_s20 }
  0x41   : > { %p57_p6 = scmp.ne.s32.totalorder %s4409_s20, %s4405_s19  ;;  %p5259_p7 = scmp.eq.s32.totalorder %s4546_s29, 0 }
  0x42   : > { %s5258_s26 = scalar_select %p4622_p5, 1, 0 }
  0x43   : > { %s4632_s7 = scalar_select %p5259_p7, %s4409_s20, %s50_s30  }
  0x44   : > { %p5260_p12 = scmp.eq.s32.totalorder %s4429_s25, 0  ;;  %s169_s6 = sand.u32 1, %s4409_s20  }
  0x45   : > { %s5261_s0 = sld [smem:[#allocation21_spill]]  ;;  %s3545_s21 = smul.u32 288, %s169_s6 }
  0x46   : > { %p59_p0 = por %p5260_p12, %p57_p6  ;;  %p5262_p9 = scmp.lt.s32.totalorder %s4429_s25, 4 }
  0x47   : > { %s173_s28 = scalar_lea.vmem [#allocation3], %s3545_s21  ;;  %s4654_s2 = scalar_lea.sflag [#allocation4], %s169_s6 }
  0x48   : > { %p4648_p10 = pnand %p5262_p9, %p59_p0  ;;  %s183_s10 = sshll.u32 %s173_s28, 4  ;;  %s4652_s10 = int_to_ptr.vmem [resolvable:$true] %s183_s10 }
  0x4a   : > { %p4217_p13 = pneg %p4648_p10 }
  0x4b   : > { %s4644_s15 = scalar_lea.hbm %s5261_s0, %s3445_s4  ;;  %s4220_s30 = scalar_lea.hbm %s5261_s0, 9216 }
  0x4c   : > { %s4215_s4 = scalar_lea.hbm %s4644_s15, 4608  ;;  %p4221_p4 = scmp.lt.u32.totalorder %s4644_s15, %s5261_s0 }
  0x4d   : > { %p4216_p11 = scmp.ne.s32.totalorder %s4644_s15, %s4215_s4  ;;  %p4222_p1 = scmp.lt.u32.totalorder %s4220_s30, %s4215_s4 }
  0x4e   : > { %p4224_p7 = scmp.lt.u32.totalorder %s4215_s4, %s4644_s15 }
  0x4f   : > { %p4218_p2 = pnand %p4217_p13, %p4216_p11  ;;  %p4223_p6 = por %p4222_p1, %p4221_p4 }
  0x51   : > { %p4219_p3 = pneg %p4218_p2  ;;  %p4225_p12 = por %p4224_p7, %p4223_p6 }
  0x53   : > { %p4226_p0 = pnand %p4225_p12, %p4219_p3 }
  0x55   : > { %4229 = shalt.err (!%p4226_p0)
}
  0x56   : > { %s4230_s6 = scalar_lea.vmem %s4652_s10, 4608  ;;  %s4435_s21 = smov [#allocation3]  }
  0x57   : > { %p4231_p9 = scmp.ne.s32.totalorder %s4652_s10, %s4230_s6  ;;  %s4235_s28 = sshll.u32 %s4435_s21, 4  ;;  %s4236_s28 = int_to_ptr.vmem [resolvable:$false] %s4235_s28 }
  0x58   : > { %s4237_s3 = scalar_lea.vmem %s4236_s28, 9216  ;;  %p4238_p8 = scmp.lt.s32.totalorder %s4652_s10, %s4236_s28 }
  0x59   : > { %p4233_p11 = pnand %p4231_p9, %p4217_p13  ;;  %p4239_p4 = scmp.lt.s32.totalorder %s4237_s3, %s4230_s6 }
  0x5b   : > { %p4234_p2 = pneg %p4233_p11  ;;  %p4240_p1 = por %p4239_p4, %p4238_p8 }
  0x5d   : > { %p4241_p6 = pnand %p4240_p1, %p4234_p2 }
  0x5f   : > { %4244 = shalt.err (!%p4241_p6)
}
  0x60   : > { %s4436_s4 = smov 2304   ;;  %s5264_s12 = sld [smem:[#allocation15_spill]] }
  0x61   : > { %s5265_s30 = sld [smem:[#allocation14_spill]]  ;;  %s4437_s8 = smov 1152  }
  0x62   : > { %s4438_s9 = smov 72   ;;  %s4683_s6 = sadd.s32 4294967295, %s4429_s25  }
  0x63   : > { %3560 = dma.hbm_to_vmem [thread:$0]  (!%p4648_p10), %s4644_s15, 4608, %s4652_s10, %s4654_s2, %s4436_s4, %s4437_s8, %s4438_s9  }
  0x64   : > { %s3099_s21 = sadd.s32 4294967294, %s4429_s25   ;;  %p64_p8 = scmp.eq.s32.totalorder %s4683_s6, 0 }
  0x65   : > { %p102_p13 = scmp.eq.s32.totalorder %s4563_s5, 0  ;;  %s104_s28 = sadd.s32 1, %s4385_s14 }
  0x66   : > { %p111_p3 = scmp.ne.s32.totalorder %s4385_s14, %s4381_s13  ;;  %p5266_p7 = scmp.ne.s32.totalorder %s4405_s19, %s4401_s18 }
  0x67   : > { %p5268_p0 = scmp.ne.s32.totalorder %s4393_s16, %s5264_s12  ;;  %p5270_p10 = scmp.eq.s32.totalorder %s4429_s25, 0 }
  0x68   : > { %p4694_p12 = por %p64_p8, %p5266_p7  ;;  %p117_p2 = scmp.ne.s32.totalorder %s4381_s13, %s5265_s30 }
  0x69   : > { %p4701_p9 = por %p5268_p0, %p64_p8  ;;  %p4710_p11 = por %p111_p3, %p5270_p10 }
  0x6a   : > { %s5267_s3 = scalar_select %p4694_p12, 1, 0 }
  0x6b   : > { %s5269_s29 = scalar_select %p4701_p9, 1, 0 }
  0x6c   : > { %s4706_s15 = scalar_select %p102_p13, %s4385_s14, %s104_s28  }
  0x6d   : > { %p143_p4 = scmp.eq.s32.totalorder %s4683_s6, 3  ;;  %p149_p1 = scmp.eq.s32.totalorder %s3099_s21, 3 }
  0x6e   : > { %p4717_p6 = por %p117_p2, %p64_p8  ;;  %s219_s5 = sand.u32 1, %s4385_s14  }
  0x6f   : > { %p4722_p7 = por %p143_p4, %p111_p3  ;;  %p4726_p13 = por %p149_p1, %p117_p2 }
  0x70   : > { %s5272_s18 = scalar_select %p4717_p6, 1, 0 }
  0x71   : > { %s5273_s2 = scalar_select %p4722_p7, 1, 0 }
  0x72   : > { %s5274_s4 = scalar_select %p4726_p13, 1, 0 }
  0x73   : > { %s3106_s12 = sshll.u32 %s219_s5, 4  ;;  %s3447_s8 = sshll.u32 %s4425_s24, 8 }
  0x74   : > { %s5275_s30 = sld [smem:[#allocation23_spill]]  ;;  %s221_s21 = scalar_lea.vmem [#allocation8], %s3106_s12 }
  0x75   : > { %s229_s1 = sshll.u32 %s221_s21, 4  ;;  %p5276_p8 = scmp.lt.s32.totalorder %s4429_s25, 4  ;;  %s230_s1 = int_to_ptr.vmem [resolvable:$true] %s229_s1 }
  0x77   : > { %p4740_p3 = pnand %p5276_p8, %p4710_p11 }
  0x79   : > { %p4247_p10 = pneg %p4740_p3 }
  0x7a   : > { %s4734_s0 = scalar_lea.hbm %s5275_s30, %s3447_s8  ;;  %s4250_s10 = scalar_lea.hbm %s5275_s30, 512 }
  0x7b   : > { %s4245_s5 = scalar_lea.hbm %s4734_s0, 256  ;;  %p4251_p11 = scmp.lt.u32.totalorder %s4734_s0, %s5275_s30 }
  0x7c   : > { %p4246_p0 = scmp.ne.s32.totalorder %s4734_s0, %s4245_s5  ;;  %p4252_p1 = scmp.lt.u32.totalorder %s4250_s10, %s4245_s5 }
  0x7d   : > { %p4254_p13 = scmp.lt.u32.totalorder %s4245_s5, %s4734_s0 }
  0x7e   : > { %p4248_p2 = pnand %p4247_p10, %p4246_p0  ;;  %p4253_p8 = por %p4252_p1, %p4251_p11 }
  0x80   : > { %p4249_p4 = pneg %p4248_p2  ;;  %p4255_p7 = por %p4254_p13, %p4253_p8 }
  0x82   : > { %p4256_p6 = pnand %p4255_p7, %p4249_p4 }
  0x84   : > { %4259 = shalt.err (!%p4256_p6)
}
  0x85   : > { %s4260_s21 = scalar_lea.vmem %s230_s1, 256  ;;  %s4439_s24 = smov [#allocation8]  }
  0x86   : > { %p4261_p9 = scmp.ne.s32.totalorder %s230_s1, %s4260_s21  ;;  %s4265_s8 = sshll.u32 %s4439_s24, 4  ;;  %s4266_s8 = int_to_ptr.vmem [resolvable:$false] %s4265_s8 }
  0x87   : > { %s4267_s12 = scalar_lea.vmem %s4266_s8, 512  ;;  %p4268_p12 = scmp.lt.s32.totalorder %s230_s1, %s4266_s8 }
  0x88   : > { %p4263_p0 = pnand %p4261_p9, %p4247_p10  ;;  %p4269_p5 = scmp.lt.s32.totalorder %s4267_s12, %s4260_s21 }
  0x8a   : > { %p4264_p2 = pneg %p4263_p0  ;;  %p4270_p1 = por %p4269_p5, %p4268_p12 }
  0x8c   : > { %p4271_p11 = pnand %p4270_p1, %p4264_p2 }
  0x8e   : > { %4274 = shalt.err (!%p4271_p11)
}
  0x8f   : > { %3566 = dma.hbm_to_vmem [thread:$0]  (!%p4740_p3), %s4734_s0, 256, %s230_s1, %s4591_s22  }
  0x90   : > { %p5278_p6 = scmp.ne.s32.totalorder %s5258_s26, 0 }
  0x91   : > { %s240_s5 = sand.u32 (!%p5278_p6), 1, %s4405_s19   ;;  %p5279_p9 = scmp.ne.s32.totalorder (!%p5278_p6), %s5267_s3, 0 }
  0x92   : > { %238 = sbr.rel (%p5278_p6) target bundleno = 826 (0x33a), region = 32  ;;  %s241_s24 = scalar_lea.sflag (!%p5278_p6), [#allocation4], %s240_s5 }
  0x93   : > { %s3547_s10 = smul.u32 (!%p5278_p6), 288, %s240_s5 }
  0x95   : > { %s4769_s9 = scalar_lea.vmem (!%p5278_p6), [#allocation3], %s3547_s10 }
  0x99   : > { %4360 = dma.done.wait (%p5279_p9), %s241_s24, 4608  }
  0x9a   : > { %4362 = vsyncadd (%p5279_p9), %s241_s24, 4294962688  ;;  %s249_s27 = sand.u32 1, %s4683_s6   ;;  %s251_s0 = sand.u32 1, %s4393_s16  }
  0x9b   : > { %s3548_s1 = smul.u32 2304, %s251_s0  ;;  %s250_s22 = scalar_lea.sflag [#allocation7], %s249_s27 }
  0x9c   : > { %p5280_p5 = scmp.ne.s32.totalorder %s5269_s29, 0 }
  0x9d   : > { %s4777_s26 = scalar_lea.vmem [#allocation6], %s3548_s1 }
  0x9e   : > { %4364 = dma.done.wait (%p5280_p5), %s250_s22, 36864  }
  0x9f   : > { %4366 = vsyncadd (%p5280_p5), %s250_s22, 4294930432  ;;  %s4784_s28 = sand.u32 1, %s4381_s13   ;;  %p5281_p12 = scmp.ne.s32.totalorder %s5272_s18, 0 }
  0xa0   : > { %s3110_s3 = sshll.u32 %s4784_s28, 4 }
  0xa1   : > { %s4787_s21 = scalar_lea.vmem [#allocation8], %s3110_s3 }
  0xa2   : > { %4368 = dma.done.wait (%p5281_p12), %s250_s22, 256  }
  0xa3   : > { %4370 = vsyncadd (%p5281_p12), %s250_s22, 4294967040  ;;  %s3111_s6 = sshll.u32 %s4784_s28, 6  ;;  %s5282_s12 = sld [smem:[#allocation16_spill]] }
  0xa4   : > { %s4794_s8 = scalar_lea.vmem [#allocation9], %s3111_s6 }
  0xa9   : > { %p3112_p7 = scmp.ne.s32.totalorder %s5282_s12, 0 }
  0xaa   : > { %v4440_v0 = vmov (!%p3112_p7), 0.0  }
  0xab   : > { %305 = sbr.rel (%p3112_p7) target bundleno = 178 (0xb2), region = 48  ;;  %306 = vst [vmem:[#allocation2] sm:$0xff] (!%p3112_p7), %v4440_v0  ;;  %307 = vst [vmem:[#allocation2 + $0x8] sm:$0xff] (!%p3112_p7), %v4440_v0 }
  0xac   : > { %308 = vst [vmem:[#allocation2 + $0x10] sm:$0xff] (!%p3112_p7), %v4440_v0  ;;  %309 = vst [vmem:[#allocation2 + $0x18] sm:$0xff] (!%p3112_p7), %v4440_v0 }
  0xad   : > { %310 = vst [vmem:[#allocation2 + $0x20] sm:$0xff] (!%p3112_p7), %v4440_v0  ;;  %311 = vst [vmem:[#allocation2 + $0x28] sm:$0xff] (!%p3112_p7), %v4440_v0 }
  0xae   : > { %312 = vst [vmem:[#allocation2 + $0x30] sm:$0xff] (!%p3112_p7), %v4440_v0  ;;  %313 = vst [vmem:[#allocation2 + $0x38] sm:$0xff] (!%p3112_p7), %v4440_v0 }
  0xb2 PF: > { %v3695_v1 = vld [vmem:[%s4777_s26 + $0x4] ss:$8 sps:$4 sm:$0xff]   ;;  %v3699_v3 = vld [vmem:[%s4777_s26] ss:$8 sps:$4 sm:$0xff]   ;;  %v3701_v5 = vld [vmem:[%s4777_s26 + $0x14] ss:$8 sps:$4 sm:$0xff]  }
  0xb3   : > { %v3697_v2 = vld [vmem:[%s4777_s26 + $0x404] ss:$8 sps:$4 sm:$0xff]   ;;  %2266 = vmatprep.subr.bf16.mxu1 %v3695_v1  ;;  %v3700_v4 = vld [vmem:[%s4777_s26 + $0x400] ss:$8 sps:$4 sm:$0xff]   ;;  %v3703_v6 = vld [vmem:[%s4777_s26 + $0x414] ss:$8 sps:$4 sm:$0xff]  }
  0xb4   : > { %2478 = vmatprep.subr.bf16.mxu0 %v3697_v2  ;;  %2267 = vmatpush1.bf16.msra.mxu1 %v3699_v3  ;;  %v3705_v7 = vld [vmem:[%s4777_s26 + $0x10] ss:$8 sps:$4 sm:$0xff]   ;;  %v3707_v9 = vld [vmem:[%s4777_s26 + $0x24] ss:$8 sps:$4 sm:$0xff]   ;;  %v3711_v11 = vld [vmem:[%s4777_s26 + $0x20] ss:$8 sps:$4 sm:$0xff]  }
  0xb5   : > { %2479 = vmatpush1.bf16.msra.mxu0 %v3700_v4  ;;  %2268 = vmatprep.subr.bf16.mxu1 %v3701_v5  ;;  %v3706_v8 = vld [vmem:[%s4777_s26 + $0x410] ss:$8 sps:$4 sm:$0xff]   ;;  %v3709_v10 = vld [vmem:[%s4777_s26 + $0x424] ss:$8 sps:$4 sm:$0xff]   ;;  %v3712_v12 = vld [vmem:[%s4777_s26 + $0x420] ss:$8 sps:$4 sm:$0xff]  }
  0xb6   : > { %2480 = vmatprep.subr.bf16.mxu0 %v3703_v6  ;;  %v3713_v13 = vld [vmem:[%s4777_s26 + $0x34] ss:$8 sps:$4 sm:$0xff]   ;;  %v3717_v15 = vld [vmem:[%s4777_s26 + $0x30] ss:$8 sps:$4 sm:$0xff]   ;;  %v3719_v17 = vld [vmem:[%s4777_s26 + $0x44] ss:$8 sps:$4 sm:$0xff]  }
  0xb7   : > { %v3715_v14 = vld [vmem:[%s4777_s26 + $0x434] ss:$8 sps:$4 sm:$0xff]   ;;  %v3718_v16 = vld [vmem:[%s4777_s26 + $0x430] ss:$8 sps:$4 sm:$0xff]   ;;  %v3721_v18 = vld [vmem:[%s4777_s26 + $0x444] ss:$8 sps:$4 sm:$0xff]  }
  0xb8   : > { %2269 = vmatpush1.bf16.msra.mxu1 %v3705_v7  ;;  %v3723_v19 = vld [vmem:[%s4777_s26 + $0x40] ss:$8 sps:$4 sm:$0xff]   ;;  %v3725_v21 = vld [vmem:[%s4777_s26 + $0x54] ss:$8 sps:$4 sm:$0xff]   ;;  %v3729_v23 = vld [vmem:[%s4777_s26 + $0x50] ss:$8 sps:$4 sm:$0xff]  }
  0xb9   : > { %2481 = vmatpush1.bf16.msra.mxu0 %v3706_v8  ;;  %2270 = vmatprep.subr.bf16.mxu1 %v3707_v9  ;;  %v3724_v20 = vld [vmem:[%s4777_s26 + $0x440] ss:$8 sps:$4 sm:$0xff]   ;;  %v3727_v22 = vld [vmem:[%s4777_s26 + $0x454] ss:$8 sps:$4 sm:$0xff]   ;;  %v3730_v24 = vld [vmem:[%s4777_s26 + $0x450] ss:$8 sps:$4 sm:$0xff]  }
  0xba   : > { %2482 = vmatprep.subr.bf16.mxu0 %v3709_v10  ;;  %v3731_v25 = vld [vmem:[%s4777_s26 + $0x64] ss:$8 sps:$4 sm:$0xff]   ;;  %v3735_v27 = vld [vmem:[%s4777_s26 + $0x60] ss:$8 sps:$4 sm:$0xff]   ;;  %v3737_v29 = vld [vmem:[%s4777_s26 + $0x74] ss:$8 sps:$4 sm:$0xff]  }
  0xbb   : > { %v3733_v26 = vld [vmem:[%s4777_s26 + $0x464] ss:$8 sps:$4 sm:$0xff]   ;;  %v3736_v28 = vld [vmem:[%s4777_s26 + $0x460] ss:$8 sps:$4 sm:$0xff]   ;;  %v3739_v30 = vld [vmem:[%s4777_s26 + $0x474] ss:$8 sps:$4 sm:$0xff]  }
  0xbc   : > { %2271 = vmatpush1.bf16.msra.mxu1 %v3711_v11  ;;  %v3741_v31 = vld [vmem:[%s4777_s26 + $0x70] ss:$8 sps:$4 sm:$0xff]   ;;  %v3743_v33 = vld [vmem:[%s4777_s26 + $0x84] ss:$8 sps:$4 sm:$0xff]   ;;  %v3747_v35 = vld [vmem:[%s4777_s26 + $0x80] ss:$8 sps:$4 sm:$0xff]  }
  0xbd   : > { %2483 = vmatpush1.bf16.msra.mxu0 %v3712_v12  ;;  %2272 = vmatprep.subr.bf16.mxu1 %v3713_v13  ;;  %v3742_v32 = vld [vmem:[%s4777_s26 + $0x470] ss:$8 sps:$4 sm:$0xff]   ;;  %v3745_v34 = vld [vmem:[%s4777_s26 + $0x484] ss:$8 sps:$4 sm:$0xff]   ;;  %v3748_v36 = vld [vmem:[%s4777_s26 + $0x480] ss:$8 sps:$4 sm:$0xff]  }
  0xbe   : > { %2484 = vmatprep.subr.bf16.mxu0 %v3715_v14  ;;  %v3749_v37 = vld [vmem:[%s4777_s26 + $0x94] ss:$8 sps:$4 sm:$0xff]   ;;  %v3753_v39 = vld [vmem:[%s4777_s26 + $0x90] ss:$8 sps:$4 sm:$0xff]   ;;  %v3755_v41 = vld [vmem:[%s4777_s26 + $0xa4] ss:$8 sps:$4 sm:$0xff]  }
  0xbf   : > { %v3751_v38 = vld [vmem:[%s4777_s26 + $0x494] ss:$8 sps:$4 sm:$0xff]   ;;  %v3754_v40 = vld [vmem:[%s4777_s26 + $0x490] ss:$8 sps:$4 sm:$0xff]   ;;  %v3757_v42 = vld [vmem:[%s4777_s26 + $0x4a4] ss:$8 sps:$4 sm:$0xff]  }
  0xc0   : > { %2273 = vmatpush1.bf16.msra.mxu1 %v3717_v15  ;;  %v3759_v43 = vld [vmem:[%s4777_s26 + $0xa0] ss:$8 sps:$4 sm:$0xff]   ;;  %v3761_v45 = vld [vmem:[%s4777_s26 + $0xb4] ss:$8 sps:$4 sm:$0xff]   ;;  %v3765_v47 = vld [vmem:[%s4777_s26 + $0xb0] ss:$8 sps:$4 sm:$0xff]  }
  0xc1   : > { %2485 = vmatpush1.bf16.msra.mxu0 %v3718_v16  ;;  %2274 = vmatprep.subr.bf16.mxu1 %v3719_v17  ;;  %v3760_v44 = vld [vmem:[%s4777_s26 + $0x4a0] ss:$8 sps:$4 sm:$0xff]   ;;  %v3763_v46 = vld [vmem:[%s4777_s26 + $0x4b4] ss:$8 sps:$4 sm:$0xff]   ;;  %v3766_v48 = vld [vmem:[%s4777_s26 + $0x4b0] ss:$8 sps:$4 sm:$0xff]  }
  0xc2   : > { %2486 = vmatprep.subr.bf16.mxu0 %v3721_v18  ;;  %v3793_v49 = vld [vmem:[%s4769_s9 + $0x4] ss:$72 sps:$4 sm:$0xff]   ;;  %v3771_v53 = vld [vmem:[%s4777_s26 + $0xc0] ss:$8 sps:$4 sm:$0xff]   ;;  %v3773_v55 = vld [vmem:[%s4777_s26 + $0xd4] ss:$8 sps:$4 sm:$0xff]  }
  0xc3   : > { %v3767_v50 = vld [vmem:[%s4777_s26 + $0xc4] ss:$8 sps:$4 sm:$0xff]   ;;  %2298 = vmatprep.mubr.bf16.mxu1 %v3793_v49  ;;  %v3772_v54 = vld [vmem:[%s4777_s26 + $0x4c0] ss:$8 sps:$4 sm:$0xff]   ;;  %v3775_v56 = vld [vmem:[%s4777_s26 + $0x4d4] ss:$8 sps:$4 sm:$0xff]  }
  0xc4   : > { %2275 = vmatpush1.bf16.msra.mxu1 %v3723_v19  ;;  %v3769_v51 = vld [vmem:[%s4777_s26 + $0x4c4] ss:$8 sps:$4 sm:$0xff]   ;;  %v3777_v57 = vld [vmem:[%s4777_s26 + $0xd0] ss:$8 sps:$4 sm:$0xff]   ;;  %v3783_v61 = vld [vmem:[%s4777_s26 + $0xe0] ss:$8 sps:$4 sm:$0xff]  }
  0xc5   : > { %2487 = vmatpush1.bf16.msra.mxu0 %v3724_v20  ;;  %2276 = vmatprep.subr.bf16.mxu1 %v3725_v21  ;;  %v3799_v52 = vld [vmem:[%s4769_s9 + $0x24] ss:$72 sps:$4 sm:$0xff]   ;;  %v3778_v58 = vld [vmem:[%s4777_s26 + $0x4d0] ss:$8 sps:$4 sm:$0xff]   ;;  %v3784_v62 = vld [vmem:[%s4777_s26 + $0x4e0] ss:$8 sps:$4 sm:$0xff]  }
  0xc6   : > { %2488 = vmatprep.subr.bf16.mxu0 %v3727_v22  ;;  %2510 = vmatprep.mubr.bf16.mxu0 %v3799_v52  ;;  %v3779_v59 = vld [vmem:[%s4777_s26 + $0xe4] ss:$8 sps:$4 sm:$0xff]   ;;  %v3785_v63 = vld [vmem:[%s4777_s26 + $0xf4] ss:$8 sps:$4 sm:$0xff]   ;;  %v3789_v1 = vld [vmem:[%s4777_s26 + $0xf0] ss:$8 sps:$4 sm:$0xff]  }
  0xc7   : > { %v3781_v60 = vld [vmem:[%s4777_s26 + $0x4e4] ss:$8 sps:$4 sm:$0xff]   ;;  %v3787_v0 = vld [vmem:[%s4777_s26 + $0x4f4] ss:$8 sps:$4 sm:$0xff]   ;;  %v3790_v2 = vld [vmem:[%s4777_s26 + $0x4f0] ss:$8 sps:$4 sm:$0xff]  }
  0xc8   : > { %2277 = vmatpush1.bf16.msra.mxu1 %v3729_v23  ;;  %v3796_v3 = vld [vmem:[%s4777_s26 + $0x104] ss:$8 sps:$4 sm:$0xff]   ;;  %v3791_v5 = vld [vmem:[%s4769_s9] ss:$72 sps:$4 sm:$0xff]   ;;  %v3805_v9 = vld [vmem:[%s4777_s26 + $0x114] ss:$8 sps:$4 sm:$0xff]  }
  0xc9   : > { %2489 = vmatpush1.bf16.msra.mxu0 %v3730_v24  ;;  %2278 = vmatprep.subr.bf16.mxu1 %v3731_v25  ;;  %v3802_v4 = vld [vmem:[%s4777_s26 + $0x504] ss:$8 sps:$4 sm:$0xff]   ;;  %v3794_v6 = vld [vmem:[%s4777_s26 + $0x100] ss:$8 sps:$4 sm:$0xff]   ;;  %v3808_v10 = vld [vmem:[%s4777_s26 + $0x514] ss:$8 sps:$4 sm:$0xff]  }
  0xca   : > { %2490 = vmatprep.subr.bf16.mxu0 %v3733_v26  ;;  %v3797_v7 = vld [vmem:[%s4769_s9 + $0x20] ss:$72 sps:$4 sm:$0xff]   ;;  %v3803_v11 = vld [vmem:[%s4777_s26 + $0x110] ss:$8 sps:$4 sm:$0xff]   ;;  %v3811_v13 = vld [vmem:[%s4777_s26 + $0x124] ss:$8 sps:$4 sm:$0xff]  }
  0xcb   : > { %v3800_v8 = vld [vmem:[%s4777_s26 + $0x500] ss:$8 sps:$4 sm:$0xff]   ;;  %v3806_v12 = vld [vmem:[%s4777_s26 + $0x510] ss:$8 sps:$4 sm:$0xff]   ;;  %v3814_v14 = vld [vmem:[%s4777_s26 + $0x524] ss:$8 sps:$4 sm:$0xff]  }
  0xcc   : > { %2279 = vmatpush1.bf16.msra.mxu1 %v3735_v27  ;;  %v3809_v15 = vld [vmem:[%s4777_s26 + $0x120] ss:$8 sps:$4 sm:$0xff]   ;;  %v3817_v17 = vld [vmem:[%s4777_s26 + $0x134] ss:$8 sps:$4 sm:$0xff]   ;;  %v3815_v19 = vld [vmem:[%s4777_s26 + $0x130] ss:$8 sps:$4 sm:$0xff]  }
  0xcd   : > { %2491 = vmatpush1.bf16.msra.mxu0 %v3736_v28  ;;  %2280 = vmatprep.subr.bf16.mxu1 %v3737_v29  ;;  %v3812_v16 = vld [vmem:[%s4777_s26 + $0x520] ss:$8 sps:$4 sm:$0xff]   ;;  %v3820_v18 = vld [vmem:[%s4777_s26 + $0x534] ss:$8 sps:$4 sm:$0xff]   ;;  %v3818_v20 = vld [vmem:[%s4777_s26 + $0x530] ss:$8 sps:$4 sm:$0xff]  }
  0xce   : > { %2492 = vmatprep.subr.bf16.mxu0 %v3739_v30  ;;  %v3823_v21 = vld [vmem:[%s4777_s26 + $0x144] ss:$8 sps:$4 sm:$0xff]   ;;  %v3821_v23 = vld [vmem:[%s4777_s26 + $0x140] ss:$8 sps:$4 sm:$0xff]   ;;  %v3829_v25 = vld [vmem:[%s4777_s26 + $0x154] ss:$8 sps:$4 sm:$0xff]  }
  0xcf   : > { %v3826_v22 = vld [vmem:[%s4777_s26 + $0x544] ss:$8 sps:$4 sm:$0xff]   ;;  %v3824_v24 = vld [vmem:[%s4777_s26 + $0x540] ss:$8 sps:$4 sm:$0xff]   ;;  %v3832_v26 = vld [vmem:[%s4777_s26 + $0x554] ss:$8 sps:$4 sm:$0xff]  }
  0xd0   : > { %2281 = vmatpush1.bf16.msra.mxu1 %v3741_v31  ;;  %v3827_v27 = vld [vmem:[%s4777_s26 + $0x150] ss:$8 sps:$4 sm:$0xff]   ;;  %v3881_v29 = vld [vmem:[%s4769_s9 + $0x94] ss:$72 sps:$4 sm:$0xff]   ;;  %v3835_v30 = vld [vmem:[%s4777_s26 + $0x164] ss:$8 sps:$4 sm:$0xff]  }
  0xd1   : > { %2493 = vmatpush1.bf16.msra.mxu0 %v3742_v32  ;;  %2282 = vmatprep.subr.bf16.mxu1 %v3743_v33  ;;  %v3830_v28 = vld [vmem:[%s4777_s26 + $0x550] ss:$8 sps:$4 sm:$0xff]   ;;  %v3838_v31 = vld [vmem:[%s4777_s26 + $0x564] ss:$8 sps:$4 sm:$0xff]   ;;  %v3886_v32 = vld [vmem:[%s4769_s9 + $0xb4] ss:$72 sps:$4 sm:$0xff]  }
  0xd2   : > { %2494 = vmatprep.subr.bf16.mxu0 %v3745_v34  ;;  %v3833_v33 = vld [vmem:[%s4777_s26 + $0x160] ss:$8 sps:$4 sm:$0xff]   ;;  %v3851_v49 = vld [vmem:[%s4777_s26 + $0x190] ss:$8 sps:$4 sm:$0xff]   ;;  %v3862_v52 = vld [vmem:[%s4777_s26 + $0x5a4] ss:$8 sps:$4 sm:$0xff]  }
  0xd3   : > { %v3836_v34 = vld [vmem:[%s4777_s26 + $0x560] ss:$8 sps:$4 sm:$0xff]   ;;  %s5283_s29 = sld [smem:[#allocation16_spill]] }
  0xd4   : > { %2283 = vmatpush1.bf16.msra.mxu1 %v3747_v35  ;;  %v3891_v35 = vld [vmem:[%s4769_s9 + $0x90] ss:$72 sps:$4 sm:$0xff]  }
  0xd5   : > { %2495 = vmatpush1.bf16.msra.mxu0 %v3748_v36  ;;  %2284 = vmatprep.subr.bf16.mxu1 %v3749_v37  ;;  %v3892_v36 = vld [vmem:[%s4769_s9 + $0xb0] ss:$72 sps:$4 sm:$0xff]   ;;  %v3841_v37 = vld [vmem:[%s4777_s26 + $0x174] ss:$8 sps:$4 sm:$0xff]  }
  0xd6   : > { %2496 = vmatprep.subr.bf16.mxu0 %v3751_v38  ;;  %v3844_v38 = vld [vmem:[%s4777_s26 + $0x574] ss:$8 sps:$4 sm:$0xff]  }
  0xd8   : > { %2285 = vmatpush1.bf16.msra.mxu1 %v3753_v39  ;;  %v3839_v39 = vld [vmem:[%s4777_s26 + $0x170] ss:$8 sps:$4 sm:$0xff]  }
  0xd9   : > { %2497 = vmatpush1.bf16.msra.mxu0 %v3754_v40  ;;  %2286 = vmatprep.subr.bf16.mxu1 %v3755_v41  ;;  %v3842_v40 = vld [vmem:[%s4777_s26 + $0x570] ss:$8 sps:$4 sm:$0xff]   ;;  %v3901_v41 = vld [vmem:[%s4769_s9 + $0xc] ss:$72 sps:$4 sm:$0xff]   ;;  %p3437_p13 = scmp.ne.s32.totalorder %s5283_s29, 1 }
  0xda   : > { %2498 = vmatprep.subr.bf16.mxu0 %v3757_v42  ;;  %v3847_v42 = vld [vmem:[%s4777_s26 + $0x184] ss:$8 sps:$4 sm:$0xff]  }
  0xdc   : > { %2287 = vmatpush1.bf16.msra.mxu1 %v3759_v43  ;;  %v3850_v43 = vld [vmem:[%s4777_s26 + $0x584] ss:$8 sps:$4 sm:$0xff]  }
  0xdd   : > { %2499 = vmatpush1.bf16.msra.mxu0 %v3760_v44  ;;  %2288 = vmatprep.subr.bf16.mxu1 %v3761_v45  ;;  %v3907_v44 = vld [vmem:[%s4769_s9 + $0x2c] ss:$72 sps:$4 sm:$0xff]   ;;  %v3845_v45 = vld [vmem:[%s4777_s26 + $0x180] ss:$8 sps:$4 sm:$0xff]  }
  0xde   : > { %2500 = vmatprep.subr.bf16.mxu0 %v3763_v46  ;;  %v3848_v46 = vld [vmem:[%s4777_s26 + $0x580] ss:$8 sps:$4 sm:$0xff]  }
  0xe0   : > { %2289 = vmatpush1.bf16.msra.mxu1 %v3765_v47  ;;  %v3853_v47 = vld [vmem:[%s4777_s26 + $0x194] ss:$8 sps:$4 sm:$0xff]  }
  0xe1   : > { %2501 = vmatpush1.bf16.msra.mxu0 %v3766_v48  ;;  %2290 = vmatprep.subr.bf16.mxu1 %v3767_v50  ;;  %v3856_v48 = vld [vmem:[%s4777_s26 + $0x594] ss:$8 sps:$4 sm:$0xff]   ;;  %v3854_v50 = vld [vmem:[%s4777_s26 + $0x590] ss:$8 sps:$4 sm:$0xff]  }
  0xe2   : > { %2502 = vmatprep.subr.bf16.mxu0 %v3769_v51  ;;  %v3859_v51 = vld [vmem:[%s4777_s26 + $0x1a4] ss:$8 sps:$4 sm:$0xff]  }
  0xe4   : > { %2291 = vmatpush1.bf16.msra.mxu1 %v3771_v53  ;;  %v3857_v53 = vld [vmem:[%s4777_s26 + $0x1a0] ss:$8 sps:$4 sm:$0xff]  }
  0xe5   : > { %2503 = vmatpush1.bf16.msra.mxu0 %v3772_v54  ;;  %2292 = vmatprep.subr.bf16.mxu1 %v3773_v55  ;;  %v3860_v54 = vld [vmem:[%s4777_s26 + $0x5a0] ss:$8 sps:$4 sm:$0xff]   ;;  %v3865_v55 = vld [vmem:[%s4777_s26 + $0x1b4] ss:$8 sps:$4 sm:$0xff]  }
  0xe6   : > { %2504 = vmatprep.subr.bf16.mxu0 %v3775_v56  ;;  %v3868_v56 = vld [vmem:[%s4777_s26 + $0x5b4] ss:$8 sps:$4 sm:$0xff]  }
  0xe8   : > { %2293 = vmatpush1.bf16.msra.mxu1 %v3777_v57  ;;  %v3863_v57 = vld [vmem:[%s4777_s26 + $0x1b0] ss:$8 sps:$4 sm:$0xff]  }
  0xe9   : > { %2505 = vmatpush1.bf16.msra.mxu0 %v3778_v58  ;;  %2294 = vmatprep.subr.bf16.mxu1 %v3779_v59  ;;  %v3866_v58 = vld [vmem:[%s4777_s26 + $0x5b0] ss:$8 sps:$4 sm:$0xff]   ;;  %v3871_v59 = vld [vmem:[%s4777_s26 + $0x1c4] ss:$8 sps:$4 sm:$0xff]  }
  0xea   : > { %2506 = vmatprep.subr.bf16.mxu0 %v3781_v60  ;;  %v3874_v60 = vld [vmem:[%s4777_s26 + $0x5c4] ss:$8 sps:$4 sm:$0xff]  }
  0xec   : > { %2295 = vmatpush1.bf16.msra.mxu1 %v3783_v61  ;;  %v3869_v61 = vld [vmem:[%s4777_s26 + $0x1c0] ss:$8 sps:$4 sm:$0xff]  }
  0xed   : > { %2507 = vmatpush1.bf16.msra.mxu0 %v3784_v62  ;;  %2296 = vmatprep.subr.bf16.mxu1 %v3785_v63  ;;  %v3872_v62 = vld [vmem:[%s4777_s26 + $0x5c0] ss:$8 sps:$4 sm:$0xff]   ;;  %v3877_v63 = vld [vmem:[%s4777_s26 + $0x1d4] ss:$8 sps:$4 sm:$0xff]  }
  0xee   : > { %2508 = vmatprep.subr.bf16.mxu0 %v3787_v0  ;;  %v3880_v0 = vld [vmem:[%s4777_s26 + $0x5d4] ss:$8 sps:$4 sm:$0xff]  }
  0xf0   : > { %2297 = vmatpush1.bf16.msra.mxu1 %v3789_v1  ;;  %v3875_v1 = vld [vmem:[%s4777_s26 + $0x1d0] ss:$8 sps:$4 sm:$0xff]  }
  0xf1   : > { %2509 = vmatpush1.bf16.msra.mxu0 %v3790_v2  ;;  %2319 = vmatprep.subr.bf16.mxu1 %v3796_v3  ;;  %v3878_v2 = vld [vmem:[%s4777_s26 + $0x5d0] ss:$8 sps:$4 sm:$0xff]   ;;  %v3885_v3 = vld [vmem:[%s4777_s26 + $0x1e4] ss:$8 sps:$4 sm:$0xff]  }
  0xf2   : > { %2531 = vmatprep.subr.bf16.mxu0 %v3802_v4  ;;  %v3890_v4 = vld [vmem:[%s4777_s26 + $0x5e4] ss:$8 sps:$4 sm:$0xff]  }
  0xf3   : > { %2299 = vmatmul.mubr.bf16.vlgmr.msra.gmra.mrb[0].mxu1 %v3791_v5  ;;  %v3883_v5 = vld [vmem:[%s4777_s26 + $0x1e0] ss:$8 sps:$4 sm:$0xff]  }
  0xf4   : > { %2511 = vmatmul.mubr.bf16.vlgmr.msra.gmra.mrb[0].mxu0 %v3797_v7  ;;  %2320 = vmatpush1.bf16.msra.mxu1 %v3794_v6  ;;  %v3888_v6 = vld [vmem:[%s4777_s26 + $0x5e0] ss:$8 sps:$4 sm:$0xff]   ;;  %v3895_v7 = vld [vmem:[%s4777_s26 + $0x1f4] ss:$8 sps:$4 sm:$0xff]  }
  0xf5   : > { %2532 = vmatpush1.bf16.msra.mxu0 %v3800_v8  ;;  %2321 = vmatprep.subr.bf16.mxu1 %v3805_v9  ;;  %v3898_v8 = vld [vmem:[%s4777_s26 + $0x5f4] ss:$8 sps:$4 sm:$0xff]   ;;  %v3893_v9 = vld [vmem:[%s4777_s26 + $0x1f0] ss:$8 sps:$4 sm:$0xff]  }
  0xf6   : > { %2533 = vmatprep.subr.bf16.mxu0 %v3808_v10  ;;  %2308 = vmatprep.mubr.bf16.mxu1 %v3881_v29  ;;  %v3896_v10 = vld [vmem:[%s4777_s26 + $0x5f0] ss:$8 sps:$4 sm:$0xff]   ;;  %v3925_v29 = vld [vmem:[%s4777_s26 + $0x234] ss:$8 sps:$4 sm:$0xff]  }
  0xf7   : > { %2520 = vmatprep.mubr.bf16.mxu0 %v3886_v32  ;;  %v3926_v32 = vld [vmem:[%s4777_s26 + $0x630] ss:$8 sps:$4 sm:$0xff]  }
  0xf8   : > { %2322 = vmatpush1.bf16.msra.mxu1 %v3803_v11  ;;  %v3904_v11 = vld [vmem:[%s4777_s26 + $0x204] ss:$8 sps:$4 sm:$0xff]  }
  0xf9   : > { %2534 = vmatpush1.bf16.msra.mxu0 %v3806_v12  ;;  %2323 = vmatprep.subr.bf16.mxu1 %v3811_v13  ;;  %v3910_v12 = vld [vmem:[%s4777_s26 + $0x604] ss:$8 sps:$4 sm:$0xff]   ;;  %v3899_v13 = vld [vmem:[%s4769_s9 + $0x8] ss:$72 sps:$4 sm:$0xff]  }
  0xfa   : > { %2535 = vmatprep.subr.bf16.mxu0 %v3814_v14  ;;  %v3902_v14 = vld [vmem:[%s4777_s26 + $0x200] ss:$8 sps:$4 sm:$0xff]  }
  0xfb   : > { %2309 = vmatmul.mubr.bf16.gmra.mrb[4].mxu1 %v3891_v35  ;;  %v3934_v35 = vld [vmem:[%s4777_s26 + $0x644] ss:$8 sps:$4 sm:$0xff]  }
  0xfc   : > { %2324 = vmatpush1.bf16.msra.mxu1 %v3809_v15  ;;  %2521 = vmatmul.mubr.bf16.gmra.mrb[4].mxu0 %v3892_v36  ;;  %v3905_v15 = vld [vmem:[%s4769_s9 + $0x28] ss:$72 sps:$4 sm:$0xff]   ;;  %v4015_v36 = vld [vmem:[%s4769_s9 + $0x34] ss:$72 sps:$4 sm:$0xff]  }
  0xfd   : > { %2536 = vmatpush1.bf16.msra.mxu0 %v3812_v16  ;;  %2325 = vmatprep.subr.bf16.mxu1 %v3817_v17  ;;  %v3908_v16 = vld [vmem:[%s4777_s26 + $0x600] ss:$8 sps:$4 sm:$0xff]   ;;  %v3913_v17 = vld [vmem:[%s4777_s26 + $0x214] ss:$8 sps:$4 sm:$0xff]  }
  0xfe   : > { %2537 = vmatprep.subr.bf16.mxu0 %v3820_v18  ;;  %2351 = vmatprep.mubr.bf16.mxu1 %v3901_v41  ;;  %v3916_v18 = vld [vmem:[%s4777_s26 + $0x614] ss:$8 sps:$4 sm:$0xff]   ;;  %v3935_v41 = vld [vmem:[%s4777_s26 + $0x250] ss:$8 sps:$4 sm:$0xff]  }
  0xff   : > { %2563 = vmatprep.mubr.bf16.mxu0 %v3907_v44  ;;  %v3946_v44 = vld [vmem:[%s4777_s26 + $0x664] ss:$8 sps:$4 sm:$0xff]  }
 0x100   : > { %2326 = vmatpush1.bf16.msra.mxu1 %v3815_v19  ;;  %v3911_v19 = vld [vmem:[%s4777_s26 + $0x210] ss:$8 sps:$4 sm:$0xff]  }
 0x101   : > { %2538 = vmatpush1.bf16.msra.mxu0 %v3818_v20  ;;  %2327 = vmatprep.subr.bf16.mxu1 %v3823_v21  ;;  %v3914_v20 = vld [vmem:[%s4777_s26 + $0x610] ss:$8 sps:$4 sm:$0xff]   ;;  %v3989_v21 = vld [vmem:[%s4769_s9 + $0x9c] ss:$72 sps:$4 sm:$0xff]  }
 0x102   : > { %2539 = vmatprep.subr.bf16.mxu0 %v3826_v22  ;;  %v3919_v22 = vld [vmem:[%s4777_s26 + $0x224] ss:$8 sps:$4 sm:$0xff]  }
 0x104   : > { %2328 = vmatpush1.bf16.msra.mxu1 %v3821_v23  ;;  %v3922_v23 = vld [vmem:[%s4777_s26 + $0x624] ss:$8 sps:$4 sm:$0xff]  }
 0x105   : > { %2540 = vmatpush1.bf16.msra.mxu0 %v3824_v24  ;;  %2329 = vmatprep.subr.bf16.mxu1 %v3829_v25  ;;  %v3994_v24 = vld [vmem:[%s4769_s9 + $0xbc] ss:$72 sps:$4 sm:$0xff]   ;;  %v3917_v25 = vld [vmem:[%s4777_s26 + $0x220] ss:$8 sps:$4 sm:$0xff]  }
 0x106   : > { %2541 = vmatprep.subr.bf16.mxu0 %v3832_v26  ;;  %v3920_v26 = vld [vmem:[%s4777_s26 + $0x620] ss:$8 sps:$4 sm:$0xff]  }
 0x108   : > { %2330 = vmatpush1.bf16.msra.mxu1 %v3827_v27  ;;  %v3999_v27 = vld [vmem:[%s4769_s9 + $0x98] ss:$72 sps:$4 sm:$0xff]  }
 0x109   : > { %2542 = vmatpush1.bf16.msra.mxu0 %v3830_v28  ;;  %2331 = vmatprep.subr.bf16.mxu1 %v3835_v30  ;;  %v4000_v28 = vld [vmem:[%s4769_s9 + $0xb8] ss:$72 sps:$4 sm:$0xff]   ;;  %v3928_v30 = vld [vmem:[%s4777_s26 + $0x634] ss:$8 sps:$4 sm:$0xff]  }
 0x10a   : > { %2543 = vmatprep.subr.bf16.mxu0 %v3838_v31  ;;  %v3923_v31 = vld [vmem:[%s4777_s26 + $0x230] ss:$8 sps:$4 sm:$0xff]  }
 0x10c   : > { %2332 = vmatpush1.bf16.msra.mxu1 %v3833_v33  ;;  %v4009_v33 = vld [vmem:[%s4769_s9 + $0x14] ss:$72 sps:$4 sm:$0xff]  }
 0x10d   : > { %2544 = vmatpush1.bf16.msra.mxu0 %v3836_v34  ;;  %2333 = vmatprep.subr.bf16.mxu1 %v3841_v37  ;;  %v3931_v34 = vld [vmem:[%s4777_s26 + $0x244] ss:$8 sps:$4 sm:$0xff]   ;;  %v3929_v37 = vld [vmem:[%s4777_s26 + $0x240] ss:$8 sps:$4 sm:$0xff]  }
 0x10e   : > { %2545 = vmatprep.subr.bf16.mxu0 %v3844_v38  ;;  %v3932_v38 = vld [vmem:[%s4777_s26 + $0x640] ss:$8 sps:$4 sm:$0xff]  }
 0x110   : > { %2334 = vmatpush1.bf16.msra.mxu1 %v3839_v39  ;;  %v3937_v39 = vld [vmem:[%s4777_s26 + $0x254] ss:$8 sps:$4 sm:$0xff]  }
 0x111   : > { %2546 = vmatpush1.bf16.msra.mxu0 %v3842_v40  ;;  %2335 = vmatprep.subr.bf16.mxu1 %v3847_v42  ;;  %v3940_v40 = vld [vmem:[%s4777_s26 + $0x654] ss:$8 sps:$4 sm:$0xff]   ;;  %v3938_v42 = vld [vmem:[%s4777_s26 + $0x650] ss:$8 sps:$4 sm:$0xff]  }
 0x112   : > { %2547 = vmatprep.subr.bf16.mxu0 %v3850_v43  ;;  %v3943_v43 = vld [vmem:[%s4777_s26 + $0x264] ss:$8 sps:$4 sm:$0xff]  }
 0x114   : > { %2336 = vmatpush1.bf16.msra.mxu1 %v3845_v45  ;;  %v3941_v45 = vld [vmem:[%s4777_s26 + $0x260] ss:$8 sps:$4 sm:$0xff]  }
 0x115   : > { %2548 = vmatpush1.bf16.msra.mxu0 %v3848_v46  ;;  %2337 = vmatprep.subr.bf16.mxu1 %v3853_v47  ;;  %v3944_v46 = vld [vmem:[%s4777_s26 + $0x660] ss:$8 sps:$4 sm:$0xff]   ;;  %v3949_v47 = vld [vmem:[%s4777_s26 + $0x274] ss:$8 sps:$4 sm:$0xff]  }
 0x116   : > { %2549 = vmatprep.subr.bf16.mxu0 %v3856_v48  ;;  %v3952_v48 = vld [vmem:[%s4777_s26 + $0x674] ss:$8 sps:$4 sm:$0xff]  }
 0x118   : > { %2338 = vmatpush1.bf16.msra.mxu1 %v3851_v49  ;;  %v3947_v49 = vld [vmem:[%s4777_s26 + $0x270] ss:$8 sps:$4 sm:$0xff]  }
 0x119   : > { %2550 = vmatpush1.bf16.msra.mxu0 %v3854_v50  ;;  %2339 = vmatprep.subr.bf16.mxu1 %v3859_v51  ;;  %v3950_v50 = vld [vmem:[%s4777_s26 + $0x670] ss:$8 sps:$4 sm:$0xff]   ;;  %v3955_v51 = vld [vmem:[%s4777_s26 + $0x284] ss:$8 sps:$4 sm:$0xff]  }
 0x11a   : > { %2551 = vmatprep.subr.bf16.mxu0 %v3862_v52  ;;  %v3958_v52 = vld [vmem:[%s4777_s26 + $0x684] ss:$8 sps:$4 sm:$0xff]  }
 0x11c   : > { %2340 = vmatpush1.bf16.msra.mxu1 %v3857_v53  ;;  %v3953_v53 = vld [vmem:[%s4777_s26 + $0x280] ss:$8 sps:$4 sm:$0xff]  }
 0x11d   : > { %2552 = vmatpush1.bf16.msra.mxu0 %v3860_v54  ;;  %2341 = vmatprep.subr.bf16.mxu1 %v3865_v55  ;;  %v3956_v54 = vld [vmem:[%s4777_s26 + $0x680] ss:$8 sps:$4 sm:$0xff]   ;;  %v3961_v55 = vld [vmem:[%s4777_s26 + $0x294] ss:$8 sps:$4 sm:$0xff]  }
 0x11e   : > { %2553 = vmatprep.subr.bf16.mxu0 %v3868_v56  ;;  %v3964_v56 = vld [vmem:[%s4777_s26 + $0x694] ss:$8 sps:$4 sm:$0xff]  }
 0x120   : > { %2342 = vmatpush1.bf16.msra.mxu1 %v3863_v57  ;;  %v3959_v57 = vld [vmem:[%s4777_s26 + $0x290] ss:$8 sps:$4 sm:$0xff]  }
 0x121   : > { %2554 = vmatpush1.bf16.msra.mxu0 %v3866_v58  ;;  %2343 = vmatprep.subr.bf16.mxu1 %v3871_v59  ;;  %v3962_v58 = vld [vmem:[%s4777_s26 + $0x690] ss:$8 sps:$4 sm:$0xff]   ;;  %v3967_v59 = vld [vmem:[%s4777_s26 + $0x2a4] ss:$8 sps:$4 sm:$0xff]  }
 0x122   : > { %2555 = vmatprep.subr.bf16.mxu0 %v3874_v60  ;;  %v3970_v60 = vld [vmem:[%s4777_s26 + $0x6a4] ss:$8 sps:$4 sm:$0xff]  }
 0x124   : > { %2344 = vmatpush1.bf16.msra.mxu1 %v3869_v61  ;;  %v3965_v61 = vld [vmem:[%s4777_s26 + $0x2a0] ss:$8 sps:$4 sm:$0xff]  }
 0x125   : > { %2556 = vmatpush1.bf16.msra.mxu0 %v3872_v62  ;;  %2345 = vmatprep.subr.bf16.mxu1 %v3877_v63  ;;  %v3968_v62 = vld [vmem:[%s4777_s26 + $0x6a0] ss:$8 sps:$4 sm:$0xff]   ;;  %v3973_v63 = vld [vmem:[%s4777_s26 + $0x2b4] ss:$8 sps:$4 sm:$0xff]  }
 0x126   : > { %2557 = vmatprep.subr.bf16.mxu0 %v3880_v0  ;;  %v3976_v0 = vld [vmem:[%s4777_s26 + $0x6b4] ss:$8 sps:$4 sm:$0xff]  }
 0x128   : > { %2346 = vmatpush1.bf16.msra.mxu1 %v3875_v1  ;;  %v3971_v1 = vld [vmem:[%s4777_s26 + $0x2b0] ss:$8 sps:$4 sm:$0xff]  }
 0x129   : > { %2558 = vmatpush1.bf16.msra.mxu0 %v3878_v2  ;;  %2347 = vmatprep.subr.bf16.mxu1 %v3885_v3  ;;  %v3974_v2 = vld [vmem:[%s4777_s26 + $0x6b0] ss:$8 sps:$4 sm:$0xff]   ;;  %v3979_v3 = vld [vmem:[%s4777_s26 + $0x2c4] ss:$8 sps:$4 sm:$0xff]  }
 0x12a   : > { %2559 = vmatprep.subr.bf16.mxu0 %v3890_v4  ;;  %v3982_v4 = vld [vmem:[%s4777_s26 + $0x6c4] ss:$8 sps:$4 sm:$0xff]  }
 0x12c   : > { %2348 = vmatpush1.bf16.msra.mxu1 %v3883_v5  ;;  %v3977_v5 = vld [vmem:[%s4777_s26 + $0x2c0] ss:$8 sps:$4 sm:$0xff]  }
 0x12d   : > { %2560 = vmatpush1.bf16.msra.mxu0 %v3888_v6  ;;  %2349 = vmatprep.subr.bf16.mxu1 %v3895_v7  ;;  %v3980_v6 = vld [vmem:[%s4777_s26 + $0x6c0] ss:$8 sps:$4 sm:$0xff]   ;;  %v3985_v7 = vld [vmem:[%s4777_s26 + $0x2d4] ss:$8 sps:$4 sm:$0xff]  }
 0x12e   : > { %2561 = vmatprep.subr.bf16.mxu0 %v3898_v8  ;;  %v3988_v8 = vld [vmem:[%s4777_s26 + $0x6d4] ss:$8 sps:$4 sm:$0xff]  }
 0x130   : > { %2350 = vmatpush1.bf16.msra.mxu1 %v3893_v9  ;;  %v3983_v9 = vld [vmem:[%s4777_s26 + $0x2d0] ss:$8 sps:$4 sm:$0xff]  }
 0x131   : > { %2562 = vmatpush1.bf16.msra.mxu0 %v3896_v10  ;;  %2372 = vmatprep.subr.bf16.mxu1 %v3904_v11  ;;  %v3986_v10 = vld [vmem:[%s4777_s26 + $0x6d0] ss:$8 sps:$4 sm:$0xff]   ;;  %v3993_v11 = vld [vmem:[%s4777_s26 + $0x2e4] ss:$8 sps:$4 sm:$0xff]  }
 0x132   : > { %2584 = vmatprep.subr.bf16.mxu0 %v3910_v12  ;;  %v3998_v12 = vld [vmem:[%s4777_s26 + $0x6e4] ss:$8 sps:$4 sm:$0xff]  }
 0x133   : > { %2352 = vmatmul.mubr.bf16.vlgmr.msra.gmra.mrb[0].mxu1 %v3899_v13  ;;  %v3991_v13 = vld [vmem:[%s4777_s26 + $0x2e0] ss:$8 sps:$4 sm:$0xff]  }
 0x134   : > { %2564 = vmatmul.mubr.bf16.vlgmr.msra.gmra.mrb[0].mxu0 %v3905_v15  ;;  %2373 = vmatpush1.bf16.msra.mxu1 %v3902_v14  ;;  %v3996_v14 = vld [vmem:[%s4777_s26 + $0x6e0] ss:$8 sps:$4 sm:$0xff]   ;;  %v4003_v15 = vld [vmem:[%s4777_s26 + $0x2f4] ss:$8 sps:$4 sm:$0xff]  }
 0x135   : > { %2585 = vmatpush1.bf16.msra.mxu0 %v3908_v16  ;;  %2374 = vmatprep.subr.bf16.mxu1 %v3913_v17  ;;  %v4006_v16 = vld [vmem:[%s4777_s26 + $0x6f4] ss:$8 sps:$4 sm:$0xff]   ;;  %v4001_v17 = vld [vmem:[%s4777_s26 + $0x2f0] ss:$8 sps:$4 sm:$0xff]  }
 0x136   : > { %2586 = vmatprep.subr.bf16.mxu0 %v3916_v18  ;;  %2361 = vmatprep.mubr.bf16.mxu1 %v3989_v21  ;;  %v4004_v18 = vld [vmem:[%s4777_s26 + $0x6f0] ss:$8 sps:$4 sm:$0xff]  }
 0x137   : > { %2573 = vmatprep.mubr.bf16.mxu0 %v3994_v24  ;;  %v4007_v21 = vld [vmem:[%s4769_s9 + $0x10] ss:$72 sps:$4 sm:$0xff]   ;;  %v4016_v24 = vld [vmem:[%s4777_s26 + $0x700] ss:$8 sps:$4 sm:$0xff]  }
 0x138   : > { %2375 = vmatpush1.bf16.msra.mxu1 %v3911_v19  ;;  %v4012_v19 = vld [vmem:[%s4777_s26 + $0x304] ss:$8 sps:$4 sm:$0xff]  }
 0x139   : > { %2587 = vmatpush1.bf16.msra.mxu0 %v3914_v20  ;;  %2376 = vmatprep.subr.bf16.mxu1 %v3919_v22  ;;  %v4018_v20 = vld [vmem:[%s4777_s26 + $0x704] ss:$8 sps:$4 sm:$0xff]   ;;  %v4010_v22 = vld [vmem:[%s4777_s26 + $0x300] ss:$8 sps:$4 sm:$0xff]  }
 0x13a   : > { %2588 = vmatprep.subr.bf16.mxu0 %v3922_v23  ;;  %v4013_v23 = vld [vmem:[%s4769_s9 + $0x30] ss:$72 sps:$4 sm:$0xff]  }
 0x13b   : > { %2362 = vmatmul.mubr.bf16.gmra.mrb[4].mxu1 %v3999_v27  ;;  %v4097_v27 = vld [vmem:[%s4769_s9 + $0xa4] ss:$72 sps:$4 sm:$0xff]  }
 0x13c   : > { %2574 = vmatmul.mubr.bf16.gmra.mrb[4].mxu0 %v4000_v28  ;;  %2377 = vmatpush1.bf16.msra.mxu1 %v3917_v25  ;;  %v4021_v25 = vld [vmem:[%s4777_s26 + $0x314] ss:$8 sps:$4 sm:$0xff]   ;;  %v4099_v28 = vld [vmem:[%s4769_s9 + $0xc4] ss:$72 sps:$4 sm:$0xff]  }
 0x13d   : > { %2589 = vmatpush1.bf16.msra.mxu0 %v3920_v26  ;;  %2378 = vmatprep.subr.bf16.mxu1 %v3925_v29  ;;  %v4024_v26 = vld [vmem:[%s4777_s26 + $0x714] ss:$8 sps:$4 sm:$0xff]   ;;  %v4019_v29 = vld [vmem:[%s4777_s26 + $0x310] ss:$8 sps:$4 sm:$0xff]  }
 0x13e   : > { %2590 = vmatprep.subr.bf16.mxu0 %v3928_v30  ;;  %2404 = vmatprep.mubr.bf16.mxu1 %v4009_v33  ;;  %v4022_v30 = vld [vmem:[%s4777_s26 + $0x710] ss:$8 sps:$4 sm:$0xff]   ;;  %v4025_v33 = vld [vmem:[%s4777_s26 + $0x320] ss:$8 sps:$4 sm:$0xff]  }
 0x13f   : > { %2616 = vmatprep.mubr.bf16.mxu0 %v4015_v36  ;;  %v4105_v36 = vld [vmem:[%s4769_s9 + $0xc0] ss:$72 sps:$4 sm:$0xff]  }
 0x140   : > { %2379 = vmatpush1.bf16.msra.mxu1 %v3923_v31  ;;  %v4027_v31 = vld [vmem:[%s4777_s26 + $0x324] ss:$8 sps:$4 sm:$0xff]  }
 0x141   : > { %2591 = vmatpush1.bf16.msra.mxu0 %v3926_v32  ;;  %2380 = vmatprep.subr.bf16.mxu1 %v3931_v34  ;;  %v4030_v32 = vld [vmem:[%s4777_s26 + $0x724] ss:$8 sps:$4 sm:$0xff]   ;;  %v4028_v34 = vld [vmem:[%s4777_s26 + $0x720] ss:$8 sps:$4 sm:$0xff]  }
 0x142   : > { %2592 = vmatprep.subr.bf16.mxu0 %v3934_v35  ;;  %v4101_v35 = vld [vmem:[%s4769_s9 + $0xa0] ss:$72 sps:$4 sm:$0xff]  }
 0x144   : > { %2381 = vmatpush1.bf16.msra.mxu1 %v3929_v37  ;;  %v4033_v37 = vld [vmem:[%s4777_s26 + $0x334] ss:$8 sps:$4 sm:$0xff]  }
 0x145   : > { %2593 = vmatpush1.bf16.msra.mxu0 %v3932_v38  ;;  %2382 = vmatprep.subr.bf16.mxu1 %v3937_v39  ;;  %v4036_v38 = vld [vmem:[%s4777_s26 + $0x734] ss:$8 sps:$4 sm:$0xff]  }
 0x146   : > { %2594 = vmatprep.subr.bf16.mxu0 %v3940_v40  ;;  %v4117_v39 = vld [vmem:[%s4769_s9 + $0x1c] ss:$72 sps:$4 sm:$0xff]  }
 0x147   : > { %v4120_v40 = vld [vmem:[%s4769_s9 + $0x3c] ss:$72 sps:$4 sm:$0xff]  }
 0x148   : > { %2383 = vmatpush1.bf16.msra.mxu1 %v3935_v41  ;;  %v4031_v41 = vld [vmem:[%s4777_s26 + $0x330] ss:$8 sps:$4 sm:$0xff]  }
 0x149   : > { %2595 = vmatpush1.bf16.msra.mxu0 %v3938_v42  ;;  %2384 = vmatprep.subr.bf16.mxu1 %v3943_v43  ;;  %v4034_v42 = vld [vmem:[%s4777_s26 + $0x730] ss:$8 sps:$4 sm:$0xff]   ;;  %v4039_v43 = vld [vmem:[%s4777_s26 + $0x344] ss:$8 sps:$4 sm:$0xff]  }
 0x14a   : > { %2596 = vmatprep.subr.bf16.mxu0 %v3946_v44  ;;  %v4042_v44 = vld [vmem:[%s4777_s26 + $0x744] ss:$8 sps:$4 sm:$0xff]  }
 0x14c   : > { %2385 = vmatpush1.bf16.msra.mxu1 %v3941_v45  ;;  %v4037_v45 = vld [vmem:[%s4777_s26 + $0x340] ss:$8 sps:$4 sm:$0xff]  }
 0x14d   : > { %2597 = vmatpush1.bf16.msra.mxu0 %v3944_v46  ;;  %2386 = vmatprep.subr.bf16.mxu1 %v3949_v47  ;;  %v4040_v46 = vld [vmem:[%s4777_s26 + $0x740] ss:$8 sps:$4 sm:$0xff]   ;;  %v4045_v47 = vld [vmem:[%s4777_s26 + $0x354] ss:$8 sps:$4 sm:$0xff]  }
 0x14e   : > { %2598 = vmatprep.subr.bf16.mxu0 %v3952_v48  ;;  %v4048_v48 = vld [vmem:[%s4777_s26 + $0x754] ss:$8 sps:$4 sm:$0xff]  }
 0x150   : > { %2387 = vmatpush1.bf16.msra.mxu1 %v3947_v49  ;;  %v4043_v49 = vld [vmem:[%s4777_s26 + $0x350] ss:$8 sps:$4 sm:$0xff]  }
 0x151   : > { %2599 = vmatpush1.bf16.msra.mxu0 %v3950_v50  ;;  %2388 = vmatprep.subr.bf16.mxu1 %v3955_v51  ;;  %v4046_v50 = vld [vmem:[%s4777_s26 + $0x750] ss:$8 sps:$4 sm:$0xff]   ;;  %v4051_v51 = vld [vmem:[%s4777_s26 + $0x364] ss:$8 sps:$4 sm:$0xff]  }
 0x152   : > { %2600 = vmatprep.subr.bf16.mxu0 %v3958_v52  ;;  %v4054_v52 = vld [vmem:[%s4777_s26 + $0x764] ss:$8 sps:$4 sm:$0xff]  }
 0x154   : > { %2389 = vmatpush1.bf16.msra.mxu1 %v3953_v53  ;;  %v4049_v53 = vld [vmem:[%s4777_s26 + $0x360] ss:$8 sps:$4 sm:$0xff]  }
 0x155   : > { %2601 = vmatpush1.bf16.msra.mxu0 %v3956_v54  ;;  %2390 = vmatprep.subr.bf16.mxu1 %v3961_v55  ;;  %v4052_v54 = vld [vmem:[%s4777_s26 + $0x760] ss:$8 sps:$4 sm:$0xff]   ;;  %v4057_v55 = vld [vmem:[%s4777_s26 + $0x374] ss:$8 sps:$4 sm:$0xff]  }
 0x156   : > { %2602 = vmatprep.subr.bf16.mxu0 %v3964_v56  ;;  %v4060_v56 = vld [vmem:[%s4777_s26 + $0x774] ss:$8 sps:$4 sm:$0xff]  }
 0x158   : > { %2391 = vmatpush1.bf16.msra.mxu1 %v3959_v57  ;;  %v4055_v57 = vld [vmem:[%s4777_s26 + $0x370] ss:$8 sps:$4 sm:$0xff]  }
 0x159   : > { %2603 = vmatpush1.bf16.msra.mxu0 %v3962_v58  ;;  %2392 = vmatprep.subr.bf16.mxu1 %v3967_v59  ;;  %v4058_v58 = vld [vmem:[%s4777_s26 + $0x770] ss:$8 sps:$4 sm:$0xff]   ;;  %v4063_v59 = vld [vmem:[%s4777_s26 + $0x384] ss:$8 sps:$4 sm:$0xff]  }
 0x15a   : > { %2604 = vmatprep.subr.bf16.mxu0 %v3970_v60  ;;  %v4066_v60 = vld [vmem:[%s4777_s26 + $0x784] ss:$8 sps:$4 sm:$0xff]  }
 0x15c   : > { %2393 = vmatpush1.bf16.msra.mxu1 %v3965_v61  ;;  %v4061_v61 = vld [vmem:[%s4777_s26 + $0x380] ss:$8 sps:$4 sm:$0xff]  }
 0x15d   : > { %2605 = vmatpush1.bf16.msra.mxu0 %v3968_v62  ;;  %2394 = vmatprep.subr.bf16.mxu1 %v3973_v63  ;;  %v4064_v62 = vld [vmem:[%s4777_s26 + $0x780] ss:$8 sps:$4 sm:$0xff]   ;;  %v4069_v63 = vld [vmem:[%s4777_s26 + $0x394] ss:$8 sps:$4 sm:$0xff]  }
 0x15e   : > { %2606 = vmatprep.subr.bf16.mxu0 %v3976_v0  ;;  %v4072_v0 = vld [vmem:[%s4777_s26 + $0x794] ss:$8 sps:$4 sm:$0xff]  }
 0x160   : > { %2395 = vmatpush1.bf16.msra.mxu1 %v3971_v1  ;;  %v4067_v1 = vld [vmem:[%s4777_s26 + $0x390] ss:$8 sps:$4 sm:$0xff]  }
 0x161   : > { %2607 = vmatpush1.bf16.msra.mxu0 %v3974_v2  ;;  %2396 = vmatprep.subr.bf16.mxu1 %v3979_v3  ;;  %v4070_v2 = vld [vmem:[%s4777_s26 + $0x790] ss:$8 sps:$4 sm:$0xff]   ;;  %v4075_v3 = vld [vmem:[%s4777_s26 + $0x3a4] ss:$8 sps:$4 sm:$0xff]  }
 0x162   : > { %2608 = vmatprep.subr.bf16.mxu0 %v3982_v4  ;;  %v4078_v4 = vld [vmem:[%s4777_s26 + $0x7a4] ss:$8 sps:$4 sm:$0xff]  }
 0x164   : > { %2397 = vmatpush1.bf16.msra.mxu1 %v3977_v5  ;;  %v4073_v5 = vld [vmem:[%s4777_s26 + $0x3a0] ss:$8 sps:$4 sm:$0xff]  }
 0x165   : > { %2609 = vmatpush1.bf16.msra.mxu0 %v3980_v6  ;;  %2398 = vmatprep.subr.bf16.mxu1 %v3985_v7  ;;  %v4076_v6 = vld [vmem:[%s4777_s26 + $0x7a0] ss:$8 sps:$4 sm:$0xff]   ;;  %v4081_v7 = vld [vmem:[%s4777_s26 + $0x3b4] ss:$8 sps:$4 sm:$0xff]  }
 0x166   : > { %2610 = vmatprep.subr.bf16.mxu0 %v3988_v8  ;;  %v4084_v8 = vld [vmem:[%s4777_s26 + $0x7b4] ss:$8 sps:$4 sm:$0xff]  }
 0x168   : > { %2399 = vmatpush1.bf16.msra.mxu1 %v3983_v9  ;;  %v4079_v9 = vld [vmem:[%s4777_s26 + $0x3b0] ss:$8 sps:$4 sm:$0xff]  }
 0x169   : > { %2611 = vmatpush1.bf16.msra.mxu0 %v3986_v10  ;;  %2400 = vmatprep.subr.bf16.mxu1 %v3993_v11  ;;  %v4082_v10 = vld [vmem:[%s4777_s26 + $0x7b0] ss:$8 sps:$4 sm:$0xff]   ;;  %v4087_v11 = vld [vmem:[%s4777_s26 + $0x3c4] ss:$8 sps:$4 sm:$0xff]  }
 0x16a   : > { %2612 = vmatprep.subr.bf16.mxu0 %v3998_v12  ;;  %v4090_v12 = vld [vmem:[%s4777_s26 + $0x7c4] ss:$8 sps:$4 sm:$0xff]  }
 0x16c   : > { %2401 = vmatpush1.bf16.msra.mxu1 %v3991_v13  ;;  %v4085_v13 = vld [vmem:[%s4777_s26 + $0x3c0] ss:$8 sps:$4 sm:$0xff]  }
 0x16d   : > { %2613 = vmatpush1.bf16.msra.mxu0 %v3996_v14  ;;  %2402 = vmatprep.subr.bf16.mxu1 %v4003_v15  ;;  %v4088_v14 = vld [vmem:[%s4777_s26 + $0x7c0] ss:$8 sps:$4 sm:$0xff]   ;;  %v4093_v15 = vld [vmem:[%s4777_s26 + $0x3d4] ss:$8 sps:$4 sm:$0xff]  }
 0x16e   : > { %2614 = vmatprep.subr.bf16.mxu0 %v4006_v16  ;;  %v4096_v16 = vld [vmem:[%s4777_s26 + $0x7d4] ss:$8 sps:$4 sm:$0xff]  }
 0x170   : > { %2403 = vmatpush1.bf16.msra.mxu1 %v4001_v17  ;;  %v4091_v17 = vld [vmem:[%s4777_s26 + $0x3d0] ss:$8 sps:$4 sm:$0xff]  }
 0x171   : > { %2615 = vmatpush1.bf16.msra.mxu0 %v4004_v18  ;;  %2425 = vmatprep.subr.bf16.mxu1 %v4012_v19  ;;  %v4094_v18 = vld [vmem:[%s4777_s26 + $0x7d0] ss:$8 sps:$4 sm:$0xff]   ;;  %v4104_v19 = vld [vmem:[%s4777_s26 + $0x3e4] ss:$8 sps:$4 sm:$0xff]  }
 0x172   : > { %2637 = vmatprep.subr.bf16.mxu0 %v4018_v20  ;;  %v4108_v20 = vld [vmem:[%s4777_s26 + $0x7e4] ss:$8 sps:$4 sm:$0xff]  }
 0x173   : > { %2405 = vmatmul.mubr.bf16.vlgmr.msra.gmra.mrb[0].mxu1 %v4007_v21  ;;  %v4102_v21 = vld [vmem:[%s4777_s26 + $0x3e0] ss:$8 sps:$4 sm:$0xff]  }
 0x174   : > { %2617 = vmatmul.mubr.bf16.vlgmr.msra.gmra.mrb[0].mxu0 %v4013_v23  ;;  %2426 = vmatpush1.bf16.msra.mxu1 %v4010_v22  ;;  %v4106_v22 = vld [vmem:[%s4777_s26 + $0x7e0] ss:$8 sps:$4 sm:$0xff]   ;;  %v4111_v23 = vld [vmem:[%s4777_s26 + $0x3f4] ss:$8 sps:$4 sm:$0xff]  }
 0x175   : > { %2638 = vmatpush1.bf16.msra.mxu0 %v4016_v24  ;;  %2427 = vmatprep.subr.bf16.mxu1 %v4021_v25  ;;  %v4114_v24 = vld [vmem:[%s4777_s26 + $0x7f4] ss:$8 sps:$4 sm:$0xff]   ;;  %v4109_v25 = vld [vmem:[%s4777_s26 + $0x3f0] ss:$8 sps:$4 sm:$0xff]  }
 0x176   : > { %2639 = vmatprep.subr.bf16.mxu0 %v4024_v26  ;;  %2414 = vmatprep.mubr.bf16.mxu1 %v4097_v27  ;;  %v4112_v26 = vld [vmem:[%s4777_s26 + $0x7f0] ss:$8 sps:$4 sm:$0xff]   ;;  %v4123_v27 = vld [vmem:[%s4777_s26 + $0x804] ss:$8 sps:$4 sm:$0xff]  }
 0x177   : > { %2626 = vmatprep.mubr.bf16.mxu0 %v4099_v28  ;;  %v4115_v28 = vld [vmem:[%s4769_s9 + $0x18] ss:$72 sps:$4 sm:$0xff]  }
 0x178   : > { %2428 = vmatpush1.bf16.msra.mxu1 %v4019_v29  ;;  %v4118_v29 = vld [vmem:[%s4769_s9 + $0x38] ss:$72 sps:$4 sm:$0xff]  }
 0x179   : > { %2640 = vmatpush1.bf16.msra.mxu0 %v4022_v30  ;;  %2429 = vmatprep.subr.bf16.mxu1 %v4027_v31  ;;  %v4121_v30 = vld [vmem:[%s4777_s26 + $0x800] ss:$8 sps:$4 sm:$0xff]   ;;  %v4126_v31 = vld [vmem:[%s4777_s26 + $0x814] ss:$8 sps:$4 sm:$0xff]  }
 0x17a   : > { %2641 = vmatprep.subr.bf16.mxu0 %v4030_v32  ;;  %v4127_v32 = vld [vmem:[%s4769_s9 + $0xac] ss:$72 sps:$4 sm:$0xff]  }
 0x17b   : > { %2415 = vmatmul.mubr.bf16.gmra.mrb[4].mxu1 %v4101_v35  ;;  %v4135_v35 = vld [vmem:[%s4777_s26 + $0x824] ss:$8 sps:$4 sm:$0xff]  }
 0x17c   : > { %2627 = vmatmul.mubr.bf16.gmra.mrb[4].mxu0 %v4105_v36  ;;  %2430 = vmatpush1.bf16.msra.mxu1 %v4025_v33  ;;  %v4129_v33 = vld [vmem:[%s4769_s9 + $0xcc] ss:$72 sps:$4 sm:$0xff]   ;;  %v4131_v36 = vld [vmem:[%s4769_s9 + $0xa8] ss:$72 sps:$4 sm:$0xff]  }
 0x17d   : > { %2642 = vmatpush1.bf16.msra.mxu0 %v4028_v34  ;;  %2431 = vmatprep.subr.bf16.mxu1 %v4033_v37  ;;  %v4124_v34 = vld [vmem:[%s4777_s26 + $0x810] ss:$8 sps:$4 sm:$0xff]  }
 0x17e   : > { %2643 = vmatprep.subr.bf16.mxu0 %v4036_v38  ;;  %2457 = vmatprep.mubr.bf16.mxu1 %v4117_v39  ;;  %v4132_v37 = vld [vmem:[%s4769_s9 + $0xc8] ss:$72 sps:$4 sm:$0xff]   ;;  %v4138_v39 = vld [vmem:[%s4777_s26 + $0x834] ss:$8 sps:$4 sm:$0xff]  }
 0x17f   : > { %2669 = vmatprep.mubr.bf16.mxu0 %v4120_v40  ;;  %v4133_v38 = vld [vmem:[%s4777_s26 + $0x820] ss:$8 sps:$4 sm:$0xff]   ;;  %v4177_v40 = vld [vmem:[%s4769_s9 + $0x44] ss:$72 sps:$4 sm:$0xff]  }
 0x180   : > { %2432 = vmatpush1.bf16.msra.mxu1 %v4031_v41  ;;  %v4180_v41 = vld [vmem:[%s4769_s9 + $0xd4] ss:$72 sps:$4 sm:$0xff]  }
 0x181   : > { %2644 = vmatpush1.bf16.msra.mxu0 %v4034_v42  ;;  %2433 = vmatprep.subr.bf16.mxu1 %v4039_v43  ;;  %v4136_v42 = vld [vmem:[%s4777_s26 + $0x830] ss:$8 sps:$4 sm:$0xff]   ;;  %v4141_v43 = vld [vmem:[%s4777_s26 + $0x844] ss:$8 sps:$4 sm:$0xff]  }
 0x182   : > { %2645 = vmatprep.subr.bf16.mxu0 %v4042_v44  ;;  %v4139_v44 = vld [vmem:[%s4777_s26 + $0x840] ss:$8 sps:$4 sm:$0xff]  }
 0x184   : > { %2434 = vmatpush1.bf16.msra.mxu1 %v4037_v45  ;;  %v4144_v45 = vld [vmem:[%s4777_s26 + $0x854] ss:$8 sps:$4 sm:$0xff]  }
 0x185   : > { %2646 = vmatpush1.bf16.msra.mxu0 %v4040_v46  ;;  %2435 = vmatprep.subr.bf16.mxu1 %v4045_v47  ;;  %v4142_v46 = vld [vmem:[%s4777_s26 + $0x850] ss:$8 sps:$4 sm:$0xff]   ;;  %v4147_v47 = vld [vmem:[%s4777_s26 + $0x864] ss:$8 sps:$4 sm:$0xff]  }
 0x186   : > { %2647 = vmatprep.subr.bf16.mxu0 %v4048_v48  ;;  %v4145_v48 = vld [vmem:[%s4777_s26 + $0x860] ss:$8 sps:$4 sm:$0xff]  }
 0x188   : > { %2436 = vmatpush1.bf16.msra.mxu1 %v4043_v49  ;;  %v4150_v49 = vld [vmem:[%s4777_s26 + $0x874] ss:$8 sps:$4 sm:$0xff]  }
 0x189   : > { %2648 = vmatpush1.bf16.msra.mxu0 %v4046_v50  ;;  %2437 = vmatprep.subr.bf16.mxu1 %v4051_v51  ;;  %v4148_v50 = vld [vmem:[%s4777_s26 + $0x870] ss:$8 sps:$4 sm:$0xff]   ;;  %v4153_v51 = vld [vmem:[%s4777_s26 + $0x884] ss:$8 sps:$4 sm:$0xff]  }
 0x18a   : > { %2649 = vmatprep.subr.bf16.mxu0 %v4054_v52  ;;  %v4151_v52 = vld [vmem:[%s4777_s26 + $0x880] ss:$8 sps:$4 sm:$0xff]  }
 0x18c   : > { %2438 = vmatpush1.bf16.msra.mxu1 %v4049_v53  ;;  %v4156_v53 = vld [vmem:[%s4777_s26 + $0x894] ss:$8 sps:$4 sm:$0xff]  }
 0x18d   : > { %2650 = vmatpush1.bf16.msra.mxu0 %v4052_v54  ;;  %2439 = vmatprep.subr.bf16.mxu1 %v4057_v55  ;;  %v4154_v54 = vld [vmem:[%s4777_s26 + $0x890] ss:$8 sps:$4 sm:$0xff]   ;;  %v4159_v55 = vld [vmem:[%s4777_s26 + $0x8a4] ss:$8 sps:$4 sm:$0xff]  }
 0x18e   : > { %2651 = vmatprep.subr.bf16.mxu0 %v4060_v56  ;;  %v4157_v56 = vld [vmem:[%s4777_s26 + $0x8a0] ss:$8 sps:$4 sm:$0xff]  }
 0x190   : > { %2440 = vmatpush1.bf16.msra.mxu1 %v4055_v57  ;;  %v4162_v57 = vld [vmem:[%s4777_s26 + $0x8b4] ss:$8 sps:$4 sm:$0xff]  }
 0x191   : > { %2652 = vmatpush1.bf16.msra.mxu0 %v4058_v58  ;;  %2441 = vmatprep.subr.bf16.mxu1 %v4063_v59  ;;  %v4160_v58 = vld [vmem:[%s4777_s26 + $0x8b0] ss:$8 sps:$4 sm:$0xff]   ;;  %v4165_v59 = vld [vmem:[%s4777_s26 + $0x8c4] ss:$8 sps:$4 sm:$0xff]  }
 0x192   : > { %2653 = vmatprep.subr.bf16.mxu0 %v4066_v60  ;;  %v4163_v60 = vld [vmem:[%s4777_s26 + $0x8c0] ss:$8 sps:$4 sm:$0xff]  }
 0x194   : > { %2442 = vmatpush1.bf16.msra.mxu1 %v4061_v61  ;;  %v4168_v61 = vld [vmem:[%s4777_s26 + $0x8d4] ss:$8 sps:$4 sm:$0xff]  }
 0x195   : > { %2654 = vmatpush1.bf16.msra.mxu0 %v4064_v62  ;;  %2443 = vmatprep.subr.bf16.mxu1 %v4069_v63  ;;  %v4166_v62 = vld [vmem:[%s4777_s26 + $0x8d0] ss:$8 sps:$4 sm:$0xff]   ;;  %v4171_v63 = vld [vmem:[%s4777_s26 + $0x8e4] ss:$8 sps:$4 sm:$0xff]  }
 0x196   : > { %2655 = vmatprep.subr.bf16.mxu0 %v4072_v0  ;;  %v4169_v0 = vld [vmem:[%s4777_s26 + $0x8e0] ss:$8 sps:$4 sm:$0xff]  }
 0x198   : > { %2444 = vmatpush1.bf16.msra.mxu1 %v4067_v1  ;;  %v4174_v1 = vld [vmem:[%s4777_s26 + $0x8f4] ss:$8 sps:$4 sm:$0xff]  }
 0x199   : > { %2656 = vmatpush1.bf16.msra.mxu0 %v4070_v2  ;;  %2445 = vmatprep.subr.bf16.mxu1 %v4075_v3  ;;  %v4172_v2 = vld [vmem:[%s4777_s26 + $0x8f0] ss:$8 sps:$4 sm:$0xff]   ;;  %v4175_v3 = vld [vmem:[%s4769_s9 + $0x40] ss:$72 sps:$4 sm:$0xff]  }
 0x19a   : > { %2657 = vmatprep.subr.bf16.mxu0 %v4078_v4  ;;  %v4178_v4 = vld [vmem:[%s4769_s9 + $0xd0] ss:$72 sps:$4 sm:$0xff]  }
 0x19c   : > { %2446 = vmatpush1.bf16.msra.mxu1 %v4073_v5 }
 0x19d   : > { %2658 = vmatpush1.bf16.msra.mxu0 %v4076_v6  ;;  %2447 = vmatprep.subr.bf16.mxu1 %v4081_v7 }
 0x19e   : > { %2659 = vmatprep.subr.bf16.mxu0 %v4084_v8 }
 0x1a0   : > { %2448 = vmatpush1.bf16.msra.mxu1 %v4079_v9 }
 0x1a1   : > { %2660 = vmatpush1.bf16.msra.mxu0 %v4082_v10  ;;  %2449 = vmatprep.subr.bf16.mxu1 %v4087_v11 }
 0x1a2   : > { %2661 = vmatprep.subr.bf16.mxu0 %v4090_v12 }
 0x1a4   : > { %2450 = vmatpush1.bf16.msra.mxu1 %v4085_v13 }
 0x1a5   : > { %2662 = vmatpush1.bf16.msra.mxu0 %v4088_v14  ;;  %2451 = vmatprep.subr.bf16.mxu1 %v4093_v15 }
 0x1a6   : > { %2663 = vmatprep.subr.bf16.mxu0 %v4096_v16 }
 0x1a8   : > { %2452 = vmatpush1.bf16.msra.mxu1 %v4091_v17 }
 0x1a9   : > { %2664 = vmatpush1.bf16.msra.mxu0 %v4094_v18  ;;  %2453 = vmatprep.subr.bf16.mxu1 %v4104_v19 }
 0x1aa   : > { %2665 = vmatprep.subr.bf16.mxu0 %v4108_v20 }
 0x1ac   : > { %2454 = vmatpush1.bf16.msra.mxu1 %v4102_v21  ;;  %v314_v21 = vld [vmem:[#allocation2] sm:$0xff] }
 0x1ad   : > { %2666 = vmatpush1.bf16.msra.mxu0 %v4106_v22  ;;  %2455 = vmatprep.subr.bf16.mxu1 %v4111_v23  ;;  %v318_v23 = vld [vmem:[#allocation2 + $0x20] sm:$0xff] }
 0x1ae   : > { %2667 = vmatprep.subr.bf16.mxu0 %v4114_v24 }
 0x1b0   : > { %2456 = vmatpush1.bf16.msra.mxu1 %v4109_v25 }
 0x1b1   : > { %2668 = vmatpush1.bf16.msra.mxu0 %v4112_v26  ;;  %3449 = vmatprep.subr.bf16.mxu1 %v4123_v27 }
 0x1b2   : > { %2690 = vmatprep.subr.bf16.mxu0 %v4123_v27  ;;  %v315_v27 = vld [vmem:[#allocation2 + $0x8] sm:$0xff] }
 0x1b3   : > { %2458 = vmatmul.mubr.bf16.vlgmr.msra.gmra.mrb[0].mxu1 %v4115_v28 }
 0x1b4   : > { %2670 = vmatmul.mubr.bf16.vlgmr.msra.gmra.mrb[0].mxu0 %v4118_v29  ;;  %3465 = vmatpush1.bf16.msra.mxu1 %v4121_v30  ;;  %v319_v29 = vld [vmem:[#allocation2 + $0x28] sm:$0xff] }
 0x1b5   : > { %2691 = vmatpush1.bf16.msra.mxu0 %v4121_v30  ;;  %3450 = vmatprep.subr.bf16.mxu1 %v4126_v31 }
 0x1b6   : > { %2692 = vmatprep.subr.bf16.mxu0 %v4126_v31  ;;  %2467 = vmatprep.mubr.bf16.mxu1 %v4127_v32 }
 0x1b7   : > { %2679 = vmatprep.mubr.bf16.mxu0 %v4129_v33  ;;  %v316_v33 = vld [vmem:[#allocation2 + $0x10] sm:$0xff] }
 0x1b8   : > { %3466 = vmatpush1.bf16.msra.mxu1 %v4124_v34 }
 0x1b9   : > { %2693 = vmatpush1.bf16.msra.mxu0 %v4124_v34  ;;  %3451 = vmatprep.subr.bf16.mxu1 %v4135_v35 }
 0x1ba   : > { %2694 = vmatprep.subr.bf16.mxu0 %v4135_v35  ;;  %v320_v35 = vld [vmem:[#allocation2 + $0x30] sm:$0xff] }
 0x1bb   : > { %2468 = vmatmul.mubr.bf16.gmra.mrb[4].mxu1 %v4131_v36 }
 0x1bc   : > { %2680 = vmatmul.mubr.bf16.gmra.mrb[4].mxu0 %v4132_v37  ;;  %3467 = vmatpush1.bf16.msra.mxu1 %v4133_v38 }
 0x1bd   : > { %2695 = vmatpush1.bf16.msra.mxu0 %v4133_v38  ;;  %3452 = vmatprep.subr.bf16.mxu1 %v4138_v39 }
 0x1be   : > { %2696 = vmatprep.subr.bf16.mxu0 %v4138_v39  ;;  %2722 = vmatprep.mubr.bf16.mxu0 %v4177_v40 }
 0x1bf   : > { %2732 = vmatprep.mubr.bf16.mxu1 %v4180_v41  ;;  %v317_v41 = vld [vmem:[#allocation2 + $0x18] sm:$0xff] }
 0x1c0   : > { %3468 = vmatpush1.bf16.msra.mxu1 %v4136_v42 }
 0x1c1   : > { %2697 = vmatpush1.bf16.msra.mxu0 %v4136_v42  ;;  %3453 = vmatprep.subr.bf16.mxu1 %v4141_v43 }
 0x1c2   : > { %2698 = vmatprep.subr.bf16.mxu0 %v4141_v43  ;;  %v321_v43 = vld [vmem:[#allocation2 + $0x38] sm:$0xff] }
 0x1c4   : > { %3469 = vmatpush1.bf16.msra.mxu1 %v4139_v44 }
 0x1c5   : > { %2699 = vmatpush1.bf16.msra.mxu0 %v4139_v44  ;;  %3454 = vmatprep.subr.bf16.mxu1 %v4144_v45 }
 0x1c6   : > { %2700 = vmatprep.subr.bf16.mxu0 %v4144_v45 }
 0x1c8   : > { %3470 = vmatpush1.bf16.msra.mxu1 %v4142_v46 }
 0x1c9   : > { %2701 = vmatpush1.bf16.msra.mxu0 %v4142_v46  ;;  %3455 = vmatprep.subr.bf16.mxu1 %v4147_v47 }
 0x1ca   : > { %2702 = vmatprep.subr.bf16.mxu0 %v4147_v47 }
 0x1cc   : > { %3471 = vmatpush1.bf16.msra.mxu1 %v4145_v48 }
 0x1cd   : > { %2703 = vmatpush1.bf16.msra.mxu0 %v4145_v48  ;;  %3456 = vmatprep.subr.bf16.mxu1 %v4150_v49 }
 0x1ce   : > { %2704 = vmatprep.subr.bf16.mxu0 %v4150_v49 }
 0x1d0   : > { %3472 = vmatpush1.bf16.msra.mxu1 %v4148_v50 }
 0x1d1   : > { %2705 = vmatpush1.bf16.msra.mxu0 %v4148_v50  ;;  %3457 = vmatprep.subr.bf16.mxu1 %v4153_v51 }
 0x1d2   : > { %2706 = vmatprep.subr.bf16.mxu0 %v4153_v51 }
 0x1d4   : > { %3473 = vmatpush1.bf16.msra.mxu1 %v4151_v52 }
 0x1d5   : > { %2707 = vmatpush1.bf16.msra.mxu0 %v4151_v52  ;;  %3458 = vmatprep.subr.bf16.mxu1 %v4156_v53 }
 0x1d6   : > { %2708 = vmatprep.subr.bf16.mxu0 %v4156_v53  ;;  %v2773_v53 = vlaneseq (!%p3437_p13) }
 0x1d8   : > { %3474 = vmatpush1.bf16.msra.mxu1 %v4154_v54 }
 0x1d9   : > { %2709 = vmatpush1.bf16.msra.mxu0 %v4154_v54  ;;  %3459 = vmatprep.subr.bf16.mxu1 %v4159_v55  ;;  %v2774_v54 = vshrl.u32 (!%p3437_p13), %v2773_v53, 7 }
 0x1da   : > { %2710 = vmatprep.subr.bf16.mxu0 %v4159_v55  ;;  %v2771_v55 = vld [vmem:[%s4787_s21] ss:$8 sm:$0x3] (!%p3437_p13) }
 0x1dc   : > { %3475 = vmatpush1.bf16.msra.mxu1 %v4157_v56 }
 0x1dd   : > { %2711 = vmatpush1.bf16.msra.mxu0 %v4157_v56  ;;  %3460 = vmatprep.subr.bf16.mxu1 %v4162_v57  ;;  %v5123_v56 = vsub.s32 (!%p3437_p13), 0, %v2774_v54 }
 0x1de   : > { %2712 = vmatprep.subr.bf16.mxu0 %v4162_v57  ;;  %v5125_v57 = vsub.s32 (!%p3437_p13), 1, %v2774_v54 }
 0x1e0   : > { %3476 = vmatpush1.bf16.msra.mxu1 %v4160_v58 }
 0x1e1   : > { %2713 = vmatpush1.bf16.msra.mxu0 %v4160_v58  ;;  %3461 = vmatprep.subr.bf16.mxu1 %v4165_v59 }
 0x1e2   : > { %2714 = vmatprep.subr.bf16.mxu0 %v4165_v59 }
 0x1e4   : > { %3477 = vmatpush1.bf16.msra.mxu1 %v4163_v60 }
 0x1e5   : > { %2715 = vmatpush1.bf16.msra.mxu0 %v4163_v60  ;;  %3462 = vmatprep.subr.bf16.mxu1 %v4168_v61 }
 0x1e6   : > { %2716 = vmatprep.subr.bf16.mxu0 %v4168_v61  ;;  %v2776_v61 = vrot.slane (!%p3437_p13), %v2771_v55, %v5123_v56 }
 0x1e8   : > { %3478 = vmatpush1.bf16.msra.mxu1 %v4166_v62 }
 0x1e9   : > { %2717 = vmatpush1.bf16.msra.mxu0 %v4166_v62  ;;  %3463 = vmatprep.subr.bf16.mxu1 %v4171_v63 }
 0x1ea   : > { %2718 = vmatprep.subr.bf16.mxu0 %v4171_v63 }
 0x1ec   : > { %3479 = vmatpush1.bf16.msra.mxu1 %v4169_v0 }
 0x1ed   : > { %2719 = vmatpush1.bf16.msra.mxu0 %v4169_v0  ;;  %3464 = vmatprep.subr.bf16.mxu1 %v4174_v1 }
 0x1ee   : > { %2720 = vmatprep.subr.bf16.mxu0 %v4174_v1  ;;  %v2780_v1 = vrot.slane (!%p3437_p13), %v2771_v55, %v5125_v57 }
 0x1f0   : > { %3480 = vmatpush1.bf16.msra.mxu1 %v4172_v2 }
 0x1f1   : > { %2721 = vmatpush1.bf16.msra.mxu0 %v4172_v2 }
 0x1f3   : > { %2733 = vmatmul.mubr.bf16.vlgmr.msra.gmra.mrb[8].mxu1 %v4178_v4 }
 0x1f4   : > { %2723 = vmatmul.mubr.bf16.vlgmr.msra.gmra.mrb[0].mxu0 %v4175_v3 }
 0x286   : > { %v2459_v5 = vpop.f32.mrb[0].mxu1 }
 0x287   : > { %v2461_v6 = vpop.f32.mrb[1].mxu1 }
 0x288   : > { %v2463_v7 = vpop.f32.mrb[2].mxu1 }
 0x289   : > { %v2465_v8 = vpop.f32.mrb[3].mxu1 }
 0x28e   : > { %v2469_v9 = vpop.f32.mrb[4].mxu1 }
 0x28f   : > { %v2681_v10 = vpop.f32.mrb[4].mxu0  ;;  %v2471_v12 = vpop.f32.mrb[5].mxu1 }
 0x290   : > { %v3485_v11 = vadd.f32 %v2681_v10, %v2469_v9  ;;  %v2683_v13 = vpop.f32.mrb[5].mxu0  ;;  %v2473_v15 = vpop.f32.mrb[6].mxu1 }
 0x291   : > { %v3487_v14 = vadd.f32 %v2683_v13, %v2471_v12  ;;  %v2685_v16 = vpop.f32.mrb[6].mxu0  ;;  %v2475_v18 = vpop.f32.mrb[7].mxu1 }
 0x292   : > { %v3489_v17 = vadd.f32 %v2685_v16, %v2473_v15  ;;  %v2687_v19 = vpop.f32.mrb[7].mxu0 }
 0x293   : > { %v3491_v20 = vadd.f32 %v2687_v19, %v2475_v18 }
 0x2c6   : > { %v2734_v24 = vpop.f32.mrb[8].mxu1 }
 0x2c7   : > { %v2724_v22 = vpop.f32.mrb[0].mxu0  ;;  %v3486_v26 = vadd.f32 %v3485_v11, %v2734_v24  ;;  %v2736_v30 = vpop.f32.mrb[9].mxu1 }
 0x2c8   : > { %v3481_v25 = vadd.f32 %v2724_v22, %v2459_v5  ;;  %v2726_v28 = vpop.f32.mrb[1].mxu0  ;;  %v3488_v32 = vadd.f32 %v3487_v14, %v2736_v30  ;;  %v2738_v36 = vpop.f32.mrb[10].mxu1 }
 0x2c9   : > { %v3482_v31 = vadd.f32 %v2726_v28, %v2461_v6  ;;  %v2728_v34 = vpop.f32.mrb[2].mxu0  ;;  %v2747_v38 = vadd.f32 %v3486_v26, %v318_v23  ;;  %v3490_v40 = vadd.f32 %v3489_v17, %v2738_v36  ;;  %v2740_v44 = vpop.f32.mrb[11].mxu1  ;;  %2762 = sbr.rel (%p3437_p13) target bundleno = 797 (0x31d), region = 52 }
 0x2ca   : > { %v2743_v37 = vadd.f32 %v3481_v25, %v314_v21  ;;  %v3483_v39 = vadd.f32 %v2728_v34, %v2463_v7  ;;  %v2730_v42 = vpop.f32.mrb[3].mxu0  ;;  %v2748_v46 = vadd.f32 %v3488_v32, %v319_v29  ;;  %v3492_v48 = vadd.f32 %v3491_v20, %v2740_v44 }
 0x2cb   : > { %v2744_v45 = vadd.f32 %v3482_v31, %v315_v27  ;;  %v3484_v47 = vadd.f32 %v2730_v42, %v2465_v8  ;;  %2755 = vst [vmem:[#allocation2 + $0x20] sm:$0xff] %v2747_v38  ;;  %v2749_v50 = vadd.f32 %v3490_v40, %v320_v35 }
 0x2cc   : > { %2751 = vst [vmem:[#allocation2] sm:$0xff] %v2743_v37  ;;  %v2745_v49 = vadd.f32 %v3483_v39, %v316_v33  ;;  %2756 = vst [vmem:[#allocation2 + $0x28] sm:$0xff] %v2748_v46  ;;  %v2750_v52 = vadd.f32 %v3492_v48, %v321_v43 }
 0x2cd   : > { %2752 = vst [vmem:[#allocation2 + $0x8] sm:$0xff] %v2744_v45  ;;  %v2746_v51 = vadd.f32 %v3484_v47, %v317_v41  ;;  %2757 = vst [vmem:[#allocation2 + $0x30] sm:$0xff] %v2749_v50 }
 0x2ce   : > { %2753 = vst [vmem:[#allocation2 + $0x10] sm:$0xff] %v2745_v49  ;;  %2758 = vst [vmem:[#allocation2 + $0x38] sm:$0xff] %v2750_v52 }
 0x2cf   : > { %2754 = vst [vmem:[#allocation2 + $0x18] sm:$0xff] %v2746_v51 }
 0x2d2   : > { %v2767_v60 = vld [vmem:[#allocation2 + $0x20] sm:$0xff] }
 0x2d3   : > { %v2763_v58 = vld [vmem:[#allocation2] sm:$0xff]  ;;  %v2768_v0 = vld [vmem:[#allocation2 + $0x28] sm:$0xff]  ;;  %v2787_v5 = vadd.f32 %v2776_v61, %v2767_v60 }
 0x2d4   : > { %v2764_v62 = vld [vmem:[#allocation2 + $0x8] sm:$0xff]  ;;  %v2769_v2 = vld [vmem:[#allocation2 + $0x30] sm:$0xff]  ;;  %v2783_v3 = vadd.f32 %v2776_v61, %v2763_v58  ;;  %v2788_v9 = vadd.f32 %v2780_v1, %v2768_v0 }
 0x2d5   : > { %v2765_v59 = vld [vmem:[#allocation2 + $0x10] sm:$0xff]  ;;  %v2770_v6 = vld [vmem:[#allocation2 + $0x38] sm:$0xff]  ;;  %v2784_v7 = vadd.f32 %v2780_v1, %v2764_v62  ;;  %v2789_v10 = vadd.f32 %v2776_v61, %v2769_v2 }
 0x2d6   : > { %v2766_v63 = vld [vmem:[#allocation2 + $0x18] sm:$0xff]  ;;  %v2785_v4 = vadd.f32 %v2776_v61, %v2765_v59  ;;  %v2790_v12 = vadd.f32 %v2780_v1, %v2770_v6 }
 0x2d7   : > { %v2786_v8 = vadd.f32 %v2780_v1, %v2766_v63 }
 0x2d8   : > { %v2808_v11 = vadd.f32 %v2785_v4, %v2783_v3 }
 0x2d9   : > { %v2817_v13 = vadd.f32 %v2786_v8, %v2784_v7 }
 0x2da   : > { %v2809_v14 = vadd.f32 %v2808_v11, %v2787_v5 }
 0x2db   : > { %v2818_v15 = vadd.f32 %v2817_v13, %v2788_v9 }
 0x2dc   : > { %v2810_v16 = vadd.f32 %v2809_v14, %v2789_v10 }
 0x2dd   : > { %v2819_v17 = vadd.f32 %v2818_v15, %v2790_v12 }
 0x2de   : > { %v2811_v18 = vrot.slane %v2810_v16, 4 }
 0x2df   : > { %v2820_v19 = vrot.slane %v2819_v17, 4 }
 0x2e0   : > { %v2812_v20 = vadd.f32 %v2811_v18, %v2810_v16 }
 0x2e1   : > { %v2821_v21 = vadd.f32 %v2820_v19, %v2819_v17 }
 0x2e2   : > { %v2813_v22 = vrot.slane %v2812_v20, 2 }
 0x2e3   : > { %v2822_v23 = vrot.slane %v2821_v21, 2 }
 0x2e4   : > { %v2814_v24 = vadd.f32 %v2813_v22, %v2812_v20 }
 0x2e5   : > { %v2823_v25 = vadd.f32 %v2822_v23, %v2821_v21 }
 0x2e6   : > { %v2815_v26 = vrot.slane %v2814_v24, 1 }
 0x2e7   : > { %v2824_v27 = vrot.slane %v2823_v25, 1 }
 0x2e8   : > { %v2816_v28 = vadd.f32 %v2815_v26, %v2814_v24 }
 0x2e9   : > { %v2825_v29 = vadd.f32 %v2824_v27, %v2823_v25 }
 0x2ea   : > { %v2826_v30 = vmul.f32 0.03125, %v2816_v28 }
 0x2eb   : > { %v2827_v31 = vmul.f32 0.03125, %v2825_v29 }
 0x2ec   : > { %v2828_v32 = vsub.f32 %v2783_v3, %v2826_v30  ;;  %v2830_v33 = vsub.f32 %v2785_v4, %v2826_v30  ;;  %v2832_v34 = vsub.f32 %v2787_v5, %v2826_v30  ;;  %v2834_v35 = vsub.f32 %v2789_v10, %v2826_v30 }
 0x2ed   : > { %v2829_v36 = vsub.f32 %v2784_v7, %v2827_v31  ;;  %v2831_v37 = vsub.f32 %v2786_v8, %v2827_v31  ;;  %v2833_v38 = vsub.f32 %v2788_v9, %v2827_v31  ;;  %v2835_v39 = vsub.f32 %v2790_v12, %v2827_v31  ;;  %v3438_v8 = vld [vmem:[%s4787_s21 + $0x1] ss:$8 sm:$0x3]  ;;  %v3439_v9 = vld [vmem:[%s4787_s21 + $0x2] ss:$8 sm:$0x3] }
 0x2ee   : > { %v2844_v40 = vmul.f32 %v2828_v32, %v2828_v32  ;;  %v2846_v41 = vmul.f32 %v2830_v33, %v2830_v33  ;;  %v2848_v42 = vmul.f32 %v2832_v34, %v2832_v34  ;;  %v2850_v46 = vmul.f32 %v2834_v35, %v2834_v35 }
 0x2ef   : > { %v2845_v43 = vmul.f32 %v2829_v36, %v2829_v36  ;;  %v2847_v44 = vmul.f32 %v2831_v37, %v2831_v37  ;;  %v2849_v45 = vmul.f32 %v2833_v38, %v2833_v38  ;;  %v2851_v48 = vmul.f32 %v2835_v39, %v2835_v39 }
 0x2f0   : > { %v2852_v47 = vadd.f32 %v2846_v41, %v2844_v40  ;;  %v2890_v10 = vrot.slane %v3438_v8, %v5123_v56  ;;  %v2911_v12 = vrot.slane %v3439_v9, %v5123_v56  ;;  %v2894_v13 = vrot.slane %v3438_v8, %v5125_v57 }
 0x2f1   : > { %v2861_v49 = vadd.f32 %v2847_v44, %v2845_v43  ;;  %v2915_v14 = vrot.slane %v3439_v9, %v5125_v57 }
 0x2f2   : > { %v2853_v50 = vadd.f32 %v2852_v47, %v2848_v42 }
 0x2f3   : > { %v2862_v51 = vadd.f32 %v2861_v49, %v2849_v45 }
 0x2f4   : > { %v2854_v52 = vadd.f32 %v2853_v50, %v2850_v46 }
 0x2f5   : > { %v2863_v53 = vadd.f32 %v2862_v51, %v2851_v48 }
 0x2f6   : > { %v2855_v54 = vrot.slane %v2854_v52, 4 }
 0x2f7   : > { %v2864_v55 = vrot.slane %v2863_v53, 4 }
 0x2f8   : > { %v2856_v58 = vadd.f32 %v2855_v54, %v2854_v52 }
 0x2f9   : > { %v2865_v59 = vadd.f32 %v2864_v55, %v2863_v53 }
 0x2fa   : > { %v2857_v60 = vrot.slane %v2856_v58, 2 }
 0x2fb   : > { %v2866_v61 = vrot.slane %v2865_v59, 2 }
 0x2fc   : > { %v2858_v62 = vadd.f32 %v2857_v60, %v2856_v58 }
 0x2fd   : > { %v2867_v63 = vadd.f32 %v2866_v61, %v2865_v59 }
 0x2fe   : > { %v2859_v0 = vrot.slane %v2858_v62, 1 }
 0x2ff   : > { %v2868_v1 = vrot.slane %v2867_v63, 1 }
 0x300   : > { %v2860_v2 = vadd.f32 %v2859_v0, %v2858_v62 }
 0x301   : > { %v2869_v3 = vadd.f32 %v2868_v1, %v2867_v63 }
 0x302   : > { %v2870_v4 = vmul.f32 0.03125, %v2860_v2 }
 0x303   : > { %v2871_v5 = vmul.f32 0.03125, %v2869_v3 }
 0x304   : > { %v2872_v6 = vadd.f32 1e-05, %v2870_v4 }
 0x305   : > { %v2873_v7 = vadd.f32 1e-05, %v2871_v5 }
 0x306   : > { %4181 = vrsqrt.f32 %v2872_v6 }
 0x307   : > { %4183 = vrsqrt.f32 %v2873_v7 }
 0x310   : > { %v4182_v11 = vpop.eup %4181 }
 0x311   : > { %v4184_v15 = vpop.eup %4183  ;;  %v2876_v16 = vmul.f32 %v4182_v11, %v2828_v32  ;;  %v2878_v17 = vmul.f32 %v4182_v11, %v2830_v33  ;;  %v2880_v18 = vmul.f32 %v4182_v11, %v2832_v34  ;;  %v2882_v19 = vmul.f32 %v4182_v11, %v2834_v35 }
 0x312   : > { %v2877_v20 = vmul.f32 %v4184_v15, %v2829_v36  ;;  %v2879_v21 = vmul.f32 %v4184_v15, %v2831_v37  ;;  %v2881_v22 = vmul.f32 %v4184_v15, %v2833_v38  ;;  %v2883_v23 = vmul.f32 %v4184_v15, %v2835_v39 }
 0x313   : > { %v2897_v24 = vmul.f32 %v2890_v10, %v2876_v16  ;;  %v2899_v25 = vmul.f32 %v2890_v10, %v2878_v17  ;;  %v2901_v26 = vmul.f32 %v2890_v10, %v2880_v18  ;;  %v2903_v27 = vmul.f32 %v2890_v10, %v2882_v19 }
 0x314   : > { %v2898_v28 = vmul.f32 %v2894_v13, %v2877_v20  ;;  %v2900_v29 = vmul.f32 %v2894_v13, %v2879_v21  ;;  %v2902_v56 = vmul.f32 %v2894_v13, %v2881_v22  ;;  %v2904_v30 = vmul.f32 %v2894_v13, %v2883_v23 }
 0x315   : > { %v2918_v31 = vadd.f32 %v2911_v12, %v2897_v24  ;;  %v2920_v57 = vadd.f32 %v2911_v12, %v2899_v25  ;;  %v2922_v32 = vadd.f32 %v2911_v12, %v2901_v26  ;;  %v2924_v33 = vadd.f32 %v2911_v12, %v2903_v27 }
 0x316   : > { %v2919_v34 = vadd.f32 %v2915_v14, %v2898_v28  ;;  %v2921_v35 = vadd.f32 %v2915_v14, %v2900_v29  ;;  %v2923_v36 = vadd.f32 %v2915_v14, %v2902_v56  ;;  %v2925_v37 = vadd.f32 %v2915_v14, %v2904_v30 }
 0x317   : > { %v2926_v38 = vmax.f32 %v2918_v31, 0.0  ;;  %v2928_v39 = vmax.f32 %v2920_v57, 0.0  ;;  %v2930_v40 = vmax.f32 %v2922_v32, 0.0  ;;  %v2932_v41 = vmax.f32 %v2924_v33, 0.0 }
 0x318   : > { %v2927_v42 = vmax.f32 %v2919_v34, 0.0  ;;  %v2929_v43 = vmax.f32 %v2921_v35, 0.0  ;;  %v2931_v44 = vmax.f32 %v2923_v36, 0.0  ;;  %v2933_v45 = vmax.f32 %v2925_v37, 0.0 }
 0x319   : > { %2934 = vst [vmem:[%s4794_s8] sm:$0xff] %v2926_v38  ;;  %2936 = vst [vmem:[%s4794_s8 + $0x10] sm:$0xff] %v2928_v39 }
 0x31a   : > { %2938 = vst [vmem:[%s4794_s8 + $0x20] sm:$0xff] %v2930_v40  ;;  %2940 = vst [vmem:[%s4794_s8 + $0x30] sm:$0xff] %v2932_v41 }
 0x31b   : > { %2935 = vst [vmem:[%s4794_s8 + $0x8] sm:$0xff] %v2927_v42  ;;  %2937 = vst [vmem:[%s4794_s8 + $0x18] sm:$0xff] %v2929_v43 }
 0x31c   : > { %2939 = vst [vmem:[%s4794_s8 + $0x28] sm:$0xff] %v2931_v44  ;;  %2941 = vst [vmem:[%s4794_s8 + $0x38] sm:$0xff] %v2933_v45 }
 0x31d PF: > { %s5284_s18 = sld [smem:[#allocation17_spill]]  ;;  %s5285_s9 = sld [smem:[#allocation24_spill]] }
 0x31e   : > { %s2959_s0 = sshll.u32 %s4794_s8, 4  ;;  %s2943_s1 = scalar_lea.sflag [#allocation5], %s4784_s28  ;;  %s5150_s0 = int_to_ptr.vmem [resolvable:$true] %s2959_s0 }
 0x31f   : > { %s4275_s22 = scalar_lea.vmem %s5150_s0, 1024  ;;  %p5286_p10 = scmp.ne.s32.totalorder %s5273_s2, 0 }
 0x320   : > { %p4276_p3 = scmp.ne.s32.totalorder %s5150_s0, %s4275_s22  ;;  %s4441_s26 = smov [#allocation9]  }
 0x321   : > { %s4279_s3 = sshll.u32 %s4441_s26, 4  ;;  %s4280_s3 = int_to_ptr.vmem [resolvable:$false] %s4279_s3 }
 0x322   : > { %p4277_p4 = pnand %p4276_p3, %p5286_p10  ;;  %s4281_s21 = scalar_lea.vmem %s4280_s3, 2048 }
 0x323   : > { %s3448_s5 = sshll.u32 %s5284_s18, 8  ;;  %p4282_p0 = scmp.lt.s32.totalorder %s5150_s0, %s4280_s3 }
 0x324   : > { %s5147_s27 = scalar_lea.hbm %s5285_s9, %s3448_s5  ;;  %p4278_p8 = pneg %p4277_p4 }
 0x325   : > { %p4283_p2 = scmp.lt.s32.totalorder %s4281_s21, %s4275_s22 }
 0x327   : > { %p4284_p1 = por %p4283_p2, %p4282_p0 }
 0x329   : > { %p4285_p11 = pnand %p4284_p1, %p4278_p8 }
 0x32b   : > { %4288 = shalt.err (!%p4285_p11)
}
 0x32c   : > { %s4289_s6 = scalar_lea.hbm %s5147_s27, 1024  ;;  %s4293_s29 = scalar_lea.hbm %s5285_s9, 2048 }
 0x32d   : > { %p4290_p6 = scmp.ne.s32.totalorder %s5147_s27, %s4289_s6  ;;  %p4294_p12 = scmp.lt.u32.totalorder %s5147_s27, %s5285_s9 }
 0x32e   : > { %p4295_p7 = scmp.lt.u32.totalorder %s4293_s29, %s4289_s6  ;;  %p4297_p3 = scmp.lt.u32.totalorder %s4289_s6, %s5147_s27 }
 0x32f   : > { %p4291_p9 = pnand %p4290_p6, %p5286_p10 }
 0x330   : > { %p4296_p13 = por %p4295_p7, %p4294_p12 }
 0x331   : > { %p4292_p5 = pneg %p4291_p9 }
 0x332   : > { %p4298_p4 = por %p4297_p3, %p4296_p13 }
 0x334   : > { %p4299_p8 = pnand %p4298_p4, %p4292_p5 }
 0x336   : > { %4302 = shalt.err (!%p4299_p8)
}
 0x337   : > { %s4442_s10 = smov 256   ;;  %s4443_s24 = smov 512  }
 0x338   : > { %s4444_s22 = smov 16  }
 0x339   : > { %3555 = dma.vmem_to_hbm [thread:$0]  (%p5286_p10), %s5150_s0, 1024, %s5147_s27, %s2943_s1, %s4442_s10, %s4443_s24, %s4444_s22  }
 0x33a PF: > { %s5287_s26 = sld [smem:[#allocation14_spill]]  ;;  %p3572_p0 = scmp.ge.s32.totalorder %s4429_s25, 2 }
 0x33b   : > { %p5288_p2 = scmp.ne.s32.totalorder %s5274_s4, 0 }
 0x33d   : > { %p3568_p1 = pnand %p3572_p0, %p5288_p2 }
 0x340   : > { %s2974_s3 = sand.u32 1, %s5287_s26  }
 0x341   : > { %s2975_s21 = scalar_lea.sflag [#allocation5], %s2974_s3 }
 0x342   : > { %4372 = dma.done.wait (!%p3568_p1), %s2975_s21, 1024  }
 0x343   : > { %4374 = vsyncadd (!%p3568_p1), %s2975_s21, 4294966272  ;;  %s22_s25 = sadd.s32 1, %s4429_s25   ;;  %s5290_s22 = sld [smem:[#allocation18_spill]] }
 0x344   : > { %p5181_p11 = scmp.ge.s32.totalorder %s22_s25, 6   ;;  %s5291_s2 = sld [smem:[#allocation19_spill]] }
 0x345   : > { %s5292_s24 = sld [smem:[#allocation20_spill]]  ;;  %s5293_s12 = smov %s4381_s13 }
 0x346   : > { %s5294_s13 = smov %s4385_s14  ;;  %s5295_s14 = smov %s4706_s15 }
 0x347   : > { %s5296_s15 = smov %s4393_s16  ;;  %s5297_s16 = smov %s4397_s17 }
 0x348   : > { %s5298_s17 = smov %s4571_s11  ;;  %s5299_s18 = smov %s4405_s19 }
 0x349   : > { %s5300_s19 = smov %s4409_s20  ;;  %s5301_s20 = smov %s4632_s7 }
 0x34a   : > { %s5302_s21 = smov %s4421_s23  ;;  %s5303_s23 = smov %s5291_s2 }
 0x34b   :  { %21 = sbr.rel (!%p5181_p11) target bundleno = 17 (0x11), region = 111 }
 0x352   :  { %2980 = vsyncpa [#allocation4], 1 }
 0x353   :  { %2982 = vsyncpa [#allocation4 + $0x1], 1 }
 0x354   :  { %2983 = vsyncpa [#allocation7], 1 }
 0x355   :  { %2985 = vsyncpa [#allocation7 + $0x1], 1 }
 0x356   :  { %2986 = vsyncpa [#allocation5], 1 }
 0x357   :  { %2988 = vsyncpa [#allocation5 + $0x1], 1 }

// kernel: up_dense_1_softmax_forward.15
= control target key start
LH: loop header
LB: loop body
LE: loop exit
PB: predicated region body
PF: predicated region fallthrough
CT: control target
= control target key end

     0   :  { %9 = vsyncpa [#allocation3], 0  ;;  %s1023_s0 = inlined_call_operand.hbm [shape: f32[32,512], index: 0, kind: input, shape index: {}]   ;;  %s1024_s1 = inlined_call_operand.hbm [shape: f32[32,512], index: 1, kind: input, shape index: {}]   ;;  %s1025_s2 = inlined_call_operand.hbm [shape: f32[32,512], index: 2, kind: input, shape index: {}]   ;;  %s1026_s3 = inlined_call_operand.hbm [shape: f32[32,512], index: 3, kind: input, shape index: {}]   ;;  %s1027_s4 = inlined_call_operand.vmem [shape: f32[32,512], index: 4, kind: output, shape index: {}]  }
   0x1   :  { %10 = vsyncpa [#allocation5], 0 }
   0x2   :  { %11 = vsyncpa [#allocation8], 0  ;;  %s576_s15 = smov [#allocation4]   ;;  %s577_s17 = smov [#allocation2]  }
   0x3   :  { %s29_s16 = sshll.u32 %s576_s15, 4  ;;  %s17_s18 = sshll.u32 %s577_s17, 4  ;;  %s30_s16 = int_to_ptr.vmem [resolvable:$true] %s29_s16  ;;  %s607_s18 = int_to_ptr.vmem [resolvable:$true] %s17_s18 }
   0x4   :  { %s482_s21 = scalar_lea.hbm %s1024_s1, 2048 }
   0x5   :  { %p483_p0 = scmp.ne.s32.totalorder %s1024_s1, %s482_s21  ;;  %p486_p1 = scmp.lt.u32.totalorder %s482_s21, %s1024_s1 }
   0x7   :  { %p488_p2 = pnand %p486_p1, %p483_p0 }
   0x9   :  { %491 = shalt.err (!%p488_p2)
}
   0xa   :  { %s492_s26 = scalar_lea.vmem %s30_s16, 2048  ;;  %p497_p4 = scmp.lt.s32.totalorder %s30_s16, %s30_s16 }
   0xb   :  { %p493_p3 = scmp.ne.s32.totalorder %s30_s16, %s492_s26  ;;  %p498_p5 = scmp.lt.s32.totalorder %s492_s26, %s492_s26 }
   0xd   :  { %p499_p6 = por %p498_p5, %p497_p4 }
   0xf   :  { %p500_p7 = pnand %p499_p6, %p493_p3 }
  0x11   :  { %503 = shalt.err (!%p500_p7)
}
  0x12   :  { %s578_s27 = smov 512   ;;  %s579_s28 = smov 32  }
  0x13   :  { %35 = dma.hbm_to_vmem [thread:$0]  %s1024_s1, 2048, %s30_s16, [#allocation5], %s578_s27, %s578_s27, %s579_s28  }
  0x14   :  { %s504_s7 = scalar_lea.hbm %s1023_s0, 2048 }
  0x15   :  { %p505_p8 = scmp.ne.s32.totalorder %s1023_s0, %s504_s7  ;;  %p508_p9 = scmp.lt.u32.totalorder %s504_s7, %s1023_s0 }
  0x17   :  { %p510_p10 = pnand %p508_p9, %p505_p8 }
  0x19   :  { %513 = shalt.err (!%p510_p10)
}
  0x1a   :  { %s514_s12 = scalar_lea.vmem %s607_s18, 2048  ;;  %p519_p12 = scmp.lt.s32.totalorder %s607_s18, %s607_s18 }
  0x1b   :  { %p515_p11 = scmp.ne.s32.totalorder %s607_s18, %s514_s12  ;;  %p520_p13 = scmp.lt.s32.totalorder %s514_s12, %s514_s12 }
  0x1d   :  { %p521_p0 = por %p520_p13, %p519_p12 }
  0x1f   :  { %p522_p1 = pnand %p521_p0, %p515_p11 }
  0x21   :  { %525 = shalt.err (!%p522_p1)
}
  0x22   :  { %23 = dma.hbm_to_vmem [thread:$0]  %s1023_s0, 2048, %s607_s18, [#allocation3], %s578_s27, %s578_s27, %s579_s28  }
  0x23   :  { %s580_s14 = smov [#allocation6]   ;;  %s581_s16 = smov [#allocation7]  }
  0x24   :  { %s41_s15 = sshll.u32 %s580_s14, 4  ;;  %s53_s17 = sshll.u32 %s581_s16, 4  ;;  %s42_s15 = int_to_ptr.vmem [resolvable:$true] %s41_s15  ;;  %s644_s17 = int_to_ptr.vmem [resolvable:$true] %s53_s17 }
  0x25   :  { %s526_s21 = scalar_lea.hbm %s1025_s2, 2048 }
  0x26   :  { %p527_p2 = scmp.ne.s32.totalorder %s1025_s2, %s526_s21  ;;  %p530_p3 = scmp.lt.u32.totalorder %s526_s21, %s1025_s2 }
  0x28   :  { %p532_p4 = pnand %p530_p3, %p527_p2 }
  0x2a   :  { %535 = shalt.err (!%p532_p4)
}
  0x2b   :  { %s536_s0 = scalar_lea.vmem %s42_s15, 2048  ;;  %p541_p6 = scmp.lt.s32.totalorder %s42_s15, %s42_s15 }
  0x2c   :  { %p537_p5 = scmp.ne.s32.totalorder %s42_s15, %s536_s0  ;;  %p542_p7 = scmp.lt.s32.totalorder %s536_s0, %s536_s0 }
  0x2e   :  { %p543_p8 = por %p542_p7, %p541_p6 }
  0x30   :  { %p544_p9 = pnand %p543_p8, %p537_p5 }
  0x32   :  { %547 = shalt.err (!%p544_p9)
}
  0x33   :  { %47 = dma.hbm_to_vmem [thread:$0]  %s1025_s2, 2048, %s42_s15, [#allocation5], %s578_s27, %s578_s27, %s579_s28  }
  0x34   :  { %s548_s5 = scalar_lea.hbm %s1026_s3, 2048 }
  0x35   :  { %p549_p10 = scmp.ne.s32.totalorder %s1026_s3, %s548_s5  ;;  %p552_p11 = scmp.lt.u32.totalorder %s548_s5, %s1026_s3 }
  0x37   :  { %p554_p12 = pnand %p552_p11, %p549_p10 }
  0x39   :  { %557 = shalt.err (!%p554_p12)
}
  0x3a   :  { %s558_s10 = scalar_lea.vmem %s644_s17, 2048  ;;  %p563_p0 = scmp.lt.s32.totalorder %s644_s17, %s644_s17 }
  0x3b   :  { %p559_p13 = scmp.ne.s32.totalorder %s644_s17, %s558_s10  ;;  %p564_p1 = scmp.lt.s32.totalorder %s558_s10, %s558_s10 }
  0x3d   :  { %p565_p2 = por %p564_p1, %p563_p0 }
  0x3f   :  { %p566_p3 = pnand %p565_p2, %p559_p13 }
  0x41   :  { %569 = shalt.err (!%p566_p3)
}
  0x42   :  { %59 = dma.hbm_to_vmem [thread:$0]  %s1026_s3, 2048, %s644_s17, [#allocation8], %s578_s27, %s578_s27, %s579_s28  }
  0x43   :  { %570 = dma.done.wait [#allocation3], 2048  }
  0x44   :  { %571 = vsyncadd [#allocation3], 4294965248 }
  0x45   :  { %572 = dma.done.wait [#allocation5], 4096  }
  0x46   :  { %573 = vsyncadd [#allocation5], 4294963200 }
  0x47   :  { %574 = dma.done.wait [#allocation8], 2048  }
  0x48   :  { %575 = vsyncadd [#allocation8], 4294965248  ;;  %v681_v0 = vld [vmem:[#allocation2 + $0x40] sm:$0xff]  ;;  %v683_v1 = vld [vmem:[#allocation2 + $0x48] sm:$0xff] }
  0x49   :  { %v685_v2 = vld [vmem:[#allocation2 + $0x50] sm:$0xff]  ;;  %v146_v3 = vadd.f32 %v683_v1, %v681_v0  ;;  %v689_v4 = vld [vmem:[#allocation2] sm:$0xff]  ;;  %v691_v5 = vld [vmem:[#allocation2 + $0x8] sm:$0xff] }
  0x4a   :  { %v693_v6 = vld [vmem:[#allocation2 + $0x58] sm:$0xff]  ;;  %v695_v7 = vld [vmem:[#allocation2 + $0x10] sm:$0xff]  ;;  %v136_v8 = vadd.f32 %v691_v5, %v689_v4  ;;  %v699_v9 = vld [vmem:[#allocation2 + $0x60] sm:$0xff] }
  0x4b   :  { %v147_v10 = vadd.f32 %v146_v3, %v685_v2  ;;  %v702_v11 = vld [vmem:[#allocation2 + $0x18] sm:$0xff]  ;;  %v704_v12 = vld [vmem:[#allocation2 + $0x68] sm:$0xff]  ;;  %v706_v13 = vld [vmem:[#allocation2 + $0x70] sm:$0xff] }
  0x4c   :  { %v137_v14 = vadd.f32 %v136_v8, %v695_v7  ;;  %v151_v15 = vadd.f32 %v704_v12, %v699_v9  ;;  %v711_v16 = vld [vmem:[#allocation2 + $0x20] sm:$0xff]  ;;  %v713_v17 = vld [vmem:[#allocation2 + $0x28] sm:$0xff]  ;;  %v715_v18 = vld [vmem:[#allocation2 + $0x30] sm:$0xff] }
  0x4d   :  { %v148_v19 = vadd.f32 %v147_v10, %v693_v6  ;;  %v718_v20 = vld [vmem:[#allocation2 + $0x78] sm:$0xff]  ;;  %v141_v21 = vadd.f32 %v713_v17, %v711_v16  ;;  %v722_v22 = vld [vmem:[#allocation4 + $0x20] sm:$0xff]  ;;  %v724_v23 = vld [vmem:[#allocation4 + $0x28] sm:$0xff] }
  0x4e   :  { %v138_v24 = vadd.f32 %v137_v14, %v702_v11  ;;  %v152_v25 = vadd.f32 %v151_v15, %v706_v13  ;;  %v728_v26 = vld [vmem:[#allocation2 + $0x38] sm:$0xff]  ;;  %v730_v27 = vld [vmem:[#allocation4 + $0x30] sm:$0xff]  ;;  %v174_v28 = vadd.f32 %v724_v23, %v722_v22  ;;  %v734_v29 = vld [vmem:[#allocation4] sm:$0xff] }
  0x4f   :  { %149 = vadd.xlane.f32.xlu1 %v148_v19  ;;  %v142_v30 = vadd.f32 %v141_v21, %v715_v18  ;;  %v737_v31 = vld [vmem:[#allocation4 + $0x38] sm:$0xff]  ;;  %v739_v32 = vld [vmem:[#allocation4 + $0x8] sm:$0xff]  ;;  %v741_v33 = vld [vmem:[#allocation4 + $0x10] sm:$0xff] }
  0x50   :  { %139 = vadd.xlane.f32.xlu0 %v138_v24  ;;  %v153_v34 = vadd.f32 %v152_v25, %v718_v20  ;;  %v175_v35 = vadd.f32 %v174_v28, %v730_v27  ;;  %v169_v36 = vadd.f32 %v739_v32, %v734_v29  ;;  %v747_v37 = vld [vmem:[#allocation4 + $0x60] sm:$0xff]  ;;  %v749_v38 = vld [vmem:[#allocation4 + $0x68] sm:$0xff]  ;;  %v751_v39 = vld [vmem:[#allocation4 + $0x70] sm:$0xff] }
  0x51   :  { %v143_v40 = vadd.f32 %v142_v30, %v728_v26  ;;  %v754_v41 = vld [vmem:[#allocation4 + $0x18] sm:$0xff]  ;;  %v184_v42 = vadd.f32 %v749_v38, %v747_v37  ;;  %v758_v43 = vld [vmem:[#allocation4 + $0x40] sm:$0xff]  ;;  %v760_v44 = vld [vmem:[#allocation4 + $0x48] sm:$0xff] }
  0x52   :  { %v170_v45 = vadd.f32 %v169_v36, %v741_v33  ;;  %v763_v46 = vld [vmem:[#allocation4 + $0x50] sm:$0xff]  ;;  %v179_v47 = vadd.f32 %v760_v44, %v758_v43  ;;  %v767_v48 = vld [vmem:[#allocation6 + $0x20] sm:$0xff]  ;;  %v176_v49 = vadd.f32 %v175_v35, %v737_v31  ;;  %v770_v50 = vld [vmem:[#allocation4 + $0x78] sm:$0xff] }
  0x53   :  { %154 = vadd.xlane.f32.xlu1 %v153_v34  ;;  %v185_v51 = vadd.f32 %v184_v42, %v751_v39  ;;  %v773_v52 = vld [vmem:[#allocation4 + $0x58] sm:$0xff]  ;;  %v775_v53 = vld [vmem:[#allocation6 + $0x28] sm:$0xff]  ;;  %v779_v56 = vld [vmem:[#allocation6 + $0x30] sm:$0xff] }
  0x54   :  { %144 = vadd.xlane.f32.xlu0 %v143_v40  ;;  %v171_v54 = vadd.f32 %v170_v45, %v754_v41  ;;  %v180_v55 = vadd.f32 %v179_v47, %v763_v46  ;;  %v206_v57 = vadd.f32 %v775_v53, %v767_v48  ;;  %v783_v58 = vld [vmem:[#allocation6] sm:$0xff]  ;;  %v785_v59 = vld [vmem:[#allocation6 + $0x8] sm:$0xff]  ;;  %v787_v60 = vld [vmem:[#allocation6 + $0x10] sm:$0xff] }
  0x55   :  { %v201_v61 = vadd.f32 %v785_v59, %v783_v58  ;;  %v791_v62 = vld [vmem:[#allocation6 + $0x60] sm:$0xff]  ;;  %v793_v63 = vld [vmem:[#allocation6 + $0x68] sm:$0xff]  ;;  %v186_v8 = vadd.f32 %v185_v51, %v770_v50  ;;  %v798_v10 = vld [vmem:[#allocation6 + $0x38] sm:$0xff] }
  0x56   :  { %1053 = vst [vmem:[#allocation12_spill] sm:$0xff] %v791_v62  ;;  %1054 = vst [vmem:[#allocation13_spill] sm:$0xff] %v793_v63  ;;  %v795_v3 = vld [vmem:[#allocation6 + $0x40] sm:$0xff]  ;;  %v207_v14 = vadd.f32 %v206_v57, %v779_v56  ;;  %v801_v15 = vld [vmem:[#allocation6 + $0x18] sm:$0xff]  ;;  %v216_v19 = vadd.f32 %v793_v63, %v791_v62  ;;  %v181_v24 = vadd.f32 %v180_v55, %v773_v52 }
  0x57   :  { %1055 = vst [vmem:[#allocation14_spill] sm:$0xff] %v795_v3  ;;  %177 = vadd.xlane.f32.xlu1 %v176_v49  ;;  %1056 = vst [vmem:[#allocation15_spill] sm:$0xff] %v801_v15  ;;  %v805_v21 = vld [vmem:[#allocation6 + $0x48] sm:$0xff]  ;;  %v202_v25 = vadd.f32 %v201_v61, %v787_v60  ;;  %v809_v28 = vld [vmem:[#allocation6 + $0x70] sm:$0xff] }
  0x58   :  { %1057 = vst [vmem:[#allocation16_spill] sm:$0xff] %v805_v21  ;;  %172 = vadd.xlane.f32.xlu0 %v171_v54  ;;  %1058 = vst [vmem:[#allocation17_spill] sm:$0xff] %v809_v28  ;;  %v211_v30 = vadd.f32 %v805_v21, %v795_v3  ;;  %v813_v34 = vld [vmem:[#allocation7 + $0x20] sm:$0xff]  ;;  %v815_v35 = vld [vmem:[#allocation7 + $0x28] sm:$0xff]  ;;  %v208_v45 = vadd.f32 %v207_v14, %v798_v10  ;;  %v217_v49 = vadd.f32 %v216_v19, %v809_v28 }
  0x59   :  { %1059 = vst [vmem:[#allocation18_spill] sm:$0xff] %v813_v34  ;;  %1060 = vst [vmem:[#allocation19_spill] sm:$0xff] %v815_v35  ;;  %v817_v36 = vld [vmem:[#allocation6 + $0x50] sm:$0xff]  ;;  %v819_v40 = vld [vmem:[#allocation7] sm:$0xff]  ;;  %v238_v54 = vadd.f32 %v815_v35, %v813_v34  ;;  %v203_v55 = vadd.f32 %v202_v25, %v801_v15 }
  0x5a   :  { %1061 = vst [vmem:[#allocation20_spill] sm:$0xff] %v817_v36  ;;  %1062 = vst [vmem:[#allocation21_spill] sm:$0xff] %v819_v40  ;;  %v821_v42 = vld [vmem:[#allocation7 + $0x8] sm:$0xff]  ;;  %v824_v47 = vld [vmem:[#allocation6 + $0x78] sm:$0xff]  ;;  %v212_v57 = vadd.f32 %v211_v30, %v817_v36 }
  0x5b   :  { %1063 = vst [vmem:[#allocation22_spill] sm:$0xff] %v821_v42  ;;  %187 = vadd.xlane.f32.xlu1 %v186_v8  ;;  %1064 = vst [vmem:[#allocation23_spill] sm:$0xff] %v824_v47  ;;  %v827_v51 = vld [vmem:[#allocation6 + $0x58] sm:$0xff]  ;;  %v833_v61 = vld [vmem:[#allocation7 + $0x30] sm:$0xff]  ;;  %v233_v8 = vadd.f32 %v821_v42, %v819_v40 }
  0x5c   :  { %1065 = vst [vmem:[#allocation24_spill] sm:$0xff] %v827_v51  ;;  %182 = vadd.xlane.f32.xlu0 %v181_v24  ;;  %1066 = vst [vmem:[#allocation25_spill] sm:$0xff] %v833_v61  ;;  %v837_v14 = vld [vmem:[#allocation7 + $0x60] sm:$0xff]  ;;  %v839_v21 = vld [vmem:[#allocation7 + $0x68] sm:$0xff]  ;;  %v218_v24 = vadd.f32 %v217_v49, %v824_v47  ;;  %v239_v25 = vadd.f32 %v238_v54, %v833_v61  ;;  %v213_v42 = vadd.f32 %v212_v57, %v827_v51 }
  0x5d   :  { %1067 = vst [vmem:[#allocation26_spill] sm:$0xff] %v837_v14  ;;  %1068 = vst [vmem:[#allocation27_spill] sm:$0xff] %v839_v21  ;;  %v841_v19 = vld [vmem:[#allocation7 + $0x10] sm:$0xff]  ;;  %v843_v3 = vld [vmem:[#allocation7 + $0x40] sm:$0xff]  ;;  %v248_v30 = vadd.f32 %v839_v21, %v837_v14 }
  0x5e   :  { %1069 = vst [vmem:[#allocation28_spill] sm:$0xff] %v841_v19  ;;  %1070 = vst [vmem:[#allocation29_spill] sm:$0xff] %v843_v3  ;;  %v845_v28 = vld [vmem:[#allocation7 + $0x48] sm:$0xff]  ;;  %v852_v40 = vld [vmem:[#allocation7 + $0x38] sm:$0xff]  ;;  %v234_v36 = vadd.f32 %v233_v8, %v841_v19 }
  0x5f   :  { %1071 = vst [vmem:[#allocation30_spill] sm:$0xff] %v845_v28  ;;  %209 = vadd.xlane.f32.xlu1 %v208_v45  ;;  %1072 = vst [vmem:[#allocation31_spill] sm:$0xff] %v852_v40  ;;  %v855_v35 = vld [vmem:[#allocation7 + $0x70] sm:$0xff]  ;;  %v243_v34 = vadd.f32 %v845_v28, %v843_v3  ;;  %v859_v45 = vld [vmem:[#allocation7 + $0x18] sm:$0xff]  ;;  %v240_v54 = vadd.f32 %v239_v25, %v852_v40 }
  0x60   :  { %204 = vadd.xlane.f32.xlu0 %v203_v55  ;;  %1073 = vst [vmem:[#allocation32_spill] sm:$0xff] %v855_v35  ;;  %1074 = vst [vmem:[#allocation33_spill] sm:$0xff] %v859_v45  ;;  %v861_v49 = vld [vmem:[#allocation7 + $0x50] sm:$0xff]  ;;  %v249_v55 = vadd.f32 %v248_v30, %v855_v35  ;;  %v235_v57 = vadd.f32 %v234_v36, %v859_v45  ;;  %v866_v21 = vld [vmem:[#allocation7 + $0x78] sm:$0xff] }
  0x61   :  { %1075 = vst [vmem:[#allocation34_spill] sm:$0xff] %v861_v49  ;;  %1076 = vst [vmem:[#allocation35_spill] sm:$0xff] %v866_v21  ;;  %v244_v8 = vadd.f32 %v243_v34, %v861_v49  ;;  %v869_v14 = vld [vmem:[#allocation7 + $0x58] sm:$0xff] }
  0x62   :  { %1077 = vst [vmem:[#allocation36_spill] sm:$0xff] %v869_v14  ;;  %v250_v28 = vadd.f32 %v249_v55, %v866_v21 }
  0x63   :  { %219 = vadd.xlane.f32.xlu1 %v218_v24  ;;  %v245_v3 = vadd.f32 %v244_v8, %v869_v14 }
  0x64   :  { %214 = vadd.xlane.f32.xlu0 %v213_v42 }
  0x67   :  { %241 = vadd.xlane.f32.xlu1 %v240_v54 }
  0x68   :  { %236 = vadd.xlane.f32.xlu0 %v235_v57 }
  0x6b   :  { %251 = vadd.xlane.f32.xlu1 %v250_v28 }
  0x6c   :  { %246 = vadd.xlane.f32.xlu0 %v245_v3 }
  0xdc   :  { %v150_v24 = vpop.xlane.xlu1 %149 }
  0xdd   :  { %v140_v25 = vpop.xlane.xlu0 %139  ;;  %v159_v35 = vmul.f32 0.001953125, %v150_v24 }
  0xde   :  { %v157_v45 = vmul.f32 0.001953125, %v140_v25 }
  0xdf   :  { %v165_v34 = vmul.f32 1.442695, %v159_v35 }
  0xe0   :  { %v155_v30 = vpop.xlane.xlu1 %154  ;;  %v161_v54 = vmul.f32 1.442695, %v157_v45 }
  0xe1   :  { %v145_v42 = vpop.xlane.xlu0 %144  ;;  %v160_v51 = vmul.f32 0.001953125, %v155_v30  ;;  %442 = vpow2.f32 %v165_v34 }
  0xe2   :  { %v158_v49 = vmul.f32 0.001953125, %v145_v42  ;;  %444 = vpow2.f32 %v161_v54 }
  0xe3   :  { %v167_v57 = vmul.f32 1.442695, %v160_v51 }
  0xe4   :  { %v178_v36 = vpop.xlane.xlu1 %177  ;;  %v163_v8 = vmul.f32 1.442695, %v158_v49 }
  0xe5   :  { %v173_v19 = vpop.xlane.xlu0 %172  ;;  %v190_v61 = vmul.f32 0.001953125, %v178_v36  ;;  %446 = vpow2.f32 %v167_v57 }
  0xe6   :  { %v189_v14 = vmul.f32 0.001953125, %v173_v19  ;;  %448 = vpow2.f32 %v163_v8 }
  0xe7   :  { %v195_v3 = vmul.f32 1.442695, %v190_v61 }
  0xe8   :  { %v188_v40 = vpop.xlane.xlu1 %187  ;;  %v193_v30 = vmul.f32 1.442695, %v189_v14 }
  0xe9   :  { %v183_v55 = vpop.xlane.xlu0 %182  ;;  %v192_v24 = vmul.f32 0.001953125, %v188_v40  ;;  %450 = vpow2.f32 %v195_v3 }
  0xea   :  { %v191_v35 = vmul.f32 0.001953125, %v183_v55  ;;  %452 = vpow2.f32 %v193_v30 }
  0xeb   :  { %v199_v47 = vmul.f32 1.442695, %v192_v24  ;;  %v873_v36 = vpop.eup %442 }
  0xec   :  { %v210_v28 = vpop.xlane.xlu1 %209  ;;  %v197_v51 = vmul.f32 1.442695, %v191_v35  ;;  %v445_v54 = vpop.eup %444  ;;  %v879_v40 = vmul.f32 %v873_v36, %v681_v0  ;;  %v883_v57 = vmul.f32 %v873_v36, %v683_v1  ;;  %v887_v8 = vmul.f32 %v873_v36, %v685_v2 }
  0xed   :  { %v205_v21 = vpop.xlane.xlu0 %204  ;;  %v222_v45 = vmul.f32 0.001953125, %v210_v28  ;;  %454 = vpow2.f32 %v199_v47  ;;  %v891_v47 = vmul.f32 %v873_v36, %v693_v6  ;;  %v285_v28 = vmul.f32 %v445_v54, %v689_v4 }
  0xee   :  { %v221_v61 = vmul.f32 0.001953125, %v205_v21  ;;  %456 = vpow2.f32 %v197_v51  ;;  %v286_v0 = vmul.f32 %v445_v54, %v691_v5  ;;  %v287_v3 = vmul.f32 %v445_v54, %v695_v7 }
  0xef   :  { %v875_v19 = vpop.eup %446  ;;  %v227_v14 = vmul.f32 1.442695, %v222_v45  ;;  %v288_v1 = vmul.f32 %v445_v54, %v702_v11 }
  0xf0   :  { %v220_v25 = vpop.xlane.xlu1 %219  ;;  %v449_v21 = vpop.eup %448  ;;  %v297_v2 = vmul.f32 %v875_v19, %v699_v9  ;;  %v225_v30 = vmul.f32 1.442695, %v221_v61  ;;  %v298_v6 = vmul.f32 %v875_v19, %v704_v12  ;;  %v299_v5 = vmul.f32 %v875_v19, %v706_v13 }
  0xf1   :  { %v215_v42 = vpop.xlane.xlu0 %214  ;;  %v224_v55 = vmul.f32 0.001953125, %v220_v25  ;;  %458 = vpow2.f32 %v227_v14  ;;  %v300_v7 = vmul.f32 %v875_v19, %v718_v20  ;;  %v289_v11 = vmul.f32 %v449_v21, %v711_v16 }
  0xf2   :  { %v290_v13 = vmul.f32 %v449_v21, %v713_v17 }
  0xf3   :  { %v451_v25 = vpop.eup %450  ;;  %v231_v51 = vmul.f32 1.442695, %v224_v55 }
  0xf4   :  { %v242_v49 = vpop.xlane.xlu1 %241  ;;  %v305_v9 = vmul.f32 %v451_v25, %v722_v22  ;;  %v453_v62 = vpop.eup %452  ;;  %v306_v12 = vmul.f32 %v451_v25, %v724_v23  ;;  %v307_v14 = vmul.f32 %v451_v25, %v730_v27  ;;  %v308_v22 = vmul.f32 %v451_v25, %v737_v31 }
  0xf5   :  { %v237_v34 = vpop.xlane.xlu0 %236  ;;  %v254_v24 = vmul.f32 0.001953125, %v242_v49  ;;  %v223_v49 = vmul.f32 0.001953125, %v215_v42  ;;  %v292_v42 = vmul.f32 %v449_v21, %v728_v26  ;;  %v301_v23 = vmul.f32 %v453_v62, %v734_v29 }
  0xf6   :  { %v253_v35 = vmul.f32 0.001953125, %v237_v34  ;;  %v302_v27 = vmul.f32 %v453_v62, %v739_v32  ;;  %v322_v17 = vadd.f32 %v306_v12, %v290_v13 }
  0xf7   :  { %v259_v4 = vmul.f32 1.442695, %v254_v24  ;;  %v291_v24 = vmul.f32 %v449_v21, %v715_v18  ;;  %v455_v16 = vpop.eup %454  ;;  %v324_v31 = vadd.f32 %v308_v22, %v292_v42  ;;  %v317_v32 = vadd.f32 %v301_v23, %v285_v28 }
  0xf8   :  { %v252_v45 = vpop.xlane.xlu1 %251  ;;  %v257_v34 = vmul.f32 1.442695, %v253_v35  ;;  %v229_v35 = vmul.f32 1.442695, %v223_v49  ;;  %v313_v26 = vmul.f32 %v455_v16, %v747_v37 }
  0xf9   :  { %v247_v63 = vpop.xlane.xlu0 %246  ;;  %460 = vpow2.f32 %v259_v4  ;;  %v256_v61 = vmul.f32 0.001953125, %v252_v45  ;;  %v266_v45 = vadd.f32 %v451_v25, %v449_v21  ;;  %v265_v4 = vadd.f32 %v453_v62, %v445_v54 }
  0xfa   :  { %462 = vpow2.f32 %v225_v30  ;;  %v255_v55 = vmul.f32 0.001953125, %v247_v63  ;;  %v457_v63 = vpop.eup %456  ;;  %v321_v30 = vadd.f32 %v305_v9, %v289_v11  ;;  %v323_v15 = vadd.f32 %v307_v14, %v291_v24 }
  0xfb   :  { %464 = vpow2.f32 %v231_v51  ;;  %v263_v20 = vmul.f32 1.442695, %v256_v61  ;;  %v303_v51 = vmul.f32 %v453_v62, %v741_v33  ;;  %v304_v61 = vmul.f32 %v453_v62, %v754_v41  ;;  %v459_v29 = vpop.eup %458 }
  0xfc   :  { %466 = vpow2.f32 %v257_v34  ;;  %v261_v18 = vmul.f32 1.442695, %v255_v55  ;;  %v314_v21 = vmul.f32 %v455_v16, %v749_v38  ;;  %v315_v54 = vmul.f32 %v455_v16, %v751_v39 }
  0xfd   :  { %468 = vpow2.f32 %v263_v20  ;;  %v318_v25 = vadd.f32 %v302_v27, %v286_v0  ;;  %v316_v11 = vmul.f32 %v455_v16, %v770_v50  ;;  %v309_v49 = vmul.f32 %v457_v63, %v758_v43  ;;  %v1078_v20 = vld [vmem:[#allocation15_spill] sm:$0xff] }
  0xfe   :  { %470 = vpow2.f32 %v229_v35  ;;  %v310_v33 = vmul.f32 %v457_v63, %v760_v44  ;;  %v311_v41 = vmul.f32 %v457_v63, %v763_v46  ;;  %v312_v37 = vmul.f32 %v457_v63, %v773_v52  ;;  %v1079_v35 = vld [vmem:[#allocation12_spill] sm:$0xff] }
  0xff   :  { %472 = vpow2.f32 %v261_v18  ;;  %v319_v9 = vadd.f32 %v303_v51, %v287_v3  ;;  %v320_v38 = vadd.f32 %v304_v61, %v288_v1  ;;  %v268_v39 = vadd.f32 %v455_v16, %v875_v19 }
 0x100   :  { %v329_v34 = vadd.f32 %v313_v26, %v297_v2  ;;  %v330_v28 = vadd.f32 %v314_v21, %v298_v6  ;;  %v331_v0 = vadd.f32 %v315_v54, %v299_v5  ;;  %v270_v14 = vadd.f32 %v459_v29, %v266_v45  ;;  %v1080_v45 = vld [vmem:[#allocation13_spill] sm:$0xff]  ;;  %v1083_v54 = vld [vmem:[#allocation18_spill] sm:$0xff] }
 0x101   :  { %v337_v50 = vmul.f32 %v459_v29, %v767_v48  ;;  %v332_v55 = vadd.f32 %v316_v11, %v300_v7  ;;  %v267_v44 = vadd.f32 %v457_v63, %v873_v36  ;;  %v929_v46 = vadd.f32 %v309_v49, %v879_v40 }
 0x102   :  { %v338_v52 = vmul.f32 %v459_v29, %v775_v53  ;;  %v933_v1 = vadd.f32 %v310_v33, %v883_v57  ;;  %v936_v19 = vadd.f32 %v311_v41, %v887_v8  ;;  %v939_v2 = vadd.f32 %v312_v37, %v891_v47  ;;  %v1084_v37 = vld [vmem:[#allocation19_spill] sm:$0xff] }
 0x103   :  { %v461_v62 = vpop.eup %460  ;;  %v339_v6 = vmul.f32 %v459_v29, %v779_v56  ;;  %v340_v36 = vmul.f32 %v459_v29, %v798_v10  ;;  %v353_v7 = vadd.f32 %v337_v50, %v321_v30 }
 0x104   :  { %v463_v12 = vpop.eup %462  ;;  %v274_v48 = vadd.f32 %v461_v62, %v270_v14  ;;  %v354_v8 = vadd.f32 %v338_v52, %v322_v17  ;;  %v1082_v17 = vld [vmem:[#allocation23_spill] sm:$0xff]  ;;  %v369_v29 = vmul.f32 %v461_v62, %v1083_v54  ;;  %v1087_v14 = vld [vmem:[#allocation14_spill] sm:$0xff]  ;;  %v1102_v54 = vld [vmem:[#allocation36_spill] sm:$0xff] }
 0x105   :  { %v465_v43 = vpop.eup %464  ;;  %v269_v5 = vadd.f32 %v463_v12, %v265_v4  ;;  %v333_v40 = vmul.f32 %v463_v12, %v783_v58  ;;  %v334_v53 = vmul.f32 %v463_v12, %v785_v59  ;;  %v335_v57 = vmul.f32 %v463_v12, %v787_v60  ;;  %v1081_v4 = vld [vmem:[#allocation17_spill] sm:$0xff] }
 0x106   :  { %v467_v3 = vpop.eup %466  ;;  %v278_v13 = vadd.f32 1e-05, %v274_v48  ;;  %v336_v16 = vmul.f32 %v463_v12, %v1078_v20  ;;  %v272_v47 = vadd.f32 %v465_v43, %v268_v39  ;;  %v345_v56 = vmul.f32 %v465_v43, %v1079_v35  ;;  %v1086_v39 = vld [vmem:[#allocation31_spill] sm:$0xff]  ;;  %v1090_v48 = vld [vmem:[#allocation24_spill] sm:$0xff] }
 0x107   :  { %v469_v24 = vpop.eup %468  ;;  %v273_v42 = vadd.f32 %v467_v3, %v269_v5  ;;  %v346_v10 = vmul.f32 %v465_v43, %v1080_v45  ;;  %v347_v23 = vmul.f32 %v465_v43, %v1081_v4  ;;  %v355_v58 = vadd.f32 %v339_v6, %v323_v15  ;;  %v1091_v6 = vld [vmem:[#allocation21_spill] sm:$0xff]  ;;  %v1092_v5 = vld [vmem:[#allocation22_spill] sm:$0xff] }
 0x108   :  { %v471_v22 = vpop.eup %470  ;;  %474 = vrcp.f32 %v278_v13  ;;  %v356_v27 = vadd.f32 %v340_v36, %v324_v31  ;;  %v349_v59 = vadd.f32 %v333_v40, %v317_v32  ;;  %v350_v30 = vadd.f32 %v334_v53, %v318_v25  ;;  %v1085_v31 = vld [vmem:[#allocation25_spill] sm:$0xff]  ;;  %v1093_v53 = vld [vmem:[#allocation28_spill] sm:$0xff] }
 0x109   :  { %v277_v63 = vadd.f32 1e-05, %v273_v42  ;;  %v473_v60 = vpop.eup %472  ;;  %v351_v18 = vadd.f32 %v335_v57, %v319_v9  ;;  %v348_v51 = vmul.f32 %v465_v43, %v1082_v17  ;;  %v276_v61 = vadd.f32 %v469_v24, %v272_v47  ;;  %v1088_v43 = vld [vmem:[#allocation16_spill] sm:$0xff]  ;;  %v1095_v42 = vld [vmem:[#allocation26_spill] sm:$0xff] }
 0x10a   :  { %v352_v26 = vadd.f32 %v336_v16, %v320_v38  ;;  %v271_v21 = vadd.f32 %v471_v22, %v267_v44  ;;  %v361_v11 = vadd.f32 %v345_v56, %v329_v34  ;;  %v362_v49 = vadd.f32 %v346_v10, %v330_v28  ;;  %v1089_v44 = vld [vmem:[#allocation20_spill] sm:$0xff]  ;;  %v1096_v56 = vld [vmem:[#allocation27_spill] sm:$0xff] }
 0x10b   :  { %476 = vrcp.f32 %v277_v63  ;;  %v363_v33 = vadd.f32 %v347_v23, %v331_v0  ;;  %v280_v41 = vadd.f32 1e-05, %v276_v61  ;;  %v370_v15 = vmul.f32 %v461_v62, %v1084_v37  ;;  %v1098_v10 = vld [vmem:[#allocation35_spill] sm:$0xff] }
 0x10c   :  { %v371_v32 = vmul.f32 %v461_v62, %v1085_v31  ;;  %v372_v12 = vmul.f32 %v461_v62, %v1086_v39  ;;  %v275_v25 = vadd.f32 %v473_v60, %v271_v21  ;;  %v364_v9 = vadd.f32 %v348_v51, %v332_v55  ;;  %v1094_v62 = vld [vmem:[#allocation33_spill] sm:$0xff] }
 0x10d   :  { %v341_v50 = vmul.f32 %v471_v22, %v1087_v14  ;;  %v342_v38 = vmul.f32 %v471_v22, %v1088_v43  ;;  %478 = vrcp.f32 %v280_v41  ;;  %v343_v52 = vmul.f32 %v471_v22, %v1089_v44 }
 0x10e   :  { %v344_v34 = vmul.f32 %v471_v22, %v1090_v48  ;;  %v385_v28 = vadd.f32 %v369_v29, %v353_v7  ;;  %v279_v0 = vadd.f32 1e-05, %v275_v25  ;;  %v365_v36 = vmul.f32 %v467_v3, %v1091_v6  ;;  %v1097_v22 = vld [vmem:[#allocation32_spill] sm:$0xff] }
 0x10f   :  { %v366_v40 = vmul.f32 %v467_v3, %v1092_v5  ;;  %v367_v57 = vmul.f32 %v467_v3, %v1093_v53  ;;  %v368_v13 = vmul.f32 %v467_v3, %v1094_v62  ;;  %v386_v55 = vadd.f32 %v370_v15, %v354_v8 }
 0x110   :  { %v387_v20 = vadd.f32 %v371_v32, %v355_v58  ;;  %v388_v16 = vadd.f32 %v372_v12, %v356_v27  ;;  %480 = vrcp.f32 %v279_v0  ;;  %v377_v35 = vmul.f32 %v469_v24, %v1095_v42 }
 0x111   :  { %v378_v45 = vmul.f32 %v469_v24, %v1096_v56  ;;  %v379_v7 = vmul.f32 %v469_v24, %v1097_v22  ;;  %v380_v4 = vmul.f32 %v469_v24, %v1098_v10  ;;  %v381_v61 = vadd.f32 %v365_v36, %v349_v59  ;;  %v1099_v24 = vld [vmem:[#allocation29_spill] sm:$0xff]  ;;  %v1100_v59 = vld [vmem:[#allocation30_spill] sm:$0xff] }
 0x112   :  { %v475_v47 = vpop.eup %474  ;;  %v382_v21 = vadd.f32 %v366_v40, %v350_v30  ;;  %v383_v3 = vadd.f32 %v367_v57, %v351_v18  ;;  %v384_v8 = vadd.f32 %v368_v13, %v352_v26  ;;  %v373_v27 = vmul.f32 %v473_v60, %v1099_v24  ;;  %v1101_v18 = vld [vmem:[#allocation34_spill] sm:$0xff] }
 0x113   :  { %v401_v23 = vmul.f32 %v475_v47, %v385_v28  ;;  %v402_v63 = vmul.f32 %v475_v47, %v386_v55  ;;  %v403_v17 = vmul.f32 %v475_v47, %v387_v20  ;;  %v404_v51 = vmul.f32 %v475_v47, %v388_v16 }
 0x114   :  { %v374_v30 = vmul.f32 %v473_v60, %v1100_v59  ;;  %v375_v26 = vmul.f32 %v473_v60, %v1101_v18  ;;  %v376_v29 = vmul.f32 %v473_v60, %v1102_v54  ;;  %v393_v32 = vadd.f32 %v377_v35, %v361_v11 }
 0x115   :  { %v477_v58 = vpop.eup %476  ;;  %417 = vst [vmem:[%s1027_s4 + $0x20] sm:$0xff] %v401_v23  ;;  %418 = vst [vmem:[%s1027_s4 + $0x28] sm:$0xff] %v402_v63  ;;  %v394_v39 = vadd.f32 %v378_v45, %v362_v49  ;;  %v395_v12 = vadd.f32 %v379_v7, %v363_v33  ;;  %v396_v25 = vadd.f32 %v380_v4, %v364_v9 }
 0x116   :  { %419 = vst [vmem:[%s1027_s4 + $0x30] sm:$0xff] %v403_v17  ;;  %420 = vst [vmem:[%s1027_s4 + $0x38] sm:$0xff] %v404_v51  ;;  %v397_v41 = vmul.f32 %v477_v58, %v381_v61  ;;  %v398_v37 = vmul.f32 %v477_v58, %v382_v21  ;;  %v399_v15 = vmul.f32 %v477_v58, %v383_v3 }
 0x117   :  { %v400_v31 = vmul.f32 %v477_v58, %v384_v8  ;;  %v479_v14 = vpop.eup %478  ;;  %v357_v43 = vadd.f32 %v341_v50, %v929_v46  ;;  %v358_v44 = vadd.f32 %v342_v38, %v933_v1  ;;  %v359_v48 = vadd.f32 %v343_v52, %v936_v19 }
 0x118   :  { %v360_v28 = vadd.f32 %v344_v34, %v939_v2  ;;  %413 = vst [vmem:[%s1027_s4] sm:$0xff] %v397_v41  ;;  %414 = vst [vmem:[%s1027_s4 + $0x8] sm:$0xff] %v398_v37  ;;  %v409_v46 = vmul.f32 %v479_v14, %v393_v32  ;;  %v410_v1 = vmul.f32 %v479_v14, %v394_v39 }
 0x119   :  { %415 = vst [vmem:[%s1027_s4 + $0x10] sm:$0xff] %v399_v15  ;;  %416 = vst [vmem:[%s1027_s4 + $0x18] sm:$0xff] %v400_v31  ;;  %v411_v19 = vmul.f32 %v479_v14, %v395_v12  ;;  %v412_v2 = vmul.f32 %v479_v14, %v396_v25  ;;  %v389_v60 = vadd.f32 %v373_v27, %v357_v43 }
 0x11a   :  { %v390_v11 = vadd.f32 %v374_v30, %v358_v44  ;;  %v391_v49 = vadd.f32 %v375_v26, %v359_v48  ;;  %v392_v33 = vadd.f32 %v376_v29, %v360_v28  ;;  %v481_v9 = vpop.eup %480  ;;  %425 = vst [vmem:[%s1027_s4 + $0x60] sm:$0xff] %v409_v46  ;;  %426 = vst [vmem:[%s1027_s4 + $0x68] sm:$0xff] %v410_v1 }
 0x11b   :  { %427 = vst [vmem:[%s1027_s4 + $0x70] sm:$0xff] %v411_v19  ;;  %428 = vst [vmem:[%s1027_s4 + $0x78] sm:$0xff] %v412_v2  ;;  %v405_v50 = vmul.f32 %v481_v9, %v389_v60 }
 0x11c   :  { %v406_v38 = vmul.f32 %v481_v9, %v390_v11  ;;  %v407_v52 = vmul.f32 %v481_v9, %v391_v49  ;;  %v408_v34 = vmul.f32 %v481_v9, %v392_v33 }
 0x11d   :  { %421 = vst [vmem:[%s1027_s4 + $0x40] sm:$0xff] %v405_v50 }
 0x11e   :  { %422 = vst [vmem:[%s1027_s4 + $0x48] sm:$0xff] %v406_v38  ;;  %423 = vst [vmem:[%s1027_s4 + $0x50] sm:$0xff] %v407_v52 }
 0x11f   :  { %424 = vst [vmem:[%s1027_s4 + $0x58] sm:$0xff] %v408_v34 }
 0x120   :  { %433 = vsyncpa [#allocation3], 1 }
 0x121   :  { %434 = vsyncpa [#allocation5], 1 }
 0x122   :  { %435 = vsyncpa [#allocation8], 1 }

// kernel: up_dense_1_softmax_forward.16
= control target key start
LH: loop header
LB: loop body
LE: loop exit
PB: predicated region body
PF: predicated region fallthrough
CT: control target
= control target key end

     0   :  { %s5228_s0 = inlined_call_operand.hbm [shape: bf16[32,9216], index: 0, kind: input, shape index: {}]   ;;  %s5229_s1 = inlined_call_operand.hbm [shape: bf16[9216,512], index: 1, kind: input, shape index: {}]   ;;  %s5230_s2 = inlined_call_operand.hbm [shape: f32[8,512], index: 2, kind: input, shape index: {}]   ;;  %s5231_s3 = inlined_call_operand.hbm [shape: f32[32,512], index: 3, kind: output, shape index: {}]  }
   0x1   :  { %5244 = sst [smem:[#allocation21_spill]] %s5228_s0 }
   0x2   :  { %5245 = sst [smem:[#allocation22_spill]] %s5229_s1 }
   0x3   :  { %5246 = sst [smem:[#allocation23_spill]] %s5230_s2 }
   0x4   :  { %5247 = sst [smem:[#allocation24_spill]] %s5231_s3 }
   0x5   :  { %8 = vsyncpa [#allocation4], 0 }
   0x6   :  { %10 = vsyncpa [#allocation4 + $0x1], 0 }
   0x7   :  { %11 = vsyncpa [#allocation7], 0 }
   0x8   :  { %13 = vsyncpa [#allocation7 + $0x1], 0 }
   0x9   :  { %14 = vsyncpa [#allocation5], 0 }
   0xa   :  { %16 = vsyncpa [#allocation5 + $0x1], 0  ;;  %s4465_s12 = smov 0   ;;  %s4467_s13 = smov 0  }
   0xb   :  { %s4469_s14 = smov 0   ;;  %s4471_s15 = smov 0  }
   0xc   :  { %s4473_s16 = smov 0   ;;  %s4475_s17 = smov 0  }
   0xd   :  { %s4477_s18 = smov 0   ;;  %s4479_s19 = smov 0  }
   0xe   :  { %s4481_s20 = smov 0   ;;  %s4483_s21 = smov 0  }
   0xf   :  { %s4485_s22 = smov 0   ;;  %s4487_s23 = smov 0  }
  0x10   :  { %s4489_s24 = smov 0   ;;  %s4491_s25 = smov 0  }
  0x11 LB: > { %5248 = sst [smem:[#allocation14_spill]] %s4377_s12  ;;  %s34_s26 = sadd.s32 1, %s4421_s23  ;;  %s4429_s25 = sphi %s4491_s25, %s22_s25   ;;  %s4425_s24 = sphi %s4489_s24, %s5292_s24   ;;  %s4421_s23 = sphi %s4487_s23, %s5303_s23   ;;  %s4417_s22 = sphi %s4485_s22, %s5290_s22   ;;  %s4413_s21 = sphi %s4483_s21, %s5302_s21   ;;  %s4409_s20 = sphi %s4481_s20, %s5301_s20   ;;  %s4405_s19 = sphi %s4479_s19, %s5300_s19   ;;  %s4401_s18 = sphi %s4477_s18, %s5299_s18   ;;  %s4397_s17 = sphi %s4475_s17, %s5298_s17   ;;  %s4393_s16 = sphi %s4473_s16, %s5297_s16   ;;  %s4389_s15 = sphi %s4471_s15, %s5296_s15   ;;  %s4385_s14 = sphi %s4469_s14, %s5295_s14   ;;  %s4381_s13 = sphi %s4467_s13, %s5294_s13   ;;  %s4377_s12 = sphi %s4465_s12, %s5293_s12  }
  0x12   : > { %5249 = sst [smem:[#allocation15_spill]] %s4389_s15  ;;  %s37_s27 = sadd.s32 1, %s4425_s24 }
  0x13   : > { %5250 = sst [smem:[#allocation16_spill]] %s4413_s21  ;;  %p35_p0 = scmp.ge.s32.totalorder %s34_s26, 4 }
  0x14   : > { %5251 = sst [smem:[#allocation17_spill]] %s4417_s22  ;;  %p5237_p1 = scmp.eq.s32.totalorder %s4429_s25, 0 }
  0x15   : > { %5252 = sst [smem:[#allocation18_spill]] %s4425_s24  ;;  %s78_s28 = sadd.s32 1, %s4397_s17 }
  0x16   : > { %p85_p2 = scmp.ne.s32.totalorder %s4397_s17, %s4393_s16  ;;  %s5305_s26 = smov (%p35_p0, %s34_s26), 0 }
  0x17   : > { %5253 = sst [smem:[#allocation19_spill]] %s5305_s26  ;;  %s5307_s27 = smov (!%p35_p0, %s37_s27), %s4425_s24 }
  0x18   : > { %s4546_s29 = ssub.s32 %s4421_s23, %s5305_s26  ;;  %p4550_p3 = por %p85_p2, %p5237_p1 }
  0x19   : > { %p39_p4 = scmp.ge.s32.totalorder %s5307_s27, 2  ;;  %p5236_p7 = scmp.lt.s32.totalorder %s4429_s25, 8 }
  0x1a   : > { %s3445_s4 = smul.u32 1152, %s4421_s23  ;;  %s193_s6 = sand.u32 1, %s4429_s25  }
  0x1b   : > { %s5309_s27 = smov (%p39_p4, %s5307_s27), 0  ;;  %s195_s8 = sand.u32 1, %s4397_s17  }
  0x1c   : > { %5255 = sst [smem:[#allocation20_spill]] %s5309_s27  ;;  %s4563_s5 = ssub.s32 %s4425_s24, %s5309_s27 }
  0x1d   : > { %s75_s7 = sor.u32 %s4563_s5, %s4546_s29  ;;  %s3546_s9 = smul.u32 2304, %s195_s8 }
  0x1e   : > { %p76_p8 = scmp.eq.s32.totalorder %s75_s7, 0  ;;  %s3103_s10 = sshll.u32 %s4425_s24, 1 }
  0x1f   : > { %s204_s26 = sadd.s32 %s3445_s4, %s3103_s10  ;;  %s197_s22 = scalar_lea.vmem [#allocation6], %s3546_s9 }
  0x20   : > { %s4571_s11 = scalar_select %p76_p8, %s4397_s17, %s78_s28  }
  0x21   : > { %s3105_s3 = sshll.u32 %s204_s26, 6  ;;  %s207_s21 = sshll.u32 %s197_s22, 4  ;;  %s4580_s21 = int_to_ptr.vmem [resolvable:$true] %s207_s21 }
  0x22   : > { %s5256_s1 = sld [smem:[#allocation22_spill]]  ;;  %p4586_p9 = pnand %p5236_p7, %p4550_p3 }
  0x23   : > { %p3109_p10 = scmp.ge.s32.totalorder %s4429_s25, 1  ;;  %s4591_s22 = scalar_lea.sflag [#allocation7], %s193_s6 }
  0x24   : > { %p4187_p12 = pneg %p4586_p9 }
  0x28   : > { %s4578_s15 = scalar_lea.hbm %s5256_s1, %s3105_s3  ;;  %s4190_s26 = scalar_lea.hbm %s5256_s1, 294912 }
  0x29   : > { %s4185_s2 = scalar_lea.hbm %s4578_s15, 36864  ;;  %p4191_p2 = scmp.lt.u32.totalorder %s4578_s15, %s5256_s1 }
  0x2a   : > { %p4186_p11 = scmp.ne.s32.totalorder %s4578_s15, %s4185_s2  ;;  %p4192_p3 = scmp.lt.u32.totalorder %s4190_s26, %s4185_s2 }
  0x2b   : > { %p4194_p8 = scmp.lt.u32.totalorder %s4185_s2, %s4578_s15 }
  0x2c   : > { %p4188_p13 = pnand %p4187_p12, %p4186_p11  ;;  %p4193_p4 = por %p4192_p3, %p4191_p2 }
  0x2e   : > { %p4189_p0 = pneg %p4188_p13  ;;  %p4195_p6 = por %p4194_p8, %p4193_p4 }
  0x30   : > { %p4196_p7 = pnand %p4195_p6, %p4189_p0 }
  0x32   : > { %4199 = shalt.err (!%p4196_p7)
}
  0x33   : > { %s4200_s6 = scalar_lea.vmem %s4580_s21, 36864  ;;  %s4431_s8 = smov [#allocation6]  }
  0x34   : > { %p4201_p11 = scmp.ne.s32.totalorder %s4580_s21, %s4200_s6  ;;  %s4205_s9 = sshll.u32 %s4431_s8, 4  ;;  %s4206_s9 = int_to_ptr.vmem [resolvable:$false] %s4205_s9 }
  0x35   : > { %s4207_s10 = scalar_lea.vmem %s4206_s9, 73728  ;;  %p4208_p5 = scmp.lt.s32.totalorder %s4580_s21, %s4206_s9 }
  0x36   : > { %p4203_p13 = pnand %p4201_p11, %p4187_p12  ;;  %p4209_p2 = scmp.lt.s32.totalorder %s4207_s10, %s4200_s6 }
  0x38   : > { %p4204_p1 = pneg %p4203_p13  ;;  %p4210_p3 = por %p4209_p2, %p4208_p5 }
  0x3a   : > { %p4211_p4 = pnand %p4210_p3, %p4204_p1 }
  0x3c   : > { %4214 = shalt.err (!%p4211_p4)
}
  0x3d   : > { %s4432_s2 = smov 256   ;;  %s4433_s3 = smov 128  }
  0x3e   : > { %s4434_s12 = smov 8   ;;  %p234_p1 = scmp.lt.s32.totalorder %s4429_s25, 9 }
  0x3f   : > { %3563 = dma.hbm_to_vmem [thread:$0]  (!%p4586_p9), %s4578_s15, 36864, %s4580_s21, %s4591_s22, %s4432_s2, %s4433_s3, %s4434_s12  }
  0x40   : > { %p4622_p5 = pnand %p3109_p10, %p234_p1  ;;  %s50_s30 = sadd.s32 1, %s4409_s20 }
  0x41   : > { %p57_p6 = scmp.ne.s32.totalorder %s4409_s20, %s4405_s19  ;;  %p5259_p7 = scmp.eq.s32.totalorder %s4546_s29, 0 }
  0x42   : > { %s5258_s26 = scalar_select %p4622_p5, 1, 0 }
  0x43   : > { %s4632_s7 = scalar_select %p5259_p7, %s4409_s20, %s50_s30  }
  0x44   : > { %p5260_p12 = scmp.eq.s32.totalorder %s4429_s25, 0  ;;  %s169_s6 = sand.u32 1, %s4409_s20  }
  0x45   : > { %s5261_s0 = sld [smem:[#allocation21_spill]]  ;;  %s3545_s21 = smul.u32 288, %s169_s6 }
  0x46   : > { %p59_p0 = por %p5260_p12, %p57_p6  ;;  %p5262_p9 = scmp.lt.s32.totalorder %s4429_s25, 8 }
  0x47   : > { %s173_s28 = scalar_lea.vmem [#allocation3], %s3545_s21  ;;  %s4654_s2 = scalar_lea.sflag [#allocation4], %s169_s6 }
  0x48   : > { %p4648_p10 = pnand %p5262_p9, %p59_p0  ;;  %s183_s10 = sshll.u32 %s173_s28, 4  ;;  %s4652_s10 = int_to_ptr.vmem [resolvable:$true] %s183_s10 }
  0x4a   : > { %p4217_p13 = pneg %p4648_p10 }
  0x4b   : > { %s4644_s15 = scalar_lea.hbm %s5261_s0, %s3445_s4  ;;  %s4220_s30 = scalar_lea.hbm %s5261_s0, 18432 }
  0x4c   : > { %s4215_s4 = scalar_lea.hbm %s4644_s15, 4608  ;;  %p4221_p4 = scmp.lt.u32.totalorder %s4644_s15, %s5261_s0 }
  0x4d   : > { %p4216_p11 = scmp.ne.s32.totalorder %s4644_s15, %s4215_s4  ;;  %p4222_p1 = scmp.lt.u32.totalorder %s4220_s30, %s4215_s4 }
  0x4e   : > { %p4224_p7 = scmp.lt.u32.totalorder %s4215_s4, %s4644_s15 }
  0x4f   : > { %p4218_p2 = pnand %p4217_p13, %p4216_p11  ;;  %p4223_p6 = por %p4222_p1, %p4221_p4 }
  0x51   : > { %p4219_p3 = pneg %p4218_p2  ;;  %p4225_p12 = por %p4224_p7, %p4223_p6 }
  0x53   : > { %p4226_p0 = pnand %p4225_p12, %p4219_p3 }
  0x55   : > { %4229 = shalt.err (!%p4226_p0)
}
  0x56   : > { %s4230_s6 = scalar_lea.vmem %s4652_s10, 4608  ;;  %s4435_s21 = smov [#allocation3]  }
  0x57   : > { %p4231_p9 = scmp.ne.s32.totalorder %s4652_s10, %s4230_s6  ;;  %s4235_s28 = sshll.u32 %s4435_s21, 4  ;;  %s4236_s28 = int_to_ptr.vmem [resolvable:$false] %s4235_s28 }
  0x58   : > { %s4237_s3 = scalar_lea.vmem %s4236_s28, 9216  ;;  %p4238_p8 = scmp.lt.s32.totalorder %s4652_s10, %s4236_s28 }
  0x59   : > { %p4233_p11 = pnand %p4231_p9, %p4217_p13  ;;  %p4239_p4 = scmp.lt.s32.totalorder %s4237_s3, %s4230_s6 }
  0x5b   : > { %p4234_p2 = pneg %p4233_p11  ;;  %p4240_p1 = por %p4239_p4, %p4238_p8 }
  0x5d   : > { %p4241_p6 = pnand %p4240_p1, %p4234_p2 }
  0x5f   : > { %4244 = shalt.err (!%p4241_p6)
}
  0x60   : > { %s4436_s4 = smov 4608   ;;  %s5264_s12 = sld [smem:[#allocation15_spill]] }
  0x61   : > { %s5265_s30 = sld [smem:[#allocation14_spill]]  ;;  %s4437_s8 = smov 1152  }
  0x62   : > { %s4438_s9 = smov 72   ;;  %s4683_s6 = sadd.s32 4294967295, %s4429_s25  }
  0x63   : > { %3560 = dma.hbm_to_vmem [thread:$0]  (!%p4648_p10), %s4644_s15, 4608, %s4652_s10, %s4654_s2, %s4436_s4, %s4437_s8, %s4438_s9  }
  0x64   : > { %s3099_s21 = sadd.s32 4294967294, %s4429_s25   ;;  %p64_p8 = scmp.eq.s32.totalorder %s4683_s6, 0 }
  0x65   : > { %p102_p13 = scmp.eq.s32.totalorder %s4563_s5, 0  ;;  %s104_s28 = sadd.s32 1, %s4385_s14 }
  0x66   : > { %p111_p3 = scmp.ne.s32.totalorder %s4385_s14, %s4381_s13  ;;  %p5266_p7 = scmp.ne.s32.totalorder %s4405_s19, %s4401_s18 }
  0x67   : > { %p5268_p0 = scmp.ne.s32.totalorder %s4393_s16, %s5264_s12  ;;  %p5270_p10 = scmp.eq.s32.totalorder %s4429_s25, 0 }
  0x68   : > { %p4694_p12 = por %p64_p8, %p5266_p7  ;;  %p117_p2 = scmp.ne.s32.totalorder %s4381_s13, %s5265_s30 }
  0x69   : > { %p4701_p9 = por %p5268_p0, %p64_p8  ;;  %p4710_p11 = por %p111_p3, %p5270_p10 }
  0x6a   : > { %s5267_s3 = scalar_select %p4694_p12, 1, 0 }
  0x6b   : > { %s5269_s29 = scalar_select %p4701_p9, 1, 0 }
  0x6c   : > { %s4706_s15 = scalar_select %p102_p13, %s4385_s14, %s104_s28  }
  0x6d   : > { %p143_p4 = scmp.eq.s32.totalorder %s4683_s6, 7  ;;  %p149_p1 = scmp.eq.s32.totalorder %s3099_s21, 7 }
  0x6e   : > { %p4717_p6 = por %p117_p2, %p64_p8  ;;  %s219_s5 = sand.u32 1, %s4385_s14  }
  0x6f   : > { %p4722_p7 = por %p143_p4, %p111_p3  ;;  %p4726_p13 = por %p149_p1, %p117_p2 }
  0x70   : > { %s5272_s18 = scalar_select %p4717_p6, 1, 0 }
  0x71   : > { %s5273_s2 = scalar_select %p4722_p7, 1, 0 }
  0x72   : > { %s5274_s4 = scalar_select %p4726_p13, 1, 0 }
  0x73   : > { %s3106_s12 = sshll.u32 %s219_s5, 4  ;;  %s3447_s8 = sshll.u32 %s4425_s24, 8 }
  0x74   : > { %s5275_s30 = sld [smem:[#allocation23_spill]]  ;;  %s221_s21 = scalar_lea.vmem [#allocation8], %s3106_s12 }
  0x75   : > { %s229_s1 = sshll.u32 %s221_s21, 4  ;;  %p5276_p8 = scmp.lt.s32.totalorder %s4429_s25, 8  ;;  %s230_s1 = int_to_ptr.vmem [resolvable:$true] %s229_s1 }
  0x77   : > { %p4740_p3 = pnand %p5276_p8, %p4710_p11 }
  0x79   : > { %p4247_p10 = pneg %p4740_p3 }
  0x7a   : > { %s4734_s0 = scalar_lea.hbm %s5275_s30, %s3447_s8  ;;  %s4250_s10 = scalar_lea.hbm %s5275_s30, 512 }
  0x7b   : > { %s4245_s5 = scalar_lea.hbm %s4734_s0, 256  ;;  %p4251_p11 = scmp.lt.u32.totalorder %s4734_s0, %s5275_s30 }
  0x7c   : > { %p4246_p0 = scmp.ne.s32.totalorder %s4734_s0, %s4245_s5  ;;  %p4252_p1 = scmp.lt.u32.totalorder %s4250_s10, %s4245_s5 }
  0x7d   : > { %p4254_p13 = scmp.lt.u32.totalorder %s4245_s5, %s4734_s0 }
  0x7e   : > { %p4248_p2 = pnand %p4247_p10, %p4246_p0  ;;  %p4253_p8 = por %p4252_p1, %p4251_p11 }
  0x80   : > { %p4249_p4 = pneg %p4248_p2  ;;  %p4255_p7 = por %p4254_p13, %p4253_p8 }
  0x82   : > { %p4256_p6 = pnand %p4255_p7, %p4249_p4 }
  0x84   : > { %4259 = shalt.err (!%p4256_p6)
}
  0x85   : > { %s4260_s21 = scalar_lea.vmem %s230_s1, 256  ;;  %s4439_s24 = smov [#allocation8]  }
  0x86   : > { %p4261_p9 = scmp.ne.s32.totalorder %s230_s1, %s4260_s21  ;;  %s4265_s8 = sshll.u32 %s4439_s24, 4  ;;  %s4266_s8 = int_to_ptr.vmem [resolvable:$false] %s4265_s8 }
  0x87   : > { %s4267_s12 = scalar_lea.vmem %s4266_s8, 512  ;;  %p4268_p12 = scmp.lt.s32.totalorder %s230_s1, %s4266_s8 }
  0x88   : > { %p4263_p0 = pnand %p4261_p9, %p4247_p10  ;;  %p4269_p5 = scmp.lt.s32.totalorder %s4267_s12, %s4260_s21 }
  0x8a   : > { %p4264_p2 = pneg %p4263_p0  ;;  %p4270_p1 = por %p4269_p5, %p4268_p12 }
  0x8c   : > { %p4271_p11 = pnand %p4270_p1, %p4264_p2 }
  0x8e   : > { %4274 = shalt.err (!%p4271_p11)
}
  0x8f   : > { %3566 = dma.hbm_to_vmem [thread:$0]  (!%p4740_p3), %s4734_s0, 256, %s230_s1, %s4591_s22  }
  0x90   : > { %p5278_p6 = scmp.ne.s32.totalorder %s5258_s26, 0 }
  0x91   : > { %s240_s5 = sand.u32 (!%p5278_p6), 1, %s4405_s19   ;;  %p5279_p9 = scmp.ne.s32.totalorder (!%p5278_p6), %s5267_s3, 0 }
  0x92   : > { %238 = sbr.rel (%p5278_p6) target bundleno = 826 (0x33a), region = 32  ;;  %s241_s24 = scalar_lea.sflag (!%p5278_p6), [#allocation4], %s240_s5 }
  0x93   : > { %s3547_s10 = smul.u32 (!%p5278_p6), 288, %s240_s5 }
  0x95   : > { %s4769_s9 = scalar_lea.vmem (!%p5278_p6), [#allocation3], %s3547_s10 }
  0x99   : > { %4360 = dma.done.wait (%p5279_p9), %s241_s24, 4608  }
  0x9a   : > { %4362 = vsyncadd (%p5279_p9), %s241_s24, 4294962688  ;;  %s249_s27 = sand.u32 1, %s4683_s6   ;;  %s251_s0 = sand.u32 1, %s4393_s16  }
  0x9b   : > { %s3548_s1 = smul.u32 2304, %s251_s0  ;;  %s250_s22 = scalar_lea.sflag [#allocation7], %s249_s27 }
  0x9c   : > { %p5280_p5 = scmp.ne.s32.totalorder %s5269_s29, 0 }
  0x9d   : > { %s4777_s26 = scalar_lea.vmem [#allocation6], %s3548_s1 }
  0x9e   : > { %4364 = dma.done.wait (%p5280_p5), %s250_s22, 36864  }
  0x9f   : > { %4366 = vsyncadd (%p5280_p5), %s250_s22, 4294930432  ;;  %s4784_s28 = sand.u32 1, %s4381_s13   ;;  %p5281_p12 = scmp.ne.s32.totalorder %s5272_s18, 0 }
  0xa0   : > { %s3110_s3 = sshll.u32 %s4784_s28, 4 }
  0xa1   : > { %s4787_s21 = scalar_lea.vmem [#allocation8], %s3110_s3 }
  0xa2   : > { %4368 = dma.done.wait (%p5281_p12), %s250_s22, 256  }
  0xa3   : > { %4370 = vsyncadd (%p5281_p12), %s250_s22, 4294967040  ;;  %s3111_s6 = sshll.u32 %s4784_s28, 6  ;;  %s5282_s12 = sld [smem:[#allocation16_spill]] }
  0xa4   : > { %s4794_s8 = scalar_lea.vmem [#allocation9], %s3111_s6 }
  0xa9   : > { %p3112_p7 = scmp.ne.s32.totalorder %s5282_s12, 0 }
  0xaa   : > { %v4440_v0 = vmov (!%p3112_p7), 0.0  }
  0xab   : > { %305 = sbr.rel (%p3112_p7) target bundleno = 178 (0xb2), region = 48  ;;  %306 = vst [vmem:[#allocation2] sm:$0xff] (!%p3112_p7), %v4440_v0  ;;  %307 = vst [vmem:[#allocation2 + $0x8] sm:$0xff] (!%p3112_p7), %v4440_v0 }
  0xac   : > { %308 = vst [vmem:[#allocation2 + $0x10] sm:$0xff] (!%p3112_p7), %v4440_v0  ;;  %309 = vst [vmem:[#allocation2 + $0x18] sm:$0xff] (!%p3112_p7), %v4440_v0 }
  0xad   : > { %310 = vst [vmem:[#allocation2 + $0x20] sm:$0xff] (!%p3112_p7), %v4440_v0  ;;  %311 = vst [vmem:[#allocation2 + $0x28] sm:$0xff] (!%p3112_p7), %v4440_v0 }
  0xae   : > { %312 = vst [vmem:[#allocation2 + $0x30] sm:$0xff] (!%p3112_p7), %v4440_v0  ;;  %313 = vst [vmem:[#allocation2 + $0x38] sm:$0xff] (!%p3112_p7), %v4440_v0 }
  0xb2 PF: > { %v3695_v1 = vld [vmem:[%s4777_s26 + $0x4] ss:$8 sps:$4 sm:$0xff]   ;;  %v3699_v3 = vld [vmem:[%s4777_s26] ss:$8 sps:$4 sm:$0xff]   ;;  %v3701_v5 = vld [vmem:[%s4777_s26 + $0x14] ss:$8 sps:$4 sm:$0xff]  }
  0xb3   : > { %v3697_v2 = vld [vmem:[%s4777_s26 + $0x404] ss:$8 sps:$4 sm:$0xff]   ;;  %2266 = vmatprep.subr.bf16.mxu1 %v3695_v1  ;;  %v3700_v4 = vld [vmem:[%s4777_s26 + $0x400] ss:$8 sps:$4 sm:$0xff]   ;;  %v3703_v6 = vld [vmem:[%s4777_s26 + $0x414] ss:$8 sps:$4 sm:$0xff]  }
  0xb4   : > { %2478 = vmatprep.subr.bf16.mxu0 %v3697_v2  ;;  %2267 = vmatpush1.bf16.msra.mxu1 %v3699_v3  ;;  %v3705_v7 = vld [vmem:[%s4777_s26 + $0x10] ss:$8 sps:$4 sm:$0xff]   ;;  %v3707_v9 = vld [vmem:[%s4777_s26 + $0x24] ss:$8 sps:$4 sm:$0xff]   ;;  %v3711_v11 = vld [vmem:[%s4777_s26 + $0x20] ss:$8 sps:$4 sm:$0xff]  }
  0xb5   : > { %2479 = vmatpush1.bf16.msra.mxu0 %v3700_v4  ;;  %2268 = vmatprep.subr.bf16.mxu1 %v3701_v5  ;;  %v3706_v8 = vld [vmem:[%s4777_s26 + $0x410] ss:$8 sps:$4 sm:$0xff]   ;;  %v3709_v10 = vld [vmem:[%s4777_s26 + $0x424] ss:$8 sps:$4 sm:$0xff]   ;;  %v3712_v12 = vld [vmem:[%s4777_s26 + $0x420] ss:$8 sps:$4 sm:$0xff]  }
  0xb6   : > { %2480 = vmatprep.subr.bf16.mxu0 %v3703_v6  ;;  %v3713_v13 = vld [vmem:[%s4777_s26 + $0x34] ss:$8 sps:$4 sm:$0xff]   ;;  %v3717_v15 = vld [vmem:[%s4777_s26 + $0x30] ss:$8 sps:$4 sm:$0xff]   ;;  %v3719_v17 = vld [vmem:[%s4777_s26 + $0x44] ss:$8 sps:$4 sm:$0xff]  }
  0xb7   : > { %v3715_v14 = vld [vmem:[%s4777_s26 + $0x434] ss:$8 sps:$4 sm:$0xff]   ;;  %v3718_v16 = vld [vmem:[%s4777_s26 + $0x430] ss:$8 sps:$4 sm:$0xff]   ;;  %v3721_v18 = vld [vmem:[%s4777_s26 + $0x444] ss:$8 sps:$4 sm:$0xff]  }
  0xb8   : > { %2269 = vmatpush1.bf16.msra.mxu1 %v3705_v7  ;;  %v3723_v19 = vld [vmem:[%s4777_s26 + $0x40] ss:$8 sps:$4 sm:$0xff]   ;;  %v3725_v21 = vld [vmem:[%s4777_s26 + $0x54] ss:$8 sps:$4 sm:$0xff]   ;;  %v3729_v23 = vld [vmem:[%s4777_s26 + $0x50] ss:$8 sps:$4 sm:$0xff]  }
  0xb9   : > { %2481 = vmatpush1.bf16.msra.mxu0 %v3706_v8  ;;  %2270 = vmatprep.subr.bf16.mxu1 %v3707_v9  ;;  %v3724_v20 = vld [vmem:[%s4777_s26 + $0x440] ss:$8 sps:$4 sm:$0xff]   ;;  %v3727_v22 = vld [vmem:[%s4777_s26 + $0x454] ss:$8 sps:$4 sm:$0xff]   ;;  %v3730_v24 = vld [vmem:[%s4777_s26 + $0x450] ss:$8 sps:$4 sm:$0xff]  }
  0xba   : > { %2482 = vmatprep.subr.bf16.mxu0 %v3709_v10  ;;  %v3731_v25 = vld [vmem:[%s4777_s26 + $0x64] ss:$8 sps:$4 sm:$0xff]   ;;  %v3735_v27 = vld [vmem:[%s4777_s26 + $0x60] ss:$8 sps:$4 sm:$0xff]   ;;  %v3737_v29 = vld [vmem:[%s4777_s26 + $0x74] ss:$8 sps:$4 sm:$0xff]  }
  0xbb   : > { %v3733_v26 = vld [vmem:[%s4777_s26 + $0x464] ss:$8 sps:$4 sm:$0xff]   ;;  %v3736_v28 = vld [vmem:[%s4777_s26 + $0x460] ss:$8 sps:$4 sm:$0xff]   ;;  %v3739_v30 = vld [vmem:[%s4777_s26 + $0x474] ss:$8 sps:$4 sm:$0xff]  }
  0xbc   : > { %2271 = vmatpush1.bf16.msra.mxu1 %v3711_v11  ;;  %v3741_v31 = vld [vmem:[%s4777_s26 + $0x70] ss:$8 sps:$4 sm:$0xff]   ;;  %v3743_v33 = vld [vmem:[%s4777_s26 + $0x84] ss:$8 sps:$4 sm:$0xff]   ;;  %v3747_v35 = vld [vmem:[%s4777_s26 + $0x80] ss:$8 sps:$4 sm:$0xff]  }
  0xbd   : > { %2483 = vmatpush1.bf16.msra.mxu0 %v3712_v12  ;;  %2272 = vmatprep.subr.bf16.mxu1 %v3713_v13  ;;  %v3742_v32 = vld [vmem:[%s4777_s26 + $0x470] ss:$8 sps:$4 sm:$0xff]   ;;  %v3745_v34 = vld [vmem:[%s4777_s26 + $0x484] ss:$8 sps:$4 sm:$0xff]   ;;  %v3748_v36 = vld [vmem:[%s4777_s26 + $0x480] ss:$8 sps:$4 sm:$0xff]  }
  0xbe   : > { %2484 = vmatprep.subr.bf16.mxu0 %v3715_v14  ;;  %v3749_v37 = vld [vmem:[%s4777_s26 + $0x94] ss:$8 sps:$4 sm:$0xff]   ;;  %v3753_v39 = vld [vmem:[%s4777_s26 + $0x90] ss:$8 sps:$4 sm:$0xff]   ;;  %v3755_v41 = vld [vmem:[%s4777_s26 + $0xa4] ss:$8 sps:$4 sm:$0xff]  }
  0xbf   : > { %v3751_v38 = vld [vmem:[%s4777_s26 + $0x494] ss:$8 sps:$4 sm:$0xff]   ;;  %v3754_v40 = vld [vmem:[%s4777_s26 + $0x490] ss:$8 sps:$4 sm:$0xff]   ;;  %v3757_v42 = vld [vmem:[%s4777_s26 + $0x4a4] ss:$8 sps:$4 sm:$0xff]  }
  0xc0   : > { %2273 = vmatpush1.bf16.msra.mxu1 %v3717_v15  ;;  %v3759_v43 = vld [vmem:[%s4777_s26 + $0xa0] ss:$8 sps:$4 sm:$0xff]   ;;  %v3761_v45 = vld [vmem:[%s4777_s26 + $0xb4] ss:$8 sps:$4 sm:$0xff]   ;;  %v3765_v47 = vld [vmem:[%s4777_s26 + $0xb0] ss:$8 sps:$4 sm:$0xff]  }
  0xc1   : > { %2485 = vmatpush1.bf16.msra.mxu0 %v3718_v16  ;;  %2274 = vmatprep.subr.bf16.mxu1 %v3719_v17  ;;  %v3760_v44 = vld [vmem:[%s4777_s26 + $0x4a0] ss:$8 sps:$4 sm:$0xff]   ;;  %v3763_v46 = vld [vmem:[%s4777_s26 + $0x4b4] ss:$8 sps:$4 sm:$0xff]   ;;  %v3766_v48 = vld [vmem:[%s4777_s26 + $0x4b0] ss:$8 sps:$4 sm:$0xff]  }
  0xc2   : > { %2486 = vmatprep.subr.bf16.mxu0 %v3721_v18  ;;  %v3793_v49 = vld [vmem:[%s4769_s9 + $0x4] ss:$72 sps:$4 sm:$0xff]   ;;  %v3771_v53 = vld [vmem:[%s4777_s26 + $0xc0] ss:$8 sps:$4 sm:$0xff]   ;;  %v3773_v55 = vld [vmem:[%s4777_s26 + $0xd4] ss:$8 sps:$4 sm:$0xff]  }
  0xc3   : > { %v3767_v50 = vld [vmem:[%s4777_s26 + $0xc4] ss:$8 sps:$4 sm:$0xff]   ;;  %2298 = vmatprep.mubr.bf16.mxu1 %v3793_v49  ;;  %v3772_v54 = vld [vmem:[%s4777_s26 + $0x4c0] ss:$8 sps:$4 sm:$0xff]   ;;  %v3775_v56 = vld [vmem:[%s4777_s26 + $0x4d4] ss:$8 sps:$4 sm:$0xff]  }
  0xc4   : > { %2275 = vmatpush1.bf16.msra.mxu1 %v3723_v19  ;;  %v3769_v51 = vld [vmem:[%s4777_s26 + $0x4c4] ss:$8 sps:$4 sm:$0xff]   ;;  %v3777_v57 = vld [vmem:[%s4777_s26 + $0xd0] ss:$8 sps:$4 sm:$0xff]   ;;  %v3783_v61 = vld [vmem:[%s4777_s26 + $0xe0] ss:$8 sps:$4 sm:$0xff]  }
  0xc5   : > { %2487 = vmatpush1.bf16.msra.mxu0 %v3724_v20  ;;  %2276 = vmatprep.subr.bf16.mxu1 %v3725_v21  ;;  %v3799_v52 = vld [vmem:[%s4769_s9 + $0x24] ss:$72 sps:$4 sm:$0xff]   ;;  %v3778_v58 = vld [vmem:[%s4777_s26 + $0x4d0] ss:$8 sps:$4 sm:$0xff]   ;;  %v3784_v62 = vld [vmem:[%s4777_s26 + $0x4e0] ss:$8 sps:$4 sm:$0xff]  }
  0xc6   : > { %2488 = vmatprep.subr.bf16.mxu0 %v3727_v22  ;;  %2510 = vmatprep.mubr.bf16.mxu0 %v3799_v52  ;;  %v3779_v59 = vld [vmem:[%s4777_s26 + $0xe4] ss:$8 sps:$4 sm:$0xff]   ;;  %v3785_v63 = vld [vmem:[%s4777_s26 + $0xf4] ss:$8 sps:$4 sm:$0xff]   ;;  %v3789_v1 = vld [vmem:[%s4777_s26 + $0xf0] ss:$8 sps:$4 sm:$0xff]  }
  0xc7   : > { %v3781_v60 = vld [vmem:[%s4777_s26 + $0x4e4] ss:$8 sps:$4 sm:$0xff]   ;;  %v3787_v0 = vld [vmem:[%s4777_s26 + $0x4f4] ss:$8 sps:$4 sm:$0xff]   ;;  %v3790_v2 = vld [vmem:[%s4777_s26 + $0x4f0] ss:$8 sps:$4 sm:$0xff]  }
  0xc8   : > { %2277 = vmatpush1.bf16.msra.mxu1 %v3729_v23  ;;  %v3796_v3 = vld [vmem:[%s4777_s26 + $0x104] ss:$8 sps:$4 sm:$0xff]   ;;  %v3791_v5 = vld [vmem:[%s4769_s9] ss:$72 sps:$4 sm:$0xff]   ;;  %v3805_v9 = vld [vmem:[%s4777_s26 + $0x114] ss:$8 sps:$4 sm:$0xff]  }
  0xc9   : > { %2489 = vmatpush1.bf16.msra.mxu0 %v3730_v24  ;;  %2278 = vmatprep.subr.bf16.mxu1 %v3731_v25  ;;  %v3802_v4 = vld [vmem:[%s4777_s26 + $0x504] ss:$8 sps:$4 sm:$0xff]   ;;  %v3794_v6 = vld [vmem:[%s4777_s26 + $0x100] ss:$8 sps:$4 sm:$0xff]   ;;  %v3808_v10 = vld [vmem:[%s4777_s26 + $0x514] ss:$8 sps:$4 sm:$0xff]  }
  0xca   : > { %2490 = vmatprep.subr.bf16.mxu0 %v3733_v26  ;;  %v3797_v7 = vld [vmem:[%s4769_s9 + $0x20] ss:$72 sps:$4 sm:$0xff]   ;;  %v3803_v11 = vld [vmem:[%s4777_s26 + $0x110] ss:$8 sps:$4 sm:$0xff]   ;;  %v3811_v13 = vld [vmem:[%s4777_s26 + $0x124] ss:$8 sps:$4 sm:$0xff]  }
  0xcb   : > { %v3800_v8 = vld [vmem:[%s4777_s26 + $0x500] ss:$8 sps:$4 sm:$0xff]   ;;  %v3806_v12 = vld [vmem:[%s4777_s26 + $0x510] ss:$8 sps:$4 sm:$0xff]   ;;  %v3814_v14 = vld [vmem:[%s4777_s26 + $0x524] ss:$8 sps:$4 sm:$0xff]  }
  0xcc   : > { %2279 = vmatpush1.bf16.msra.mxu1 %v3735_v27  ;;  %v3809_v15 = vld [vmem:[%s4777_s26 + $0x120] ss:$8 sps:$4 sm:$0xff]   ;;  %v3817_v17 = vld [vmem:[%s4777_s26 + $0x134] ss:$8 sps:$4 sm:$0xff]   ;;  %v3815_v19 = vld [vmem:[%s4777_s26 + $0x130] ss:$8 sps:$4 sm:$0xff]  }
  0xcd   : > { %2491 = vmatpush1.bf16.msra.mxu0 %v3736_v28  ;;  %2280 = vmatprep.subr.bf16.mxu1 %v3737_v29  ;;  %v3812_v16 = vld [vmem:[%s4777_s26 + $0x520] ss:$8 sps:$4 sm:$0xff]   ;;  %v3820_v18 = vld [vmem:[%s4777_s26 + $0x534] ss:$8 sps:$4 sm:$0xff]   ;;  %v3818_v20 = vld [vmem:[%s4777_s26 + $0x530] ss:$8 sps:$4 sm:$0xff]  }
  0xce   : > { %2492 = vmatprep.subr.bf16.mxu0 %v3739_v30  ;;  %v3823_v21 = vld [vmem:[%s4777_s26 + $0x144] ss:$8 sps:$4 sm:$0xff]   ;;  %v3821_v23 = vld [vmem:[%s4777_s26 + $0x140] ss:$8 sps:$4 sm:$0xff]   ;;  %v3829_v25 = vld [vmem:[%s4777_s26 + $0x154] ss:$8 sps:$4 sm:$0xff]  }
  0xcf   : > { %v3826_v22 = vld [vmem:[%s4777_s26 + $0x544] ss:$8 sps:$4 sm:$0xff]   ;;  %v3824_v24 = vld [vmem:[%s4777_s26 + $0x540] ss:$8 sps:$4 sm:$0xff]   ;;  %v3832_v26 = vld [vmem:[%s4777_s26 + $0x554] ss:$8 sps:$4 sm:$0xff]  }
  0xd0   : > { %2281 = vmatpush1.bf16.msra.mxu1 %v3741_v31  ;;  %v3827_v27 = vld [vmem:[%s4777_s26 + $0x150] ss:$8 sps:$4 sm:$0xff]   ;;  %v3881_v29 = vld [vmem:[%s4769_s9 + $0x94] ss:$72 sps:$4 sm:$0xff]   ;;  %v3835_v30 = vld [vmem:[%s4777_s26 + $0x164] ss:$8 sps:$4 sm:$0xff]  }
  0xd1   : > { %2493 = vmatpush1.bf16.msra.mxu0 %v3742_v32  ;;  %2282 = vmatprep.subr.bf16.mxu1 %v3743_v33  ;;  %v3830_v28 = vld [vmem:[%s4777_s26 + $0x550] ss:$8 sps:$4 sm:$0xff]   ;;  %v3838_v31 = vld [vmem:[%s4777_s26 + $0x564] ss:$8 sps:$4 sm:$0xff]   ;;  %v3886_v32 = vld [vmem:[%s4769_s9 + $0xb4] ss:$72 sps:$4 sm:$0xff]  }
  0xd2   : > { %2494 = vmatprep.subr.bf16.mxu0 %v3745_v34  ;;  %v3833_v33 = vld [vmem:[%s4777_s26 + $0x160] ss:$8 sps:$4 sm:$0xff]   ;;  %v3851_v49 = vld [vmem:[%s4777_s26 + $0x190] ss:$8 sps:$4 sm:$0xff]   ;;  %v3862_v52 = vld [vmem:[%s4777_s26 + $0x5a4] ss:$8 sps:$4 sm:$0xff]  }
  0xd3   : > { %v3836_v34 = vld [vmem:[%s4777_s26 + $0x560] ss:$8 sps:$4 sm:$0xff]   ;;  %s5283_s29 = sld [smem:[#allocation16_spill]] }
  0xd4   : > { %2283 = vmatpush1.bf16.msra.mxu1 %v3747_v35  ;;  %v3891_v35 = vld [vmem:[%s4769_s9 + $0x90] ss:$72 sps:$4 sm:$0xff]  }
  0xd5   : > { %2495 = vmatpush1.bf16.msra.mxu0 %v3748_v36  ;;  %2284 = vmatprep.subr.bf16.mxu1 %v3749_v37  ;;  %v3892_v36 = vld [vmem:[%s4769_s9 + $0xb0] ss:$72 sps:$4 sm:$0xff]   ;;  %v3841_v37 = vld [vmem:[%s4777_s26 + $0x174] ss:$8 sps:$4 sm:$0xff]  }
  0xd6   : > { %2496 = vmatprep.subr.bf16.mxu0 %v3751_v38  ;;  %v3844_v38 = vld [vmem:[%s4777_s26 + $0x574] ss:$8 sps:$4 sm:$0xff]  }
  0xd8   : > { %2285 = vmatpush1.bf16.msra.mxu1 %v3753_v39  ;;  %v3839_v39 = vld [vmem:[%s4777_s26 + $0x170] ss:$8 sps:$4 sm:$0xff]  }
  0xd9   : > { %2497 = vmatpush1.bf16.msra.mxu0 %v3754_v40  ;;  %2286 = vmatprep.subr.bf16.mxu1 %v3755_v41  ;;  %v3842_v40 = vld [vmem:[%s4777_s26 + $0x570] ss:$8 sps:$4 sm:$0xff]   ;;  %v3901_v41 = vld [vmem:[%s4769_s9 + $0xc] ss:$72 sps:$4 sm:$0xff]   ;;  %p3437_p13 = scmp.ne.s32.totalorder %s5283_s29, 3 }
  0xda   : > { %2498 = vmatprep.subr.bf16.mxu0 %v3757_v42  ;;  %v3847_v42 = vld [vmem:[%s4777_s26 + $0x184] ss:$8 sps:$4 sm:$0xff]  }
  0xdc   : > { %2287 = vmatpush1.bf16.msra.mxu1 %v3759_v43  ;;  %v3850_v43 = vld [vmem:[%s4777_s26 + $0x584] ss:$8 sps:$4 sm:$0xff]  }
  0xdd   : > { %2499 = vmatpush1.bf16.msra.mxu0 %v3760_v44  ;;  %2288 = vmatprep.subr.bf16.mxu1 %v3761_v45  ;;  %v3907_v44 = vld [vmem:[%s4769_s9 + $0x2c] ss:$72 sps:$4 sm:$0xff]   ;;  %v3845_v45 = vld [vmem:[%s4777_s26 + $0x180] ss:$8 sps:$4 sm:$0xff]  }
  0xde   : > { %2500 = vmatprep.subr.bf16.mxu0 %v3763_v46  ;;  %v3848_v46 = vld [vmem:[%s4777_s26 + $0x580] ss:$8 sps:$4 sm:$0xff]  }
  0xe0   : > { %2289 = vmatpush1.bf16.msra.mxu1 %v3765_v47  ;;  %v3853_v47 = vld [vmem:[%s4777_s26 + $0x194] ss:$8 sps:$4 sm:$0xff]  }
  0xe1   : > { %2501 = vmatpush1.bf16.msra.mxu0 %v3766_v48  ;;  %2290 = vmatprep.subr.bf16.mxu1 %v3767_v50  ;;  %v3856_v48 = vld [vmem:[%s4777_s26 + $0x594] ss:$8 sps:$4 sm:$0xff]   ;;  %v3854_v50 = vld [vmem:[%s4777_s26 + $0x590] ss:$8 sps:$4 sm:$0xff]  }
  0xe2   : > { %2502 = vmatprep.subr.bf16.mxu0 %v3769_v51  ;;  %v3859_v51 = vld [vmem:[%s4777_s26 + $0x1a4] ss:$8 sps:$4 sm:$0xff]  }
  0xe4   : > { %2291 = vmatpush1.bf16.msra.mxu1 %v3771_v53  ;;  %v3857_v53 = vld [vmem:[%s4777_s26 + $0x1a0] ss:$8 sps:$4 sm:$0xff]  }
  0xe5   : > { %2503 = vmatpush1.bf16.msra.mxu0 %v3772_v54  ;;  %2292 = vmatprep.subr.bf16.mxu1 %v3773_v55  ;;  %v3860_v54 = vld [vmem:[%s4777_s26 + $0x5a0] ss:$8 sps:$4 sm:$0xff]   ;;  %v3865_v55 = vld [vmem:[%s4777_s26 + $0x1b4] ss:$8 sps:$4 sm:$0xff]  }
  0xe6   : > { %2504 = vmatprep.subr.bf16.mxu0 %v3775_v56  ;;  %v3868_v56 = vld [vmem:[%s4777_s26 + $0x5b4] ss:$8 sps:$4 sm:$0xff]  }
  0xe8   : > { %2293 = vmatpush1.bf16.msra.mxu1 %v3777_v57  ;;  %v3863_v57 = vld [vmem:[%s4777_s26 + $0x1b0] ss:$8 sps:$4 sm:$0xff]  }
  0xe9   : > { %2505 = vmatpush1.bf16.msra.mxu0 %v3778_v58  ;;  %2294 = vmatprep.subr.bf16.mxu1 %v3779_v59  ;;  %v3866_v58 = vld [vmem:[%s4777_s26 + $0x5b0] ss:$8 sps:$4 sm:$0xff]   ;;  %v3871_v59 = vld [vmem:[%s4777_s26 + $0x1c4] ss:$8 sps:$4 sm:$0xff]  }
  0xea   : > { %2506 = vmatprep.subr.bf16.mxu0 %v3781_v60  ;;  %v3874_v60 = vld [vmem:[%s4777_s26 + $0x5c4] ss:$8 sps:$4 sm:$0xff]  }
  0xec   : > { %2295 = vmatpush1.bf16.msra.mxu1 %v3783_v61  ;;  %v3869_v61 = vld [vmem:[%s4777_s26 + $0x1c0] ss:$8 sps:$4 sm:$0xff]  }
  0xed   : > { %2507 = vmatpush1.bf16.msra.mxu0 %v3784_v62  ;;  %2296 = vmatprep.subr.bf16.mxu1 %v3785_v63  ;;  %v3872_v62 = vld [vmem:[%s4777_s26 + $0x5c0] ss:$8 sps:$4 sm:$0xff]   ;;  %v3877_v63 = vld [vmem:[%s4777_s26 + $0x1d4] ss:$8 sps:$4 sm:$0xff]  }
  0xee   : > { %2508 = vmatprep.subr.bf16.mxu0 %v3787_v0  ;;  %v3880_v0 = vld [vmem:[%s4777_s26 + $0x5d4] ss:$8 sps:$4 sm:$0xff]  }
  0xf0   : > { %2297 = vmatpush1.bf16.msra.mxu1 %v3789_v1  ;;  %v3875_v1 = vld [vmem:[%s4777_s26 + $0x1d0] ss:$8 sps:$4 sm:$0xff]  }
  0xf1   : > { %2509 = vmatpush1.bf16.msra.mxu0 %v3790_v2  ;;  %2319 = vmatprep.subr.bf16.mxu1 %v3796_v3  ;;  %v3878_v2 = vld [vmem:[%s4777_s26 + $0x5d0] ss:$8 sps:$4 sm:$0xff]   ;;  %v3885_v3 = vld [vmem:[%s4777_s26 + $0x1e4] ss:$8 sps:$4 sm:$0xff]  }
  0xf2   : > { %2531 = vmatprep.subr.bf16.mxu0 %v3802_v4  ;;  %v3890_v4 = vld [vmem:[%s4777_s26 + $0x5e4] ss:$8 sps:$4 sm:$0xff]  }
  0xf3   : > { %2299 = vmatmul.mubr.bf16.vlgmr.msra.gmra.mrb[0].mxu1 %v3791_v5  ;;  %v3883_v5 = vld [vmem:[%s4777_s26 + $0x1e0] ss:$8 sps:$4 sm:$0xff]  }
  0xf4   : > { %2511 = vmatmul.mubr.bf16.vlgmr.msra.gmra.mrb[0].mxu0 %v3797_v7  ;;  %2320 = vmatpush1.bf16.msra.mxu1 %v3794_v6  ;;  %v3888_v6 = vld [vmem:[%s4777_s26 + $0x5e0] ss:$8 sps:$4 sm:$0xff]   ;;  %v3895_v7 = vld [vmem:[%s4777_s26 + $0x1f4] ss:$8 sps:$4 sm:$0xff]  }
  0xf5   : > { %2532 = vmatpush1.bf16.msra.mxu0 %v3800_v8  ;;  %2321 = vmatprep.subr.bf16.mxu1 %v3805_v9  ;;  %v3898_v8 = vld [vmem:[%s4777_s26 + $0x5f4] ss:$8 sps:$4 sm:$0xff]   ;;  %v3893_v9 = vld [vmem:[%s4777_s26 + $0x1f0] ss:$8 sps:$4 sm:$0xff]  }
  0xf6   : > { %2533 = vmatprep.subr.bf16.mxu0 %v3808_v10  ;;  %2308 = vmatprep.mubr.bf16.mxu1 %v3881_v29  ;;  %v3896_v10 = vld [vmem:[%s4777_s26 + $0x5f0] ss:$8 sps:$4 sm:$0xff]   ;;  %v3925_v29 = vld [vmem:[%s4777_s26 + $0x234] ss:$8 sps:$4 sm:$0xff]  }
  0xf7   : > { %2520 = vmatprep.mubr.bf16.mxu0 %v3886_v32  ;;  %v3926_v32 = vld [vmem:[%s4777_s26 + $0x630] ss:$8 sps:$4 sm:$0xff]  }
  0xf8   : > { %2322 = vmatpush1.bf16.msra.mxu1 %v3803_v11  ;;  %v3904_v11 = vld [vmem:[%s4777_s26 + $0x204] ss:$8 sps:$4 sm:$0xff]  }
  0xf9   : > { %2534 = vmatpush1.bf16.msra.mxu0 %v3806_v12  ;;  %2323 = vmatprep.subr.bf16.mxu1 %v3811_v13  ;;  %v3910_v12 = vld [vmem:[%s4777_s26 + $0x604] ss:$8 sps:$4 sm:$0xff]   ;;  %v3899_v13 = vld [vmem:[%s4769_s9 + $0x8] ss:$72 sps:$4 sm:$0xff]  }
  0xfa   : > { %2535 = vmatprep.subr.bf16.mxu0 %v3814_v14  ;;  %v3902_v14 = vld [vmem:[%s4777_s26 + $0x200] ss:$8 sps:$4 sm:$0xff]  }
  0xfb   : > { %2309 = vmatmul.mubr.bf16.gmra.mrb[4].mxu1 %v3891_v35  ;;  %v3934_v35 = vld [vmem:[%s4777_s26 + $0x644] ss:$8 sps:$4 sm:$0xff]  }
  0xfc   : > { %2324 = vmatpush1.bf16.msra.mxu1 %v3809_v15  ;;  %2521 = vmatmul.mubr.bf16.gmra.mrb[4].mxu0 %v3892_v36  ;;  %v3905_v15 = vld [vmem:[%s4769_s9 + $0x28] ss:$72 sps:$4 sm:$0xff]   ;;  %v4015_v36 = vld [vmem:[%s4769_s9 + $0x34] ss:$72 sps:$4 sm:$0xff]  }
  0xfd   : > { %2536 = vmatpush1.bf16.msra.mxu0 %v3812_v16  ;;  %2325 = vmatprep.subr.bf16.mxu1 %v3817_v17  ;;  %v3908_v16 = vld [vmem:[%s4777_s26 + $0x600] ss:$8 sps:$4 sm:$0xff]   ;;  %v3913_v17 = vld [vmem:[%s4777_s26 + $0x214] ss:$8 sps:$4 sm:$0xff]  }
  0xfe   : > { %2537 = vmatprep.subr.bf16.mxu0 %v3820_v18  ;;  %2351 = vmatprep.mubr.bf16.mxu1 %v3901_v41  ;;  %v3916_v18 = vld [vmem:[%s4777_s26 + $0x614] ss:$8 sps:$4 sm:$0xff]   ;;  %v3935_v41 = vld [vmem:[%s4777_s26 + $0x250] ss:$8 sps:$4 sm:$0xff]  }
  0xff   : > { %2563 = vmatprep.mubr.bf16.mxu0 %v3907_v44  ;;  %v3946_v44 = vld [vmem:[%s4777_s26 + $0x664] ss:$8 sps:$4 sm:$0xff]  }
 0x100   : > { %2326 = vmatpush1.bf16.msra.mxu1 %v3815_v19  ;;  %v3911_v19 = vld [vmem:[%s4777_s26 + $0x210] ss:$8 sps:$4 sm:$0xff]  }
 0x101   : > { %2538 = vmatpush1.bf16.msra.mxu0 %v3818_v20  ;;  %2327 = vmatprep.subr.bf16.mxu1 %v3823_v21  ;;  %v3914_v20 = vld [vmem:[%s4777_s26 + $0x610] ss:$8 sps:$4 sm:$0xff]   ;;  %v3989_v21 = vld [vmem:[%s4769_s9 + $0x9c] ss:$72 sps:$4 sm:$0xff]  }
 0x102   : > { %2539 = vmatprep.subr.bf16.mxu0 %v3826_v22  ;;  %v3919_v22 = vld [vmem:[%s4777_s26 + $0x224] ss:$8 sps:$4 sm:$0xff]  }
 0x104   : > { %2328 = vmatpush1.bf16.msra.mxu1 %v3821_v23  ;;  %v3922_v23 = vld [vmem:[%s4777_s26 + $0x624] ss:$8 sps:$4 sm:$0xff]  }
 0x105   : > { %2540 = vmatpush1.bf16.msra.mxu0 %v3824_v24  ;;  %2329 = vmatprep.subr.bf16.mxu1 %v3829_v25  ;;  %v3994_v24 = vld [vmem:[%s4769_s9 + $0xbc] ss:$72 sps:$4 sm:$0xff]   ;;  %v3917_v25 = vld [vmem:[%s4777_s26 + $0x220] ss:$8 sps:$4 sm:$0xff]  }
 0x106   : > { %2541 = vmatprep.subr.bf16.mxu0 %v3832_v26  ;;  %v3920_v26 = vld [vmem:[%s4777_s26 + $0x620] ss:$8 sps:$4 sm:$0xff]  }
 0x108   : > { %2330 = vmatpush1.bf16.msra.mxu1 %v3827_v27  ;;  %v3999_v27 = vld [vmem:[%s4769_s9 + $0x98] ss:$72 sps:$4 sm:$0xff]  }
 0x109   : > { %2542 = vmatpush1.bf16.msra.mxu0 %v3830_v28  ;;  %2331 = vmatprep.subr.bf16.mxu1 %v3835_v30  ;;  %v4000_v28 = vld [vmem:[%s4769_s9 + $0xb8] ss:$72 sps:$4 sm:$0xff]   ;;  %v3928_v30 = vld [vmem:[%s4777_s26 + $0x634] ss:$8 sps:$4 sm:$0xff]  }
 0x10a   : > { %2543 = vmatprep.subr.bf16.mxu0 %v3838_v31  ;;  %v3923_v31 = vld [vmem:[%s4777_s26 + $0x230] ss:$8 sps:$4 sm:$0xff]  }
 0x10c   : > { %2332 = vmatpush1.bf16.msra.mxu1 %v3833_v33  ;;  %v4009_v33 = vld [vmem:[%s4769_s9 + $0x14] ss:$72 sps:$4 sm:$0xff]  }
 0x10d   : > { %2544 = vmatpush1.bf16.msra.mxu0 %v3836_v34  ;;  %2333 = vmatprep.subr.bf16.mxu1 %v3841_v37  ;;  %v3931_v34 = vld [vmem:[%s4777_s26 + $0x244] ss:$8 sps:$4 sm:$0xff]   ;;  %v3929_v37 = vld [vmem:[%s4777_s26 + $0x240] ss:$8 sps:$4 sm:$0xff]  }
 0x10e   : > { %2545 = vmatprep.subr.bf16.mxu0 %v3844_v38  ;;  %v3932_v38 = vld [vmem:[%s4777_s26 + $0x640] ss:$8 sps:$4 sm:$0xff]  }
 0x110   : > { %2334 = vmatpush1.bf16.msra.mxu1 %v3839_v39  ;;  %v3937_v39 = vld [vmem:[%s4777_s26 + $0x254] ss:$8 sps:$4 sm:$0xff]  }
 0x111   : > { %2546 = vmatpush1.bf16.msra.mxu0 %v3842_v40  ;;  %2335 = vmatprep.subr.bf16.mxu1 %v3847_v42  ;;  %v3940_v40 = vld [vmem:[%s4777_s26 + $0x654] ss:$8 sps:$4 sm:$0xff]   ;;  %v3938_v42 = vld [vmem:[%s4777_s26 + $0x650] ss:$8 sps:$4 sm:$0xff]  }
 0x112   : > { %2547 = vmatprep.subr.bf16.mxu0 %v3850_v43  ;;  %v3943_v43 = vld [vmem:[%s4777_s26 + $0x264] ss:$8 sps:$4 sm:$0xff]  }
 0x114   : > { %2336 = vmatpush1.bf16.msra.mxu1 %v3845_v45  ;;  %v3941_v45 = vld [vmem:[%s4777_s26 + $0x260] ss:$8 sps:$4 sm:$0xff]  }
 0x115   : > { %2548 = vmatpush1.bf16.msra.mxu0 %v3848_v46  ;;  %2337 = vmatprep.subr.bf16.mxu1 %v3853_v47  ;;  %v3944_v46 = vld [vmem:[%s4777_s26 + $0x660] ss:$8 sps:$4 sm:$0xff]   ;;  %v3949_v47 = vld [vmem:[%s4777_s26 + $0x274] ss:$8 sps:$4 sm:$0xff]  }
 0x116   : > { %2549 = vmatprep.subr.bf16.mxu0 %v3856_v48  ;;  %v3952_v48 = vld [vmem:[%s4777_s26 + $0x674] ss:$8 sps:$4 sm:$0xff]  }
 0x118   : > { %2338 = vmatpush1.bf16.msra.mxu1 %v3851_v49  ;;  %v3947_v49 = vld [vmem:[%s4777_s26 + $0x270] ss:$8 sps:$4 sm:$0xff]  }
 0x119   : > { %2550 = vmatpush1.bf16.msra.mxu0 %v3854_v50  ;;  %2339 = vmatprep.subr.bf16.mxu1 %v3859_v51  ;;  %v3950_v50 = vld [vmem:[%s4777_s26 + $0x670] ss:$8 sps:$4 sm:$0xff]   ;;  %v3955_v51 = vld [vmem:[%s4777_s26 + $0x284] ss:$8 sps:$4 sm:$0xff]  }
 0x11a   : > { %2551 = vmatprep.subr.bf16.mxu0 %v3862_v52  ;;  %v3958_v52 = vld [vmem:[%s4777_s26 + $0x684] ss:$8 sps:$4 sm:$0xff]  }
 0x11c   : > { %2340 = vmatpush1.bf16.msra.mxu1 %v3857_v53  ;;  %v3953_v53 = vld [vmem:[%s4777_s26 + $0x280] ss:$8 sps:$4 sm:$0xff]  }
 0x11d   : > { %2552 = vmatpush1.bf16.msra.mxu0 %v3860_v54  ;;  %2341 = vmatprep.subr.bf16.mxu1 %v3865_v55  ;;  %v3956_v54 = vld [vmem:[%s4777_s26 + $0x680] ss:$8 sps:$4 sm:$0xff]   ;;  %v3961_v55 = vld [vmem:[%s4777_s26 + $0x294] ss:$8 sps:$4 sm:$0xff]  }
 0x11e   : > { %2553 = vmatprep.subr.bf16.mxu0 %v3868_v56  ;;  %v3964_v56 = vld [vmem:[%s4777_s26 + $0x694] ss:$8 sps:$4 sm:$0xff]  }
 0x120   : > { %2342 = vmatpush1.bf16.msra.mxu1 %v3863_v57  ;;  %v3959_v57 = vld [vmem:[%s4777_s26 + $0x290] ss:$8 sps:$4 sm:$0xff]  }
 0x121   : > { %2554 = vmatpush1.bf16.msra.mxu0 %v3866_v58  ;;  %2343 = vmatprep.subr.bf16.mxu1 %v3871_v59  ;;  %v3962_v58 = vld [vmem:[%s4777_s26 + $0x690] ss:$8 sps:$4 sm:$0xff]   ;;  %v3967_v59 = vld [vmem:[%s4777_s26 + $0x2a4] ss:$8 sps:$4 sm:$0xff]  }
 0x122   : > { %2555 = vmatprep.subr.bf16.mxu0 %v3874_v60  ;;  %v3970_v60 = vld [vmem:[%s4777_s26 + $0x6a4] ss:$8 sps:$4 sm:$0xff]  }
 0x124   : > { %2344 = vmatpush1.bf16.msra.mxu1 %v3869_v61  ;;  %v3965_v61 = vld [vmem:[%s4777_s26 + $0x2a0] ss:$8 sps:$4 sm:$0xff]  }
 0x125   : > { %2556 = vmatpush1.bf16.msra.mxu0 %v3872_v62  ;;  %2345 = vmatprep.subr.bf16.mxu1 %v3877_v63  ;;  %v3968_v62 = vld [vmem:[%s4777_s26 + $0x6a0] ss:$8 sps:$4 sm:$0xff]   ;;  %v3973_v63 = vld [vmem:[%s4777_s26 + $0x2b4] ss:$8 sps:$4 sm:$0xff]  }
 0x126   : > { %2557 = vmatprep.subr.bf16.mxu0 %v3880_v0  ;;  %v3976_v0 = vld [vmem:[%s4777_s26 + $0x6b4] ss:$8 sps:$4 sm:$0xff]  }
 0x128   : > { %2346 = vmatpush1.bf16.msra.mxu1 %v3875_v1  ;;  %v3971_v1 = vld [vmem:[%s4777_s26 + $0x2b0] ss:$8 sps:$4 sm:$0xff]  }
 0x129   : > { %2558 = vmatpush1.bf16.msra.mxu0 %v3878_v2  ;;  %2347 = vmatprep.subr.bf16.mxu1 %v3885_v3  ;;  %v3974_v2 = vld [vmem:[%s4777_s26 + $0x6b0] ss:$8 sps:$4 sm:$0xff]   ;;  %v3979_v3 = vld [vmem:[%s4777_s26 + $0x2c4] ss:$8 sps:$4 sm:$0xff]  }
 0x12a   : > { %2559 = vmatprep.subr.bf16.mxu0 %v3890_v4  ;;  %v3982_v4 = vld [vmem:[%s4777_s26 + $0x6c4] ss:$8 sps:$4 sm:$0xff]  }
 0x12c   : > { %2348 = vmatpush1.bf16.msra.mxu1 %v3883_v5  ;;  %v3977_v5 = vld [vmem:[%s4777_s26 + $0x2c0] ss:$8 sps:$4 sm:$0xff]  }
 0x12d   : > { %2560 = vmatpush1.bf16.msra.mxu0 %v3888_v6  ;;  %2349 = vmatprep.subr.bf16.mxu1 %v3895_v7  ;;  %v3980_v6 = vld [vmem:[%s4777_s26 + $0x6c0] ss:$8 sps:$4 sm:$0xff]   ;;  %v3985_v7 = vld [vmem:[%s4777_s26 + $0x2d4] ss:$8 sps:$4 sm:$0xff]  }
 0x12e   : > { %2561 = vmatprep.subr.bf16.mxu0 %v3898_v8  ;;  %v3988_v8 = vld [vmem:[%s4777_s26 + $0x6d4] ss:$8 sps:$4 sm:$0xff]  }
 0x130   : > { %2350 = vmatpush1.bf16.msra.mxu1 %v3893_v9  ;;  %v3983_v9 = vld [vmem:[%s4777_s26 + $0x2d0] ss:$8 sps:$4 sm:$0xff]  }
 0x131   : > { %2562 = vmatpush1.bf16.msra.mxu0 %v3896_v10  ;;  %2372 = vmatprep.subr.bf16.mxu1 %v3904_v11  ;;  %v3986_v10 = vld [vmem:[%s4777_s26 + $0x6d0] ss:$8 sps:$4 sm:$0xff]   ;;  %v3993_v11 = vld [vmem:[%s4777_s26 + $0x2e4] ss:$8 sps:$4 sm:$0xff]  }
 0x132   : > { %2584 = vmatprep.subr.bf16.mxu0 %v3910_v12  ;;  %v3998_v12 = vld [vmem:[%s4777_s26 + $0x6e4] ss:$8 sps:$4 sm:$0xff]  }
 0x133   : > { %2352 = vmatmul.mubr.bf16.vlgmr.msra.gmra.mrb[0].mxu1 %v3899_v13  ;;  %v3991_v13 = vld [vmem:[%s4777_s26 + $0x2e0] ss:$8 sps:$4 sm:$0xff]  }
 0x134   : > { %2564 = vmatmul.mubr.bf16.vlgmr.msra.gmra.mrb[0].mxu0 %v3905_v15  ;;  %2373 = vmatpush1.bf16.msra.mxu1 %v3902_v14  ;;  %v3996_v14 = vld [vmem:[%s4777_s26 + $0x6e0] ss:$8 sps:$4 sm:$0xff]   ;;  %v4003_v15 = vld [vmem:[%s4777_s26 + $0x2f4] ss:$8 sps:$4 sm:$0xff]  }
 0x135   : > { %2585 = vmatpush1.bf16.msra.mxu0 %v3908_v16  ;;  %2374 = vmatprep.subr.bf16.mxu1 %v3913_v17  ;;  %v4006_v16 = vld [vmem:[%s4777_s26 + $0x6f4] ss:$8 sps:$4 sm:$0xff]   ;;  %v4001_v17 = vld [vmem:[%s4777_s26 + $0x2f0] ss:$8 sps:$4 sm:$0xff]  }
 0x136   : > { %2586 = vmatprep.subr.bf16.mxu0 %v3916_v18  ;;  %2361 = vmatprep.mubr.bf16.mxu1 %v3989_v21  ;;  %v4004_v18 = vld [vmem:[%s4777_s26 + $0x6f0] ss:$8 sps:$4 sm:$0xff]  }
 0x137   : > { %2573 = vmatprep.mubr.bf16.mxu0 %v3994_v24  ;;  %v4007_v21 = vld [vmem:[%s4769_s9 + $0x10] ss:$72 sps:$4 sm:$0xff]   ;;  %v4016_v24 = vld [vmem:[%s4777_s26 + $0x700] ss:$8 sps:$4 sm:$0xff]  }
 0x138   : > { %2375 = vmatpush1.bf16.msra.mxu1 %v3911_v19  ;;  %v4012_v19 = vld [vmem:[%s4777_s26 + $0x304] ss:$8 sps:$4 sm:$0xff]  }
 0x139   : > { %2587 = vmatpush1.bf16.msra.mxu0 %v3914_v20  ;;  %2376 = vmatprep.subr.bf16.mxu1 %v3919_v22  ;;  %v4018_v20 = vld [vmem:[%s4777_s26 + $0x704] ss:$8 sps:$4 sm:$0xff]   ;;  %v4010_v22 = vld [vmem:[%s4777_s26 + $0x300] ss:$8 sps:$4 sm:$0xff]  }
 0x13a   : > { %2588 = vmatprep.subr.bf16.mxu0 %v3922_v23  ;;  %v4013_v23 = vld [vmem:[%s4769_s9 + $0x30] ss:$72 sps:$4 sm:$0xff]  }
 0x13b   : > { %2362 = vmatmul.mubr.bf16.gmra.mrb[4].mxu1 %v3999_v27  ;;  %v4097_v27 = vld [vmem:[%s4769_s9 + $0xa4] ss:$72 sps:$4 sm:$0xff]  }
 0x13c   : > { %2574 = vmatmul.mubr.bf16.gmra.mrb[4].mxu0 %v4000_v28  ;;  %2377 = vmatpush1.bf16.msra.mxu1 %v3917_v25  ;;  %v4021_v25 = vld [vmem:[%s4777_s26 + $0x314] ss:$8 sps:$4 sm:$0xff]   ;;  %v4099_v28 = vld [vmem:[%s4769_s9 + $0xc4] ss:$72 sps:$4 sm:$0xff]  }
 0x13d   : > { %2589 = vmatpush1.bf16.msra.mxu0 %v3920_v26  ;;  %2378 = vmatprep.subr.bf16.mxu1 %v3925_v29  ;;  %v4024_v26 = vld [vmem:[%s4777_s26 + $0x714] ss:$8 sps:$4 sm:$0xff]   ;;  %v4019_v29 = vld [vmem:[%s4777_s26 + $0x310] ss:$8 sps:$4 sm:$0xff]  }
 0x13e   : > { %2590 = vmatprep.subr.bf16.mxu0 %v3928_v30  ;;  %2404 = vmatprep.mubr.bf16.mxu1 %v4009_v33  ;;  %v4022_v30 = vld [vmem:[%s4777_s26 + $0x710] ss:$8 sps:$4 sm:$0xff]   ;;  %v4025_v33 = vld [vmem:[%s4777_s26 + $0x320] ss:$8 sps:$4 sm:$0xff]  }
 0x13f   : > { %2616 = vmatprep.mubr.bf16.mxu0 %v4015_v36  ;;  %v4105_v36 = vld [vmem:[%s4769_s9 + $0xc0] ss:$72 sps:$4 sm:$0xff]  }
 0x140   : > { %2379 = vmatpush1.bf16.msra.mxu1 %v3923_v31  ;;  %v4027_v31 = vld [vmem:[%s4777_s26 + $0x324] ss:$8 sps:$4 sm:$0xff]  }
 0x141   : > { %2591 = vmatpush1.bf16.msra.mxu0 %v3926_v32  ;;  %2380 = vmatprep.subr.bf16.mxu1 %v3931_v34  ;;  %v4030_v32 = vld [vmem:[%s4777_s26 + $0x724] ss:$8 sps:$4 sm:$0xff]   ;;  %v4028_v34 = vld [vmem:[%s4777_s26 + $0x720] ss:$8 sps:$4 sm:$0xff]  }
 0x142   : > { %2592 = vmatprep.subr.bf16.mxu0 %v3934_v35  ;;  %v4101_v35 = vld [vmem:[%s4769_s9 + $0xa0] ss:$72 sps:$4 sm:$0xff]  }
 0x144   : > { %2381 = vmatpush1.bf16.msra.mxu1 %v3929_v37  ;;  %v4033_v37 = vld [vmem:[%s4777_s26 + $0x334] ss:$8 sps:$4 sm:$0xff]  }
 0x145   : > { %2593 = vmatpush1.bf16.msra.mxu0 %v3932_v38  ;;  %2382 = vmatprep.subr.bf16.mxu1 %v3937_v39  ;;  %v4036_v38 = vld [vmem:[%s4777_s26 + $0x734] ss:$8 sps:$4 sm:$0xff]  }
 0x146   : > { %2594 = vmatprep.subr.bf16.mxu0 %v3940_v40  ;;  %v4117_v39 = vld [vmem:[%s4769_s9 + $0x1c] ss:$72 sps:$4 sm:$0xff]  }
 0x147   : > { %v4120_v40 = vld [vmem:[%s4769_s9 + $0x3c] ss:$72 sps:$4 sm:$0xff]  }
 0x148   : > { %2383 = vmatpush1.bf16.msra.mxu1 %v3935_v41  ;;  %v4031_v41 = vld [vmem:[%s4777_s26 + $0x330] ss:$8 sps:$4 sm:$0xff]  }
 0x149   : > { %2595 = vmatpush1.bf16.msra.mxu0 %v3938_v42  ;;  %2384 = vmatprep.subr.bf16.mxu1 %v3943_v43  ;;  %v4034_v42 = vld [vmem:[%s4777_s26 + $0x730] ss:$8 sps:$4 sm:$0xff]   ;;  %v4039_v43 = vld [vmem:[%s4777_s26 + $0x344] ss:$8 sps:$4 sm:$0xff]  }
 0x14a   : > { %2596 = vmatprep.subr.bf16.mxu0 %v3946_v44  ;;  %v4042_v44 = vld [vmem:[%s4777_s26 + $0x744] ss:$8 sps:$4 sm:$0xff]  }
 0x14c   : > { %2385 = vmatpush1.bf16.msra.mxu1 %v3941_v45  ;;  %v4037_v45 = vld [vmem:[%s4777_s26 + $0x340] ss:$8 sps:$4 sm:$0xff]  }
 0x14d   : > { %2597 = vmatpush1.bf16.msra.mxu0 %v3944_v46  ;;  %2386 = vmatprep.subr.bf16.mxu1 %v3949_v47  ;;  %v4040_v46 = vld [vmem:[%s4777_s26 + $0x740] ss:$8 sps:$4 sm:$0xff]   ;;  %v4045_v47 = vld [vmem:[%s4777_s26 + $0x354] ss:$8 sps:$4 sm:$0xff]  }
 0x14e   : > { %2598 = vmatprep.subr.bf16.mxu0 %v3952_v48  ;;  %v4048_v48 = vld [vmem:[%s4777_s26 + $0x754] ss:$8 sps:$4 sm:$0xff]  }
 0x150   : > { %2387 = vmatpush1.bf16.msra.mxu1 %v3947_v49  ;;  %v4043_v49 = vld [vmem:[%s4777_s26 + $0x350] ss:$8 sps:$4 sm:$0xff]  }
 0x151   : > { %2599 = vmatpush1.bf16.msra.mxu0 %v3950_v50  ;;  %2388 = vmatprep.subr.bf16.mxu1 %v3955_v51  ;;  %v4046_v50 = vld [vmem:[%s4777_s26 + $0x750] ss:$8 sps:$4 sm:$0xff]   ;;  %v4051_v51 = vld [vmem:[%s4777_s26 + $0x364] ss:$8 sps:$4 sm:$0xff]  }
 0x152   : > { %2600 = vmatprep.subr.bf16.mxu0 %v3958_v52  ;;  %v4054_v52 = vld [vmem:[%s4777_s26 + $0x764] ss:$8 sps:$4 sm:$0xff]  }
 0x154   : > { %2389 = vmatpush1.bf16.msra.mxu1 %v3953_v53  ;;  %v4049_v53 = vld [vmem:[%s4777_s26 + $0x360] ss:$8 sps:$4 sm:$0xff]  }
 0x155   : > { %2601 = vmatpush1.bf16.msra.mxu0 %v3956_v54  ;;  %2390 = vmatprep.subr.bf16.mxu1 %v3961_v55  ;;  %v4052_v54 = vld [vmem:[%s4777_s26 + $0x760] ss:$8 sps:$4 sm:$0xff]   ;;  %v4057_v55 = vld [vmem:[%s4777_s26 + $0x374] ss:$8 sps:$4 sm:$0xff]  }
 0x156   : > { %2602 = vmatprep.subr.bf16.mxu0 %v3964_v56  ;;  %v4060_v56 = vld [vmem:[%s4777_s26 + $0x774] ss:$8 sps:$4 sm:$0xff]  }
 0x158   : > { %2391 = vmatpush1.bf16.msra.mxu1 %v3959_v57  ;;  %v4055_v57 = vld [vmem:[%s4777_s26 + $0x370] ss:$8 sps:$4 sm:$0xff]  }
 0x159   : > { %2603 = vmatpush1.bf16.msra.mxu0 %v3962_v58  ;;  %2392 = vmatprep.subr.bf16.mxu1 %v3967_v59  ;;  %v4058_v58 = vld [vmem:[%s4777_s26 + $0x770] ss:$8 sps:$4 sm:$0xff]   ;;  %v4063_v59 = vld [vmem:[%s4777_s26 + $0x384] ss:$8 sps:$4 sm:$0xff]  }
 0x15a   : > { %2604 = vmatprep.subr.bf16.mxu0 %v3970_v60  ;;  %v4066_v60 = vld [vmem:[%s4777_s26 + $0x784] ss:$8 sps:$4 sm:$0xff]  }
 0x15c   : > { %2393 = vmatpush1.bf16.msra.mxu1 %v3965_v61  ;;  %v4061_v61 = vld [vmem:[%s4777_s26 + $0x380] ss:$8 sps:$4 sm:$0xff]  }
 0x15d   : > { %2605 = vmatpush1.bf16.msra.mxu0 %v3968_v62  ;;  %2394 = vmatprep.subr.bf16.mxu1 %v3973_v63  ;;  %v4064_v62 = vld [vmem:[%s4777_s26 + $0x780] ss:$8 sps:$4 sm:$0xff]   ;;  %v4069_v63 = vld [vmem:[%s4777_s26 + $0x394] ss:$8 sps:$4 sm:$0xff]  }
 0x15e   : > { %2606 = vmatprep.subr.bf16.mxu0 %v3976_v0  ;;  %v4072_v0 = vld [vmem:[%s4777_s26 + $0x794] ss:$8 sps:$4 sm:$0xff]  }
 0x160   : > { %2395 = vmatpush1.bf16.msra.mxu1 %v3971_v1  ;;  %v4067_v1 = vld [vmem:[%s4777_s26 + $0x390] ss:$8 sps:$4 sm:$0xff]  }
 0x161   : > { %2607 = vmatpush1.bf16.msra.mxu0 %v3974_v2  ;;  %2396 = vmatprep.subr.bf16.mxu1 %v3979_v3  ;;  %v4070_v2 = vld [vmem:[%s4777_s26 + $0x790] ss:$8 sps:$4 sm:$0xff]   ;;  %v4075_v3 = vld [vmem:[%s4777_s26 + $0x3a4] ss:$8 sps:$4 sm:$0xff]  }
 0x162   : > { %2608 = vmatprep.subr.bf16.mxu0 %v3982_v4  ;;  %v4078_v4 = vld [vmem:[%s4777_s26 + $0x7a4] ss:$8 sps:$4 sm:$0xff]  }
 0x164   : > { %2397 = vmatpush1.bf16.msra.mxu1 %v3977_v5  ;;  %v4073_v5 = vld [vmem:[%s4777_s26 + $0x3a0] ss:$8 sps:$4 sm:$0xff]  }
 0x165   : > { %2609 = vmatpush1.bf16.msra.mxu0 %v3980_v6  ;;  %2398 = vmatprep.subr.bf16.mxu1 %v3985_v7  ;;  %v4076_v6 = vld [vmem:[%s4777_s26 + $0x7a0] ss:$8 sps:$4 sm:$0xff]   ;;  %v4081_v7 = vld [vmem:[%s4777_s26 + $0x3b4] ss:$8 sps:$4 sm:$0xff]  }
 0x166   : > { %2610 = vmatprep.subr.bf16.mxu0 %v3988_v8  ;;  %v4084_v8 = vld [vmem:[%s4777_s26 + $0x7b4] ss:$8 sps:$4 sm:$0xff]  }
 0x168   : > { %2399 = vmatpush1.bf16.msra.mxu1 %v3983_v9  ;;  %v4079_v9 = vld [vmem:[%s4777_s26 + $0x3b0] ss:$8 sps:$4 sm:$0xff]  }
 0x169   : > { %2611 = vmatpush1.bf16.msra.mxu0 %v3986_v10  ;;  %2400 = vmatprep.subr.bf16.mxu1 %v3993_v11  ;;  %v4082_v10 = vld [vmem:[%s4777_s26 + $0x7b0] ss:$8 sps:$4 sm:$0xff]   ;;  %v4087_v11 = vld [vmem:[%s4777_s26 + $0x3c4] ss:$8 sps:$4 sm:$0xff]  }
 0x16a   : > { %2612 = vmatprep.subr.bf16.mxu0 %v3998_v12  ;;  %v4090_v12 = vld [vmem:[%s4777_s26 + $0x7c4] ss:$8 sps:$4 sm:$0xff]  }
 0x16c   : > { %2401 = vmatpush1.bf16.msra.mxu1 %v3991_v13  ;;  %v4085_v13 = vld [vmem:[%s4777_s26 + $0x3c0] ss:$8 sps:$4 sm:$0xff]  }
 0x16d   : > { %2613 = vmatpush1.bf16.msra.mxu0 %v3996_v14  ;;  %2402 = vmatprep.subr.bf16.mxu1 %v4003_v15  ;;  %v4088_v14 = vld [vmem:[%s4777_s26 + $0x7c0] ss:$8 sps:$4 sm:$0xff]   ;;  %v4093_v15 = vld [vmem:[%s4777_s26 + $0x3d4] ss:$8 sps:$4 sm:$0xff]  }
 0x16e   : > { %2614 = vmatprep.subr.bf16.mxu0 %v4006_v16  ;;  %v4096_v16 = vld [vmem:[%s4777_s26 + $0x7d4] ss:$8 sps:$4 sm:$0xff]  }
 0x170   : > { %2403 = vmatpush1.bf16.msra.mxu1 %v4001_v17  ;;  %v4091_v17 = vld [vmem:[%s4777_s26 + $0x3d0] ss:$8 sps:$4 sm:$0xff]  }
 0x171   : > { %2615 = vmatpush1.bf16.msra.mxu0 %v4004_v18  ;;  %2425 = vmatprep.subr.bf16.mxu1 %v4012_v19  ;;  %v4094_v18 = vld [vmem:[%s4777_s26 + $0x7d0] ss:$8 sps:$4 sm:$0xff]   ;;  %v4104_v19 = vld [vmem:[%s4777_s26 + $0x3e4] ss:$8 sps:$4 sm:$0xff]  }
 0x172   : > { %2637 = vmatprep.subr.bf16.mxu0 %v4018_v20  ;;  %v4108_v20 = vld [vmem:[%s4777_s26 + $0x7e4] ss:$8 sps:$4 sm:$0xff]  }
 0x173   : > { %2405 = vmatmul.mubr.bf16.vlgmr.msra.gmra.mrb[0].mxu1 %v4007_v21  ;;  %v4102_v21 = vld [vmem:[%s4777_s26 + $0x3e0] ss:$8 sps:$4 sm:$0xff]  }
 0x174   : > { %2617 = vmatmul.mubr.bf16.vlgmr.msra.gmra.mrb[0].mxu0 %v4013_v23  ;;  %2426 = vmatpush1.bf16.msra.mxu1 %v4010_v22  ;;  %v4106_v22 = vld [vmem:[%s4777_s26 + $0x7e0] ss:$8 sps:$4 sm:$0xff]   ;;  %v4111_v23 = vld [vmem:[%s4777_s26 + $0x3f4] ss:$8 sps:$4 sm:$0xff]  }
 0x175   : > { %2638 = vmatpush1.bf16.msra.mxu0 %v4016_v24  ;;  %2427 = vmatprep.subr.bf16.mxu1 %v4021_v25  ;;  %v4114_v24 = vld [vmem:[%s4777_s26 + $0x7f4] ss:$8 sps:$4 sm:$0xff]   ;;  %v4109_v25 = vld [vmem:[%s4777_s26 + $0x3f0] ss:$8 sps:$4 sm:$0xff]  }
 0x176   : > { %2639 = vmatprep.subr.bf16.mxu0 %v4024_v26  ;;  %2414 = vmatprep.mubr.bf16.mxu1 %v4097_v27  ;;  %v4112_v26 = vld [vmem:[%s4777_s26 + $0x7f0] ss:$8 sps:$4 sm:$0xff]   ;;  %v4123_v27 = vld [vmem:[%s4777_s26 + $0x804] ss:$8 sps:$4 sm:$0xff]  }
 0x177   : > { %2626 = vmatprep.mubr.bf16.mxu0 %v4099_v28  ;;  %v4115_v28 = vld [vmem:[%s4769_s9 + $0x18] ss:$72 sps:$4 sm:$0xff]  }
 0x178   : > { %2428 = vmatpush1.bf16.msra.mxu1 %v4019_v29  ;;  %v4118_v29 = vld [vmem:[%s4769_s9 + $0x38] ss:$72 sps:$4 sm:$0xff]  }
 0x179   : > { %2640 = vmatpush1.bf16.msra.mxu0 %v4022_v30  ;;  %2429 = vmatprep.subr.bf16.mxu1 %v4027_v31  ;;  %v4121_v30 = vld [vmem:[%s4777_s26 + $0x800] ss:$8 sps:$4 sm:$0xff]   ;;  %v4126_v31 = vld [vmem:[%s4777_s26 + $0x814] ss:$8 sps:$4 sm:$0xff]  }
 0x17a   : > { %2641 = vmatprep.subr.bf16.mxu0 %v4030_v32  ;;  %v4127_v32 = vld [vmem:[%s4769_s9 + $0xac] ss:$72 sps:$4 sm:$0xff]  }
 0x17b   : > { %2415 = vmatmul.mubr.bf16.gmra.mrb[4].mxu1 %v4101_v35  ;;  %v4135_v35 = vld [vmem:[%s4777_s26 + $0x824] ss:$8 sps:$4 sm:$0xff]  }
 0x17c   : > { %2627 = vmatmul.mubr.bf16.gmra.mrb[4].mxu0 %v4105_v36  ;;  %2430 = vmatpush1.bf16.msra.mxu1 %v4025_v33  ;;  %v4129_v33 = vld [vmem:[%s4769_s9 + $0xcc] ss:$72 sps:$4 sm:$0xff]   ;;  %v4131_v36 = vld [vmem:[%s4769_s9 + $0xa8] ss:$72 sps:$4 sm:$0xff]  }
 0x17d   : > { %2642 = vmatpush1.bf16.msra.mxu0 %v4028_v34  ;;  %2431 = vmatprep.subr.bf16.mxu1 %v4033_v37  ;;  %v4124_v34 = vld [vmem:[%s4777_s26 + $0x810] ss:$8 sps:$4 sm:$0xff]  }
 0x17e   : > { %2643 = vmatprep.subr.bf16.mxu0 %v4036_v38  ;;  %2457 = vmatprep.mubr.bf16.mxu1 %v4117_v39  ;;  %v4132_v37 = vld [vmem:[%s4769_s9 + $0xc8] ss:$72 sps:$4 sm:$0xff]   ;;  %v4138_v39 = vld [vmem:[%s4777_s26 + $0x834] ss:$8 sps:$4 sm:$0xff]  }
 0x17f   : > { %2669 = vmatprep.mubr.bf16.mxu0 %v4120_v40  ;;  %v4133_v38 = vld [vmem:[%s4777_s26 + $0x820] ss:$8 sps:$4 sm:$0xff]   ;;  %v4177_v40 = vld [vmem:[%s4769_s9 + $0x44] ss:$72 sps:$4 sm:$0xff]  }
 0x180   : > { %2432 = vmatpush1.bf16.msra.mxu1 %v4031_v41  ;;  %v4180_v41 = vld [vmem:[%s4769_s9 + $0xd4] ss:$72 sps:$4 sm:$0xff]  }
 0x181   : > { %2644 = vmatpush1.bf16.msra.mxu0 %v4034_v42  ;;  %2433 = vmatprep.subr.bf16.mxu1 %v4039_v43  ;;  %v4136_v42 = vld [vmem:[%s4777_s26 + $0x830] ss:$8 sps:$4 sm:$0xff]   ;;  %v4141_v43 = vld [vmem:[%s4777_s26 + $0x844] ss:$8 sps:$4 sm:$0xff]  }
 0x182   : > { %2645 = vmatprep.subr.bf16.mxu0 %v4042_v44  ;;  %v4139_v44 = vld [vmem:[%s4777_s26 + $0x840] ss:$8 sps:$4 sm:$0xff]  }
 0x184   : > { %2434 = vmatpush1.bf16.msra.mxu1 %v4037_v45  ;;  %v4144_v45 = vld [vmem:[%s4777_s26 + $0x854] ss:$8 sps:$4 sm:$0xff]  }
 0x185   : > { %2646 = vmatpush1.bf16.msra.mxu0 %v4040_v46  ;;  %2435 = vmatprep.subr.bf16.mxu1 %v4045_v47  ;;  %v4142_v46 = vld [vmem:[%s4777_s26 + $0x850] ss:$8 sps:$4 sm:$0xff]   ;;  %v4147_v47 = vld [vmem:[%s4777_s26 + $0x864] ss:$8 sps:$4 sm:$0xff]  }
 0x186   : > { %2647 = vmatprep.subr.bf16.mxu0 %v4048_v48  ;;  %v4145_v48 = vld [vmem:[%s4777_s26 + $0x860] ss:$8 sps:$4 sm:$0xff]  }
 0x188   : > { %2436 = vmatpush1.bf16.msra.mxu1 %v4043_v49  ;;  %v4150_v49 = vld [vmem:[%s4777_s26 + $0x874] ss:$8 sps:$4 sm:$0xff]  }
 0x189   : > { %2648 = vmatpush1.bf16.msra.mxu0 %v4046_v50  ;;  %2437 = vmatprep.subr.bf16.mxu1 %v4051_v51  ;;  %v4148_v50 = vld [vmem:[%s4777_s26 + $0x870] ss:$8 sps:$4 sm:$0xff]   ;;  %v4153_v51 = vld [vmem:[%s4777_s26 + $0x884] ss:$8 sps:$4 sm:$0xff]  }
 0x18a   : > { %2649 = vmatprep.subr.bf16.mxu0 %v4054_v52  ;;  %v4151_v52 = vld [vmem:[%s4777_s26 + $0x880] ss:$8 sps:$4 sm:$0xff]  }
 0x18c   : > { %2438 = vmatpush1.bf16.msra.mxu1 %v4049_v53  ;;  %v4156_v53 = vld [vmem:[%s4777_s26 + $0x894] ss:$8 sps:$4 sm:$0xff]  }
 0x18d   : > { %2650 = vmatpush1.bf16.msra.mxu0 %v4052_v54  ;;  %2439 = vmatprep.subr.bf16.mxu1 %v4057_v55  ;;  %v4154_v54 = vld [vmem:[%s4777_s26 + $0x890] ss:$8 sps:$4 sm:$0xff]   ;;  %v4159_v55 = vld [vmem:[%s4777_s26 + $0x8a4] ss:$8 sps:$4 sm:$0xff]  }
 0x18e   : > { %2651 = vmatprep.subr.bf16.mxu0 %v4060_v56  ;;  %v4157_v56 = vld [vmem:[%s4777_s26 + $0x8a0] ss:$8 sps:$4 sm:$0xff]  }
 0x190   : > { %2440 = vmatpush1.bf16.msra.mxu1 %v4055_v57  ;;  %v4162_v57 = vld [vmem:[%s4777_s26 + $0x8b4] ss:$8 sps:$4 sm:$0xff]  }
 0x191   : > { %2652 = vmatpush1.bf16.msra.mxu0 %v4058_v58  ;;  %2441 = vmatprep.subr.bf16.mxu1 %v4063_v59  ;;  %v4160_v58 = vld [vmem:[%s4777_s26 + $0x8b0] ss:$8 sps:$4 sm:$0xff]   ;;  %v4165_v59 = vld [vmem:[%s4777_s26 + $0x8c4] ss:$8 sps:$4 sm:$0xff]  }
 0x192   : > { %2653 = vmatprep.subr.bf16.mxu0 %v4066_v60  ;;  %v4163_v60 = vld [vmem:[%s4777_s26 + $0x8c0] ss:$8 sps:$4 sm:$0xff]  }
 0x194   : > { %2442 = vmatpush1.bf16.msra.mxu1 %v4061_v61  ;;  %v4168_v61 = vld [vmem:[%s4777_s26 + $0x8d4] ss:$8 sps:$4 sm:$0xff]  }
 0x195   : > { %2654 = vmatpush1.bf16.msra.mxu0 %v4064_v62  ;;  %2443 = vmatprep.subr.bf16.mxu1 %v4069_v63  ;;  %v4166_v62 = vld [vmem:[%s4777_s26 + $0x8d0] ss:$8 sps:$4 sm:$0xff]   ;;  %v4171_v63 = vld [vmem:[%s4777_s26 + $0x8e4] ss:$8 sps:$4 sm:$0xff]  }
 0x196   : > { %2655 = vmatprep.subr.bf16.mxu0 %v4072_v0  ;;  %v4169_v0 = vld [vmem:[%s4777_s26 + $0x8e0] ss:$8 sps:$4 sm:$0xff]  }
 0x198   : > { %2444 = vmatpush1.bf16.msra.mxu1 %v4067_v1  ;;  %v4174_v1 = vld [vmem:[%s4777_s26 + $0x8f4] ss:$8 sps:$4 sm:$0xff]  }
 0x199   : > { %2656 = vmatpush1.bf16.msra.mxu0 %v4070_v2  ;;  %2445 = vmatprep.subr.bf16.mxu1 %v4075_v3  ;;  %v4172_v2 = vld [vmem:[%s4777_s26 + $0x8f0] ss:$8 sps:$4 sm:$0xff]   ;;  %v4175_v3 = vld [vmem:[%s4769_s9 + $0x40] ss:$72 sps:$4 sm:$0xff]  }
 0x19a   : > { %2657 = vmatprep.subr.bf16.mxu0 %v4078_v4  ;;  %v4178_v4 = vld [vmem:[%s4769_s9 + $0xd0] ss:$72 sps:$4 sm:$0xff]  }
 0x19c   : > { %2446 = vmatpush1.bf16.msra.mxu1 %v4073_v5 }
 0x19d   : > { %2658 = vmatpush1.bf16.msra.mxu0 %v4076_v6  ;;  %2447 = vmatprep.subr.bf16.mxu1 %v4081_v7 }
 0x19e   : > { %2659 = vmatprep.subr.bf16.mxu0 %v4084_v8 }
 0x1a0   : > { %2448 = vmatpush1.bf16.msra.mxu1 %v4079_v9 }
 0x1a1   : > { %2660 = vmatpush1.bf16.msra.mxu0 %v4082_v10  ;;  %2449 = vmatprep.subr.bf16.mxu1 %v4087_v11 }
 0x1a2   : > { %2661 = vmatprep.subr.bf16.mxu0 %v4090_v12 }
 0x1a4   : > { %2450 = vmatpush1.bf16.msra.mxu1 %v4085_v13 }
 0x1a5   : > { %2662 = vmatpush1.bf16.msra.mxu0 %v4088_v14  ;;  %2451 = vmatprep.subr.bf16.mxu1 %v4093_v15 }
 0x1a6   : > { %2663 = vmatprep.subr.bf16.mxu0 %v4096_v16 }
 0x1a8   : > { %2452 = vmatpush1.bf16.msra.mxu1 %v4091_v17 }
 0x1a9   : > { %2664 = vmatpush1.bf16.msra.mxu0 %v4094_v18  ;;  %2453 = vmatprep.subr.bf16.mxu1 %v4104_v19 }
 0x1aa   : > { %2665 = vmatprep.subr.bf16.mxu0 %v4108_v20 }
 0x1ac   : > { %2454 = vmatpush1.bf16.msra.mxu1 %v4102_v21  ;;  %v314_v21 = vld [vmem:[#allocation2] sm:$0xff] }
 0x1ad   : > { %2666 = vmatpush1.bf16.msra.mxu0 %v4106_v22  ;;  %2455 = vmatprep.subr.bf16.mxu1 %v4111_v23  ;;  %v318_v23 = vld [vmem:[#allocation2 + $0x20] sm:$0xff] }
 0x1ae   : > { %2667 = vmatprep.subr.bf16.mxu0 %v4114_v24 }
 0x1b0   : > { %2456 = vmatpush1.bf16.msra.mxu1 %v4109_v25 }
 0x1b1   : > { %2668 = vmatpush1.bf16.msra.mxu0 %v4112_v26  ;;  %3449 = vmatprep.subr.bf16.mxu1 %v4123_v27 }
 0x1b2   : > { %2690 = vmatprep.subr.bf16.mxu0 %v4123_v27  ;;  %v315_v27 = vld [vmem:[#allocation2 + $0x8] sm:$0xff] }
 0x1b3   : > { %2458 = vmatmul.mubr.bf16.vlgmr.msra.gmra.mrb[0].mxu1 %v4115_v28 }
 0x1b4   : > { %2670 = vmatmul.mubr.bf16.vlgmr.msra.gmra.mrb[0].mxu0 %v4118_v29  ;;  %3465 = vmatpush1.bf16.msra.mxu1 %v4121_v30  ;;  %v319_v29 = vld [vmem:[#allocation2 + $0x28] sm:$0xff] }
 0x1b5   : > { %2691 = vmatpush1.bf16.msra.mxu0 %v4121_v30  ;;  %3450 = vmatprep.subr.bf16.mxu1 %v4126_v31 }
 0x1b6   : > { %2692 = vmatprep.subr.bf16.mxu0 %v4126_v31  ;;  %2467 = vmatprep.mubr.bf16.mxu1 %v4127_v32 }
 0x1b7   : > { %2679 = vmatprep.mubr.bf16.mxu0 %v4129_v33  ;;  %v316_v33 = vld [vmem:[#allocation2 + $0x10] sm:$0xff] }
 0x1b8   : > { %3466 = vmatpush1.bf16.msra.mxu1 %v4124_v34 }
 0x1b9   : > { %2693 = vmatpush1.bf16.msra.mxu0 %v4124_v34  ;;  %3451 = vmatprep.subr.bf16.mxu1 %v4135_v35 }
 0x1ba   : > { %2694 = vmatprep.subr.bf16.mxu0 %v4135_v35  ;;  %v320_v35 = vld [vmem:[#allocation2 + $0x30] sm:$0xff] }
 0x1bb   : > { %2468 = vmatmul.mubr.bf16.gmra.mrb[4].mxu1 %v4131_v36 }
 0x1bc   : > { %2680 = vmatmul.mubr.bf16.gmra.mrb[4].mxu0 %v4132_v37  ;;  %3467 = vmatpush1.bf16.msra.mxu1 %v4133_v38 }
 0x1bd   : > { %2695 = vmatpush1.bf16.msra.mxu0 %v4133_v38  ;;  %3452 = vmatprep.subr.bf16.mxu1 %v4138_v39 }
 0x1be   : > { %2696 = vmatprep.subr.bf16.mxu0 %v4138_v39  ;;  %2722 = vmatprep.mubr.bf16.mxu0 %v4177_v40 }
 0x1bf   : > { %2732 = vmatprep.mubr.bf16.mxu1 %v4180_v41  ;;  %v317_v41 = vld [vmem:[#allocation2 + $0x18] sm:$0xff] }
 0x1c0   : > { %3468 = vmatpush1.bf16.msra.mxu1 %v4136_v42 }
 0x1c1   : > { %2697 = vmatpush1.bf16.msra.mxu0 %v4136_v42  ;;  %3453 = vmatprep.subr.bf16.mxu1 %v4141_v43 }
 0x1c2   : > { %2698 = vmatprep.subr.bf16.mxu0 %v4141_v43  ;;  %v321_v43 = vld [vmem:[#allocation2 + $0x38] sm:$0xff] }
 0x1c4   : > { %3469 = vmatpush1.bf16.msra.mxu1 %v4139_v44 }
 0x1c5   : > { %2699 = vmatpush1.bf16.msra.mxu0 %v4139_v44  ;;  %3454 = vmatprep.subr.bf16.mxu1 %v4144_v45 }
 0x1c6   : > { %2700 = vmatprep.subr.bf16.mxu0 %v4144_v45 }
 0x1c8   : > { %3470 = vmatpush1.bf16.msra.mxu1 %v4142_v46 }
 0x1c9   : > { %2701 = vmatpush1.bf16.msra.mxu0 %v4142_v46  ;;  %3455 = vmatprep.subr.bf16.mxu1 %v4147_v47 }
 0x1ca   : > { %2702 = vmatprep.subr.bf16.mxu0 %v4147_v47 }
 0x1cc   : > { %3471 = vmatpush1.bf16.msra.mxu1 %v4145_v48 }
 0x1cd   : > { %2703 = vmatpush1.bf16.msra.mxu0 %v4145_v48  ;;  %3456 = vmatprep.subr.bf16.mxu1 %v4150_v49 }
 0x1ce   : > { %2704 = vmatprep.subr.bf16.mxu0 %v4150_v49 }
 0x1d0   : > { %3472 = vmatpush1.bf16.msra.mxu1 %v4148_v50 }
 0x1d1   : > { %2705 = vmatpush1.bf16.msra.mxu0 %v4148_v50  ;;  %3457 = vmatprep.subr.bf16.mxu1 %v4153_v51 }
 0x1d2   : > { %2706 = vmatprep.subr.bf16.mxu0 %v4153_v51 }
 0x1d4   : > { %3473 = vmatpush1.bf16.msra.mxu1 %v4151_v52 }
 0x1d5   : > { %2707 = vmatpush1.bf16.msra.mxu0 %v4151_v52  ;;  %3458 = vmatprep.subr.bf16.mxu1 %v4156_v53 }
 0x1d6   : > { %2708 = vmatprep.subr.bf16.mxu0 %v4156_v53  ;;  %v2773_v53 = vlaneseq (!%p3437_p13) }
 0x1d8   : > { %3474 = vmatpush1.bf16.msra.mxu1 %v4154_v54 }
 0x1d9   : > { %2709 = vmatpush1.bf16.msra.mxu0 %v4154_v54  ;;  %3459 = vmatprep.subr.bf16.mxu1 %v4159_v55  ;;  %v2774_v54 = vshrl.u32 (!%p3437_p13), %v2773_v53, 7 }
 0x1da   : > { %2710 = vmatprep.subr.bf16.mxu0 %v4159_v55  ;;  %v2771_v55 = vld [vmem:[%s4787_s21] ss:$8 sm:$0x3] (!%p3437_p13) }
 0x1dc   : > { %3475 = vmatpush1.bf16.msra.mxu1 %v4157_v56 }
 0x1dd   : > { %2711 = vmatpush1.bf16.msra.mxu0 %v4157_v56  ;;  %3460 = vmatprep.subr.bf16.mxu1 %v4162_v57  ;;  %v5123_v56 = vsub.s32 (!%p3437_p13), 0, %v2774_v54 }
 0x1de   : > { %2712 = vmatprep.subr.bf16.mxu0 %v4162_v57  ;;  %v5125_v57 = vsub.s32 (!%p3437_p13), 1, %v2774_v54 }
 0x1e0   : > { %3476 = vmatpush1.bf16.msra.mxu1 %v4160_v58 }
 0x1e1   : > { %2713 = vmatpush1.bf16.msra.mxu0 %v4160_v58  ;;  %3461 = vmatprep.subr.bf16.mxu1 %v4165_v59 }
 0x1e2   : > { %2714 = vmatprep.subr.bf16.mxu0 %v4165_v59 }
 0x1e4   : > { %3477 = vmatpush1.bf16.msra.mxu1 %v4163_v60 }
 0x1e5   : > { %2715 = vmatpush1.bf16.msra.mxu0 %v4163_v60  ;;  %3462 = vmatprep.subr.bf16.mxu1 %v4168_v61 }
 0x1e6   : > { %2716 = vmatprep.subr.bf16.mxu0 %v4168_v61  ;;  %v2776_v61 = vrot.slane (!%p3437_p13), %v2771_v55, %v5123_v56 }
 0x1e8   : > { %3478 = vmatpush1.bf16.msra.mxu1 %v4166_v62 }
 0x1e9   : > { %2717 = vmatpush1.bf16.msra.mxu0 %v4166_v62  ;;  %3463 = vmatprep.subr.bf16.mxu1 %v4171_v63 }
 0x1ea   : > { %2718 = vmatprep.subr.bf16.mxu0 %v4171_v63 }
 0x1ec   : > { %3479 = vmatpush1.bf16.msra.mxu1 %v4169_v0 }
 0x1ed   : > { %2719 = vmatpush1.bf16.msra.mxu0 %v4169_v0  ;;  %3464 = vmatprep.subr.bf16.mxu1 %v4174_v1 }
 0x1ee   : > { %2720 = vmatprep.subr.bf16.mxu0 %v4174_v1  ;;  %v2780_v1 = vrot.slane (!%p3437_p13), %v2771_v55, %v5125_v57 }
 0x1f0   : > { %3480 = vmatpush1.bf16.msra.mxu1 %v4172_v2 }
 0x1f1   : > { %2721 = vmatpush1.bf16.msra.mxu0 %v4172_v2 }
 0x1f3   : > { %2733 = vmatmul.mubr.bf16.vlgmr.msra.gmra.mrb[8].mxu1 %v4178_v4 }
 0x1f4   : > { %2723 = vmatmul.mubr.bf16.vlgmr.msra.gmra.mrb[0].mxu0 %v4175_v3 }
 0x286   : > { %v2459_v5 = vpop.f32.mrb[0].mxu1 }
 0x287   : > { %v2461_v6 = vpop.f32.mrb[1].mxu1 }
 0x288   : > { %v2463_v7 = vpop.f32.mrb[2].mxu1 }
 0x289   : > { %v2465_v8 = vpop.f32.mrb[3].mxu1 }
 0x28e   : > { %v2469_v9 = vpop.f32.mrb[4].mxu1 }
 0x28f   : > { %v2681_v10 = vpop.f32.mrb[4].mxu0  ;;  %v2471_v12 = vpop.f32.mrb[5].mxu1 }
 0x290   : > { %v3485_v11 = vadd.f32 %v2681_v10, %v2469_v9  ;;  %v2683_v13 = vpop.f32.mrb[5].mxu0  ;;  %v2473_v15 = vpop.f32.mrb[6].mxu1 }
 0x291   : > { %v3487_v14 = vadd.f32 %v2683_v13, %v2471_v12  ;;  %v2685_v16 = vpop.f32.mrb[6].mxu0  ;;  %v2475_v18 = vpop.f32.mrb[7].mxu1 }
 0x292   : > { %v3489_v17 = vadd.f32 %v2685_v16, %v2473_v15  ;;  %v2687_v19 = vpop.f32.mrb[7].mxu0 }
 0x293   : > { %v3491_v20 = vadd.f32 %v2687_v19, %v2475_v18 }
 0x2c6   : > { %v2734_v24 = vpop.f32.mrb[8].mxu1 }
 0x2c7   : > { %v2724_v22 = vpop.f32.mrb[0].mxu0  ;;  %v3486_v26 = vadd.f32 %v3485_v11, %v2734_v24  ;;  %v2736_v30 = vpop.f32.mrb[9].mxu1 }
 0x2c8   : > { %v3481_v25 = vadd.f32 %v2724_v22, %v2459_v5  ;;  %v2726_v28 = vpop.f32.mrb[1].mxu0  ;;  %v3488_v32 = vadd.f32 %v3487_v14, %v2736_v30  ;;  %v2738_v36 = vpop.f32.mrb[10].mxu1 }
 0x2c9   : > { %v3482_v31 = vadd.f32 %v2726_v28, %v2461_v6  ;;  %v2728_v34 = vpop.f32.mrb[2].mxu0  ;;  %v2747_v38 = vadd.f32 %v3486_v26, %v318_v23  ;;  %v3490_v40 = vadd.f32 %v3489_v17, %v2738_v36  ;;  %v2740_v44 = vpop.f32.mrb[11].mxu1  ;;  %2762 = sbr.rel (%p3437_p13) target bundleno = 797 (0x31d), region = 52 }
 0x2ca   : > { %v2743_v37 = vadd.f32 %v3481_v25, %v314_v21  ;;  %v3483_v39 = vadd.f32 %v2728_v34, %v2463_v7  ;;  %v2730_v42 = vpop.f32.mrb[3].mxu0  ;;  %v2748_v46 = vadd.f32 %v3488_v32, %v319_v29  ;;  %v3492_v48 = vadd.f32 %v3491_v20, %v2740_v44 }
 0x2cb   : > { %v2744_v45 = vadd.f32 %v3482_v31, %v315_v27  ;;  %v3484_v47 = vadd.f32 %v2730_v42, %v2465_v8  ;;  %2755 = vst [vmem:[#allocation2 + $0x20] sm:$0xff] %v2747_v38  ;;  %v2749_v50 = vadd.f32 %v3490_v40, %v320_v35 }
 0x2cc   : > { %2751 = vst [vmem:[#allocation2] sm:$0xff] %v2743_v37  ;;  %v2745_v49 = vadd.f32 %v3483_v39, %v316_v33  ;;  %2756 = vst [vmem:[#allocation2 + $0x28] sm:$0xff] %v2748_v46  ;;  %v2750_v52 = vadd.f32 %v3492_v48, %v321_v43 }
 0x2cd   : > { %2752 = vst [vmem:[#allocation2 + $0x8] sm:$0xff] %v2744_v45  ;;  %v2746_v51 = vadd.f32 %v3484_v47, %v317_v41  ;;  %2757 = vst [vmem:[#allocation2 + $0x30] sm:$0xff] %v2749_v50 }
 0x2ce   : > { %2753 = vst [vmem:[#allocation2 + $0x10] sm:$0xff] %v2745_v49  ;;  %2758 = vst [vmem:[#allocation2 + $0x38] sm:$0xff] %v2750_v52 }
 0x2cf   : > { %2754 = vst [vmem:[#allocation2 + $0x18] sm:$0xff] %v2746_v51 }
 0x2d2   : > { %v2767_v60 = vld [vmem:[#allocation2 + $0x20] sm:$0xff] }
 0x2d3   : > { %v2763_v58 = vld [vmem:[#allocation2] sm:$0xff]  ;;  %v2768_v0 = vld [vmem:[#allocation2 + $0x28] sm:$0xff]  ;;  %v2787_v5 = vadd.f32 %v2776_v61, %v2767_v60 }
 0x2d4   : > { %v2764_v62 = vld [vmem:[#allocation2 + $0x8] sm:$0xff]  ;;  %v2769_v2 = vld [vmem:[#allocation2 + $0x30] sm:$0xff]  ;;  %v2783_v3 = vadd.f32 %v2776_v61, %v2763_v58  ;;  %v2788_v9 = vadd.f32 %v2780_v1, %v2768_v0 }
 0x2d5   : > { %v2765_v59 = vld [vmem:[#allocation2 + $0x10] sm:$0xff]  ;;  %v2770_v6 = vld [vmem:[#allocation2 + $0x38] sm:$0xff]  ;;  %v2784_v7 = vadd.f32 %v2780_v1, %v2764_v62  ;;  %v2789_v10 = vadd.f32 %v2776_v61, %v2769_v2 }
 0x2d6   : > { %v2766_v63 = vld [vmem:[#allocation2 + $0x18] sm:$0xff]  ;;  %v2785_v4 = vadd.f32 %v2776_v61, %v2765_v59  ;;  %v2790_v12 = vadd.f32 %v2780_v1, %v2770_v6 }
 0x2d7   : > { %v2786_v8 = vadd.f32 %v2780_v1, %v2766_v63 }
 0x2d8   : > { %v2808_v11 = vadd.f32 %v2785_v4, %v2783_v3 }
 0x2d9   : > { %v2817_v13 = vadd.f32 %v2786_v8, %v2784_v7 }
 0x2da   : > { %v2809_v14 = vadd.f32 %v2808_v11, %v2787_v5 }
 0x2db   : > { %v2818_v15 = vadd.f32 %v2817_v13, %v2788_v9 }
 0x2dc   : > { %v2810_v16 = vadd.f32 %v2809_v14, %v2789_v10 }
 0x2dd   : > { %v2819_v17 = vadd.f32 %v2818_v15, %v2790_v12 }
 0x2de   : > { %v2811_v18 = vrot.slane %v2810_v16, 4 }
 0x2df   : > { %v2820_v19 = vrot.slane %v2819_v17, 4 }
 0x2e0   : > { %v2812_v20 = vadd.f32 %v2811_v18, %v2810_v16 }
 0x2e1   : > { %v2821_v21 = vadd.f32 %v2820_v19, %v2819_v17 }
 0x2e2   : > { %v2813_v22 = vrot.slane %v2812_v20, 2 }
 0x2e3   : > { %v2822_v23 = vrot.slane %v2821_v21, 2 }
 0x2e4   : > { %v2814_v24 = vadd.f32 %v2813_v22, %v2812_v20 }
 0x2e5   : > { %v2823_v25 = vadd.f32 %v2822_v23, %v2821_v21 }
 0x2e6   : > { %v2815_v26 = vrot.slane %v2814_v24, 1 }
 0x2e7   : > { %v2824_v27 = vrot.slane %v2823_v25, 1 }
 0x2e8   : > { %v2816_v28 = vadd.f32 %v2815_v26, %v2814_v24 }
 0x2e9   : > { %v2825_v29 = vadd.f32 %v2824_v27, %v2823_v25 }
 0x2ea   : > { %v2826_v30 = vmul.f32 0.03125, %v2816_v28 }
 0x2eb   : > { %v2827_v31 = vmul.f32 0.03125, %v2825_v29 }
 0x2ec   : > { %v2828_v32 = vsub.f32 %v2783_v3, %v2826_v30  ;;  %v2830_v33 = vsub.f32 %v2785_v4, %v2826_v30  ;;  %v2832_v34 = vsub.f32 %v2787_v5, %v2826_v30  ;;  %v2834_v35 = vsub.f32 %v2789_v10, %v2826_v30 }
 0x2ed   : > { %v2829_v36 = vsub.f32 %v2784_v7, %v2827_v31  ;;  %v2831_v37 = vsub.f32 %v2786_v8, %v2827_v31  ;;  %v2833_v38 = vsub.f32 %v2788_v9, %v2827_v31  ;;  %v2835_v39 = vsub.f32 %v2790_v12, %v2827_v31  ;;  %v3438_v8 = vld [vmem:[%s4787_s21 + $0x1] ss:$8 sm:$0x3]  ;;  %v3439_v9 = vld [vmem:[%s4787_s21 + $0x2] ss:$8 sm:$0x3] }
 0x2ee   : > { %v2844_v40 = vmul.f32 %v2828_v32, %v2828_v32  ;;  %v2846_v41 = vmul.f32 %v2830_v33, %v2830_v33  ;;  %v2848_v42 = vmul.f32 %v2832_v34, %v2832_v34  ;;  %v2850_v46 = vmul.f32 %v2834_v35, %v2834_v35 }
 0x2ef   : > { %v2845_v43 = vmul.f32 %v2829_v36, %v2829_v36  ;;  %v2847_v44 = vmul.f32 %v2831_v37, %v2831_v37  ;;  %v2849_v45 = vmul.f32 %v2833_v38, %v2833_v38  ;;  %v2851_v48 = vmul.f32 %v2835_v39, %v2835_v39 }
 0x2f0   : > { %v2852_v47 = vadd.f32 %v2846_v41, %v2844_v40  ;;  %v2890_v10 = vrot.slane %v3438_v8, %v5123_v56  ;;  %v2911_v12 = vrot.slane %v3439_v9, %v5123_v56  ;;  %v2894_v13 = vrot.slane %v3438_v8, %v5125_v57 }
 0x2f1   : > { %v2861_v49 = vadd.f32 %v2847_v44, %v2845_v43  ;;  %v2915_v14 = vrot.slane %v3439_v9, %v5125_v57 }
 0x2f2   : > { %v2853_v50 = vadd.f32 %v2852_v47, %v2848_v42 }
 0x2f3   : > { %v2862_v51 = vadd.f32 %v2861_v49, %v2849_v45 }
 0x2f4   : > { %v2854_v52 = vadd.f32 %v2853_v50, %v2850_v46 }
 0x2f5   : > { %v2863_v53 = vadd.f32 %v2862_v51, %v2851_v48 }
 0x2f6   : > { %v2855_v54 = vrot.slane %v2854_v52, 4 }
 0x2f7   : > { %v2864_v55 = vrot.slane %v2863_v53, 4 }
 0x2f8   : > { %v2856_v58 = vadd.f32 %v2855_v54, %v2854_v52 }
 0x2f9   : > { %v2865_v59 = vadd.f32 %v2864_v55, %v2863_v53 }
 0x2fa   : > { %v2857_v60 = vrot.slane %v2856_v58, 2 }
 0x2fb   : > { %v2866_v61 = vrot.slane %v2865_v59, 2 }
 0x2fc   : > { %v2858_v62 = vadd.f32 %v2857_v60, %v2856_v58 }
 0x2fd   : > { %v2867_v63 = vadd.f32 %v2866_v61, %v2865_v59 }
 0x2fe   : > { %v2859_v0 = vrot.slane %v2858_v62, 1 }
 0x2ff   : > { %v2868_v1 = vrot.slane %v2867_v63, 1 }
 0x300   : > { %v2860_v2 = vadd.f32 %v2859_v0, %v2858_v62 }
 0x301   : > { %v2869_v3 = vadd.f32 %v2868_v1, %v2867_v63 }
 0x302   : > { %v2870_v4 = vmul.f32 0.03125, %v2860_v2 }
 0x303   : > { %v2871_v5 = vmul.f32 0.03125, %v2869_v3 }
 0x304   : > { %v2872_v6 = vadd.f32 1e-05, %v2870_v4 }
 0x305   : > { %v2873_v7 = vadd.f32 1e-05, %v2871_v5 }
 0x306   : > { %4181 = vrsqrt.f32 %v2872_v6 }
 0x307   : > { %4183 = vrsqrt.f32 %v2873_v7 }
 0x310   : > { %v4182_v11 = vpop.eup %4181 }
 0x311   : > { %v4184_v15 = vpop.eup %4183  ;;  %v2876_v16 = vmul.f32 %v4182_v11, %v2828_v32  ;;  %v2878_v17 = vmul.f32 %v4182_v11, %v2830_v33  ;;  %v2880_v18 = vmul.f32 %v4182_v11, %v2832_v34  ;;  %v2882_v19 = vmul.f32 %v4182_v11, %v2834_v35 }
 0x312   : > { %v2877_v20 = vmul.f32 %v4184_v15, %v2829_v36  ;;  %v2879_v21 = vmul.f32 %v4184_v15, %v2831_v37  ;;  %v2881_v22 = vmul.f32 %v4184_v15, %v2833_v38  ;;  %v2883_v23 = vmul.f32 %v4184_v15, %v2835_v39 }
 0x313   : > { %v2897_v24 = vmul.f32 %v2890_v10, %v2876_v16  ;;  %v2899_v25 = vmul.f32 %v2890_v10, %v2878_v17  ;;  %v2901_v26 = vmul.f32 %v2890_v10, %v2880_v18  ;;  %v2903_v27 = vmul.f32 %v2890_v10, %v2882_v19 }
 0x314   : > { %v2898_v28 = vmul.f32 %v2894_v13, %v2877_v20  ;;  %v2900_v29 = vmul.f32 %v2894_v13, %v2879_v21  ;;  %v2902_v56 = vmul.f32 %v2894_v13, %v2881_v22  ;;  %v2904_v30 = vmul.f32 %v2894_v13, %v2883_v23 }
 0x315   : > { %v2918_v31 = vadd.f32 %v2911_v12, %v2897_v24  ;;  %v2920_v57 = vadd.f32 %v2911_v12, %v2899_v25  ;;  %v2922_v32 = vadd.f32 %v2911_v12, %v2901_v26  ;;  %v2924_v33 = vadd.f32 %v2911_v12, %v2903_v27 }
 0x316   : > { %v2919_v34 = vadd.f32 %v2915_v14, %v2898_v28  ;;  %v2921_v35 = vadd.f32 %v2915_v14, %v2900_v29  ;;  %v2923_v36 = vadd.f32 %v2915_v14, %v2902_v56  ;;  %v2925_v37 = vadd.f32 %v2915_v14, %v2904_v30 }
 0x317   : > { %v2926_v38 = vmax.f32 %v2918_v31, 0.0  ;;  %v2928_v39 = vmax.f32 %v2920_v57, 0.0  ;;  %v2930_v40 = vmax.f32 %v2922_v32, 0.0  ;;  %v2932_v41 = vmax.f32 %v2924_v33, 0.0 }
 0x318   : > { %v2927_v42 = vmax.f32 %v2919_v34, 0.0  ;;  %v2929_v43 = vmax.f32 %v2921_v35, 0.0  ;;  %v2931_v44 = vmax.f32 %v2923_v36, 0.0  ;;  %v2933_v45 = vmax.f32 %v2925_v37, 0.0 }
 0x319   : > { %2934 = vst [vmem:[%s4794_s8] sm:$0xff] %v2926_v38  ;;  %2936 = vst [vmem:[%s4794_s8 + $0x10] sm:$0xff] %v2928_v39 }
 0x31a   : > { %2938 = vst [vmem:[%s4794_s8 + $0x20] sm:$0xff] %v2930_v40  ;;  %2940 = vst [vmem:[%s4794_s8 + $0x30] sm:$0xff] %v2932_v41 }
 0x31b   : > { %2935 = vst [vmem:[%s4794_s8 + $0x8] sm:$0xff] %v2927_v42  ;;  %2937 = vst [vmem:[%s4794_s8 + $0x18] sm:$0xff] %v2929_v43 }
 0x31c   : > { %2939 = vst [vmem:[%s4794_s8 + $0x28] sm:$0xff] %v2931_v44  ;;  %2941 = vst [vmem:[%s4794_s8 + $0x38] sm:$0xff] %v2933_v45 }
 0x31d PF: > { %s5284_s18 = sld [smem:[#allocation17_spill]]  ;;  %s5285_s9 = sld [smem:[#allocation24_spill]] }
 0x31e   : > { %s2959_s0 = sshll.u32 %s4794_s8, 4  ;;  %s2943_s1 = scalar_lea.sflag [#allocation5], %s4784_s28  ;;  %s5150_s0 = int_to_ptr.vmem [resolvable:$true] %s2959_s0 }
 0x31f   : > { %s4275_s22 = scalar_lea.vmem %s5150_s0, 1024  ;;  %p5286_p10 = scmp.ne.s32.totalorder %s5273_s2, 0 }
 0x320   : > { %p4276_p3 = scmp.ne.s32.totalorder %s5150_s0, %s4275_s22  ;;  %s4441_s26 = smov [#allocation9]  }
 0x321   : > { %s4279_s3 = sshll.u32 %s4441_s26, 4  ;;  %s4280_s3 = int_to_ptr.vmem [resolvable:$false] %s4279_s3 }
 0x322   : > { %p4277_p4 = pnand %p4276_p3, %p5286_p10  ;;  %s4281_s21 = scalar_lea.vmem %s4280_s3, 2048 }
 0x323   : > { %s3448_s5 = sshll.u32 %s5284_s18, 8  ;;  %p4282_p0 = scmp.lt.s32.totalorder %s5150_s0, %s4280_s3 }
 0x324   : > { %s5147_s27 = scalar_lea.hbm %s5285_s9, %s3448_s5  ;;  %p4278_p8 = pneg %p4277_p4 }
 0x325   : > { %p4283_p2 = scmp.lt.s32.totalorder %s4281_s21, %s4275_s22 }
 0x327   : > { %p4284_p1 = por %p4283_p2, %p4282_p0 }
 0x329   : > { %p4285_p11 = pnand %p4284_p1, %p4278_p8 }
 0x32b   : > { %4288 = shalt.err (!%p4285_p11)
}
 0x32c   : > { %s4289_s6 = scalar_lea.hbm %s5147_s27, 1024  ;;  %s4293_s29 = scalar_lea.hbm %s5285_s9, 2048 }
 0x32d   : > { %p4290_p6 = scmp.ne.s32.totalorder %s5147_s27, %s4289_s6  ;;  %p4294_p12 = scmp.lt.u32.totalorder %s5147_s27, %s5285_s9 }
 0x32e   : > { %p4295_p7 = scmp.lt.u32.totalorder %s4293_s29, %s4289_s6  ;;  %p4297_p3 = scmp.lt.u32.totalorder %s4289_s6, %s5147_s27 }
 0x32f   : > { %p4291_p9 = pnand %p4290_p6, %p5286_p10 }
 0x330   : > { %p4296_p13 = por %p4295_p7, %p4294_p12 }
 0x331   : > { %p4292_p5 = pneg %p4291_p9 }
 0x332   : > { %p4298_p4 = por %p4297_p3, %p4296_p13 }
 0x334   : > { %p4299_p8 = pnand %p4298_p4, %p4292_p5 }
 0x336   : > { %4302 = shalt.err (!%p4299_p8)
}
 0x337   : > { %s4442_s10 = smov 256   ;;  %s4443_s24 = smov 512  }
 0x338   : > { %s4444_s22 = smov 16  }
 0x339   : > { %3555 = dma.vmem_to_hbm [thread:$0]  (%p5286_p10), %s5150_s0, 1024, %s5147_s27, %s2943_s1, %s4442_s10, %s4443_s24, %s4444_s22  }
 0x33a PF: > { %s5287_s26 = sld [smem:[#allocation14_spill]]  ;;  %p3572_p0 = scmp.ge.s32.totalorder %s4429_s25, 2 }
 0x33b   : > { %p5288_p2 = scmp.ne.s32.totalorder %s5274_s4, 0 }
 0x33d   : > { %p3568_p1 = pnand %p3572_p0, %p5288_p2 }
 0x340   : > { %s2974_s3 = sand.u32 1, %s5287_s26  }
 0x341   : > { %s2975_s21 = scalar_lea.sflag [#allocation5], %s2974_s3 }
 0x342   : > { %4372 = dma.done.wait (!%p3568_p1), %s2975_s21, 1024  }
 0x343   : > { %4374 = vsyncadd (!%p3568_p1), %s2975_s21, 4294966272  ;;  %s22_s25 = sadd.s32 1, %s4429_s25   ;;  %s5290_s22 = sld [smem:[#allocation18_spill]] }
 0x344   : > { %p5181_p11 = scmp.ge.s32.totalorder %s22_s25, 10   ;;  %s5291_s2 = sld [smem:[#allocation19_spill]] }
 0x345   : > { %s5292_s24 = sld [smem:[#allocation20_spill]]  ;;  %s5293_s12 = smov %s4381_s13 }
 0x346   : > { %s5294_s13 = smov %s4385_s14  ;;  %s5295_s14 = smov %s4706_s15 }
 0x347   : > { %s5296_s15 = smov %s4393_s16  ;;  %s5297_s16 = smov %s4397_s17 }
 0x348   : > { %s5298_s17 = smov %s4571_s11  ;;  %s5299_s18 = smov %s4405_s19 }
 0x349   : > { %s5300_s19 = smov %s4409_s20  ;;  %s5301_s20 = smov %s4632_s7 }
 0x34a   : > { %s5302_s21 = smov %s4421_s23  ;;  %s5303_s23 = smov %s5291_s2 }
 0x34b   :  { %21 = sbr.rel (!%p5181_p11) target bundleno = 17 (0x11), region = 111 }
 0x352   :  { %2980 = vsyncpa [#allocation4], 1 }
 0x353   :  { %2982 = vsyncpa [#allocation4 + $0x1], 1 }
 0x354   :  { %2983 = vsyncpa [#allocation7], 1 }
 0x355   :  { %2985 = vsyncpa [#allocation7 + $0x1], 1 }
 0x356   :  { %2986 = vsyncpa [#allocation5], 1 }
 0x357   :  { %2988 = vsyncpa [#allocation5 + $0x1], 1 }

</bundles_post_ra>
